<compile_context>
chip_gen: v6e
topology: v6e:2x2x1
jax: 0.10.0
libtpu: 0.0.40
codegen_flags: <defaults>
</compile_context>

<pallas_src>
import functools

import numpy as np

import jax
import jax.numpy as jnp
from jax.experimental import pallas as pl
from jax.experimental.pallas import tpu as pltpu


# --------------------------- in-kernel helpers -------------------------------

def _sel_conv(x, s_ref, w_of_k, bias):
    """3x3 conv (pad=1) as  bias + sum_k S_k @ (x @ W_k).

    x       : (M_in, Cin)  f32 activation (rows = b*H*W + h*W + w)
    s_ref   : Ref (9, M_out, M_in) bf16 0/1 selection matrices (zero rows = pad)
    w_of_k  : k -> (Cin, Cout) bf16 weight for tap k = ki*3 + kj
    bias    : (1, Cout) f32
    Pure matmul + add: no in-kernel pad / strided slice / concat needed.
    """
    xb = x.astype(jnp.bfloat16)
    acc = bias
    for k in range(9):
        t = jnp.dot(xb, w_of_k(k), preferred_element_type=jnp.float32)
        acc = acc + jnp.dot(s_ref[k], t.astype(jnp.bfloat16),
                            preferred_element_type=jnp.float32)
    return acc


def _make_fused_kernel(n_sel, n_blocks):
    """Build the single fused forward kernel for a given layer structure."""

    def kernel(*refs):
        # ---- unpack (order must match operand list in aptnet_forward) ----
        out_ref = refs[-1]
        cols1_ref, w1_ref, b1_ref = refs[0], refs[1], refs[2]
        idx = 3
        s_refs = refs[idx:idx + n_sel]; idx += n_sel
        s_blk_ref = refs[idx]; idx += 1
        sel_w = []
        for _ in range(n_sel):
            sel_w.append((refs[idx], refs[idx + 1])); idx += 2
        wa_ref, ba_ref, wb_ref, bb_ref = (refs[idx], refs[idx + 1],
                                          refs[idx + 2], refs[idx + 3]); idx += 4
        wf_ref, bfin_ref, emb_ref = refs[idx], refs[idx + 1], refs[idx + 2]

        # ---- first conv: im2col already done in XLA -> plain matmul ----
        x = jax.nn.sigmoid(
            jnp.dot(cols1_ref[...], w1_ref[...],
                    preferred_element_type=jnp.float32) + b1_ref[...])

        # ---- remaining downsampling / stride-1 sigmoid convs ----
        for li in range(n_sel):
            w_ref, b_ref = sel_w[li]
            x = jax.nn.sigmoid(
                _sel_conv(x, s_refs[li],
                          lambda k, w_ref=w_ref: w_ref[k], b_ref[...]))

        # ---- BasicBlocks: conv-BN-ReLU-conv-BN + identity, ReLU (BN folded) ----
        for bi in range(n_blocks):
            identity = x
            h = jnp.maximum(
                _sel_conv(x, s_blk_ref,
                          lambda k, bi=bi: wa_ref[bi, k], ba_ref[bi]), 0.0)
            x = jnp.maximum(
                _sel_conv(h, s_blk_ref,
                          lambda k, bi=bi: wb_ref[bi, k], bb_ref[bi])
                + identity, 0.0)

        # ---- final 1x1 conv -> vocab logits ----
        logits = jnp.dot(x.astype(jnp.bfloat16), wf_ref[...],
                         preferred_element_type=jnp.float32) + bfin_ref[...]

        # ---- softmax over vocab fused with embedding matmul ----
        m = jnp.max(logits, axis=-1, keepdims=True)
        p = jnp.exp(logits - m)
        denom = jnp.sum(p, axis=-1, keepdims=True)
        y = jnp.dot(p, emb_ref[...], preferred_element_type=jnp.float32)
        # fold the 1/denom after the dot; reciprocal goes to the EUP slot
        out_ref[...] = (y * pl.reciprocal(denom, approx=True)).astype(out_ref.dtype)

    return kernel


# --------------------------- XLA-side glue -----------------------------------

def _im2col(x, k, stride, pad):
    """x: (B, H, W, C) NHWC -> (B*Ho*Wo, k*k*C); flat K index = (ki*k+kj)*C + c."""
    B, H, W, C = x.shape
    Ho = (H + 2 * pad - k) // stride + 1
    Wo = (W + 2 * pad - k) // stride + 1
    xp = jnp.pad(x, ((0, 0), (pad, pad), (pad, pad), (0, 0)))
    cols = []
    for ki in range(k):
        for kj in range(k):
            cols.append(xp[:, ki:ki + stride * Ho:stride,
                           kj:kj + stride * Wo:stride, :])
    cols = jnp.concatenate(cols, axis=-1)
    return cols.reshape(B * Ho * Wo, k * k * C), (B, Ho, Wo)


@functools.lru_cache(maxsize=None)
def _selection_matrices_np(B, H, W, stride):
    """0/1 matrices S_k (k=ki*3+kj): out row (b,ho,wo) <- in row (b, s*ho-1+ki, s*wo-1+kj)."""
    Ho = (H + 2 - 3) // stride + 1
    Wo = (W + 2 - 3) // stride + 1
    S = np.zeros((9, B * Ho * Wo, B * H * W), np.float32)
    for b in range(B):
        for ho in range(Ho):
            for wo in range(Wo):
                r = b * Ho * Wo + ho * Wo + wo
                for ki in range(3):
                    for kj in range(3):
                        h = stride * ho - 1 + ki
                        w = stride * wo - 1 + kj
                        if 0 <= h < H and 0 <= w < W:
                            S[ki * 3 + kj, r, b * H * W + h * W + w] = 1.0
    return S


def _fold_bn(w, gamma, beta, mean, var, eps=1e-5):
    """Fold inference-mode BatchNorm into a bias-free conv weight."""
    scale = gamma / jnp.sqrt(var + eps)
    return w * scale[:, None, None, None], beta - mean * scale


# ------------------------------- params --------------------------------------

def init_aptnet_params(key, args, base_filter_channels=16, additional_layers=3):
    """Mirrors the torch layer-construction loop; stores weights pre-transformed
    into matmul layout (hoisted out of the forward pass), bf16 for MXU feeds."""
    C, ps, V = args["channels"], args["patch_size"], args["vocab_size"]
    patch_numel = C * ps * ps
    keys = iter(jax.random.split(key, 256))

    def conv_w(cout, cin, k):
        return jax.random.normal(next(keys), (cout, cin, k, k), jnp.float32) * (
            1.0 / jnp.sqrt(cin * k * k))

    def bias(n):
        return 0.1 * jax.random.normal(next(keys), (n,), jnp.float32)

    convs = []   # (w_torch_layout, b, stride) for the sigmoid convs
    blocks = []  # BN-folded BasicBlock conv pairs
    in_dim, out_dim = C, base_filter_channels
    total_reduction, reduction_done = ps, 1
    while True:
        s = 2 if reduction_done < total_reduction else 1
        convs.append((conv_w(out_dim, in_dim, 3), bias(out_dim), s))
        in_dim, out_dim = out_dim, out_dim * 2
        reduction_done *= 2
        if s == 1:
            for _ in range(additional_layers):
                # Standard ResNet BasicBlock: conv3x3-BN-ReLU-conv3x3-BN, +id, ReLU
                # (bias-free convs).  BN evaluated in inference mode, folded here.
                # TODO(synk): training-mode BatchNorm (batch statistics) is not reproduced.
                blk = {}
                for tag in ("1", "2"):
                    w = conv_w(in_dim, in_dim, 3)
                    gamma = 1.0 + 0.05 * jax.random.normal(next(keys), (in_dim,), jnp.float32)
                    beta = 0.05 * jax.random.normal(next(keys), (in_dim,), jnp.float32)
                    mean = 0.05 * jax.random.normal(next(keys), (in_dim,), jnp.float32)
                    var = 1.0 + 0.05 * jnp.abs(jax.random.normal(next(keys), (in_dim,), jnp.float32))
                    wf, bf = _fold_bn(w, gamma, beta, mean, var)
                    blk["w" + tag] = wf
                    blk["b" + tag] = bf
                blocks.append(blk)
            break
    final_w = conv_w(V, in_dim, 1)
    final_b = bias(V)
    emb = 0.5 * jax.random.normal(next(keys), (V, patch_numel), jnp.float32)

    # ---- pre-transform to matmul layouts (done once, not per forward) ----
    w0, b0, s0 = convs[0]
    l1 = {"w": jnp.transpose(w0, (2, 3, 1, 0)).reshape(-1, w0.shape[0]).astype(jnp.bfloat16),
          "b": b0.reshape(1, -1)}

    sel_convs, sel_strides = [], []
    for (w, b, s) in convs[1:]:
        cout, cin = w.shape[0], w.shape[1]
        sel_convs.append({
            "wk": jnp.transpose(w, (2, 3, 1, 0)).reshape(9, cin, cout).astype(jnp.bfloat16),
            "b": b.reshape(1, -1)})
        sel_strides.append(s)

    def stack_blk(tag):
        wk = jnp.stack([jnp.transpose(blk["w" + tag], (2, 3, 1, 0)).reshape(9, in_dim, in_dim)
                        for blk in blocks]).astype(jnp.bfloat16)
        bb = jnp.stack([blk["b" + tag].reshape(1, -1) for blk in blocks])
        return wk, bb

    blk_wa, blk_ba = stack_blk("1")
    blk_wb, blk_bb = stack_blk("2")

    final = {"w": jnp.transpose(final_w, (2, 3, 1, 0)).reshape(in_dim, V).astype(jnp.bfloat16),
             "b": final_b.reshape(1, -1)}

    params = {"l1": l1, "sel_convs": sel_convs,
              "blk_wa": blk_wa, "blk_ba": blk_ba,
              "blk_wb": blk_wb, "blk_bb": blk_bb,
              "final": final, "emb": emb}
    meta = {"l1_stride": s0, "sel_strides": sel_strides,
            "n_blocks": len(blocks)}
    return params, meta


# ------------------------------- forward --------------------------------------

def aptnet_forward(params, x_nchw, args, meta):
    C, ps = args["channels"], args["patch_size"]
    B = x_nchw.shape[0]

    # NCHW -> NHWC; first-conv im2col stays in XLA (tiny, fused under jit)
    x = jnp.transpose(x_nchw, (0, 2, 3, 1))
    cols1, (_, H, W) = _im2col(x, 3, meta["l1_stride"], 1)
    cols1 = cols1.astype(jnp.bfloat16)

    # selection matrices for all remaining convs (trace-time constants)
    s_mats = []
    for stride in meta["sel_strides"]:
        s_mats.append(jnp.asarray(_selection_matrices_np(B, H, W, stride),
                                  dtype=jnp.bfloat16))
        H = (H + 2 - 3) // stride + 1
        W = (W + 2 - 3) // stride + 1
    # stride-1 selection at the block resolution (== last sel conv's when present)
    s_blk = jnp.asarray(_selection_matrices_np(B, H, W, 1), dtype=jnp.bfloat16)

    operands = [cols1, params["l1"]["w"], params["l1"]["b"]]
    operands += s_mats + [s_blk]
    for lw in params["sel_convs"]:
        operands += [lw["wk"], lw["b"]]
    operands += [params["blk_wa"], params["blk_ba"],
                 params["blk_wb"], params["blk_bb"]]
    operands += [params["final"]["w"], params["final"]["b"], params["emb"]]

    kernel = _make_fused_kernel(len(s_mats), meta["n_blocks"])
    patch_numel = C * ps * ps
    y = pl.pallas_call(
        kernel,
        out_shape=jax.ShapeDtypeStruct((B * H * W, patch_numel), jnp.float32),
        in_specs=[pl.BlockSpec(memory_space=pltpu.MemorySpace.VMEM)
                  for _ in operands],
        out_specs=pl.BlockSpec(memory_space=pltpu.MemorySpace.VMEM),
    )(*operands)

    # inverse(): identity-filter ConvTranspose2d (stride=kernel=patch_size) is a
    # pure depatchify rearrangement (zero FLOPs) -> jitted XLA glue.
    # patch_numel index i decodes as i = ch + C*row + C*ps*col (ch fastest),
    # matching the torch identity-filter construction.
    y = y.reshape(B, H, W, ps, ps, C)         # (b, gy, gx, col, row, ch)
    y = jnp.transpose(y, (0, 5, 1, 4, 2, 3))  # (b, ch, gy, row, gx, col)
    return y.reshape(B, C, H * ps, W * ps)    # NCHW image


# --------------------------------- main ---------------------------------------

if __name__ == "__main__":
    args = {"channels": 3, "patch_size": 4, "image_size": 16, "vocab_size": 32}
    key = jax.random.PRNGKey(0)
    pkey, xkey = jax.random.split(key)

    params, meta = init_aptnet_params(pkey, args)
    x = jax.random.normal(
        xkey, (2, args["channels"], args["image_size"], args["image_size"]),
        jnp.float32)

    fwd = jax.jit(lambda p, inp: aptnet_forward(p, inp, args, meta))
    out = jax.block_until_ready(fwd(params, x))

    assert out.shape == (2, args["channels"], args["image_size"],
                         args["image_size"]), out.shape
    assert bool(jnp.all(jnp.isfinite(out)))
    print("KERNEL_OK")
</pallas_src>

<mosaic_0001>
module attributes {stable_mosaic.version = 11 : i64} {
  func.func @kernel(%arg0: memref<128x27xbf16, #tpu.memory_space<vmem>>, %arg1: memref<27x16xbf16, #tpu.memory_space<vmem>>, %arg2: memref<1x16xf32, #tpu.memory_space<vmem>>, %arg3: memref<9x32x128xbf16, #tpu.memory_space<vmem>>, %arg4: memref<9x32x32xbf16, #tpu.memory_space<vmem>>, %arg5: memref<9x32x32xbf16, #tpu.memory_space<vmem>>, %arg6: memref<9x16x32xbf16, #tpu.memory_space<vmem>>, %arg7: memref<1x32xf32, #tpu.memory_space<vmem>>, %arg8: memref<9x32x64xbf16, #tpu.memory_space<vmem>>, %arg9: memref<1x64xf32, #tpu.memory_space<vmem>>, %arg10: memref<3x9x64x64xbf16, #tpu.memory_space<vmem>>, %arg11: memref<3x1x64xf32, #tpu.memory_space<vmem>>, %arg12: memref<3x9x64x64xbf16, #tpu.memory_space<vmem>>, %arg13: memref<3x1x64xf32, #tpu.memory_space<vmem>>, %arg14: memref<64x32xbf16, #tpu.memory_space<vmem>>, %arg15: memref<1x32xf32, #tpu.memory_space<vmem>>, %arg16: memref<32x48xf32, #tpu.memory_space<vmem>>, %arg17: memref<32x48xf32, #tpu.memory_space<vmem>>) attributes {dimension_semantics = [], scalar_prefetch = 0 : i64, scratch_operands = 0 : i64, tpu.core_type = #tpu.core_type<tc>} {
    %c0 = arith.constant 0 : index
    %c0_0 = arith.constant 0 : index
    %0 = vector.load %arg0[%c0, %c0_0] : memref<128x27xbf16, #tpu.memory_space<vmem>>, vector<128x27xbf16>
    %c0_1 = arith.constant 0 : index
    %c0_2 = arith.constant 0 : index
    %1 = vector.load %arg1[%c0_1, %c0_2] : memref<27x16xbf16, #tpu.memory_space<vmem>>, vector<27x16xbf16>
    %cst = arith.constant dense<0.000000e+00> : vector<128x16xf32>
    %2 = tpu.matmul %0, %1, %cst {dimension_numbers = #tpu.dot_dimension_numbers<[1], [0], [0], [1], [0, 0, 1, 1], [], []>} : vector<128x27xbf16>, vector<27x16xbf16>, vector<128x16xf32> -> vector<128x16xf32>
    %c0_3 = arith.constant 0 : index
    %c0_4 = arith.constant 0 : index
    %3 = vector.load %arg2[%c0_3, %c0_4] : memref<1x16xf32, #tpu.memory_space<vmem>>, vector<1x16xf32>
    %4 = vector.broadcast %3 : vector<1x16xf32> to vector<128x16xf32>
    %5 = arith.addf %2, %4 : vector<128x16xf32>
    %6 = arith.negf %5 : vector<128x16xf32>
    %7 = math.exp %6 : vector<128x16xf32>
    %cst_5 = arith.constant 1.000000e+00 : f32
    %8 = vector.broadcast %cst_5 : f32 to vector<128x16xf32>
    %9 = arith.addf %8, %7 : vector<128x16xf32>
    %10 = arith.divf %8, %9 : vector<128x16xf32>
    %c0_6 = arith.constant 0 : index
    %c0_7 = arith.constant 0 : index
    %11 = vector.load %arg7[%c0_6, %c0_7] : memref<1x32xf32, #tpu.memory_space<vmem>>, vector<1x32xf32>
    %12 = arith.truncf %10 : vector<128x16xf32> to vector<128x16xbf16>
    %c0_8 = arith.constant 0 : index
    %c0_9 = arith.constant 0 : index
    %c0_10 = arith.constant 0 : index
    %13 = vector.load %arg6[%c0_8, %c0_9, %c0_10] : memref<9x16x32xbf16, #tpu.memory_space<vmem>>, vector<1x16x32xbf16>
    %14 = vector.shape_cast %13 : vector<1x16x32xbf16> to vector<16x32xbf16>
    %cst_11 = arith.constant dense<0.000000e+00> : vector<128x32xf32>
    %15 = tpu.matmul %12, %14, %cst_11 {dimension_numbers = #tpu.dot_dimension_numbers<[1], [0], [0], [1], [0, 0, 1, 1], [], []>} : vector<128x16xbf16>, vector<16x32xbf16>, vector<128x32xf32> -> vector<128x32xf32>
    %c0_12 = arith.constant 0 : index
    %c0_13 = arith.constant 0 : index
    %c0_14 = arith.constant 0 : index
    %16 = vector.load %arg3[%c0_12, %c0_13, %c0_14] : memref<9x32x128xbf16, #tpu.memory_space<vmem>>, vector<1x32x128xbf16>
    %17 = vector.shape_cast %16 : vector<1x32x128xbf16> to vector<32x128xbf16>
    %18 = arith.truncf %15 : vector<128x32xf32> to vector<128x32xbf16>
    %cst_15 = arith.constant dense<0.000000e+00> : vector<32x32xf32>
    %19 = tpu.matmul %17, %18, %cst_15 {dimension_numbers = #tpu.dot_dimension_numbers<[1], [0], [0], [1], [0, 0, 1, 1], [], []>} : vector<32x128xbf16>, vector<128x32xbf16>, vector<32x32xf32> -> vector<32x32xf32>
    %20 = vector.broadcast %11 : vector<1x32xf32> to vector<32x32xf32>
    %21 = arith.addf %20, %19 : vector<32x32xf32>
    %c1 = arith.constant 1 : index
    %c0_16 = arith.constant 0 : index
    %c0_17 = arith.constant 0 : index
    %22 = vector.load %arg6[%c1, %c0_16, %c0_17] : memref<9x16x32xbf16, #tpu.memory_space<vmem>>, vector<1x16x32xbf16>
    %23 = vector.shape_cast %22 : vector<1x16x32xbf16> to vector<16x32xbf16>
    %cst_18 = arith.constant dense<0.000000e+00> : vector<128x32xf32>
    %24 = tpu.matmul %12, %23, %cst_18 {dimension_numbers = #tpu.dot_dimension_numbers<[1], [0], [0], [1], [0, 0, 1, 1], [], []>} : vector<128x16xbf16>, vector<16x32xbf16>, vector<128x32xf32> -> vector<128x32xf32>
    %c1_19 = arith.constant 1 : index
    %c0_20 = arith.constant 0 : index
    %c0_21 = arith.constant 0 : index
    %25 = vector.load %arg3[%c1_19, %c0_20, %c0_21] : memref<9x32x128xbf16, #tpu.memory_space<vmem>>, vector<1x32x128xbf16>
    %26 = vector.shape_cast %25 : vector<1x32x128xbf16> to vector<32x128xbf16>
    %27 = arith.truncf %24 : vector<128x32xf32> to vector<128x32xbf16>
    %cst_22 = arith.constant dense<0.000000e+00> : vector<32x32xf32>
    %28 = tpu.matmul %26, %27, %cst_22 {dimension_numbers = #tpu.dot_dimension_numbers<[1], [0], [0], [1], [0, 0, 1, 1], [], []>} : vector<32x128xbf16>, vector<128x32xbf16>, vector<32x32xf32> -> vector<32x32xf32>
    %29 = arith.addf %21, %28 : vector<32x32xf32>
    %c2 = arith.constant 2 : index
    %c0_23 = arith.constant 0 : index
    %c0_24 = arith.constant 0 : index
    %30 = vector.load %arg6[%c2, %c0_23, %c0_24] : memref<9x16x32xbf16, #tpu.memory_space<vmem>>, vector<1x16x32xbf16>
    %31 = vector.shape_cast %30 : vector<1x16x32xbf16> to vector<16x32xbf16>
    %cst_25 = arith.constant dense<0.000000e+00> : vector<128x32xf32>
    %32 = tpu.matmul %12, %31, %cst_25 {dimension_numbers = #tpu.dot_dimension_numbers<[1], [0], [0], [1], [0, 0, 1, 1], [], []>} : vector<128x16xbf16>, vector<16x32xbf16>, vector<128x32xf32> -> vector<128x32xf32>
    %c2_26 = arith.constant 2 : index
    %c0_27 = arith.constant 0 : index
    %c0_28 = arith.constant 0 : index
    %33 = vector.load %arg3[%c2_26, %c0_27, %c0_28] : memref<9x32x128xbf16, #tpu.memory_space<vmem>>, vector<1x32x128xbf16>
    %34 = vector.shape_cast %33 : vector<1x32x128xbf16> to vector<32x128xbf16>
    %35 = arith.truncf %32 : vector<128x32xf32> to vector<128x32xbf16>
    %cst_29 = arith.constant dense<0.000000e+00> : vector<32x32xf32>
    %36 = tpu.matmul %34, %35, %cst_29 {dimension_numbers = #tpu.dot_dimension_numbers<[1], [0], [0], [1], [0, 0, 1, 1], [], []>} : vector<32x128xbf16>, vector<128x32xbf16>, vector<32x32xf32> -> vector<32x32xf32>
    %37 = arith.addf %29, %36 : vector<32x32xf32>
    %c3 = arith.constant 3 : index
    %c0_30 = arith.constant 0 : index
    %c0_31 = arith.constant 0 : index
    %38 = vector.load %arg6[%c3, %c0_30, %c0_31] : memref<9x16x32xbf16, #tpu.memory_space<vmem>>, vector<1x16x32xbf16>
    %39 = vector.shape_cast %38 : vector<1x16x32xbf16> to vector<16x32xbf16>
    %cst_32 = arith.constant dense<0.000000e+00> : vector<128x32xf32>
    %40 = tpu.matmul %12, %39, %cst_32 {dimension_numbers = #tpu.dot_dimension_numbers<[1], [0], [0], [1], [0, 0, 1, 1], [], []>} : vector<128x16xbf16>, vector<16x32xbf16>, vector<128x32xf32> -> vector<128x32xf32>
    %c3_33 = arith.constant 3 : index
    %c0_34 = arith.constant 0 : index
    %c0_35 = arith.constant 0 : index
    %41 = vector.load %arg3[%c3_33, %c0_34, %c0_35] : memref<9x32x128xbf16, #tpu.memory_space<vmem>>, vector<1x32x128xbf16>
    %42 = vector.shape_cast %41 : vector<1x32x128xbf16> to vector<32x128xbf16>
    %43 = arith.truncf %40 : vector<128x32xf32> to vector<128x32xbf16>
    %cst_36 = arith.constant dense<0.000000e+00> : vector<32x32xf32>
    %44 = tpu.matmul %42, %43, %cst_36 {dimension_numbers = #tpu.dot_dimension_numbers<[1], [0], [0], [1], [0, 0, 1, 1], [], []>} : vector<32x128xbf16>, vector<128x32xbf16>, vector<32x32xf32> -> vector<32x32xf32>
    %45 = arith.addf %37, %44 : vector<32x32xf32>
    %c4 = arith.constant 4 : index
    %c0_37 = arith.constant 0 : index
    %c0_38 = arith.constant 0 : index
    %46 = vector.load %arg6[%c4, %c0_37, %c0_38] : memref<9x16x32xbf16, #tpu.memory_space<vmem>>, vector<1x16x32xbf16>
    %47 = vector.shape_cast %46 : vector<1x16x32xbf16> to vector<16x32xbf16>
    %cst_39 = arith.constant dense<0.000000e+00> : vector<128x32xf32>
    %48 = tpu.matmul %12, %47, %cst_39 {dimension_numbers = #tpu.dot_dimension_numbers<[1], [0], [0], [1], [0, 0, 1, 1], [], []>} : vector<128x16xbf16>, vector<16x32xbf16>, vector<128x32xf32> -> vector<128x32xf32>
    %c4_40 = arith.constant 4 : index
    %c0_41 = arith.constant 0 : index
    %c0_42 = arith.constant 0 : index
    %49 = vector.load %arg3[%c4_40, %c0_41, %c0_42] : memref<9x32x128xbf16, #tpu.memory_space<vmem>>, vector<1x32x128xbf16>
    %50 = vector.shape_cast %49 : vector<1x32x128xbf16> to vector<32x128xbf16>
    %51 = arith.truncf %48 : vector<128x32xf32> to vector<128x32xbf16>
    %cst_43 = arith.constant dense<0.000000e+00> : vector<32x32xf32>
    %52 = tpu.matmul %50, %51, %cst_43 {dimension_numbers = #tpu.dot_dimension_numbers<[1], [0], [0], [1], [0, 0, 1, 1], [], []>} : vector<32x128xbf16>, vector<128x32xbf16>, vector<32x32xf32> -> vector<32x32xf32>
    %53 = arith.addf %45, %52 : vector<32x32xf32>
    %c5 = arith.constant 5 : index
    %c0_44 = arith.constant 0 : index
    %c0_45 = arith.constant 0 : index
    %54 = vector.load %arg6[%c5, %c0_44, %c0_45] : memref<9x16x32xbf16, #tpu.memory_space<vmem>>, vector<1x16x32xbf16>
    %55 = vector.shape_cast %54 : vector<1x16x32xbf16> to vector<16x32xbf16>
    %cst_46 = arith.constant dense<0.000000e+00> : vector<128x32xf32>
    %56 = tpu.matmul %12, %55, %cst_46 {dimension_numbers = #tpu.dot_dimension_numbers<[1], [0], [0], [1], [0, 0, 1, 1], [], []>} : vector<128x16xbf16>, vector<16x32xbf16>, vector<128x32xf32> -> vector<128x32xf32>
    %c5_47 = arith.constant 5 : index
    %c0_48 = arith.constant 0 : index
    %c0_49 = arith.constant 0 : index
    %57 = vector.load %arg3[%c5_47, %c0_48, %c0_49] : memref<9x32x128xbf16, #tpu.memory_space<vmem>>, vector<1x32x128xbf16>
    %58 = vector.shape_cast %57 : vector<1x32x128xbf16> to vector<32x128xbf16>
    %59 = arith.truncf %56 : vector<128x32xf32> to vector<128x32xbf16>
    %cst_50 = arith.constant dense<0.000000e+00> : vector<32x32xf32>
    %60 = tpu.matmul %58, %59, %cst_50 {dimension_numbers = #tpu.dot_dimension_numbers<[1], [0], [0], [1], [0, 0, 1, 1], [], []>} : vector<32x128xbf16>, vector<128x32xbf16>, vector<32x32xf32> -> vector<32x32xf32>
    %61 = arith.addf %53, %60 : vector<32x32xf32>
    %c6 = arith.constant 6 : index
    %c0_51 = arith.constant 0 : index
    %c0_52 = arith.constant 0 : index
    %62 = vector.load %arg6[%c6, %c0_51, %c0_52] : memref<9x16x32xbf16, #tpu.memory_space<vmem>>, vector<1x16x32xbf16>
    %63 = vector.shape_cast %62 : vector<1x16x32xbf16> to vector<16x32xbf16>
    %cst_53 = arith.constant dense<0.000000e+00> : vector<128x32xf32>
    %64 = tpu.matmul %12, %63, %cst_53 {dimension_numbers = #tpu.dot_dimension_numbers<[1], [0], [0], [1], [0, 0, 1, 1], [], []>} : vector<128x16xbf16>, vector<16x32xbf16>, vector<128x32xf32> -> vector<128x32xf32>
    %c6_54 = arith.constant 6 : index
    %c0_55 = arith.constant 0 : index
    %c0_56 = arith.constant 0 : index
    %65 = vector.load %arg3[%c6_54, %c0_55, %c0_56] : memref<9x32x128xbf16, #tpu.memory_space<vmem>>, vector<1x32x128xbf16>
    %66 = vector.shape_cast %65 : vector<1x32x128xbf16> to vector<32x128xbf16>
    %67 = arith.truncf %64 : vector<128x32xf32> to vector<128x32xbf16>
    %cst_57 = arith.constant dense<0.000000e+00> : vector<32x32xf32>
    %68 = tpu.matmul %66, %67, %cst_57 {dimension_numbers = #tpu.dot_dimension_numbers<[1], [0], [0], [1], [0, 0, 1, 1], [], []>} : vector<32x128xbf16>, vector<128x32xbf16>, vector<32x32xf32> -> vector<32x32xf32>
    %69 = arith.addf %61, %68 : vector<32x32xf32>
    %c7 = arith.constant 7 : index
    %c0_58 = arith.constant 0 : index
    %c0_59 = arith.constant 0 : index
    %70 = vector.load %arg6[%c7, %c0_58, %c0_59] : memref<9x16x32xbf16, #tpu.memory_space<vmem>>, vector<1x16x32xbf16>
    %71 = vector.shape_cast %70 : vector<1x16x32xbf16> to vector<16x32xbf16>
    %cst_60 = arith.constant dense<0.000000e+00> : vector<128x32xf32>
    %72 = tpu.matmul %12, %71, %cst_60 {dimension_numbers = #tpu.dot_dimension_numbers<[1], [0], [0], [1], [0, 0, 1, 1], [], []>} : vector<128x16xbf16>, vector<16x32xbf16>, vector<128x32xf32> -> vector<128x32xf32>
    %c7_61 = arith.constant 7 : index
    %c0_62 = arith.constant 0 : index
    %c0_63 = arith.constant 0 : index
    %73 = vector.load %arg3[%c7_61, %c0_62, %c0_63] : memref<9x32x128xbf16, #tpu.memory_space<vmem>>, vector<1x32x128xbf16>
    %74 = vector.shape_cast %73 : vector<1x32x128xbf16> to vector<32x128xbf16>
    %75 = arith.truncf %72 : vector<128x32xf32> to vector<128x32xbf16>
    %cst_64 = arith.constant dense<0.000000e+00> : vector<32x32xf32>
    %76 = tpu.matmul %74, %75, %cst_64 {dimension_numbers = #tpu.dot_dimension_numbers<[1], [0], [0], [1], [0, 0, 1, 1], [], []>} : vector<32x128xbf16>, vector<128x32xbf16>, vector<32x32xf32> -> vector<32x32xf32>
    %77 = arith.addf %69, %76 : vector<32x32xf32>
    %c8 = arith.constant 8 : index
    %c0_65 = arith.constant 0 : index
    %c0_66 = arith.constant 0 : index
    %78 = vector.load %arg6[%c8, %c0_65, %c0_66] : memref<9x16x32xbf16, #tpu.memory_space<vmem>>, vector<1x16x32xbf16>
    %79 = vector.shape_cast %78 : vector<1x16x32xbf16> to vector<16x32xbf16>
    %cst_67 = arith.constant dense<0.000000e+00> : vector<128x32xf32>
    %80 = tpu.matmul %12, %79, %cst_67 {dimension_numbers = #tpu.dot_dimension_numbers<[1], [0], [0], [1], [0, 0, 1, 1], [], []>} : vector<128x16xbf16>, vector<16x32xbf16>, vector<128x32xf32> -> vector<128x32xf32>
    %c8_68 = arith.constant 8 : index
    %c0_69 = arith.constant 0 : index
    %c0_70 = arith.constant 0 : index
    %81 = vector.load %arg3[%c8_68, %c0_69, %c0_70] : memref<9x32x128xbf16, #tpu.memory_space<vmem>>, vector<1x32x128xbf16>
    %82 = vector.shape_cast %81 : vector<1x32x128xbf16> to vector<32x128xbf16>
    %83 = arith.truncf %80 : vector<128x32xf32> to vector<128x32xbf16>
    %cst_71 = arith.constant dense<0.000000e+00> : vector<32x32xf32>
    %84 = tpu.matmul %82, %83, %cst_71 {dimension_numbers = #tpu.dot_dimension_numbers<[1], [0], [0], [1], [0, 0, 1, 1], [], []>} : vector<32x128xbf16>, vector<128x32xbf16>, vector<32x32xf32> -> vector<32x32xf32>
    %85 = arith.addf %77, %84 : vector<32x32xf32>
    %86 = arith.negf %85 : vector<32x32xf32>
    %87 = math.exp %86 : vector<32x32xf32>
    %cst_72 = arith.constant 1.000000e+00 : f32
    %88 = vector.broadcast %cst_72 : f32 to vector<32x32xf32>
    %89 = arith.addf %88, %87 : vector<32x32xf32>
    %90 = arith.divf %88, %89 : vector<32x32xf32>
    %c0_73 = arith.constant 0 : index
    %c0_74 = arith.constant 0 : index
    %91 = vector.load %arg9[%c0_73, %c0_74] : memref<1x64xf32, #tpu.memory_space<vmem>>, vector<1x64xf32>
    %92 = arith.truncf %90 : vector<32x32xf32> to vector<32x32xbf16>
    %c0_75 = arith.constant 0 : index
    %c0_76 = arith.constant 0 : index
    %c0_77 = arith.constant 0 : index
    %93 = vector.load %arg8[%c0_75, %c0_76, %c0_77] : memref<9x32x64xbf16, #tpu.memory_space<vmem>>, vector<1x32x64xbf16>
    %94 = vector.shape_cast %93 : vector<1x32x64xbf16> to vector<32x64xbf16>
    %cst_78 = arith.constant dense<0.000000e+00> : vector<32x64xf32>
    %95 = tpu.matmul %92, %94, %cst_78 {dimension_numbers = #tpu.dot_dimension_numbers<[1], [0], [0], [1], [0, 0, 1, 1], [], []>} : vector<32x32xbf16>, vector<32x64xbf16>, vector<32x64xf32> -> vector<32x64xf32>
    %c0_79 = arith.constant 0 : index
    %c0_80 = arith.constant 0 : index
    %c0_81 = arith.constant 0 : index
    %96 = vector.load %arg4[%c0_79, %c0_80, %c0_81] : memref<9x32x32xbf16, #tpu.memory_space<vmem>>, vector<1x32x32xbf16>
    %97 = vector.shape_cast %96 : vector<1x32x32xbf16> to vector<32x32xbf16>
    %98 = arith.truncf %95 : vector<32x64xf32> to vector<32x64xbf16>
    %cst_82 = arith.constant dense<0.000000e+00> : vector<32x64xf32>
    %99 = tpu.matmul %97, %98, %cst_82 {dimension_numbers = #tpu.dot_dimension_numbers<[1], [0], [0], [1], [0, 0, 1, 1], [], []>} : vector<32x32xbf16>, vector<32x64xbf16>, vector<32x64xf32> -> vector<32x64xf32>
    %100 = vector.broadcast %91 : vector<1x64xf32> to vector<32x64xf32>
    %101 = arith.addf %100, %99 : vector<32x64xf32>
    %c1_83 = arith.constant 1 : index
    %c0_84 = arith.constant 0 : index
    %c0_85 = arith.constant 0 : index
    %102 = vector.load %arg8[%c1_83, %c0_84, %c0_85] : memref<9x32x64xbf16, #tpu.memory_space<vmem>>, vector<1x32x64xbf16>
    %103 = vector.shape_cast %102 : vector<1x32x64xbf16> to vector<32x64xbf16>
    %cst_86 = arith.constant dense<0.000000e+00> : vector<32x64xf32>
    %104 = tpu.matmul %92, %103, %cst_86 {dimension_numbers = #tpu.dot_dimension_numbers<[1], [0], [0], [1], [0, 0, 1, 1], [], []>} : vector<32x32xbf16>, vector<32x64xbf16>, vector<32x64xf32> -> vector<32x64xf32>
    %c1_87 = arith.constant 1 : index
    %c0_88 = arith.constant 0 : index
    %c0_89 = arith.constant 0 : index
    %105 = vector.load %arg4[%c1_87, %c0_88, %c0_89] : memref<9x32x32xbf16, #tpu.memory_space<vmem>>, vector<1x32x32xbf16>
    %106 = vector.shape_cast %105 : vector<1x32x32xbf16> to vector<32x32xbf16>
    %107 = arith.truncf %104 : vector<32x64xf32> to vector<32x64xbf16>
    %cst_90 = arith.constant dense<0.000000e+00> : vector<32x64xf32>
    %108 = tpu.matmul %106, %107, %cst_90 {dimension_numbers = #tpu.dot_dimension_numbers<[1], [0], [0], [1], [0, 0, 1, 1], [], []>} : vector<32x32xbf16>, vector<32x64xbf16>, vector<32x64xf32> -> vector<32x64xf32>
    %109 = arith.addf %101, %108 : vector<32x64xf32>
    %c2_91 = arith.constant 2 : index
    %c0_92 = arith.constant 0 : index
    %c0_93 = arith.constant 0 : index
    %110 = vector.load %arg8[%c2_91, %c0_92, %c0_93] : memref<9x32x64xbf16, #tpu.memory_space<vmem>>, vector<1x32x64xbf16>
    %111 = vector.shape_cast %110 : vector<1x32x64xbf16> to vector<32x64xbf16>
    %cst_94 = arith.constant dense<0.000000e+00> : vector<32x64xf32>
    %112 = tpu.matmul %92, %111, %cst_94 {dimension_numbers = #tpu.dot_dimension_numbers<[1], [0], [0], [1], [0, 0, 1, 1], [], []>} : vector<32x32xbf16>, vector<32x64xbf16>, vector<32x64xf32> -> vector<32x64xf32>
    %c2_95 = arith.constant 2 : index
    %c0_96 = arith.constant 0 : index
    %c0_97 = arith.constant 0 : index
    %113 = vector.load %arg4[%c2_95, %c0_96, %c0_97] : memref<9x32x32xbf16, #tpu.memory_space<vmem>>, vector<1x32x32xbf16>
    %114 = vector.shape_cast %113 : vector<1x32x32xbf16> to vector<32x32xbf16>
    %115 = arith.truncf %112 : vector<32x64xf32> to vector<32x64xbf16>
    %cst_98 = arith.constant dense<0.000000e+00> : vector<32x64xf32>
    %116 = tpu.matmul %114, %115, %cst_98 {dimension_numbers = #tpu.dot_dimension_numbers<[1], [0], [0], [1], [0, 0, 1, 1], [], []>} : vector<32x32xbf16>, vector<32x64xbf16>, vector<32x64xf32> -> vector<32x64xf32>
    %117 = arith.addf %109, %116 : vector<32x64xf32>
    %c3_99 = arith.constant 3 : index
    %c0_100 = arith.constant 0 : index
    %c0_101 = arith.constant 0 : index
    %118 = vector.load %arg8[%c3_99, %c0_100, %c0_101] : memref<9x32x64xbf16, #tpu.memory_space<vmem>>, vector<1x32x64xbf16>
    %119 = vector.shape_cast %118 : vector<1x32x64xbf16> to vector<32x64xbf16>
    %cst_102 = arith.constant dense<0.000000e+00> : vector<32x64xf32>
    %120 = tpu.matmul %92, %119, %cst_102 {dimension_numbers = #tpu.dot_dimension_numbers<[1], [0], [0], [1], [0, 0, 1, 1], [], []>} : vector<32x32xbf16>, vector<32x64xbf16>, vector<32x64xf32> -> vector<32x64xf32>
    %c3_103 = arith.constant 3 : index
    %c0_104 = arith.constant 0 : index
    %c0_105 = arith.constant 0 : index
    %121 = vector.load %arg4[%c3_103, %c0_104, %c0_105] : memref<9x32x32xbf16, #tpu.memory_space<vmem>>, vector<1x32x32xbf16>
    %122 = vector.shape_cast %121 : vector<1x32x32xbf16> to vector<32x32xbf16>
    %123 = arith.truncf %120 : vector<32x64xf32> to vector<32x64xbf16>
    %cst_106 = arith.constant dense<0.000000e+00> : vector<32x64xf32>
    %124 = tpu.matmul %122, %123, %cst_106 {dimension_numbers = #tpu.dot_dimension_numbers<[1], [0], [0], [1], [0, 0, 1, 1], [], []>} : vector<32x32xbf16>, vector<32x64xbf16>, vector<32x64xf32> -> vector<32x64xf32>
    %125 = arith.addf %117, %124 : vector<32x64xf32>
    %c4_107 = arith.constant 4 : index
    %c0_108 = arith.constant 0 : index
    %c0_109 = arith.constant 0 : index
    %126 = vector.load %arg8[%c4_107, %c0_108, %c0_109] : memref<9x32x64xbf16, #tpu.memory_space<vmem>>, vector<1x32x64xbf16>
    %127 = vector.shape_cast %126 : vector<1x32x64xbf16> to vector<32x64xbf16>
    %cst_110 = arith.constant dense<0.000000e+00> : vector<32x64xf32>
    %128 = tpu.matmul %92, %127, %cst_110 {dimension_numbers = #tpu.dot_dimension_numbers<[1], [0], [0], [1], [0, 0, 1, 1], [], []>} : vector<32x32xbf16>, vector<32x64xbf16>, vector<32x64xf32> -> vector<32x64xf32>
    %c4_111 = arith.constant 4 : index
    %c0_112 = arith.constant 0 : index
    %c0_113 = arith.constant 0 : index
    %129 = vector.load %arg4[%c4_111, %c0_112, %c0_113] : memref<9x32x32xbf16, #tpu.memory_space<vmem>>, vector<1x32x32xbf16>
    %130 = vector.shape_cast %129 : vector<1x32x32xbf16> to vector<32x32xbf16>
    %131 = arith.truncf %128 : vector<32x64xf32> to vector<32x64xbf16>
    %cst_114 = arith.constant dense<0.000000e+00> : vector<32x64xf32>
    %132 = tpu.matmul %130, %131, %cst_114 {dimension_numbers = #tpu.dot_dimension_numbers<[1], [0], [0], [1], [0, 0, 1, 1], [], []>} : vector<32x32xbf16>, vector<32x64xbf16>, vector<32x64xf32> -> vector<32x64xf32>
    %133 = arith.addf %125, %132 : vector<32x64xf32>
    %c5_115 = arith.constant 5 : index
    %c0_116 = arith.constant 0 : index
    %c0_117 = arith.constant 0 : index
    %134 = vector.load %arg8[%c5_115, %c0_116, %c0_117] : memref<9x32x64xbf16, #tpu.memory_space<vmem>>, vector<1x32x64xbf16>
    %135 = vector.shape_cast %134 : vector<1x32x64xbf16> to vector<32x64xbf16>
    %cst_118 = arith.constant dense<0.000000e+00> : vector<32x64xf32>
    %136 = tpu.matmul %92, %135, %cst_118 {dimension_numbers = #tpu.dot_dimension_numbers<[1], [0], [0], [1], [0, 0, 1, 1], [], []>} : vector<32x32xbf16>, vector<32x64xbf16>, vector<32x64xf32> -> vector<32x64xf32>
    %c5_119 = arith.constant 5 : index
    %c0_120 = arith.constant 0 : index
    %c0_121 = arith.constant 0 : index
    %137 = vector.load %arg4[%c5_119, %c0_120, %c0_121] : memref<9x32x32xbf16, #tpu.memory_space<vmem>>, vector<1x32x32xbf16>
    %138 = vector.shape_cast %137 : vector<1x32x32xbf16> to vector<32x32xbf16>
    %139 = arith.truncf %136 : vector<32x64xf32> to vector<32x64xbf16>
    %cst_122 = arith.constant dense<0.000000e+00> : vector<32x64xf32>
    %140 = tpu.matmul %138, %139, %cst_122 {dimension_numbers = #tpu.dot_dimension_numbers<[1], [0], [0], [1], [0, 0, 1, 1], [], []>} : vector<32x32xbf16>, vector<32x64xbf16>, vector<32x64xf32> -> vector<32x64xf32>
    %141 = arith.addf %133, %140 : vector<32x64xf32>
    %c6_123 = arith.constant 6 : index
    %c0_124 = arith.constant 0 : index
    %c0_125 = arith.constant 0 : index
    %142 = vector.load %arg8[%c6_123, %c0_124, %c0_125] : memref<9x32x64xbf16, #tpu.memory_space<vmem>>, vector<1x32x64xbf16>
    %143 = vector.shape_cast %142 : vector<1x32x64xbf16> to vector<32x64xbf16>
    %cst_126 = arith.constant dense<0.000000e+00> : vector<32x64xf32>
    %144 = tpu.matmul %92, %143, %cst_126 {dimension_numbers = #tpu.dot_dimension_numbers<[1], [0], [0], [1], [0, 0, 1, 1], [], []>} : vector<32x32xbf16>, vector<32x64xbf16>, vector<32x64xf32> -> vector<32x64xf32>
    %c6_127 = arith.constant 6 : index
    %c0_128 = arith.constant 0 : index
    %c0_129 = arith.constant 0 : index
    %145 = vector.load %arg4[%c6_127, %c0_128, %c0_129] : memref<9x32x32xbf16, #tpu.memory_space<vmem>>, vector<1x32x32xbf16>
    %146 = vector.shape_cast %145 : vector<1x32x32xbf16> to vector<32x32xbf16>
    %147 = arith.truncf %144 : vector<32x64xf32> to vector<32x64xbf16>
    %cst_130 = arith.constant dense<0.000000e+00> : vector<32x64xf32>
    %148 = tpu.matmul %146, %147, %cst_130 {dimension_numbers = #tpu.dot_dimension_numbers<[1], [0], [0], [1], [0, 0, 1, 1], [], []>} : vector<32x32xbf16>, vector<32x64xbf16>, vector<32x64xf32> -> vector<32x64xf32>
    %149 = arith.addf %141, %148 : vector<32x64xf32>
    %c7_131 = arith.constant 7 : index
    %c0_132 = arith.constant 0 : index
    %c0_133 = arith.constant 0 : index
    %150 = vector.load %arg8[%c7_131, %c0_132, %c0_133] : memref<9x32x64xbf16, #tpu.memory_space<vmem>>, vector<1x32x64xbf16>
    %151 = vector.shape_cast %150 : vector<1x32x64xbf16> to vector<32x64xbf16>
    %cst_134 = arith.constant dense<0.000000e+00> : vector<32x64xf32>
    %152 = tpu.matmul %92, %151, %cst_134 {dimension_numbers = #tpu.dot_dimension_numbers<[1], [0], [0], [1], [0, 0, 1, 1], [], []>} : vector<32x32xbf16>, vector<32x64xbf16>, vector<32x64xf32> -> vector<32x64xf32>
    %c7_135 = arith.constant 7 : index
    %c0_136 = arith.constant 0 : index
    %c0_137 = arith.constant 0 : index
    %153 = vector.load %arg4[%c7_135, %c0_136, %c0_137] : memref<9x32x32xbf16, #tpu.memory_space<vmem>>, vector<1x32x32xbf16>
    %154 = vector.shape_cast %153 : vector<1x32x32xbf16> to vector<32x32xbf16>
    %155 = arith.truncf %152 : vector<32x64xf32> to vector<32x64xbf16>
    %cst_138 = arith.constant dense<0.000000e+00> : vector<32x64xf32>
    %156 = tpu.matmul %154, %155, %cst_138 {dimension_numbers = #tpu.dot_dimension_numbers<[1], [0], [0], [1], [0, 0, 1, 1], [], []>} : vector<32x32xbf16>, vector<32x64xbf16>, vector<32x64xf32> -> vector<32x64xf32>
    %157 = arith.addf %149, %156 : vector<32x64xf32>
    %c8_139 = arith.constant 8 : index
    %c0_140 = arith.constant 0 : index
    %c0_141 = arith.constant 0 : index
    %158 = vector.load %arg8[%c8_139, %c0_140, %c0_141] : memref<9x32x64xbf16, #tpu.memory_space<vmem>>, vector<1x32x64xbf16>
    %159 = vector.shape_cast %158 : vector<1x32x64xbf16> to vector<32x64xbf16>
    %cst_142 = arith.constant dense<0.000000e+00> : vector<32x64xf32>
    %160 = tpu.matmul %92, %159, %cst_142 {dimension_numbers = #tpu.dot_dimension_numbers<[1], [0], [0], [1], [0, 0, 1, 1], [], []>} : vector<32x32xbf16>, vector<32x64xbf16>, vector<32x64xf32> -> vector<32x64xf32>
    %c8_143 = arith.constant 8 : index
    %c0_144 = arith.constant 0 : index
    %c0_145 = arith.constant 0 : index
    %161 = vector.load %arg4[%c8_143, %c0_144, %c0_145] : memref<9x32x32xbf16, #tpu.memory_space<vmem>>, vector<1x32x32xbf16>
    %162 = vector.shape_cast %161 : vector<1x32x32xbf16> to vector<32x32xbf16>
    %163 = arith.truncf %160 : vector<32x64xf32> to vector<32x64xbf16>
    %cst_146 = arith.constant dense<0.000000e+00> : vector<32x64xf32>
    %164 = tpu.matmul %162, %163, %cst_146 {dimension_numbers = #tpu.dot_dimension_numbers<[1], [0], [0], [1], [0, 0, 1, 1], [], []>} : vector<32x32xbf16>, vector<32x64xbf16>, vector<32x64xf32> -> vector<32x64xf32>
    %165 = arith.addf %157, %164 : vector<32x64xf32>
    %166 = arith.negf %165 : vector<32x64xf32>
    %167 = math.exp %166 : vector<32x64xf32>
    %cst_147 = arith.constant 1.000000e+00 : f32
    %168 = vector.broadcast %cst_147 : f32 to vector<32x64xf32>
    %169 = arith.addf %168, %167 : vector<32x64xf32>
    %170 = arith.divf %168, %169 : vector<32x64xf32>
    %c0_148 = arith.constant 0 : index
    %c0_149 = arith.constant 0 : index
    %c0_150 = arith.constant 0 : index
    %171 = vector.load %arg11[%c0_148, %c0_149, %c0_150] : memref<3x1x64xf32, #tpu.memory_space<vmem>>, vector<1x1x64xf32>
    %172 = vector.shape_cast %171 : vector<1x1x64xf32> to vector<1x64xf32>
    %173 = arith.truncf %170 : vector<32x64xf32> to vector<32x64xbf16>
    %c0_151 = arith.constant 0 : index
    %c0_152 = arith.constant 0 : index
    %c0_153 = arith.constant 0 : index
    %c0_154 = arith.constant 0 : index
    %174 = vector.load %arg10[%c0_151, %c0_152, %c0_153, %c0_154] : memref<3x9x64x64xbf16, #tpu.memory_space<vmem>>, vector<1x1x64x64xbf16>
    %175 = vector.shape_cast %174 : vector<1x1x64x64xbf16> to vector<64x64xbf16>
    %cst_155 = arith.constant dense<0.000000e+00> : vector<32x64xf32>
    %176 = tpu.matmul %173, %175, %cst_155 {dimension_numbers = #tpu.dot_dimension_numbers<[1], [0], [0], [1], [0, 0, 1, 1], [], []>} : vector<32x64xbf16>, vector<64x64xbf16>, vector<32x64xf32> -> vector<32x64xf32>
    %c0_156 = arith.constant 0 : index
    %c0_157 = arith.constant 0 : index
    %c0_158 = arith.constant 0 : index
    %177 = vector.load %arg5[%c0_156, %c0_157, %c0_158] : memref<9x32x32xbf16, #tpu.memory_space<vmem>>, vector<1x32x32xbf16>
    %178 = vector.shape_cast %177 : vector<1x32x32xbf16> to vector<32x32xbf16>
    %179 = arith.truncf %176 : vector<32x64xf32> to vector<32x64xbf16>
    %cst_159 = arith.constant dense<0.000000e+00> : vector<32x64xf32>
    %180 = tpu.matmul %178, %179, %cst_159 {dimension_numbers = #tpu.dot_dimension_numbers<[1], [0], [0], [1], [0, 0, 1, 1], [], []>} : vector<32x32xbf16>, vector<32x64xbf16>, vector<32x64xf32> -> vector<32x64xf32>
    %181 = vector.broadcast %172 : vector<1x64xf32> to vector<32x64xf32>
    %182 = arith.addf %181, %180 : vector<32x64xf32>
    %c0_160 = arith.constant 0 : index
    %c1_161 = arith.constant 1 : index
    %c0_162 = arith.constant 0 : index
    %c0_163 = arith.constant 0 : index
    %183 = vector.load %arg10[%c0_160, %c1_161, %c0_162, %c0_163] : memref<3x9x64x64xbf16, #tpu.memory_space<vmem>>, vector<1x1x64x64xbf16>
    %184 = vector.shape_cast %183 : vector<1x1x64x64xbf16> to vector<64x64xbf16>
    %cst_164 = arith.constant dense<0.000000e+00> : vector<32x64xf32>
    %185 = tpu.matmul %173, %184, %cst_164 {dimension_numbers = #tpu.dot_dimension_numbers<[1], [0], [0], [1], [0, 0, 1, 1], [], []>} : vector<32x64xbf16>, vector<64x64xbf16>, vector<32x64xf32> -> vector<32x64xf32>
    %c1_165 = arith.constant 1 : index
    %c0_166 = arith.constant 0 : index
    %c0_167 = arith.constant 0 : index
    %186 = vector.load %arg5[%c1_165, %c0_166, %c0_167] : memref<9x32x32xbf16, #tpu.memory_space<vmem>>, vector<1x32x32xbf16>
    %187 = vector.shape_cast %186 : vector<1x32x32xbf16> to vector<32x32xbf16>
    %188 = arith.truncf %185 : vector<32x64xf32> to vector<32x64xbf16>
    %cst_168 = arith.constant dense<0.000000e+00> : vector<32x64xf32>
    %189 = tpu.matmul %187, %188, %cst_168 {dimension_numbers = #tpu.dot_dimension_numbers<[1], [0], [0], [1], [0, 0, 1, 1], [], []>} : vector<32x32xbf16>, vector<32x64xbf16>, vector<32x64xf32> -> vector<32x64xf32>
    %190 = arith.addf %182, %189 : vector<32x64xf32>
    %c0_169 = arith.constant 0 : index
    %c2_170 = arith.constant 2 : index
    %c0_171 = arith.constant 0 : index
    %c0_172 = arith.constant 0 : index
    %191 = vector.load %arg10[%c0_169, %c2_170, %c0_171, %c0_172] : memref<3x9x64x64xbf16, #tpu.memory_space<vmem>>, vector<1x1x64x64xbf16>
    %192 = vector.shape_cast %191 : vector<1x1x64x64xbf16> to vector<64x64xbf16>
    %cst_173 = arith.constant dense<0.000000e+00> : vector<32x64xf32>
    %193 = tpu.matmul %173, %192, %cst_173 {dimension_numbers = #tpu.dot_dimension_numbers<[1], [0], [0], [1], [0, 0, 1, 1], [], []>} : vector<32x64xbf16>, vector<64x64xbf16>, vector<32x64xf32> -> vector<32x64xf32>
    %c2_174 = arith.constant 2 : index
    %c0_175 = arith.constant 0 : index
    %c0_176 = arith.constant 0 : index
    %194 = vector.load %arg5[%c2_174, %c0_175, %c0_176] : memref<9x32x32xbf16, #tpu.memory_space<vmem>>, vector<1x32x32xbf16>
    %195 = vector.shape_cast %194 : vector<1x32x32xbf16> to vector<32x32xbf16>
    %196 = arith.truncf %193 : vector<32x64xf32> to vector<32x64xbf16>
    %cst_177 = arith.constant dense<0.000000e+00> : vector<32x64xf32>
    %197 = tpu.matmul %195, %196, %cst_177 {dimension_numbers = #tpu.dot_dimension_numbers<[1], [0], [0], [1], [0, 0, 1, 1], [], []>} : vector<32x32xbf16>, vector<32x64xbf16>, vector<32x64xf32> -> vector<32x64xf32>
    %198 = arith.addf %190, %197 : vector<32x64xf32>
    %c0_178 = arith.constant 0 : index
    %c3_179 = arith.constant 3 : index
    %c0_180 = arith.constant 0 : index
    %c0_181 = arith.constant 0 : index
    %199 = vector.load %arg10[%c0_178, %c3_179, %c0_180, %c0_181] : memref<3x9x64x64xbf16, #tpu.memory_space<vmem>>, vector<1x1x64x64xbf16>
    %200 = vector.shape_cast %199 : vector<1x1x64x64xbf16> to vector<64x64xbf16>
    %cst_182 = arith.constant dense<0.000000e+00> : vector<32x64xf32>
    %201 = tpu.matmul %173, %200, %cst_182 {dimension_numbers = #tpu.dot_dimension_numbers<[1], [0], [0], [1], [0, 0, 1, 1], [], []>} : vector<32x64xbf16>, vector<64x64xbf16>, vector<32x64xf32> -> vector<32x64xf32>
    %c3_183 = arith.constant 3 : index
    %c0_184 = arith.constant 0 : index
    %c0_185 = arith.constant 0 : index
    %202 = vector.load %arg5[%c3_183, %c0_184, %c0_185] : memref<9x32x32xbf16, #tpu.memory_space<vmem>>, vector<1x32x32xbf16>
    %203 = vector.shape_cast %202 : vector<1x32x32xbf16> to vector<32x32xbf16>
    %204 = arith.truncf %201 : vector<32x64xf32> to vector<32x64xbf16>
    %cst_186 = arith.constant dense<0.000000e+00> : vector<32x64xf32>
    %205 = tpu.matmul %203, %204, %cst_186 {dimension_numbers = #tpu.dot_dimension_numbers<[1], [0], [0], [1], [0, 0, 1, 1], [], []>} : vector<32x32xbf16>, vector<32x64xbf16>, vector<32x64xf32> -> vector<32x64xf32>
    %206 = arith.addf %198, %205 : vector<32x64xf32>
    %c0_187 = arith.constant 0 : index
    %c4_188 = arith.constant 4 : index
    %c0_189 = arith.constant 0 : index
    %c0_190 = arith.constant 0 : index
    %207 = vector.load %arg10[%c0_187, %c4_188, %c0_189, %c0_190] : memref<3x9x64x64xbf16, #tpu.memory_space<vmem>>, vector<1x1x64x64xbf16>
    %208 = vector.shape_cast %207 : vector<1x1x64x64xbf16> to vector<64x64xbf16>
    %cst_191 = arith.constant dense<0.000000e+00> : vector<32x64xf32>
    %209 = tpu.matmul %173, %208, %cst_191 {dimension_numbers = #tpu.dot_dimension_numbers<[1], [0], [0], [1], [0, 0, 1, 1], [], []>} : vector<32x64xbf16>, vector<64x64xbf16>, vector<32x64xf32> -> vector<32x64xf32>
    %c4_192 = arith.constant 4 : index
    %c0_193 = arith.constant 0 : index
    %c0_194 = arith.constant 0 : index
    %210 = vector.load %arg5[%c4_192, %c0_193, %c0_194] : memref<9x32x32xbf16, #tpu.memory_space<vmem>>, vector<1x32x32xbf16>
    %211 = vector.shape_cast %210 : vector<1x32x32xbf16> to vector<32x32xbf16>
    %212 = arith.truncf %209 : vector<32x64xf32> to vector<32x64xbf16>
    %cst_195 = arith.constant dense<0.000000e+00> : vector<32x64xf32>
    %213 = tpu.matmul %211, %212, %cst_195 {dimension_numbers = #tpu.dot_dimension_numbers<[1], [0], [0], [1], [0, 0, 1, 1], [], []>} : vector<32x32xbf16>, vector<32x64xbf16>, vector<32x64xf32> -> vector<32x64xf32>
    %214 = arith.addf %206, %213 : vector<32x64xf32>
    %c0_196 = arith.constant 0 : index
    %c5_197 = arith.constant 5 : index
    %c0_198 = arith.constant 0 : index
    %c0_199 = arith.constant 0 : index
    %215 = vector.load %arg10[%c0_196, %c5_197, %c0_198, %c0_199] : memref<3x9x64x64xbf16, #tpu.memory_space<vmem>>, vector<1x1x64x64xbf16>
    %216 = vector.shape_cast %215 : vector<1x1x64x64xbf16> to vector<64x64xbf16>
    %cst_200 = arith.constant dense<0.000000e+00> : vector<32x64xf32>
    %217 = tpu.matmul %173, %216, %cst_200 {dimension_numbers = #tpu.dot_dimension_numbers<[1], [0], [0], [1], [0, 0, 1, 1], [], []>} : vector<32x64xbf16>, vector<64x64xbf16>, vector<32x64xf32> -> vector<32x64xf32>
    %c5_201 = arith.constant 5 : index
    %c0_202 = arith.constant 0 : index
    %c0_203 = arith.constant 0 : index
    %218 = vector.load %arg5[%c5_201, %c0_202, %c0_203] : memref<9x32x32xbf16, #tpu.memory_space<vmem>>, vector<1x32x32xbf16>
    %219 = vector.shape_cast %218 : vector<1x32x32xbf16> to vector<32x32xbf16>
    %220 = arith.truncf %217 : vector<32x64xf32> to vector<32x64xbf16>
    %cst_204 = arith.constant dense<0.000000e+00> : vector<32x64xf32>
    %221 = tpu.matmul %219, %220, %cst_204 {dimension_numbers = #tpu.dot_dimension_numbers<[1], [0], [0], [1], [0, 0, 1, 1], [], []>} : vector<32x32xbf16>, vector<32x64xbf16>, vector<32x64xf32> -> vector<32x64xf32>
    %222 = arith.addf %214, %221 : vector<32x64xf32>
    %c0_205 = arith.constant 0 : index
    %c6_206 = arith.constant 6 : index
    %c0_207 = arith.constant 0 : index
    %c0_208 = arith.constant 0 : index
    %223 = vector.load %arg10[%c0_205, %c6_206, %c0_207, %c0_208] : memref<3x9x64x64xbf16, #tpu.memory_space<vmem>>, vector<1x1x64x64xbf16>
    %224 = vector.shape_cast %223 : vector<1x1x64x64xbf16> to vector<64x64xbf16>
    %cst_209 = arith.constant dense<0.000000e+00> : vector<32x64xf32>
    %225 = tpu.matmul %173, %224, %cst_209 {dimension_numbers = #tpu.dot_dimension_numbers<[1], [0], [0], [1], [0, 0, 1, 1], [], []>} : vector<32x64xbf16>, vector<64x64xbf16>, vector<32x64xf32> -> vector<32x64xf32>
    %c6_210 = arith.constant 6 : index
    %c0_211 = arith.constant 0 : index
    %c0_212 = arith.constant 0 : index
    %226 = vector.load %arg5[%c6_210, %c0_211, %c0_212] : memref<9x32x32xbf16, #tpu.memory_space<vmem>>, vector<1x32x32xbf16>
    %227 = vector.shape_cast %226 : vector<1x32x32xbf16> to vector<32x32xbf16>
    %228 = arith.truncf %225 : vector<32x64xf32> to vector<32x64xbf16>
    %cst_213 = arith.constant dense<0.000000e+00> : vector<32x64xf32>
    %229 = tpu.matmul %227, %228, %cst_213 {dimension_numbers = #tpu.dot_dimension_numbers<[1], [0], [0], [1], [0, 0, 1, 1], [], []>} : vector<32x32xbf16>, vector<32x64xbf16>, vector<32x64xf32> -> vector<32x64xf32>
    %230 = arith.addf %222, %229 : vector<32x64xf32>
    %c0_214 = arith.constant 0 : index
    %c7_215 = arith.constant 7 : index
    %c0_216 = arith.constant 0 : index
    %c0_217 = arith.constant 0 : index
    %231 = vector.load %arg10[%c0_214, %c7_215, %c0_216, %c0_217] : memref<3x9x64x64xbf16, #tpu.memory_space<vmem>>, vector<1x1x64x64xbf16>
    %232 = vector.shape_cast %231 : vector<1x1x64x64xbf16> to vector<64x64xbf16>
    %cst_218 = arith.constant dense<0.000000e+00> : vector<32x64xf32>
    %233 = tpu.matmul %173, %232, %cst_218 {dimension_numbers = #tpu.dot_dimension_numbers<[1], [0], [0], [1], [0, 0, 1, 1], [], []>} : vector<32x64xbf16>, vector<64x64xbf16>, vector<32x64xf32> -> vector<32x64xf32>
    %c7_219 = arith.constant 7 : index
    %c0_220 = arith.constant 0 : index
    %c0_221 = arith.constant 0 : index
    %234 = vector.load %arg5[%c7_219, %c0_220, %c0_221] : memref<9x32x32xbf16, #tpu.memory_space<vmem>>, vector<1x32x32xbf16>
    %235 = vector.shape_cast %234 : vector<1x32x32xbf16> to vector<32x32xbf16>
    %236 = arith.truncf %233 : vector<32x64xf32> to vector<32x64xbf16>
    %cst_222 = arith.constant dense<0.000000e+00> : vector<32x64xf32>
    %237 = tpu.matmul %235, %236, %cst_222 {dimension_numbers = #tpu.dot_dimension_numbers<[1], [0], [0], [1], [0, 0, 1, 1], [], []>} : vector<32x32xbf16>, vector<32x64xbf16>, vector<32x64xf32> -> vector<32x64xf32>
    %238 = arith.addf %230, %237 : vector<32x64xf32>
    %c0_223 = arith.constant 0 : index
    %c8_224 = arith.constant 8 : index
    %c0_225 = arith.constant 0 : index
    %c0_226 = arith.constant 0 : index
    %239 = vector.load %arg10[%c0_223, %c8_224, %c0_225, %c0_226] : memref<3x9x64x64xbf16, #tpu.memory_space<vmem>>, vector<1x1x64x64xbf16>
    %240 = vector.shape_cast %239 : vector<1x1x64x64xbf16> to vector<64x64xbf16>
    %cst_227 = arith.constant dense<0.000000e+00> : vector<32x64xf32>
    %241 = tpu.matmul %173, %240, %cst_227 {dimension_numbers = #tpu.dot_dimension_numbers<[1], [0], [0], [1], [0, 0, 1, 1], [], []>} : vector<32x64xbf16>, vector<64x64xbf16>, vector<32x64xf32> -> vector<32x64xf32>
    %c8_228 = arith.constant 8 : index
    %c0_229 = arith.constant 0 : index
    %c0_230 = arith.constant 0 : index
    %242 = vector.load %arg5[%c8_228, %c0_229, %c0_230] : memref<9x32x32xbf16, #tpu.memory_space<vmem>>, vector<1x32x32xbf16>
    %243 = vector.shape_cast %242 : vector<1x32x32xbf16> to vector<32x32xbf16>
    %244 = arith.truncf %241 : vector<32x64xf32> to vector<32x64xbf16>
    %cst_231 = arith.constant dense<0.000000e+00> : vector<32x64xf32>
    %245 = tpu.matmul %243, %244, %cst_231 {dimension_numbers = #tpu.dot_dimension_numbers<[1], [0], [0], [1], [0, 0, 1, 1], [], []>} : vector<32x32xbf16>, vector<32x64xbf16>, vector<32x64xf32> -> vector<32x64xf32>
    %246 = arith.addf %238, %245 : vector<32x64xf32>
    %cst_232 = arith.constant 0.000000e+00 : f32
    %247 = vector.broadcast %cst_232 : f32 to vector<32x64xf32>
    %248 = arith.maximumf %246, %247 : vector<32x64xf32>
    %c0_233 = arith.constant 0 : index
    %c0_234 = arith.constant 0 : index
    %c0_235 = arith.constant 0 : index
    %249 = vector.load %arg13[%c0_233, %c0_234, %c0_235] : memref<3x1x64xf32, #tpu.memory_space<vmem>>, vector<1x1x64xf32>
    %250 = vector.shape_cast %249 : vector<1x1x64xf32> to vector<1x64xf32>
    %251 = arith.truncf %248 : vector<32x64xf32> to vector<32x64xbf16>
    %c0_236 = arith.constant 0 : index
    %c0_237 = arith.constant 0 : index
    %c0_238 = arith.constant 0 : index
    %c0_239 = arith.constant 0 : index
    %252 = vector.load %arg12[%c0_236, %c0_237, %c0_238, %c0_239] : memref<3x9x64x64xbf16, #tpu.memory_space<vmem>>, vector<1x1x64x64xbf16>
    %253 = vector.shape_cast %252 : vector<1x1x64x64xbf16> to vector<64x64xbf16>
    %cst_240 = arith.constant dense<0.000000e+00> : vector<32x64xf32>
    %254 = tpu.matmul %251, %253, %cst_240 {dimension_numbers = #tpu.dot_dimension_numbers<[1], [0], [0], [1], [0, 0, 1, 1], [], []>} : vector<32x64xbf16>, vector<64x64xbf16>, vector<32x64xf32> -> vector<32x64xf32>
    %c0_241 = arith.constant 0 : index
    %c0_242 = arith.constant 0 : index
    %c0_243 = arith.constant 0 : index
    %255 = vector.load %arg5[%c0_241, %c0_242, %c0_243] : memref<9x32x32xbf16, #tpu.memory_space<vmem>>, vector<1x32x32xbf16>
    %256 = vector.shape_cast %255 : vector<1x32x32xbf16> to vector<32x32xbf16>
    %257 = arith.truncf %254 : vector<32x64xf32> to vector<32x64xbf16>
    %cst_244 = arith.constant dense<0.000000e+00> : vector<32x64xf32>
    %258 = tpu.matmul %256, %257, %cst_244 {dimension_numbers = #tpu.dot_dimension_numbers<[1], [0], [0], [1], [0, 0, 1, 1], [], []>} : vector<32x32xbf16>, vector<32x64xbf16>, vector<32x64xf32> -> vector<32x64xf32>
    %259 = vector.broadcast %250 : vector<1x64xf32> to vector<32x64xf32>
    %260 = arith.addf %259, %258 : vector<32x64xf32>
    %c0_245 = arith.constant 0 : index
    %c1_246 = arith.constant 1 : index
    %c0_247 = arith.constant 0 : index
    %c0_248 = arith.constant 0 : index
    %261 = vector.load %arg12[%c0_245, %c1_246, %c0_247, %c0_248] : memref<3x9x64x64xbf16, #tpu.memory_space<vmem>>, vector<1x1x64x64xbf16>
    %262 = vector.shape_cast %261 : vector<1x1x64x64xbf16> to vector<64x64xbf16>
    %cst_249 = arith.constant dense<0.000000e+00> : vector<32x64xf32>
    %263 = tpu.matmul %251, %262, %cst_249 {dimension_numbers = #tpu.dot_dimension_numbers<[1], [0], [0], [1], [0, 0, 1, 1], [], []>} : vector<32x64xbf16>, vector<64x64xbf16>, vector<32x64xf32> -> vector<32x64xf32>
    %c1_250 = arith.constant 1 : index
    %c0_251 = arith.constant 0 : index
    %c0_252 = arith.constant 0 : index
    %264 = vector.load %arg5[%c1_250, %c0_251, %c0_252] : memref<9x32x32xbf16, #tpu.memory_space<vmem>>, vector<1x32x32xbf16>
    %265 = vector.shape_cast %264 : vector<1x32x32xbf16> to vector<32x32xbf16>
    %266 = arith.truncf %263 : vector<32x64xf32> to vector<32x64xbf16>
    %cst_253 = arith.constant dense<0.000000e+00> : vector<32x64xf32>
    %267 = tpu.matmul %265, %266, %cst_253 {dimension_numbers = #tpu.dot_dimension_numbers<[1], [0], [0], [1], [0, 0, 1, 1], [], []>} : vector<32x32xbf16>, vector<32x64xbf16>, vector<32x64xf32> -> vector<32x64xf32>
    %268 = arith.addf %260, %267 : vector<32x64xf32>
    %c0_254 = arith.constant 0 : index
    %c2_255 = arith.constant 2 : index
    %c0_256 = arith.constant 0 : index
    %c0_257 = arith.constant 0 : index
    %269 = vector.load %arg12[%c0_254, %c2_255, %c0_256, %c0_257] : memref<3x9x64x64xbf16, #tpu.memory_space<vmem>>, vector<1x1x64x64xbf16>
    %270 = vector.shape_cast %269 : vector<1x1x64x64xbf16> to vector<64x64xbf16>
    %cst_258 = arith.constant dense<0.000000e+00> : vector<32x64xf32>
    %271 = tpu.matmul %251, %270, %cst_258 {dimension_numbers = #tpu.dot_dimension_numbers<[1], [0], [0], [1], [0, 0, 1, 1], [], []>} : vector<32x64xbf16>, vector<64x64xbf16>, vector<32x64xf32> -> vector<32x64xf32>
    %c2_259 = arith.constant 2 : index
    %c0_260 = arith.constant 0 : index
    %c0_261 = arith.constant 0 : index
    %272 = vector.load %arg5[%c2_259, %c0_260, %c0_261] : memref<9x32x32xbf16, #tpu.memory_space<vmem>>, vector<1x32x32xbf16>
    %273 = vector.shape_cast %272 : vector<1x32x32xbf16> to vector<32x32xbf16>
    %274 = arith.truncf %271 : vector<32x64xf32> to vector<32x64xbf16>
    %cst_262 = arith.constant dense<0.000000e+00> : vector<32x64xf32>
    %275 = tpu.matmul %273, %274, %cst_262 {dimension_numbers = #tpu.dot_dimension_numbers<[1], [0], [0], [1], [0, 0, 1, 1], [], []>} : vector<32x32xbf16>, vector<32x64xbf16>, vector<32x64xf32> -> vector<32x64xf32>
    %276 = arith.addf %268, %275 : vector<32x64xf32>
    %c0_263 = arith.constant 0 : index
    %c3_264 = arith.constant 3 : index
    %c0_265 = arith.constant 0 : index
    %c0_266 = arith.constant 0 : index
    %277 = vector.load %arg12[%c0_263, %c3_264, %c0_265, %c0_266] : memref<3x9x64x64xbf16, #tpu.memory_space<vmem>>, vector<1x1x64x64xbf16>
    %278 = vector.shape_cast %277 : vector<1x1x64x64xbf16> to vector<64x64xbf16>
    %cst_267 = arith.constant dense<0.000000e+00> : vector<32x64xf32>
    %279 = tpu.matmul %251, %278, %cst_267 {dimension_numbers = #tpu.dot_dimension_numbers<[1], [0], [0], [1], [0, 0, 1, 1], [], []>} : vector<32x64xbf16>, vector<64x64xbf16>, vector<32x64xf32> -> vector<32x64xf32>
    %c3_268 = arith.constant 3 : index
    %c0_269 = arith.constant 0 : index
    %c0_270 = arith.constant 0 : index
    %280 = vector.load %arg5[%c3_268, %c0_269, %c0_270] : memref<9x32x32xbf16, #tpu.memory_space<vmem>>, vector<1x32x32xbf16>
    %281 = vector.shape_cast %280 : vector<1x32x32xbf16> to vector<32x32xbf16>
    %282 = arith.truncf %279 : vector<32x64xf32> to vector<32x64xbf16>
    %cst_271 = arith.constant dense<0.000000e+00> : vector<32x64xf32>
    %283 = tpu.matmul %281, %282, %cst_271 {dimension_numbers = #tpu.dot_dimension_numbers<[1], [0], [0], [1], [0, 0, 1, 1], [], []>} : vector<32x32xbf16>, vector<32x64xbf16>, vector<32x64xf32> -> vector<32x64xf32>
    %284 = arith.addf %276, %283 : vector<32x64xf32>
    %c0_272 = arith.constant 0 : index
    %c4_273 = arith.constant 4 : index
    %c0_274 = arith.constant 0 : index
    %c0_275 = arith.constant 0 : index
    %285 = vector.load %arg12[%c0_272, %c4_273, %c0_274, %c0_275] : memref<3x9x64x64xbf16, #tpu.memory_space<vmem>>, vector<1x1x64x64xbf16>
    %286 = vector.shape_cast %285 : vector<1x1x64x64xbf16> to vector<64x64xbf16>
    %cst_276 = arith.constant dense<0.000000e+00> : vector<32x64xf32>
    %287 = tpu.matmul %251, %286, %cst_276 {dimension_numbers = #tpu.dot_dimension_numbers<[1], [0], [0], [1], [0, 0, 1, 1], [], []>} : vector<32x64xbf16>, vector<64x64xbf16>, vector<32x64xf32> -> vector<32x64xf32>
    %c4_277 = arith.constant 4 : index
    %c0_278 = arith.constant 0 : index
    %c0_279 = arith.constant 0 : index
    %288 = vector.load %arg5[%c4_277, %c0_278, %c0_279] : memref<9x32x32xbf16, #tpu.memory_space<vmem>>, vector<1x32x32xbf16>
    %289 = vector.shape_cast %288 : vector<1x32x32xbf16> to vector<32x32xbf16>
    %290 = arith.truncf %287 : vector<32x64xf32> to vector<32x64xbf16>
    %cst_280 = arith.constant dense<0.000000e+00> : vector<32x64xf32>
    %291 = tpu.matmul %289, %290, %cst_280 {dimension_numbers = #tpu.dot_dimension_numbers<[1], [0], [0], [1], [0, 0, 1, 1], [], []>} : vector<32x32xbf16>, vector<32x64xbf16>, vector<32x64xf32> -> vector<32x64xf32>
    %292 = arith.addf %284, %291 : vector<32x64xf32>
    %c0_281 = arith.constant 0 : index
    %c5_282 = arith.constant 5 : index
    %c0_283 = arith.constant 0 : index
    %c0_284 = arith.constant 0 : index
    %293 = vector.load %arg12[%c0_281, %c5_282, %c0_283, %c0_284] : memref<3x9x64x64xbf16, #tpu.memory_space<vmem>>, vector<1x1x64x64xbf16>
    %294 = vector.shape_cast %293 : vector<1x1x64x64xbf16> to vector<64x64xbf16>
    %cst_285 = arith.constant dense<0.000000e+00> : vector<32x64xf32>
    %295 = tpu.matmul %251, %294, %cst_285 {dimension_numbers = #tpu.dot_dimension_numbers<[1], [0], [0], [1], [0, 0, 1, 1], [], []>} : vector<32x64xbf16>, vector<64x64xbf16>, vector<32x64xf32> -> vector<32x64xf32>
    %c5_286 = arith.constant 5 : index
    %c0_287 = arith.constant 0 : index
    %c0_288 = arith.constant 0 : index
    %296 = vector.load %arg5[%c5_286, %c0_287, %c0_288] : memref<9x32x32xbf16, #tpu.memory_space<vmem>>, vector<1x32x32xbf16>
    %297 = vector.shape_cast %296 : vector<1x32x32xbf16> to vector<32x32xbf16>
    %298 = arith.truncf %295 : vector<32x64xf32> to vector<32x64xbf16>
    %cst_289 = arith.constant dense<0.000000e+00> : vector<32x64xf32>
    %299 = tpu.matmul %297, %298, %cst_289 {dimension_numbers = #tpu.dot_dimension_numbers<[1], [0], [0], [1], [0, 0, 1, 1], [], []>} : vector<32x32xbf16>, vector<32x64xbf16>, vector<32x64xf32> -> vector<32x64xf32>
    %300 = arith.addf %292, %299 : vector<32x64xf32>
    %c0_290 = arith.constant 0 : index
    %c6_291 = arith.constant 6 : index
    %c0_292 = arith.constant 0 : index
    %c0_293 = arith.constant 0 : index
    %301 = vector.load %arg12[%c0_290, %c6_291, %c0_292, %c0_293] : memref<3x9x64x64xbf16, #tpu.memory_space<vmem>>, vector<1x1x64x64xbf16>
    %302 = vector.shape_cast %301 : vector<1x1x64x64xbf16> to vector<64x64xbf16>
    %cst_294 = arith.constant dense<0.000000e+00> : vector<32x64xf32>
    %303 = tpu.matmul %251, %302, %cst_294 {dimension_numbers = #tpu.dot_dimension_numbers<[1], [0], [0], [1], [0, 0, 1, 1], [], []>} : vector<32x64xbf16>, vector<64x64xbf16>, vector<32x64xf32> -> vector<32x64xf32>
    %c6_295 = arith.constant 6 : index
    %c0_296 = arith.constant 0 : index
    %c0_297 = arith.constant 0 : index
    %304 = vector.load %arg5[%c6_295, %c0_296, %c0_297] : memref<9x32x32xbf16, #tpu.memory_space<vmem>>, vector<1x32x32xbf16>
    %305 = vector.shape_cast %304 : vector<1x32x32xbf16> to vector<32x32xbf16>
    %306 = arith.truncf %303 : vector<32x64xf32> to vector<32x64xbf16>
    %cst_298 = arith.constant dense<0.000000e+00> : vector<32x64xf32>
    %307 = tpu.matmul %305, %306, %cst_298 {dimension_numbers = #tpu.dot_dimension_numbers<[1], [0], [0], [1], [0, 0, 1, 1], [], []>} : vector<32x32xbf16>, vector<32x64xbf16>, vector<32x64xf32> -> vector<32x64xf32>
    %308 = arith.addf %300, %307 : vector<32x64xf32>
    %c0_299 = arith.constant 0 : index
    %c7_300 = arith.constant 7 : index
    %c0_301 = arith.constant 0 : index
    %c0_302 = arith.constant 0 : index
    %309 = vector.load %arg12[%c0_299, %c7_300, %c0_301, %c0_302] : memref<3x9x64x64xbf16, #tpu.memory_space<vmem>>, vector<1x1x64x64xbf16>
    %310 = vector.shape_cast %309 : vector<1x1x64x64xbf16> to vector<64x64xbf16>
    %cst_303 = arith.constant dense<0.000000e+00> : vector<32x64xf32>
    %311 = tpu.matmul %251, %310, %cst_303 {dimension_numbers = #tpu.dot_dimension_numbers<[1], [0], [0], [1], [0, 0, 1, 1], [], []>} : vector<32x64xbf16>, vector<64x64xbf16>, vector<32x64xf32> -> vector<32x64xf32>
    %c7_304 = arith.constant 7 : index
    %c0_305 = arith.constant 0 : index
    %c0_306 = arith.constant 0 : index
    %312 = vector.load %arg5[%c7_304, %c0_305, %c0_306] : memref<9x32x32xbf16, #tpu.memory_space<vmem>>, vector<1x32x32xbf16>
    %313 = vector.shape_cast %312 : vector<1x32x32xbf16> to vector<32x32xbf16>
    %314 = arith.truncf %311 : vector<32x64xf32> to vector<32x64xbf16>
    %cst_307 = arith.constant dense<0.000000e+00> : vector<32x64xf32>
    %315 = tpu.matmul %313, %314, %cst_307 {dimension_numbers = #tpu.dot_dimension_numbers<[1], [0], [0], [1], [0, 0, 1, 1], [], []>} : vector<32x32xbf16>, vector<32x64xbf16>, vector<32x64xf32> -> vector<32x64xf32>
    %316 = arith.addf %308, %315 : vector<32x64xf32>
    %c0_308 = arith.constant 0 : index
    %c8_309 = arith.constant 8 : index
    %c0_310 = arith.constant 0 : index
    %c0_311 = arith.constant 0 : index
    %317 = vector.load %arg12[%c0_308, %c8_309, %c0_310, %c0_311] : memref<3x9x64x64xbf16, #tpu.memory_space<vmem>>, vector<1x1x64x64xbf16>
    %318 = vector.shape_cast %317 : vector<1x1x64x64xbf16> to vector<64x64xbf16>
    %cst_312 = arith.constant dense<0.000000e+00> : vector<32x64xf32>
    %319 = tpu.matmul %251, %318, %cst_312 {dimension_numbers = #tpu.dot_dimension_numbers<[1], [0], [0], [1], [0, 0, 1, 1], [], []>} : vector<32x64xbf16>, vector<64x64xbf16>, vector<32x64xf32> -> vector<32x64xf32>
    %c8_313 = arith.constant 8 : index
    %c0_314 = arith.constant 0 : index
    %c0_315 = arith.constant 0 : index
    %320 = vector.load %arg5[%c8_313, %c0_314, %c0_315] : memref<9x32x32xbf16, #tpu.memory_space<vmem>>, vector<1x32x32xbf16>
    %321 = vector.shape_cast %320 : vector<1x32x32xbf16> to vector<32x32xbf16>
    %322 = arith.truncf %319 : vector<32x64xf32> to vector<32x64xbf16>
    %cst_316 = arith.constant dense<0.000000e+00> : vector<32x64xf32>
    %323 = tpu.matmul %321, %322, %cst_316 {dimension_numbers = #tpu.dot_dimension_numbers<[1], [0], [0], [1], [0, 0, 1, 1], [], []>} : vector<32x32xbf16>, vector<32x64xbf16>, vector<32x64xf32> -> vector<32x64xf32>
    %324 = arith.addf %316, %323 : vector<32x64xf32>
    %325 = arith.addf %324, %170 : vector<32x64xf32>
    %cst_317 = arith.constant 0.000000e+00 : f32
    %326 = vector.broadcast %cst_317 : f32 to vector<32x64xf32>
    %327 = arith.maximumf %325, %326 : vector<32x64xf32>
    %c1_318 = arith.constant 1 : index
    %c0_319 = arith.constant 0 : index
    %c0_320 = arith.constant 0 : index
    %328 = vector.load %arg11[%c1_318, %c0_319, %c0_320] : memref<3x1x64xf32, #tpu.memory_space<vmem>>, vector<1x1x64xf32>
    %329 = vector.shape_cast %328 : vector<1x1x64xf32> to vector<1x64xf32>
    %330 = arith.truncf %327 : vector<32x64xf32> to vector<32x64xbf16>
    %c1_321 = arith.constant 1 : index
    %c0_322 = arith.constant 0 : index
    %c0_323 = arith.constant 0 : index
    %c0_324 = arith.constant 0 : index
    %331 = vector.load %arg10[%c1_321, %c0_322, %c0_323, %c0_324] : memref<3x9x64x64xbf16, #tpu.memory_space<vmem>>, vector<1x1x64x64xbf16>
    %332 = vector.shape_cast %331 : vector<1x1x64x64xbf16> to vector<64x64xbf16>
    %cst_325 = arith.constant dense<0.000000e+00> : vector<32x64xf32>
    %333 = tpu.matmul %330, %332, %cst_325 {dimension_numbers = #tpu.dot_dimension_numbers<[1], [0], [0], [1], [0, 0, 1, 1], [], []>} : vector<32x64xbf16>, vector<64x64xbf16>, vector<32x64xf32> -> vector<32x64xf32>
    %c0_326 = arith.constant 0 : index
    %c0_327 = arith.constant 0 : index
    %c0_328 = arith.constant 0 : index
    %334 = vector.load %arg5[%c0_326, %c0_327, %c0_328] : memref<9x32x32xbf16, #tpu.memory_space<vmem>>, vector<1x32x32xbf16>
    %335 = vector.shape_cast %334 : vector<1x32x32xbf16> to vector<32x32xbf16>
    %336 = arith.truncf %333 : vector<32x64xf32> to vector<32x64xbf16>
    %cst_329 = arith.constant dense<0.000000e+00> : vector<32x64xf32>
    %337 = tpu.matmul %335, %336, %cst_329 {dimension_numbers = #tpu.dot_dimension_numbers<[1], [0], [0], [1], [0, 0, 1, 1], [], []>} : vector<32x32xbf16>, vector<32x64xbf16>, vector<32x64xf32> -> vector<32x64xf32>
    %338 = vector.broadcast %329 : vector<1x64xf32> to vector<32x64xf32>
    %339 = arith.addf %338, %337 : vector<32x64xf32>
    %c1_330 = arith.constant 1 : index
    %c1_331 = arith.constant 1 : index
    %c0_332 = arith.constant 0 : index
    %c0_333 = arith.constant 0 : index
    %340 = vector.load %arg10[%c1_330, %c1_331, %c0_332, %c0_333] : memref<3x9x64x64xbf16, #tpu.memory_space<vmem>>, vector<1x1x64x64xbf16>
    %341 = vector.shape_cast %340 : vector<1x1x64x64xbf16> to vector<64x64xbf16>
    %cst_334 = arith.constant dense<0.000000e+00> : vector<32x64xf32>
    %342 = tpu.matmul %330, %341, %cst_334 {dimension_numbers = #tpu.dot_dimension_numbers<[1], [0], [0], [1], [0, 0, 1, 1], [], []>} : vector<32x64xbf16>, vector<64x64xbf16>, vector<32x64xf32> -> vector<32x64xf32>
    %c1_335 = arith.constant 1 : index
    %c0_336 = arith.constant 0 : index
    %c0_337 = arith.constant 0 : index
    %343 = vector.load %arg5[%c1_335, %c0_336, %c0_337] : memref<9x32x32xbf16, #tpu.memory_space<vmem>>, vector<1x32x32xbf16>
    %344 = vector.shape_cast %343 : vector<1x32x32xbf16> to vector<32x32xbf16>
    %345 = arith.truncf %342 : vector<32x64xf32> to vector<32x64xbf16>
    %cst_338 = arith.constant dense<0.000000e+00> : vector<32x64xf32>
    %346 = tpu.matmul %344, %345, %cst_338 {dimension_numbers = #tpu.dot_dimension_numbers<[1], [0], [0], [1], [0, 0, 1, 1], [], []>} : vector<32x32xbf16>, vector<32x64xbf16>, vector<32x64xf32> -> vector<32x64xf32>
    %347 = arith.addf %339, %346 : vector<32x64xf32>
    %c1_339 = arith.constant 1 : index
    %c2_340 = arith.constant 2 : index
    %c0_341 = arith.constant 0 : index
    %c0_342 = arith.constant 0 : index
    %348 = vector.load %arg10[%c1_339, %c2_340, %c0_341, %c0_342] : memref<3x9x64x64xbf16, #tpu.memory_space<vmem>>, vector<1x1x64x64xbf16>
    %349 = vector.shape_cast %348 : vector<1x1x64x64xbf16> to vector<64x64xbf16>
    %cst_343 = arith.constant dense<0.000000e+00> : vector<32x64xf32>
    %350 = tpu.matmul %330, %349, %cst_343 {dimension_numbers = #tpu.dot_dimension_numbers<[1], [0], [0], [1], [0, 0, 1, 1], [], []>} : vector<32x64xbf16>, vector<64x64xbf16>, vector<32x64xf32> -> vector<32x64xf32>
    %c2_344 = arith.constant 2 : index
    %c0_345 = arith.constant 0 : index
    %c0_346 = arith.constant 0 : index
    %351 = vector.load %arg5[%c2_344, %c0_345, %c0_346] : memref<9x32x32xbf16, #tpu.memory_space<vmem>>, vector<1x32x32xbf16>
    %352 = vector.shape_cast %351 : vector<1x32x32xbf16> to vector<32x32xbf16>
    %353 = arith.truncf %350 : vector<32x64xf32> to vector<32x64xbf16>
    %cst_347 = arith.constant dense<0.000000e+00> : vector<32x64xf32>
    %354 = tpu.matmul %352, %353, %cst_347 {dimension_numbers = #tpu.dot_dimension_numbers<[1], [0], [0], [1], [0, 0, 1, 1], [], []>} : vector<32x32xbf16>, vector<32x64xbf16>, vector<32x64xf32> -> vector<32x64xf32>
    %355 = arith.addf %347, %354 : vector<32x64xf32>
    %c1_348 = arith.constant 1 : index
    %c3_349 = arith.constant 3 : index
    %c0_350 = arith.constant 0 : index
    %c0_351 = arith.constant 0 : index
    %356 = vector.load %arg10[%c1_348, %c3_349, %c0_350, %c0_351] : memref<3x9x64x64xbf16, #tpu.memory_space<vmem>>, vector<1x1x64x64xbf16>
    %357 = vector.shape_cast %356 : vector<1x1x64x64xbf16> to vector<64x64xbf16>
    %cst_352 = arith.constant dense<0.000000e+00> : vector<32x64xf32>
    %358 = tpu.matmul %330, %357, %cst_352 {dimension_numbers = #tpu.dot_dimension_numbers<[1], [0], [0], [1], [0, 0, 1, 1], [], []>} : vector<32x64xbf16>, vector<64x64xbf16>, vector<32x64xf32> -> vector<32x64xf32>
    %c3_353 = arith.constant 3 : index
    %c0_354 = arith.constant 0 : index
    %c0_355 = arith.constant 0 : index
    %359 = vector.load %arg5[%c3_353, %c0_354, %c0_355] : memref<9x32x32xbf16, #tpu.memory_space<vmem>>, vector<1x32x32xbf16>
    %360 = vector.shape_cast %359 : vector<1x32x32xbf16> to vector<32x32xbf16>
    %361 = arith.truncf %358 : vector<32x64xf32> to vector<32x64xbf16>
    %cst_356 = arith.constant dense<0.000000e+00> : vector<32x64xf32>
    %362 = tpu.matmul %360, %361, %cst_356 {dimension_numbers = #tpu.dot_dimension_numbers<[1], [0], [0], [1], [0, 0, 1, 1], [], []>} : vector<32x32xbf16>, vector<32x64xbf16>, vector<32x64xf32> -> vector<32x64xf32>
    %363 = arith.addf %355, %362 : vector<32x64xf32>
    %c1_357 = arith.constant 1 : index
    %c4_358 = arith.constant 4 : index
    %c0_359 = arith.constant 0 : index
    %c0_360 = arith.constant 0 : index
    %364 = vector.load %arg10[%c1_357, %c4_358, %c0_359, %c0_360] : memref<3x9x64x64xbf16, #tpu.memory_space<vmem>>, vector<1x1x64x64xbf16>
    %365 = vector.shape_cast %364 : vector<1x1x64x64xbf16> to vector<64x64xbf16>
    %cst_361 = arith.constant dense<0.000000e+00> : vector<32x64xf32>
    %366 = tpu.matmul %330, %365, %cst_361 {dimension_numbers = #tpu.dot_dimension_numbers<[1], [0], [0], [1], [0, 0, 1, 1], [], []>} : vector<32x64xbf16>, vector<64x64xbf16>, vector<32x64xf32> -> vector<32x64xf32>
    %c4_362 = arith.constant 4 : index
    %c0_363 = arith.constant 0 : index
    %c0_364 = arith.constant 0 : index
    %367 = vector.load %arg5[%c4_362, %c0_363, %c0_364] : memref<9x32x32xbf16, #tpu.memory_space<vmem>>, vector<1x32x32xbf16>
    %368 = vector.shape_cast %367 : vector<1x32x32xbf16> to vector<32x32xbf16>
    %369 = arith.truncf %366 : vector<32x64xf32> to vector<32x64xbf16>
    %cst_365 = arith.constant dense<0.000000e+00> : vector<32x64xf32>
    %370 = tpu.matmul %368, %369, %cst_365 {dimension_numbers = #tpu.dot_dimension_numbers<[1], [0], [0], [1], [0, 0, 1, 1], [], []>} : vector<32x32xbf16>, vector<32x64xbf16>, vector<32x64xf32> -> vector<32x64xf32>
    %371 = arith.addf %363, %370 : vector<32x64xf32>
    %c1_366 = arith.constant 1 : index
    %c5_367 = arith.constant 5 : index
    %c0_368 = arith.constant 0 : index
    %c0_369 = arith.constant 0 : index
    %372 = vector.load %arg10[%c1_366, %c5_367, %c0_368, %c0_369] : memref<3x9x64x64xbf16, #tpu.memory_space<vmem>>, vector<1x1x64x64xbf16>
    %373 = vector.shape_cast %372 : vector<1x1x64x64xbf16> to vector<64x64xbf16>
    %cst_370 = arith.constant dense<0.000000e+00> : vector<32x64xf32>
    %374 = tpu.matmul %330, %373, %cst_370 {dimension_numbers = #tpu.dot_dimension_numbers<[1], [0], [0], [1], [0, 0, 1, 1], [], []>} : vector<32x64xbf16>, vector<64x64xbf16>, vector<32x64xf32> -> vector<32x64xf32>
    %c5_371 = arith.constant 5 : index
    %c0_372 = arith.constant 0 : index
    %c0_373 = arith.constant 0 : index
    %375 = vector.load %arg5[%c5_371, %c0_372, %c0_373] : memref<9x32x32xbf16, #tpu.memory_space<vmem>>, vector<1x32x32xbf16>
    %376 = vector.shape_cast %375 : vector<1x32x32xbf16> to vector<32x32xbf16>
    %377 = arith.truncf %374 : vector<32x64xf32> to vector<32x64xbf16>
    %cst_374 = arith.constant dense<0.000000e+00> : vector<32x64xf32>
    %378 = tpu.matmul %376, %377, %cst_374 {dimension_numbers = #tpu.dot_dimension_numbers<[1], [0], [0], [1], [0, 0, 1, 1], [], []>} : vector<32x32xbf16>, vector<32x64xbf16>, vector<32x64xf32> -> vector<32x64xf32>
    %379 = arith.addf %371, %378 : vector<32x64xf32>
    %c1_375 = arith.constant 1 : index
    %c6_376 = arith.constant 6 : index
    %c0_377 = arith.constant 0 : index
    %c0_378 = arith.constant 0 : index
    %380 = vector.load %arg10[%c1_375, %c6_376, %c0_377, %c0_378] : memref<3x9x64x64xbf16, #tpu.memory_space<vmem>>, vector<1x1x64x64xbf16>
    %381 = vector.shape_cast %380 : vector<1x1x64x64xbf16> to vector<64x64xbf16>
    %cst_379 = arith.constant dense<0.000000e+00> : vector<32x64xf32>
    %382 = tpu.matmul %330, %381, %cst_379 {dimension_numbers = #tpu.dot_dimension_numbers<[1], [0], [0], [1], [0, 0, 1, 1], [], []>} : vector<32x64xbf16>, vector<64x64xbf16>, vector<32x64xf32> -> vector<32x64xf32>
    %c6_380 = arith.constant 6 : index
    %c0_381 = arith.constant 0 : index
    %c0_382 = arith.constant 0 : index
    %383 = vector.load %arg5[%c6_380, %c0_381, %c0_382] : memref<9x32x32xbf16, #tpu.memory_space<vmem>>, vector<1x32x32xbf16>
    %384 = vector.shape_cast %383 : vector<1x32x32xbf16> to vector<32x32xbf16>
    %385 = arith.truncf %382 : vector<32x64xf32> to vector<32x64xbf16>
    %cst_383 = arith.constant dense<0.000000e+00> : vector<32x64xf32>
    %386 = tpu.matmul %384, %385, %cst_383 {dimension_numbers = #tpu.dot_dimension_numbers<[1], [0], [0], [1], [0, 0, 1, 1], [], []>} : vector<32x32xbf16>, vector<32x64xbf16>, vector<32x64xf32> -> vector<32x64xf32>
    %387 = arith.addf %379, %386 : vector<32x64xf32>
    %c1_384 = arith.constant 1 : index
    %c7_385 = arith.constant 7 : index
    %c0_386 = arith.constant 0 : index
    %c0_387 = arith.constant 0 : index
    %388 = vector.load %arg10[%c1_384, %c7_385, %c0_386, %c0_387] : memref<3x9x64x64xbf16, #tpu.memory_space<vmem>>, vector<1x1x64x64xbf16>
    %389 = vector.shape_cast %388 : vector<1x1x64x64xbf16> to vector<64x64xbf16>
    %cst_388 = arith.constant dense<0.000000e+00> : vector<32x64xf32>
    %390 = tpu.matmul %330, %389, %cst_388 {dimension_numbers = #tpu.dot_dimension_numbers<[1], [0], [0], [1], [0, 0, 1, 1], [], []>} : vector<32x64xbf16>, vector<64x64xbf16>, vector<32x64xf32> -> vector<32x64xf32>
    %c7_389 = arith.constant 7 : index
    %c0_390 = arith.constant 0 : index
    %c0_391 = arith.constant 0 : index
    %391 = vector.load %arg5[%c7_389, %c0_390, %c0_391] : memref<9x32x32xbf16, #tpu.memory_space<vmem>>, vector<1x32x32xbf16>
    %392 = vector.shape_cast %391 : vector<1x32x32xbf16> to vector<32x32xbf16>
    %393 = arith.truncf %390 : vector<32x64xf32> to vector<32x64xbf16>
    %cst_392 = arith.constant dense<0.000000e+00> : vector<32x64xf32>
    %394 = tpu.matmul %392, %393, %cst_392 {dimension_numbers = #tpu.dot_dimension_numbers<[1], [0], [0], [1], [0, 0, 1, 1], [], []>} : vector<32x32xbf16>, vector<32x64xbf16>, vector<32x64xf32> -> vector<32x64xf32>
    %395 = arith.addf %387, %394 : vector<32x64xf32>
    %c1_393 = arith.constant 1 : index
    %c8_394 = arith.constant 8 : index
    %c0_395 = arith.constant 0 : index
    %c0_396 = arith.constant 0 : index
    %396 = vector.load %arg10[%c1_393, %c8_394, %c0_395, %c0_396] : memref<3x9x64x64xbf16, #tpu.memory_space<vmem>>, vector<1x1x64x64xbf16>
    %397 = vector.shape_cast %396 : vector<1x1x64x64xbf16> to vector<64x64xbf16>
    %cst_397 = arith.constant dense<0.000000e+00> : vector<32x64xf32>
    %398 = tpu.matmul %330, %397, %cst_397 {dimension_numbers = #tpu.dot_dimension_numbers<[1], [0], [0], [1], [0, 0, 1, 1], [], []>} : vector<32x64xbf16>, vector<64x64xbf16>, vector<32x64xf32> -> vector<32x64xf32>
    %c8_398 = arith.constant 8 : index
    %c0_399 = arith.constant 0 : index
    %c0_400 = arith.constant 0 : index
    %399 = vector.load %arg5[%c8_398, %c0_399, %c0_400] : memref<9x32x32xbf16, #tpu.memory_space<vmem>>, vector<1x32x32xbf16>
    %400 = vector.shape_cast %399 : vector<1x32x32xbf16> to vector<32x32xbf16>
    %401 = arith.truncf %398 : vector<32x64xf32> to vector<32x64xbf16>
    %cst_401 = arith.constant dense<0.000000e+00> : vector<32x64xf32>
    %402 = tpu.matmul %400, %401, %cst_401 {dimension_numbers = #tpu.dot_dimension_numbers<[1], [0], [0], [1], [0, 0, 1, 1], [], []>} : vector<32x32xbf16>, vector<32x64xbf16>, vector<32x64xf32> -> vector<32x64xf32>
    %403 = arith.addf %395, %402 : vector<32x64xf32>
    %cst_402 = arith.constant 0.000000e+00 : f32
    %404 = vector.broadcast %cst_402 : f32 to vector<32x64xf32>
    %405 = arith.maximumf %403, %404 : vector<32x64xf32>
    %c1_403 = arith.constant 1 : index
    %c0_404 = arith.constant 0 : index
    %c0_405 = arith.constant 0 : index
    %406 = vector.load %arg13[%c1_403, %c0_404, %c0_405] : memref<3x1x64xf32, #tpu.memory_space<vmem>>, vector<1x1x64xf32>
    %407 = vector.shape_cast %406 : vector<1x1x64xf32> to vector<1x64xf32>
    %408 = arith.truncf %405 : vector<32x64xf32> to vector<32x64xbf16>
    %c1_406 = arith.constant 1 : index
    %c0_407 = arith.constant 0 : index
    %c0_408 = arith.constant 0 : index
    %c0_409 = arith.constant 0 : index
    %409 = vector.load %arg12[%c1_406, %c0_407, %c0_408, %c0_409] : memref<3x9x64x64xbf16, #tpu.memory_space<vmem>>, vector<1x1x64x64xbf16>
    %410 = vector.shape_cast %409 : vector<1x1x64x64xbf16> to vector<64x64xbf16>
    %cst_410 = arith.constant dense<0.000000e+00> : vector<32x64xf32>
    %411 = tpu.matmul %408, %410, %cst_410 {dimension_numbers = #tpu.dot_dimension_numbers<[1], [0], [0], [1], [0, 0, 1, 1], [], []>} : vector<32x64xbf16>, vector<64x64xbf16>, vector<32x64xf32> -> vector<32x64xf32>
    %c0_411 = arith.constant 0 : index
    %c0_412 = arith.constant 0 : index
    %c0_413 = arith.constant 0 : index
    %412 = vector.load %arg5[%c0_411, %c0_412, %c0_413] : memref<9x32x32xbf16, #tpu.memory_space<vmem>>, vector<1x32x32xbf16>
    %413 = vector.shape_cast %412 : vector<1x32x32xbf16> to vector<32x32xbf16>
    %414 = arith.truncf %411 : vector<32x64xf32> to vector<32x64xbf16>
    %cst_414 = arith.constant dense<0.000000e+00> : vector<32x64xf32>
    %415 = tpu.matmul %413, %414, %cst_414 {dimension_numbers = #tpu.dot_dimension_numbers<[1], [0], [0], [1], [0, 0, 1, 1], [], []>} : vector<32x32xbf16>, vector<32x64xbf16>, vector<32x64xf32> -> vector<32x64xf32>
    %416 = vector.broadcast %407 : vector<1x64xf32> to vector<32x64xf32>
    %417 = arith.addf %416, %415 : vector<32x64xf32>
    %c1_415 = arith.constant 1 : index
    %c1_416 = arith.constant 1 : index
    %c0_417 = arith.constant 0 : index
    %c0_418 = arith.constant 0 : index
    %418 = vector.load %arg12[%c1_415, %c1_416, %c0_417, %c0_418] : memref<3x9x64x64xbf16, #tpu.memory_space<vmem>>, vector<1x1x64x64xbf16>
    %419 = vector.shape_cast %418 : vector<1x1x64x64xbf16> to vector<64x64xbf16>
    %cst_419 = arith.constant dense<0.000000e+00> : vector<32x64xf32>
    %420 = tpu.matmul %408, %419, %cst_419 {dimension_numbers = #tpu.dot_dimension_numbers<[1], [0], [0], [1], [0, 0, 1, 1], [], []>} : vector<32x64xbf16>, vector<64x64xbf16>, vector<32x64xf32> -> vector<32x64xf32>
    %c1_420 = arith.constant 1 : index
    %c0_421 = arith.constant 0 : index
    %c0_422 = arith.constant 0 : index
    %421 = vector.load %arg5[%c1_420, %c0_421, %c0_422] : memref<9x32x32xbf16, #tpu.memory_space<vmem>>, vector<1x32x32xbf16>
    %422 = vector.shape_cast %421 : vector<1x32x32xbf16> to vector<32x32xbf16>
    %423 = arith.truncf %420 : vector<32x64xf32> to vector<32x64xbf16>
    %cst_423 = arith.constant dense<0.000000e+00> : vector<32x64xf32>
    %424 = tpu.matmul %422, %423, %cst_423 {dimension_numbers = #tpu.dot_dimension_numbers<[1], [0], [0], [1], [0, 0, 1, 1], [], []>} : vector<32x32xbf16>, vector<32x64xbf16>, vector<32x64xf32> -> vector<32x64xf32>
    %425 = arith.addf %417, %424 : vector<32x64xf32>
    %c1_424 = arith.constant 1 : index
    %c2_425 = arith.constant 2 : index
    %c0_426 = arith.constant 0 : index
    %c0_427 = arith.constant 0 : index
    %426 = vector.load %arg12[%c1_424, %c2_425, %c0_426, %c0_427] : memref<3x9x64x64xbf16, #tpu.memory_space<vmem>>, vector<1x1x64x64xbf16>
    %427 = vector.shape_cast %426 : vector<1x1x64x64xbf16> to vector<64x64xbf16>
    %cst_428 = arith.constant dense<0.000000e+00> : vector<32x64xf32>
    %428 = tpu.matmul %408, %427, %cst_428 {dimension_numbers = #tpu.dot_dimension_numbers<[1], [0], [0], [1], [0, 0, 1, 1], [], []>} : vector<32x64xbf16>, vector<64x64xbf16>, vector<32x64xf32> -> vector<32x64xf32>
    %c2_429 = arith.constant 2 : index
    %c0_430 = arith.constant 0 : index
    %c0_431 = arith.constant 0 : index
    %429 = vector.load %arg5[%c2_429, %c0_430, %c0_431] : memref<9x32x32xbf16, #tpu.memory_space<vmem>>, vector<1x32x32xbf16>
    %430 = vector.shape_cast %429 : vector<1x32x32xbf16> to vector<32x32xbf16>
    %431 = arith.truncf %428 : vector<32x64xf32> to vector<32x64xbf16>
    %cst_432 = arith.constant dense<0.000000e+00> : vector<32x64xf32>
    %432 = tpu.matmul %430, %431, %cst_432 {dimension_numbers = #tpu.dot_dimension_numbers<[1], [0], [0], [1], [0, 0, 1, 1], [], []>} : vector<32x32xbf16>, vector<32x64xbf16>, vector<32x64xf32> -> vector<32x64xf32>
    %433 = arith.addf %425, %432 : vector<32x64xf32>
    %c1_433 = arith.constant 1 : index
    %c3_434 = arith.constant 3 : index
    %c0_435 = arith.constant 0 : index
    %c0_436 = arith.constant 0 : index
    %434 = vector.load %arg12[%c1_433, %c3_434, %c0_435, %c0_436] : memref<3x9x64x64xbf16, #tpu.memory_space<vmem>>, vector<1x1x64x64xbf16>
    %435 = vector.shape_cast %434 : vector<1x1x64x64xbf16> to vector<64x64xbf16>
    %cst_437 = arith.constant dense<0.000000e+00> : vector<32x64xf32>
    %436 = tpu.matmul %408, %435, %cst_437 {dimension_numbers = #tpu.dot_dimension_numbers<[1], [0], [0], [1], [0, 0, 1, 1], [], []>} : vector<32x64xbf16>, vector<64x64xbf16>, vector<32x64xf32> -> vector<32x64xf32>
    %c3_438 = arith.constant 3 : index
    %c0_439 = arith.constant 0 : index
    %c0_440 = arith.constant 0 : index
    %437 = vector.load %arg5[%c3_438, %c0_439, %c0_440] : memref<9x32x32xbf16, #tpu.memory_space<vmem>>, vector<1x32x32xbf16>
    %438 = vector.shape_cast %437 : vector<1x32x32xbf16> to vector<32x32xbf16>
    %439 = arith.truncf %436 : vector<32x64xf32> to vector<32x64xbf16>
    %cst_441 = arith.constant dense<0.000000e+00> : vector<32x64xf32>
    %440 = tpu.matmul %438, %439, %cst_441 {dimension_numbers = #tpu.dot_dimension_numbers<[1], [0], [0], [1], [0, 0, 1, 1], [], []>} : vector<32x32xbf16>, vector<32x64xbf16>, vector<32x64xf32> -> vector<32x64xf32>
    %441 = arith.addf %433, %440 : vector<32x64xf32>
    %c1_442 = arith.constant 1 : index
    %c4_443 = arith.constant 4 : index
    %c0_444 = arith.constant 0 : index
    %c0_445 = arith.constant 0 : index
    %442 = vector.load %arg12[%c1_442, %c4_443, %c0_444, %c0_445] : memref<3x9x64x64xbf16, #tpu.memory_space<vmem>>, vector<1x1x64x64xbf16>
    %443 = vector.shape_cast %442 : vector<1x1x64x64xbf16> to vector<64x64xbf16>
    %cst_446 = arith.constant dense<0.000000e+00> : vector<32x64xf32>
    %444 = tpu.matmul %408, %443, %cst_446 {dimension_numbers = #tpu.dot_dimension_numbers<[1], [0], [0], [1], [0, 0, 1, 1], [], []>} : vector<32x64xbf16>, vector<64x64xbf16>, vector<32x64xf32> -> vector<32x64xf32>
    %c4_447 = arith.constant 4 : index
    %c0_448 = arith.constant 0 : index
    %c0_449 = arith.constant 0 : index
    %445 = vector.load %arg5[%c4_447, %c0_448, %c0_449] : memref<9x32x32xbf16, #tpu.memory_space<vmem>>, vector<1x32x32xbf16>
    %446 = vector.shape_cast %445 : vector<1x32x32xbf16> to vector<32x32xbf16>
    %447 = arith.truncf %444 : vector<32x64xf32> to vector<32x64xbf16>
    %cst_450 = arith.constant dense<0.000000e+00> : vector<32x64xf32>
    %448 = tpu.matmul %446, %447, %cst_450 {dimension_numbers = #tpu.dot_dimension_numbers<[1], [0], [0], [1], [0, 0, 1, 1], [], []>} : vector<32x32xbf16>, vector<32x64xbf16>, vector<32x64xf32> -> vector<32x64xf32>
    %449 = arith.addf %441, %448 : vector<32x64xf32>
    %c1_451 = arith.constant 1 : index
    %c5_452 = arith.constant 5 : index
    %c0_453 = arith.constant 0 : index
    %c0_454 = arith.constant 0 : index
    %450 = vector.load %arg12[%c1_451, %c5_452, %c0_453, %c0_454] : memref<3x9x64x64xbf16, #tpu.memory_space<vmem>>, vector<1x1x64x64xbf16>
    %451 = vector.shape_cast %450 : vector<1x1x64x64xbf16> to vector<64x64xbf16>
    %cst_455 = arith.constant dense<0.000000e+00> : vector<32x64xf32>
    %452 = tpu.matmul %408, %451, %cst_455 {dimension_numbers = #tpu.dot_dimension_numbers<[1], [0], [0], [1], [0, 0, 1, 1], [], []>} : vector<32x64xbf16>, vector<64x64xbf16>, vector<32x64xf32> -> vector<32x64xf32>
    %c5_456 = arith.constant 5 : index
    %c0_457 = arith.constant 0 : index
    %c0_458 = arith.constant 0 : index
    %453 = vector.load %arg5[%c5_456, %c0_457, %c0_458] : memref<9x32x32xbf16, #tpu.memory_space<vmem>>, vector<1x32x32xbf16>
    %454 = vector.shape_cast %453 : vector<1x32x32xbf16> to vector<32x32xbf16>
    %455 = arith.truncf %452 : vector<32x64xf32> to vector<32x64xbf16>
    %cst_459 = arith.constant dense<0.000000e+00> : vector<32x64xf32>
    %456 = tpu.matmul %454, %455, %cst_459 {dimension_numbers = #tpu.dot_dimension_numbers<[1], [0], [0], [1], [0, 0, 1, 1], [], []>} : vector<32x32xbf16>, vector<32x64xbf16>, vector<32x64xf32> -> vector<32x64xf32>
    %457 = arith.addf %449, %456 : vector<32x64xf32>
    %c1_460 = arith.constant 1 : index
    %c6_461 = arith.constant 6 : index
    %c0_462 = arith.constant 0 : index
    %c0_463 = arith.constant 0 : index
    %458 = vector.load %arg12[%c1_460, %c6_461, %c0_462, %c0_463] : memref<3x9x64x64xbf16, #tpu.memory_space<vmem>>, vector<1x1x64x64xbf16>
    %459 = vector.shape_cast %458 : vector<1x1x64x64xbf16> to vector<64x64xbf16>
    %cst_464 = arith.constant dense<0.000000e+00> : vector<32x64xf32>
    %460 = tpu.matmul %408, %459, %cst_464 {dimension_numbers = #tpu.dot_dimension_numbers<[1], [0], [0], [1], [0, 0, 1, 1], [], []>} : vector<32x64xbf16>, vector<64x64xbf16>, vector<32x64xf32> -> vector<32x64xf32>
    %c6_465 = arith.constant 6 : index
    %c0_466 = arith.constant 0 : index
    %c0_467 = arith.constant 0 : index
    %461 = vector.load %arg5[%c6_465, %c0_466, %c0_467] : memref<9x32x32xbf16, #tpu.memory_space<vmem>>, vector<1x32x32xbf16>
    %462 = vector.shape_cast %461 : vector<1x32x32xbf16> to vector<32x32xbf16>
    %463 = arith.truncf %460 : vector<32x64xf32> to vector<32x64xbf16>
    %cst_468 = arith.constant dense<0.000000e+00> : vector<32x64xf32>
    %464 = tpu.matmul %462, %463, %cst_468 {dimension_numbers = #tpu.dot_dimension_numbers<[1], [0], [0], [1], [0, 0, 1, 1], [], []>} : vector<32x32xbf16>, vector<32x64xbf16>, vector<32x64xf32> -> vector<32x64xf32>
    %465 = arith.addf %457, %464 : vector<32x64xf32>
    %c1_469 = arith.constant 1 : index
    %c7_470 = arith.constant 7 : index
    %c0_471 = arith.constant 0 : index
    %c0_472 = arith.constant 0 : index
    %466 = vector.load %arg12[%c1_469, %c7_470, %c0_471, %c0_472] : memref<3x9x64x64xbf16, #tpu.memory_space<vmem>>, vector<1x1x64x64xbf16>
    %467 = vector.shape_cast %466 : vector<1x1x64x64xbf16> to vector<64x64xbf16>
    %cst_473 = arith.constant dense<0.000000e+00> : vector<32x64xf32>
    %468 = tpu.matmul %408, %467, %cst_473 {dimension_numbers = #tpu.dot_dimension_numbers<[1], [0], [0], [1], [0, 0, 1, 1], [], []>} : vector<32x64xbf16>, vector<64x64xbf16>, vector<32x64xf32> -> vector<32x64xf32>
    %c7_474 = arith.constant 7 : index
    %c0_475 = arith.constant 0 : index
    %c0_476 = arith.constant 0 : index
    %469 = vector.load %arg5[%c7_474, %c0_475, %c0_476] : memref<9x32x32xbf16, #tpu.memory_space<vmem>>, vector<1x32x32xbf16>
    %470 = vector.shape_cast %469 : vector<1x32x32xbf16> to vector<32x32xbf16>
    %471 = arith.truncf %468 : vector<32x64xf32> to vector<32x64xbf16>
    %cst_477 = arith.constant dense<0.000000e+00> : vector<32x64xf32>
    %472 = tpu.matmul %470, %471, %cst_477 {dimension_numbers = #tpu.dot_dimension_numbers<[1], [0], [0], [1], [0, 0, 1, 1], [], []>} : vector<32x32xbf16>, vector<32x64xbf16>, vector<32x64xf32> -> vector<32x64xf32>
    %473 = arith.addf %465, %472 : vector<32x64xf32>
    %c1_478 = arith.constant 1 : index
    %c8_479 = arith.constant 8 : index
    %c0_480 = arith.constant 0 : index
    %c0_481 = arith.constant 0 : index
    %474 = vector.load %arg12[%c1_478, %c8_479, %c0_480, %c0_481] : memref<3x9x64x64xbf16, #tpu.memory_space<vmem>>, vector<1x1x64x64xbf16>
    %475 = vector.shape_cast %474 : vector<1x1x64x64xbf16> to vector<64x64xbf16>
    %cst_482 = arith.constant dense<0.000000e+00> : vector<32x64xf32>
    %476 = tpu.matmul %408, %475, %cst_482 {dimension_numbers = #tpu.dot_dimension_numbers<[1], [0], [0], [1], [0, 0, 1, 1], [], []>} : vector<32x64xbf16>, vector<64x64xbf16>, vector<32x64xf32> -> vector<32x64xf32>
    %c8_483 = arith.constant 8 : index
    %c0_484 = arith.constant 0 : index
    %c0_485 = arith.constant 0 : index
    %477 = vector.load %arg5[%c8_483, %c0_484, %c0_485] : memref<9x32x32xbf16, #tpu.memory_space<vmem>>, vector<1x32x32xbf16>
    %478 = vector.shape_cast %477 : vector<1x32x32xbf16> to vector<32x32xbf16>
    %479 = arith.truncf %476 : vector<32x64xf32> to vector<32x64xbf16>
    %cst_486 = arith.constant dense<0.000000e+00> : vector<32x64xf32>
    %480 = tpu.matmul %478, %479, %cst_486 {dimension_numbers = #tpu.dot_dimension_numbers<[1], [0], [0], [1], [0, 0, 1, 1], [], []>} : vector<32x32xbf16>, vector<32x64xbf16>, vector<32x64xf32> -> vector<32x64xf32>
    %481 = arith.addf %473, %480 : vector<32x64xf32>
    %482 = arith.addf %481, %327 : vector<32x64xf32>
    %cst_487 = arith.constant 0.000000e+00 : f32
    %483 = vector.broadcast %cst_487 : f32 to vector<32x64xf32>
    %484 = arith.maximumf %482, %483 : vector<32x64xf32>
    %c2_488 = arith.constant 2 : index
    %c0_489 = arith.constant 0 : index
    %c0_490 = arith.constant 0 : index
    %485 = vector.load %arg11[%c2_488, %c0_489, %c0_490] : memref<3x1x64xf32, #tpu.memory_space<vmem>>, vector<1x1x64xf32>
    %486 = vector.shape_cast %485 : vector<1x1x64xf32> to vector<1x64xf32>
    %487 = arith.truncf %484 : vector<32x64xf32> to vector<32x64xbf16>
    %c2_491 = arith.constant 2 : index
    %c0_492 = arith.constant 0 : index
    %c0_493 = arith.constant 0 : index
    %c0_494 = arith.constant 0 : index
    %488 = vector.load %arg10[%c2_491, %c0_492, %c0_493, %c0_494] : memref<3x9x64x64xbf16, #tpu.memory_space<vmem>>, vector<1x1x64x64xbf16>
    %489 = vector.shape_cast %488 : vector<1x1x64x64xbf16> to vector<64x64xbf16>
    %cst_495 = arith.constant dense<0.000000e+00> : vector<32x64xf32>
    %490 = tpu.matmul %487, %489, %cst_495 {dimension_numbers = #tpu.dot_dimension_numbers<[1], [0], [0], [1], [0, 0, 1, 1], [], []>} : vector<32x64xbf16>, vector<64x64xbf16>, vector<32x64xf32> -> vector<32x64xf32>
    %c0_496 = arith.constant 0 : index
    %c0_497 = arith.constant 0 : index
    %c0_498 = arith.constant 0 : index
    %491 = vector.load %arg5[%c0_496, %c0_497, %c0_498] : memref<9x32x32xbf16, #tpu.memory_space<vmem>>, vector<1x32x32xbf16>
    %492 = vector.shape_cast %491 : vector<1x32x32xbf16> to vector<32x32xbf16>
    %493 = arith.truncf %490 : vector<32x64xf32> to vector<32x64xbf16>
    %cst_499 = arith.constant dense<0.000000e+00> : vector<32x64xf32>
    %494 = tpu.matmul %492, %493, %cst_499 {dimension_numbers = #tpu.dot_dimension_numbers<[1], [0], [0], [1], [0, 0, 1, 1], [], []>} : vector<32x32xbf16>, vector<32x64xbf16>, vector<32x64xf32> -> vector<32x64xf32>
    %495 = vector.broadcast %486 : vector<1x64xf32> to vector<32x64xf32>
    %496 = arith.addf %495, %494 : vector<32x64xf32>
    %c2_500 = arith.constant 2 : index
    %c1_501 = arith.constant 1 : index
    %c0_502 = arith.constant 0 : index
    %c0_503 = arith.constant 0 : index
    %497 = vector.load %arg10[%c2_500, %c1_501, %c0_502, %c0_503] : memref<3x9x64x64xbf16, #tpu.memory_space<vmem>>, vector<1x1x64x64xbf16>
    %498 = vector.shape_cast %497 : vector<1x1x64x64xbf16> to vector<64x64xbf16>
    %cst_504 = arith.constant dense<0.000000e+00> : vector<32x64xf32>
    %499 = tpu.matmul %487, %498, %cst_504 {dimension_numbers = #tpu.dot_dimension_numbers<[1], [0], [0], [1], [0, 0, 1, 1], [], []>} : vector<32x64xbf16>, vector<64x64xbf16>, vector<32x64xf32> -> vector<32x64xf32>
    %c1_505 = arith.constant 1 : index
    %c0_506 = arith.constant 0 : index
    %c0_507 = arith.constant 0 : index
    %500 = vector.load %arg5[%c1_505, %c0_506, %c0_507] : memref<9x32x32xbf16, #tpu.memory_space<vmem>>, vector<1x32x32xbf16>
    %501 = vector.shape_cast %500 : vector<1x32x32xbf16> to vector<32x32xbf16>
    %502 = arith.truncf %499 : vector<32x64xf32> to vector<32x64xbf16>
    %cst_508 = arith.constant dense<0.000000e+00> : vector<32x64xf32>
    %503 = tpu.matmul %501, %502, %cst_508 {dimension_numbers = #tpu.dot_dimension_numbers<[1], [0], [0], [1], [0, 0, 1, 1], [], []>} : vector<32x32xbf16>, vector<32x64xbf16>, vector<32x64xf32> -> vector<32x64xf32>
    %504 = arith.addf %496, %503 : vector<32x64xf32>
    %c2_509 = arith.constant 2 : index
    %c2_510 = arith.constant 2 : index
    %c0_511 = arith.constant 0 : index
    %c0_512 = arith.constant 0 : index
    %505 = vector.load %arg10[%c2_509, %c2_510, %c0_511, %c0_512] : memref<3x9x64x64xbf16, #tpu.memory_space<vmem>>, vector<1x1x64x64xbf16>
    %506 = vector.shape_cast %505 : vector<1x1x64x64xbf16> to vector<64x64xbf16>
    %cst_513 = arith.constant dense<0.000000e+00> : vector<32x64xf32>
    %507 = tpu.matmul %487, %506, %cst_513 {dimension_numbers = #tpu.dot_dimension_numbers<[1], [0], [0], [1], [0, 0, 1, 1], [], []>} : vector<32x64xbf16>, vector<64x64xbf16>, vector<32x64xf32> -> vector<32x64xf32>
    %c2_514 = arith.constant 2 : index
    %c0_515 = arith.constant 0 : index
    %c0_516 = arith.constant 0 : index
    %508 = vector.load %arg5[%c2_514, %c0_515, %c0_516] : memref<9x32x32xbf16, #tpu.memory_space<vmem>>, vector<1x32x32xbf16>
    %509 = vector.shape_cast %508 : vector<1x32x32xbf16> to vector<32x32xbf16>
    %510 = arith.truncf %507 : vector<32x64xf32> to vector<32x64xbf16>
    %cst_517 = arith.constant dense<0.000000e+00> : vector<32x64xf32>
    %511 = tpu.matmul %509, %510, %cst_517 {dimension_numbers = #tpu.dot_dimension_numbers<[1], [0], [0], [1], [0, 0, 1, 1], [], []>} : vector<32x32xbf16>, vector<32x64xbf16>, vector<32x64xf32> -> vector<32x64xf32>
    %512 = arith.addf %504, %511 : vector<32x64xf32>
    %c2_518 = arith.constant 2 : index
    %c3_519 = arith.constant 3 : index
    %c0_520 = arith.constant 0 : index
    %c0_521 = arith.constant 0 : index
    %513 = vector.load %arg10[%c2_518, %c3_519, %c0_520, %c0_521] : memref<3x9x64x64xbf16, #tpu.memory_space<vmem>>, vector<1x1x64x64xbf16>
    %514 = vector.shape_cast %513 : vector<1x1x64x64xbf16> to vector<64x64xbf16>
    %cst_522 = arith.constant dense<0.000000e+00> : vector<32x64xf32>
    %515 = tpu.matmul %487, %514, %cst_522 {dimension_numbers = #tpu.dot_dimension_numbers<[1], [0], [0], [1], [0, 0, 1, 1], [], []>} : vector<32x64xbf16>, vector<64x64xbf16>, vector<32x64xf32> -> vector<32x64xf32>
    %c3_523 = arith.constant 3 : index
    %c0_524 = arith.constant 0 : index
    %c0_525 = arith.constant 0 : index
    %516 = vector.load %arg5[%c3_523, %c0_524, %c0_525] : memref<9x32x32xbf16, #tpu.memory_space<vmem>>, vector<1x32x32xbf16>
    %517 = vector.shape_cast %516 : vector<1x32x32xbf16> to vector<32x32xbf16>
    %518 = arith.truncf %515 : vector<32x64xf32> to vector<32x64xbf16>
    %cst_526 = arith.constant dense<0.000000e+00> : vector<32x64xf32>
    %519 = tpu.matmul %517, %518, %cst_526 {dimension_numbers = #tpu.dot_dimension_numbers<[1], [0], [0], [1], [0, 0, 1, 1], [], []>} : vector<32x32xbf16>, vector<32x64xbf16>, vector<32x64xf32> -> vector<32x64xf32>
    %520 = arith.addf %512, %519 : vector<32x64xf32>
    %c2_527 = arith.constant 2 : index
    %c4_528 = arith.constant 4 : index
    %c0_529 = arith.constant 0 : index
    %c0_530 = arith.constant 0 : index
    %521 = vector.load %arg10[%c2_527, %c4_528, %c0_529, %c0_530] : memref<3x9x64x64xbf16, #tpu.memory_space<vmem>>, vector<1x1x64x64xbf16>
    %522 = vector.shape_cast %521 : vector<1x1x64x64xbf16> to vector<64x64xbf16>
    %cst_531 = arith.constant dense<0.000000e+00> : vector<32x64xf32>
    %523 = tpu.matmul %487, %522, %cst_531 {dimension_numbers = #tpu.dot_dimension_numbers<[1], [0], [0], [1], [0, 0, 1, 1], [], []>} : vector<32x64xbf16>, vector<64x64xbf16>, vector<32x64xf32> -> vector<32x64xf32>
    %c4_532 = arith.constant 4 : index
    %c0_533 = arith.constant 0 : index
    %c0_534 = arith.constant 0 : index
    %524 = vector.load %arg5[%c4_532, %c0_533, %c0_534] : memref<9x32x32xbf16, #tpu.memory_space<vmem>>, vector<1x32x32xbf16>
    %525 = vector.shape_cast %524 : vector<1x32x32xbf16> to vector<32x32xbf16>
    %526 = arith.truncf %523 : vector<32x64xf32> to vector<32x64xbf16>
    %cst_535 = arith.constant dense<0.000000e+00> : vector<32x64xf32>
    %527 = tpu.matmul %525, %526, %cst_535 {dimension_numbers = #tpu.dot_dimension_numbers<[1], [0], [0], [1], [0, 0, 1, 1], [], []>} : vector<32x32xbf16>, vector<32x64xbf16>, vector<32x64xf32> -> vector<32x64xf32>
    %528 = arith.addf %520, %527 : vector<32x64xf32>
    %c2_536 = arith.constant 2 : index
    %c5_537 = arith.constant 5 : index
    %c0_538 = arith.constant 0 : index
    %c0_539 = arith.constant 0 : index
    %529 = vector.load %arg10[%c2_536, %c5_537, %c0_538, %c0_539] : memref<3x9x64x64xbf16, #tpu.memory_space<vmem>>, vector<1x1x64x64xbf16>
    %530 = vector.shape_cast %529 : vector<1x1x64x64xbf16> to vector<64x64xbf16>
    %cst_540 = arith.constant dense<0.000000e+00> : vector<32x64xf32>
    %531 = tpu.matmul %487, %530, %cst_540 {dimension_numbers = #tpu.dot_dimension_numbers<[1], [0], [0], [1], [0, 0, 1, 1], [], []>} : vector<32x64xbf16>, vector<64x64xbf16>, vector<32x64xf32> -> vector<32x64xf32>
    %c5_541 = arith.constant 5 : index
    %c0_542 = arith.constant 0 : index
    %c0_543 = arith.constant 0 : index
    %532 = vector.load %arg5[%c5_541, %c0_542, %c0_543] : memref<9x32x32xbf16, #tpu.memory_space<vmem>>, vector<1x32x32xbf16>
    %533 = vector.shape_cast %532 : vector<1x32x32xbf16> to vector<32x32xbf16>
    %534 = arith.truncf %531 : vector<32x64xf32> to vector<32x64xbf16>
    %cst_544 = arith.constant dense<0.000000e+00> : vector<32x64xf32>
    %535 = tpu.matmul %533, %534, %cst_544 {dimension_numbers = #tpu.dot_dimension_numbers<[1], [0], [0], [1], [0, 0, 1, 1], [], []>} : vector<32x32xbf16>, vector<32x64xbf16>, vector<32x64xf32> -> vector<32x64xf32>
    %536 = arith.addf %528, %535 : vector<32x64xf32>
    %c2_545 = arith.constant 2 : index
    %c6_546 = arith.constant 6 : index
    %c0_547 = arith.constant 0 : index
    %c0_548 = arith.constant 0 : index
    %537 = vector.load %arg10[%c2_545, %c6_546, %c0_547, %c0_548] : memref<3x9x64x64xbf16, #tpu.memory_space<vmem>>, vector<1x1x64x64xbf16>
    %538 = vector.shape_cast %537 : vector<1x1x64x64xbf16> to vector<64x64xbf16>
    %cst_549 = arith.constant dense<0.000000e+00> : vector<32x64xf32>
    %539 = tpu.matmul %487, %538, %cst_549 {dimension_numbers = #tpu.dot_dimension_numbers<[1], [0], [0], [1], [0, 0, 1, 1], [], []>} : vector<32x64xbf16>, vector<64x64xbf16>, vector<32x64xf32> -> vector<32x64xf32>
    %c6_550 = arith.constant 6 : index
    %c0_551 = arith.constant 0 : index
    %c0_552 = arith.constant 0 : index
    %540 = vector.load %arg5[%c6_550, %c0_551, %c0_552] : memref<9x32x32xbf16, #tpu.memory_space<vmem>>, vector<1x32x32xbf16>
    %541 = vector.shape_cast %540 : vector<1x32x32xbf16> to vector<32x32xbf16>
    %542 = arith.truncf %539 : vector<32x64xf32> to vector<32x64xbf16>
    %cst_553 = arith.constant dense<0.000000e+00> : vector<32x64xf32>
    %543 = tpu.matmul %541, %542, %cst_553 {dimension_numbers = #tpu.dot_dimension_numbers<[1], [0], [0], [1], [0, 0, 1, 1], [], []>} : vector<32x32xbf16>, vector<32x64xbf16>, vector<32x64xf32> -> vector<32x64xf32>
    %544 = arith.addf %536, %543 : vector<32x64xf32>
    %c2_554 = arith.constant 2 : index
    %c7_555 = arith.constant 7 : index
    %c0_556 = arith.constant 0 : index
    %c0_557 = arith.constant 0 : index
    %545 = vector.load %arg10[%c2_554, %c7_555, %c0_556, %c0_557] : memref<3x9x64x64xbf16, #tpu.memory_space<vmem>>, vector<1x1x64x64xbf16>
    %546 = vector.shape_cast %545 : vector<1x1x64x64xbf16> to vector<64x64xbf16>
    %cst_558 = arith.constant dense<0.000000e+00> : vector<32x64xf32>
    %547 = tpu.matmul %487, %546, %cst_558 {dimension_numbers = #tpu.dot_dimension_numbers<[1], [0], [0], [1], [0, 0, 1, 1], [], []>} : vector<32x64xbf16>, vector<64x64xbf16>, vector<32x64xf32> -> vector<32x64xf32>
    %c7_559 = arith.constant 7 : index
    %c0_560 = arith.constant 0 : index
    %c0_561 = arith.constant 0 : index
    %548 = vector.load %arg5[%c7_559, %c0_560, %c0_561] : memref<9x32x32xbf16, #tpu.memory_space<vmem>>, vector<1x32x32xbf16>
    %549 = vector.shape_cast %548 : vector<1x32x32xbf16> to vector<32x32xbf16>
    %550 = arith.truncf %547 : vector<32x64xf32> to vector<32x64xbf16>
    %cst_562 = arith.constant dense<0.000000e+00> : vector<32x64xf32>
    %551 = tpu.matmul %549, %550, %cst_562 {dimension_numbers = #tpu.dot_dimension_numbers<[1], [0], [0], [1], [0, 0, 1, 1], [], []>} : vector<32x32xbf16>, vector<32x64xbf16>, vector<32x64xf32> -> vector<32x64xf32>
    %552 = arith.addf %544, %551 : vector<32x64xf32>
    %c2_563 = arith.constant 2 : index
    %c8_564 = arith.constant 8 : index
    %c0_565 = arith.constant 0 : index
    %c0_566 = arith.constant 0 : index
    %553 = vector.load %arg10[%c2_563, %c8_564, %c0_565, %c0_566] : memref<3x9x64x64xbf16, #tpu.memory_space<vmem>>, vector<1x1x64x64xbf16>
    %554 = vector.shape_cast %553 : vector<1x1x64x64xbf16> to vector<64x64xbf16>
    %cst_567 = arith.constant dense<0.000000e+00> : vector<32x64xf32>
    %555 = tpu.matmul %487, %554, %cst_567 {dimension_numbers = #tpu.dot_dimension_numbers<[1], [0], [0], [1], [0, 0, 1, 1], [], []>} : vector<32x64xbf16>, vector<64x64xbf16>, vector<32x64xf32> -> vector<32x64xf32>
    %c8_568 = arith.constant 8 : index
    %c0_569 = arith.constant 0 : index
    %c0_570 = arith.constant 0 : index
    %556 = vector.load %arg5[%c8_568, %c0_569, %c0_570] : memref<9x32x32xbf16, #tpu.memory_space<vmem>>, vector<1x32x32xbf16>
    %557 = vector.shape_cast %556 : vector<1x32x32xbf16> to vector<32x32xbf16>
    %558 = arith.truncf %555 : vector<32x64xf32> to vector<32x64xbf16>
    %cst_571 = arith.constant dense<0.000000e+00> : vector<32x64xf32>
    %559 = tpu.matmul %557, %558, %cst_571 {dimension_numbers = #tpu.dot_dimension_numbers<[1], [0], [0], [1], [0, 0, 1, 1], [], []>} : vector<32x32xbf16>, vector<32x64xbf16>, vector<32x64xf32> -> vector<32x64xf32>
    %560 = arith.addf %552, %559 : vector<32x64xf32>
    %cst_572 = arith.constant 0.000000e+00 : f32
    %561 = vector.broadcast %cst_572 : f32 to vector<32x64xf32>
    %562 = arith.maximumf %560, %561 : vector<32x64xf32>
    %c2_573 = arith.constant 2 : index
    %c0_574 = arith.constant 0 : index
    %c0_575 = arith.constant 0 : index
    %563 = vector.load %arg13[%c2_573, %c0_574, %c0_575] : memref<3x1x64xf32, #tpu.memory_space<vmem>>, vector<1x1x64xf32>
    %564 = vector.shape_cast %563 : vector<1x1x64xf32> to vector<1x64xf32>
    %565 = arith.truncf %562 : vector<32x64xf32> to vector<32x64xbf16>
    %c2_576 = arith.constant 2 : index
    %c0_577 = arith.constant 0 : index
    %c0_578 = arith.constant 0 : index
    %c0_579 = arith.constant 0 : index
    %566 = vector.load %arg12[%c2_576, %c0_577, %c0_578, %c0_579] : memref<3x9x64x64xbf16, #tpu.memory_space<vmem>>, vector<1x1x64x64xbf16>
    %567 = vector.shape_cast %566 : vector<1x1x64x64xbf16> to vector<64x64xbf16>
    %cst_580 = arith.constant dense<0.000000e+00> : vector<32x64xf32>
    %568 = tpu.matmul %565, %567, %cst_580 {dimension_numbers = #tpu.dot_dimension_numbers<[1], [0], [0], [1], [0, 0, 1, 1], [], []>} : vector<32x64xbf16>, vector<64x64xbf16>, vector<32x64xf32> -> vector<32x64xf32>
    %c0_581 = arith.constant 0 : index
    %c0_582 = arith.constant 0 : index
    %c0_583 = arith.constant 0 : index
    %569 = vector.load %arg5[%c0_581, %c0_582, %c0_583] : memref<9x32x32xbf16, #tpu.memory_space<vmem>>, vector<1x32x32xbf16>
    %570 = vector.shape_cast %569 : vector<1x32x32xbf16> to vector<32x32xbf16>
    %571 = arith.truncf %568 : vector<32x64xf32> to vector<32x64xbf16>
    %cst_584 = arith.constant dense<0.000000e+00> : vector<32x64xf32>
    %572 = tpu.matmul %570, %571, %cst_584 {dimension_numbers = #tpu.dot_dimension_numbers<[1], [0], [0], [1], [0, 0, 1, 1], [], []>} : vector<32x32xbf16>, vector<32x64xbf16>, vector<32x64xf32> -> vector<32x64xf32>
    %573 = vector.broadcast %564 : vector<1x64xf32> to vector<32x64xf32>
    %574 = arith.addf %573, %572 : vector<32x64xf32>
    %c2_585 = arith.constant 2 : index
    %c1_586 = arith.constant 1 : index
    %c0_587 = arith.constant 0 : index
    %c0_588 = arith.constant 0 : index
    %575 = vector.load %arg12[%c2_585, %c1_586, %c0_587, %c0_588] : memref<3x9x64x64xbf16, #tpu.memory_space<vmem>>, vector<1x1x64x64xbf16>
    %576 = vector.shape_cast %575 : vector<1x1x64x64xbf16> to vector<64x64xbf16>
    %cst_589 = arith.constant dense<0.000000e+00> : vector<32x64xf32>
    %577 = tpu.matmul %565, %576, %cst_589 {dimension_numbers = #tpu.dot_dimension_numbers<[1], [0], [0], [1], [0, 0, 1, 1], [], []>} : vector<32x64xbf16>, vector<64x64xbf16>, vector<32x64xf32> -> vector<32x64xf32>
    %c1_590 = arith.constant 1 : index
    %c0_591 = arith.constant 0 : index
    %c0_592 = arith.constant 0 : index
    %578 = vector.load %arg5[%c1_590, %c0_591, %c0_592] : memref<9x32x32xbf16, #tpu.memory_space<vmem>>, vector<1x32x32xbf16>
    %579 = vector.shape_cast %578 : vector<1x32x32xbf16> to vector<32x32xbf16>
    %580 = arith.truncf %577 : vector<32x64xf32> to vector<32x64xbf16>
    %cst_593 = arith.constant dense<0.000000e+00> : vector<32x64xf32>
    %581 = tpu.matmul %579, %580, %cst_593 {dimension_numbers = #tpu.dot_dimension_numbers<[1], [0], [0], [1], [0, 0, 1, 1], [], []>} : vector<32x32xbf16>, vector<32x64xbf16>, vector<32x64xf32> -> vector<32x64xf32>
    %582 = arith.addf %574, %581 : vector<32x64xf32>
    %c2_594 = arith.constant 2 : index
    %c2_595 = arith.constant 2 : index
    %c0_596 = arith.constant 0 : index
    %c0_597 = arith.constant 0 : index
    %583 = vector.load %arg12[%c2_594, %c2_595, %c0_596, %c0_597] : memref<3x9x64x64xbf16, #tpu.memory_space<vmem>>, vector<1x1x64x64xbf16>
    %584 = vector.shape_cast %583 : vector<1x1x64x64xbf16> to vector<64x64xbf16>
    %cst_598 = arith.constant dense<0.000000e+00> : vector<32x64xf32>
    %585 = tpu.matmul %565, %584, %cst_598 {dimension_numbers = #tpu.dot_dimension_numbers<[1], [0], [0], [1], [0, 0, 1, 1], [], []>} : vector<32x64xbf16>, vector<64x64xbf16>, vector<32x64xf32> -> vector<32x64xf32>
    %c2_599 = arith.constant 2 : index
    %c0_600 = arith.constant 0 : index
    %c0_601 = arith.constant 0 : index
    %586 = vector.load %arg5[%c2_599, %c0_600, %c0_601] : memref<9x32x32xbf16, #tpu.memory_space<vmem>>, vector<1x32x32xbf16>
    %587 = vector.shape_cast %586 : vector<1x32x32xbf16> to vector<32x32xbf16>
    %588 = arith.truncf %585 : vector<32x64xf32> to vector<32x64xbf16>
    %cst_602 = arith.constant dense<0.000000e+00> : vector<32x64xf32>
    %589 = tpu.matmul %587, %588, %cst_602 {dimension_numbers = #tpu.dot_dimension_numbers<[1], [0], [0], [1], [0, 0, 1, 1], [], []>} : vector<32x32xbf16>, vector<32x64xbf16>, vector<32x64xf32> -> vector<32x64xf32>
    %590 = arith.addf %582, %589 : vector<32x64xf32>
    %c2_603 = arith.constant 2 : index
    %c3_604 = arith.constant 3 : index
    %c0_605 = arith.constant 0 : index
    %c0_606 = arith.constant 0 : index
    %591 = vector.load %arg12[%c2_603, %c3_604, %c0_605, %c0_606] : memref<3x9x64x64xbf16, #tpu.memory_space<vmem>>, vector<1x1x64x64xbf16>
    %592 = vector.shape_cast %591 : vector<1x1x64x64xbf16> to vector<64x64xbf16>
    %cst_607 = arith.constant dense<0.000000e+00> : vector<32x64xf32>
    %593 = tpu.matmul %565, %592, %cst_607 {dimension_numbers = #tpu.dot_dimension_numbers<[1], [0], [0], [1], [0, 0, 1, 1], [], []>} : vector<32x64xbf16>, vector<64x64xbf16>, vector<32x64xf32> -> vector<32x64xf32>
    %c3_608 = arith.constant 3 : index
    %c0_609 = arith.constant 0 : index
    %c0_610 = arith.constant 0 : index
    %594 = vector.load %arg5[%c3_608, %c0_609, %c0_610] : memref<9x32x32xbf16, #tpu.memory_space<vmem>>, vector<1x32x32xbf16>
    %595 = vector.shape_cast %594 : vector<1x32x32xbf16> to vector<32x32xbf16>
    %596 = arith.truncf %593 : vector<32x64xf32> to vector<32x64xbf16>
    %cst_611 = arith.constant dense<0.000000e+00> : vector<32x64xf32>
    %597 = tpu.matmul %595, %596, %cst_611 {dimension_numbers = #tpu.dot_dimension_numbers<[1], [0], [0], [1], [0, 0, 1, 1], [], []>} : vector<32x32xbf16>, vector<32x64xbf16>, vector<32x64xf32> -> vector<32x64xf32>
    %598 = arith.addf %590, %597 : vector<32x64xf32>
    %c2_612 = arith.constant 2 : index
    %c4_613 = arith.constant 4 : index
    %c0_614 = arith.constant 0 : index
    %c0_615 = arith.constant 0 : index
    %599 = vector.load %arg12[%c2_612, %c4_613, %c0_614, %c0_615] : memref<3x9x64x64xbf16, #tpu.memory_space<vmem>>, vector<1x1x64x64xbf16>
    %600 = vector.shape_cast %599 : vector<1x1x64x64xbf16> to vector<64x64xbf16>
    %cst_616 = arith.constant dense<0.000000e+00> : vector<32x64xf32>
    %601 = tpu.matmul %565, %600, %cst_616 {dimension_numbers = #tpu.dot_dimension_numbers<[1], [0], [0], [1], [0, 0, 1, 1], [], []>} : vector<32x64xbf16>, vector<64x64xbf16>, vector<32x64xf32> -> vector<32x64xf32>
    %c4_617 = arith.constant 4 : index
    %c0_618 = arith.constant 0 : index
    %c0_619 = arith.constant 0 : index
    %602 = vector.load %arg5[%c4_617, %c0_618, %c0_619] : memref<9x32x32xbf16, #tpu.memory_space<vmem>>, vector<1x32x32xbf16>
    %603 = vector.shape_cast %602 : vector<1x32x32xbf16> to vector<32x32xbf16>
    %604 = arith.truncf %601 : vector<32x64xf32> to vector<32x64xbf16>
    %cst_620 = arith.constant dense<0.000000e+00> : vector<32x64xf32>
    %605 = tpu.matmul %603, %604, %cst_620 {dimension_numbers = #tpu.dot_dimension_numbers<[1], [0], [0], [1], [0, 0, 1, 1], [], []>} : vector<32x32xbf16>, vector<32x64xbf16>, vector<32x64xf32> -> vector<32x64xf32>
    %606 = arith.addf %598, %605 : vector<32x64xf32>
    %c2_621 = arith.constant 2 : index
    %c5_622 = arith.constant 5 : index
    %c0_623 = arith.constant 0 : index
    %c0_624 = arith.constant 0 : index
    %607 = vector.load %arg12[%c2_621, %c5_622, %c0_623, %c0_624] : memref<3x9x64x64xbf16, #tpu.memory_space<vmem>>, vector<1x1x64x64xbf16>
    %608 = vector.shape_cast %607 : vector<1x1x64x64xbf16> to vector<64x64xbf16>
    %cst_625 = arith.constant dense<0.000000e+00> : vector<32x64xf32>
    %609 = tpu.matmul %565, %608, %cst_625 {dimension_numbers = #tpu.dot_dimension_numbers<[1], [0], [0], [1], [0, 0, 1, 1], [], []>} : vector<32x64xbf16>, vector<64x64xbf16>, vector<32x64xf32> -> vector<32x64xf32>
    %c5_626 = arith.constant 5 : index
    %c0_627 = arith.constant 0 : index
    %c0_628 = arith.constant 0 : index
    %610 = vector.load %arg5[%c5_626, %c0_627, %c0_628] : memref<9x32x32xbf16, #tpu.memory_space<vmem>>, vector<1x32x32xbf16>
    %611 = vector.shape_cast %610 : vector<1x32x32xbf16> to vector<32x32xbf16>
    %612 = arith.truncf %609 : vector<32x64xf32> to vector<32x64xbf16>
    %cst_629 = arith.constant dense<0.000000e+00> : vector<32x64xf32>
    %613 = tpu.matmul %611, %612, %cst_629 {dimension_numbers = #tpu.dot_dimension_numbers<[1], [0], [0], [1], [0, 0, 1, 1], [], []>} : vector<32x32xbf16>, vector<32x64xbf16>, vector<32x64xf32> -> vector<32x64xf32>
    %614 = arith.addf %606, %613 : vector<32x64xf32>
    %c2_630 = arith.constant 2 : index
    %c6_631 = arith.constant 6 : index
    %c0_632 = arith.constant 0 : index
    %c0_633 = arith.constant 0 : index
    %615 = vector.load %arg12[%c2_630, %c6_631, %c0_632, %c0_633] : memref<3x9x64x64xbf16, #tpu.memory_space<vmem>>, vector<1x1x64x64xbf16>
    %616 = vector.shape_cast %615 : vector<1x1x64x64xbf16> to vector<64x64xbf16>
    %cst_634 = arith.constant dense<0.000000e+00> : vector<32x64xf32>
    %617 = tpu.matmul %565, %616, %cst_634 {dimension_numbers = #tpu.dot_dimension_numbers<[1], [0], [0], [1], [0, 0, 1, 1], [], []>} : vector<32x64xbf16>, vector<64x64xbf16>, vector<32x64xf32> -> vector<32x64xf32>
    %c6_635 = arith.constant 6 : index
    %c0_636 = arith.constant 0 : index
    %c0_637 = arith.constant 0 : index
    %618 = vector.load %arg5[%c6_635, %c0_636, %c0_637] : memref<9x32x32xbf16, #tpu.memory_space<vmem>>, vector<1x32x32xbf16>
    %619 = vector.shape_cast %618 : vector<1x32x32xbf16> to vector<32x32xbf16>
    %620 = arith.truncf %617 : vector<32x64xf32> to vector<32x64xbf16>
    %cst_638 = arith.constant dense<0.000000e+00> : vector<32x64xf32>
    %621 = tpu.matmul %619, %620, %cst_638 {dimension_numbers = #tpu.dot_dimension_numbers<[1], [0], [0], [1], [0, 0, 1, 1], [], []>} : vector<32x32xbf16>, vector<32x64xbf16>, vector<32x64xf32> -> vector<32x64xf32>
    %622 = arith.addf %614, %621 : vector<32x64xf32>
    %c2_639 = arith.constant 2 : index
    %c7_640 = arith.constant 7 : index
    %c0_641 = arith.constant 0 : index
    %c0_642 = arith.constant 0 : index
    %623 = vector.load %arg12[%c2_639, %c7_640, %c0_641, %c0_642] : memref<3x9x64x64xbf16, #tpu.memory_space<vmem>>, vector<1x1x64x64xbf16>
    %624 = vector.shape_cast %623 : vector<1x1x64x64xbf16> to vector<64x64xbf16>
    %cst_643 = arith.constant dense<0.000000e+00> : vector<32x64xf32>
    %625 = tpu.matmul %565, %624, %cst_643 {dimension_numbers = #tpu.dot_dimension_numbers<[1], [0], [0], [1], [0, 0, 1, 1], [], []>} : vector<32x64xbf16>, vector<64x64xbf16>, vector<32x64xf32> -> vector<32x64xf32>
    %c7_644 = arith.constant 7 : index
    %c0_645 = arith.constant 0 : index
    %c0_646 = arith.constant 0 : index
    %626 = vector.load %arg5[%c7_644, %c0_645, %c0_646] : memref<9x32x32xbf16, #tpu.memory_space<vmem>>, vector<1x32x32xbf16>
    %627 = vector.shape_cast %626 : vector<1x32x32xbf16> to vector<32x32xbf16>
    %628 = arith.truncf %625 : vector<32x64xf32> to vector<32x64xbf16>
    %cst_647 = arith.constant dense<0.000000e+00> : vector<32x64xf32>
    %629 = tpu.matmul %627, %628, %cst_647 {dimension_numbers = #tpu.dot_dimension_numbers<[1], [0], [0], [1], [0, 0, 1, 1], [], []>} : vector<32x32xbf16>, vector<32x64xbf16>, vector<32x64xf32> -> vector<32x64xf32>
    %630 = arith.addf %622, %629 : vector<32x64xf32>
    %c2_648 = arith.constant 2 : index
    %c8_649 = arith.constant 8 : index
    %c0_650 = arith.constant 0 : index
    %c0_651 = arith.constant 0 : index
    %631 = vector.load %arg12[%c2_648, %c8_649, %c0_650, %c0_651] : memref<3x9x64x64xbf16, #tpu.memory_space<vmem>>, vector<1x1x64x64xbf16>
    %632 = vector.shape_cast %631 : vector<1x1x64x64xbf16> to vector<64x64xbf16>
    %cst_652 = arith.constant dense<0.000000e+00> : vector<32x64xf32>
    %633 = tpu.matmul %565, %632, %cst_652 {dimension_numbers = #tpu.dot_dimension_numbers<[1], [0], [0], [1], [0, 0, 1, 1], [], []>} : vector<32x64xbf16>, vector<64x64xbf16>, vector<32x64xf32> -> vector<32x64xf32>
    %c8_653 = arith.constant 8 : index
    %c0_654 = arith.constant 0 : index
    %c0_655 = arith.constant 0 : index
    %634 = vector.load %arg5[%c8_653, %c0_654, %c0_655] : memref<9x32x32xbf16, #tpu.memory_space<vmem>>, vector<1x32x32xbf16>
    %635 = vector.shape_cast %634 : vector<1x32x32xbf16> to vector<32x32xbf16>
    %636 = arith.truncf %633 : vector<32x64xf32> to vector<32x64xbf16>
    %cst_656 = arith.constant dense<0.000000e+00> : vector<32x64xf32>
    %637 = tpu.matmul %635, %636, %cst_656 {dimension_numbers = #tpu.dot_dimension_numbers<[1], [0], [0], [1], [0, 0, 1, 1], [], []>} : vector<32x32xbf16>, vector<32x64xbf16>, vector<32x64xf32> -> vector<32x64xf32>
    %638 = arith.addf %630, %637 : vector<32x64xf32>
    %639 = arith.addf %638, %484 : vector<32x64xf32>
    %cst_657 = arith.constant 0.000000e+00 : f32
    %640 = vector.broadcast %cst_657 : f32 to vector<32x64xf32>
    %641 = arith.maximumf %639, %640 : vector<32x64xf32>
    %642 = arith.truncf %641 : vector<32x64xf32> to vector<32x64xbf16>
    %c0_658 = arith.constant 0 : index
    %c0_659 = arith.constant 0 : index
    %643 = vector.load %arg14[%c0_658, %c0_659] : memref<64x32xbf16, #tpu.memory_space<vmem>>, vector<64x32xbf16>
    %cst_660 = arith.constant dense<0.000000e+00> : vector<32x32xf32>
    %644 = tpu.matmul %642, %643, %cst_660 {dimension_numbers = #tpu.dot_dimension_numbers<[1], [0], [0], [1], [0, 0, 1, 1], [], []>} : vector<32x64xbf16>, vector<64x32xbf16>, vector<32x32xf32> -> vector<32x32xf32>
    %c0_661 = arith.constant 0 : index
    %c0_662 = arith.constant 0 : index
    %645 = vector.load %arg15[%c0_661, %c0_662] : memref<1x32xf32, #tpu.memory_space<vmem>>, vector<1x32xf32>
    %646 = vector.broadcast %645 : vector<1x32xf32> to vector<32x32xf32>
    %647 = arith.addf %644, %646 : vector<32x32xf32>
    %cst_663 = arith.constant dense<0xFF800000> : vector<32xf32>
    %648 = vector.multi_reduction <maximumf>, %647, %cst_663 [1] : vector<32x32xf32> to vector<32xf32>
    %649 = vector.shape_cast %648 : vector<32xf32> to vector<32x1xf32>
    %650 = vector.broadcast %649 : vector<32x1xf32> to vector<32x32xf32>
    %651 = arith.subf %647, %650 : vector<32x32xf32>
    %652 = math.exp %651 : vector<32x32xf32>
    %cst_664 = arith.constant dense<0.000000e+00> : vector<32xf32>
    %653 = vector.multi_reduction <add>, %652, %cst_664 [1] : vector<32x32xf32> to vector<32xf32>
    %654 = vector.shape_cast %653 : vector<32xf32> to vector<32x1xf32>
    %c0_665 = arith.constant 0 : index
    %c0_666 = arith.constant 0 : index
    %655 = vector.load %arg16[%c0_665, %c0_666] : memref<32x48xf32, #tpu.memory_space<vmem>>, vector<32x48xf32>
    %cst_667 = arith.constant dense<0.000000e+00> : vector<32x48xf32>
    %656 = tpu.matmul %652, %655, %cst_667 {dimension_numbers = #tpu.dot_dimension_numbers<[1], [0], [0], [1], [0, 0, 1, 1], [], []>} : vector<32x32xf32>, vector<32x48xf32>, vector<32x48xf32> -> vector<32x48xf32>
    %657 = tpu.reciprocal %654 {approx = true} : vector<32x1xf32> -> vector<32x1xf32>
    %658 = vector.broadcast %657 : vector<32x1xf32> to vector<32x48xf32>
    %659 = arith.mulf %656, %658 : vector<32x48xf32>
    %c0_668 = arith.constant 0 : index
    %c0_669 = arith.constant 0 : index
    %660 = vector.load %arg17[%c0_668, %c0_669] : memref<32x48xf32, #tpu.memory_space<vmem>>, vector<32x48xf32>
    tpu.vector_store %arg17[%c0_668, %c0_669], %659 {strides = array<i32>} : memref<32x48xf32, #tpu.memory_space<vmem>>, vector<32x48xf32>,
    return
  }
}

</mosaic_0001>

<bundles_post_ra>
// kernel: _lambda_.1
= control target key start
LH: loop header
LB: loop body
LE: loop exit
PB: predicated region body
PF: predicated region fallthrough
CT: control target
= control target key end

     0   :  { %vm160_vm0 = vcmask 1044480   ;;  %vm161_vm1 = vcmask 1045504   ;;  %v15495_v1 = vmov 65535   ;;  %vm135_vm2 = vcmask 220160   ;;  %s17916_s1 = inlined_call_operand.vmem [shape: bf16[27,16], index: 1, kind: input, shape index: {}]   ;;  %s17917_s0 = inlined_call_operand.vmem [shape: bf16[128,27], index: 0, kind: input, shape index: {}]   ;;  %s17918_s6 = inlined_call_operand.vmem [shape: bf16[9,16,32], index: 6, kind: input, shape index: {}]   ;;  %s17919_s2 = inlined_call_operand.vmem [shape: f32[1,16], index: 2, kind: input, shape index: {}]   ;;  %s17920_s3 = inlined_call_operand.vmem [shape: bf16[9,32,128], index: 3, kind: input, shape index: {}]   ;;  %s17921_s8 = inlined_call_operand.vmem [shape: bf16[9,32,64], index: 8, kind: input, shape index: {}]   ;;  %s17922_s7 = inlined_call_operand.vmem [shape: f32[1,32], index: 7, kind: input, shape index: {}]   ;;  %s17923_s4 = inlined_call_operand.vmem [shape: bf16[9,32,32], index: 4, kind: input, shape index: {}, may-alias: {4,5}]   ;;  %s17924_s10 = inlined_call_operand.vmem [shape: bf16[3,9,64,64], index: 10, kind: input, shape index: {}]   ;;  %s17925_s9 = inlined_call_operand.vmem [shape: f32[1,64], index: 9, kind: input, shape index: {}]   ;;  %s17926_s5 = inlined_call_operand.vmem [shape: bf16[9,32,32], index: 5, kind: input, shape index: {}, may-alias: {4,5}]   ;;  %s17927_s11 = inlined_call_operand.vmem [shape: f32[3,1,64], index: 11, kind: input, shape index: {}]   ;;  %s17928_s12 = inlined_call_operand.vmem [shape: bf16[3,9,64,64], index: 12, kind: input, shape index: {}]   ;;  %s17929_s13 = inlined_call_operand.vmem [shape: f32[3,1,64], index: 13, kind: input, shape index: {}]   ;;  %s17930_s14 = inlined_call_operand.vmem [shape: bf16[64,32], index: 14, kind: input, shape index: {}]   ;;  %s17931_s15 = inlined_call_operand.vmem [shape: f32[1,32], index: 15, kind: input, shape index: {}]   ;;  %s17932_s16 = inlined_call_operand.vmem [shape: f32[32,48], index: 16, kind: input, shape index: {}]   ;;  %s17933_s17 = inlined_call_operand.vmem [shape: f32[32,48], index: 17, kind: output, shape index: {}]  }
   0x1   :  { %17936 = sst [smem:[#allocation2_spill]] %s17916_s1  ;;  %v162_v2 = vsel %vm160_vm0, 4294967295, %v15495_v1  ;;  %v15036_v14 = vld [vmem:[%s17918_s6] sm:$0xff]   ;;  %v15037_v15 = vld [vmem:[%s17918_s6 + $0x8] sm:$0xff]   ;;  %v15633_v16 = vld [vmem:[%s17918_s6 + $0x10] sm:$0xff]   ;;  %vm377_vm3 = vcmask 130048  }
   0x2   :  { %17937 = sst [smem:[#allocation3_spill]] %s17917_s0  ;;  %v163_v3 = vsel %vm161_vm1, %v162_v2, 0  ;;  %13433 = vmatprep.subr.bf16.mxu1 %v15036_v14  ;;  %v15639_v17 = vld [vmem:[%s17919_s2] ss:$0 sm:$0xff]  ;;  %vm2097_vm4 = vcmask 261120   ;;  %vm3429_vm5 = vcmask 523264  }
   0x3   :  { %s17938_s26 = sld [smem:[#allocation2_spill]]  ;;  %13434 = vmatpush3.bf16.msra.mxu1 %v15036_v14  ;;  %vm11350_vm6 = vcmask 392192  }
   0x4   :  { %s17939_s29 = sld [smem:[#allocation3_spill]] }
   0x9   :  { %v15026_v0 = vld [vmem:[%s17938_s26 + $0x8] sm:$0x3f]   ;;  %v15027_v6 = vld [vmem:[%s17938_s26] sm:$0xff]  }
   0xa   :  { %v15028_v4 = vld [vmem:[%s17939_s29] sm:$0xff]   ;;  %v165_v5 = vand.u32 %v15026_v0, %v163_v3  ;;  %v15029_v7 = vld [vmem:[%s17939_s29 + $0x8] sm:$0xff]   ;;  %v15030_v8 = vld [vmem:[%s17939_s29 + $0x10] sm:$0xff]  }
   0xb   :  { %13417 = vmatprep.mubr.msk.bf16.mxu0 %vm135_vm2, %v15028_v4  ;;  %v15031_v9 = vld [vmem:[%s17939_s29 + $0x18] sm:$0xff]   ;;  %v15032_v10 = vld [vmem:[%s17939_s29 + $0x20] sm:$0xff]   ;;  %v15033_v11 = vld [vmem:[%s17939_s29 + $0x28] sm:$0xff]  }
   0xc   :  { %13413 = vmatprep.subr.bf16.mxu0 %v165_v5  ;;  %v15034_v12 = vld [vmem:[%s17939_s29 + $0x30] sm:$0xff]   ;;  %v15035_v13 = vld [vmem:[%s17939_s29 + $0x38] sm:$0xff]  }
   0xd   :  { %13414 = vmatpush3.bf16.msra.mxu0 %v165_v5 }
   0xe   :  { %13415 = vmatprep.subr.bf16.mxu0 %v15027_v6 }
  0x11   :  { %13416 = vmatpush3.bf16.msra.mxu0 %v15027_v6 }
  0x12   :  { %13471 = vmatprep.subr.bf16.mxu0 %v15037_v15 }
  0x14   :  { %13418 = vmatmul.mubr.msk.bf16.vlgmr.msra.gmra.mxu0 %vm135_vm2, %v15029_v7 }
  0x15   :  { %13421 = vmatprep.mubr.msk.bf16.mxu0 %vm135_vm2, %v15030_v8  ;;  %13472 = vmatpush3.bf16.msra.mxu0 %v15037_v15 }
  0x16   :  { %13509 = vmatprep.subr.bf16.mxu0 %v15633_v16 }
  0x1c   :  { %13422 = vmatmul.mubr.msk.bf16.gmra.mxu0 %vm135_vm2, %v15031_v9 }
  0x1d   :  { %13425 = vmatprep.mubr.msk.bf16.mxu0 %vm135_vm2, %v15032_v10 }
  0x24   :  { %13426 = vmatmul.mubr.msk.bf16.gmra.mxu0 %vm135_vm2, %v15033_v11 }
  0x25   :  { %13429 = vmatprep.mubr.msk.bf16.mxu0 %vm135_vm2, %v15034_v12 }
  0x2c   :  { %13430 = vmatmul.mubr.msk.bf16.gmra.mxu0 %vm135_vm2, %v15035_v13 }
  0xd4   :  { %v13419_v18 = vpop.f32.mrf.mxu0 }
  0xd5   :  { %v210_v19 = vadd.f32 %v13419_v18, %v15639_v17 }
  0xd6   :  { %v201_v20 = vpop.f32.mrf.mxu0 }
  0xd7   :  { %v11380_v21 = vmul.f32 -1.442695, %v210_v19  ;;  %v202_v22 = vadd.f32 %v15639_v17, %v201_v20 }
  0xd8   :  { %v13420_v23 = vpop.f32.mrf.mxu0 }
  0xd9   :  { %15337 = vpow2.f32 %v11380_v21  ;;  %v11378_v24 = vmul.f32 -1.442695, %v202_v22  ;;  %v213_v25 = vadd.f32 %v13420_v23, %v15639_v17 }
  0xda   :  { %v204_v26 = vpop.f32.mrf.mxu0 }
  0xdb   :  { %15339 = vpow2.f32 %v11378_v24  ;;  %v11381_v27 = vmul.f32 -1.442695, %v213_v25  ;;  %v205_v28 = vadd.f32 %v15639_v17, %v204_v26 }
  0xdc   :  { %v13423_v29 = vpop.f32.mrf.mxu0 }
  0xdd   :  { %15341 = vpow2.f32 %v11381_v27  ;;  %v11379_v30 = vmul.f32 -1.442695, %v205_v28  ;;  %v226_v31 = vadd.f32 %v13423_v29, %v15639_v17 }
  0xde   :  { %v217_v32 = vpop.f32.mrf.mxu0 }
  0xdf   :  { %15343 = vpow2.f32 %v11379_v30  ;;  %v11384_v33 = vmul.f32 -1.442695, %v226_v31  ;;  %v218_v34 = vadd.f32 %v15639_v17, %v217_v32 }
  0xe0   :  { %v13424_v35 = vpop.f32.mrf.mxu0 }
  0xe1   :  { %15345 = vpow2.f32 %v11384_v33  ;;  %v11382_v36 = vmul.f32 -1.442695, %v218_v34  ;;  %v229_v37 = vadd.f32 %v13424_v35, %v15639_v17  ;;  %v15039_v34 = vld [vmem:[%s17918_s6 + $0x18] sm:$0xff]  }
  0xe2   :  { %v220_v38 = vpop.f32.mrf.mxu0 }
  0xe3   :  { %15347 = vpow2.f32 %v11382_v36  ;;  %v11385_v39 = vmul.f32 -1.442695, %v229_v37  ;;  %v221_v40 = vadd.f32 %v15639_v17, %v220_v38 }
  0xe4   :  { %v13427_v41 = vpop.f32.mrf.mxu0 }
  0xe5   :  { %15349 = vpow2.f32 %v11385_v39  ;;  %v11383_v42 = vmul.f32 -1.442695, %v221_v40  ;;  %v242_v43 = vadd.f32 %v13427_v41, %v15639_v17 }
  0xe6   :  { %v15338_v44 = vpop.eup %15337  ;;  %v233_v45 = vpop.f32.mrf.mxu0 }
  0xe7   :  { %v314_v46 = vadd.f32 1.0, %v15338_v44  ;;  %15351 = vpow2.f32 %v11383_v42  ;;  %v11388_v47 = vmul.f32 -1.442695, %v242_v43  ;;  %v234_v48 = vadd.f32 %v15639_v17, %v233_v45 }
  0xe8   :  { %v15340_v49 = vpop.eup %15339  ;;  %v13428_v50 = vpop.f32.mrf.mxu0 }
  0xe9   :  { %15353 = vrcp.f32 %v314_v46  ;;  %v312_v51 = vadd.f32 1.0, %v15340_v49  ;;  %v11386_v52 = vmul.f32 -1.442695, %v234_v48  ;;  %v245_v53 = vadd.f32 %v13428_v50, %v15639_v17 }
  0xea   :  { %v15342_v54 = vpop.eup %15341  ;;  %15355 = vpow2.f32 %v11388_v47  ;;  %v236_v55 = vpop.f32.mrf.mxu0 }
  0xeb   :  { %15357 = vrcp.f32 %v312_v51  ;;  %v315_v56 = vadd.f32 1.0, %v15342_v54  ;;  %v11389_v57 = vmul.f32 -1.442695, %v245_v53  ;;  %v237_v58 = vadd.f32 %v15639_v17, %v236_v55 }
  0xec   :  { %v15344_v59 = vpop.eup %15343  ;;  %15359 = vpow2.f32 %v11386_v52  ;;  %v13431_v60 = vpop.f32.mrf.mxu0 }
  0xed   :  { %15361 = vrcp.f32 %v315_v56  ;;  %v313_v61 = vadd.f32 1.0, %v15344_v59  ;;  %v11387_v62 = vmul.f32 -1.442695, %v237_v58  ;;  %v258_v63 = vadd.f32 %v13431_v60, %v15639_v17  ;;  %v15040_v59 = vld [vmem:[%s17918_s6 + $0x20] sm:$0xff]   ;;  %v15041_v60 = vld [vmem:[%s17918_s6 + $0x28] sm:$0xff]  }
  0xee   :  { %v15346_v0 = vpop.eup %15345  ;;  %15363 = vpow2.f32 %v11389_v57  ;;  %v249_v1 = vpop.f32.mrf.mxu0 }
  0xef   :  { %15365 = vrcp.f32 %v313_v61  ;;  %v318_v2 = vadd.f32 1.0, %v15346_v0  ;;  %v11392_v3 = vmul.f32 -1.442695, %v258_v63  ;;  %v250_v4 = vadd.f32 %v15639_v17, %v249_v1  ;;  %v15042_v61 = vld [vmem:[%s17918_s6 + $0x30] sm:$0xff]   ;;  %v15043_v63 = vld [vmem:[%s17918_s6 + $0x38] sm:$0xff]   ;;  %v15044_v0 = vld [vmem:[%s17918_s6 + $0x40] sm:$0xff]  }
  0xf0   :  { %v15348_v5 = vpop.eup %15347  ;;  %15367 = vpow2.f32 %v11387_v62  ;;  %v13432_v6 = vpop.f32.mrf.mxu0  ;;  %v15045_v62 = vld [vmem:[%s17920_s3] sm:$0xff]  }
  0xf1   :  { %15369 = vrcp.f32 %v318_v2  ;;  %v316_v7 = vadd.f32 1.0, %v15348_v5  ;;  %v11390_v8 = vmul.f32 -1.442695, %v250_v4  ;;  %v261_v9 = vadd.f32 %v13432_v6, %v15639_v17 }
  0xf2   :  { %v15350_v10 = vpop.eup %15349  ;;  %15371 = vpow2.f32 %v11392_v3  ;;  %v252_v11 = vpop.f32.mrf.mxu0 }
  0xf3   :  { %15373 = vrcp.f32 %v316_v7  ;;  %v319_v12 = vadd.f32 1.0, %v15350_v10  ;;  %v11393_v13 = vmul.f32 -1.442695, %v261_v9  ;;  %v253_v14 = vadd.f32 %v15639_v17, %v252_v11 }
  0xf4   :  { %v15352_v15 = vpop.eup %15351  ;;  %15375 = vpow2.f32 %v11390_v8 }
  0xf5   :  { %15377 = vrcp.f32 %v319_v12  ;;  %v317_v18 = vadd.f32 1.0, %v15352_v15  ;;  %v11391_v19 = vmul.f32 -1.442695, %v253_v14 }
  0xf6   :  { %v15354_v20 = vpop.eup %15353  ;;  %15379 = vpow2.f32 %v11393_v13 }
  0xf7   :  { %v15356_v21 = vpop.eup %15355  ;;  %15381 = vrcp.f32 %v317_v18 }
  0xf8   :  { %v15358_v22 = vpop.eup %15357  ;;  %15383 = vpow2.f32 %v11391_v19  ;;  %v322_v30 = vadd.f32 1.0, %v15356_v21 }
  0xf9   :  { %v15360_v23 = vpop.eup %15359 }
  0xfa   :  { %v15362_v24 = vpop.eup %15361  ;;  %v320_v25 = vadd.f32 1.0, %v15360_v23 }
  0xfb   :  { %v15364_v26 = vpop.eup %15363  ;;  %v15659_v32 = vpack.c.bf16 %v15362_v24, %v15354_v20 }
  0xfc   :  { %v15366_v27 = vpop.eup %15365  ;;  %v323_v28 = vadd.f32 1.0, %v15364_v26  ;;  %15385 = vrcp.f32 %v320_v25 }
  0xfd   :  { %v15368_v29 = vpop.eup %15367  ;;  %v15657_v17 = vpack.c.bf16 %v15366_v27, %v15358_v22 }
  0xfe   :  { %v15370_v31 = vpop.eup %15369  ;;  %v321_v33 = vadd.f32 1.0, %v15368_v29  ;;  %15387 = vrcp.f32 %v323_v28 }
  0xff   :  { %v15372_v35 = vpop.eup %15371  ;;  %13435 = vmatprep.mubr.msk.bf16.mxu1 %vm377_vm3, %v15657_v17  ;;  %13473 = vmatprep.mubr.msk.bf16.mxu0 %vm377_vm3, %v15657_v17 }
 0x100   :  { %v15374_v36 = vpop.eup %15373  ;;  %15389 = vrcp.f32 %v321_v33  ;;  %13436 = vmatmul.mubr.msk.bf16.vlgmr.msra.gmra.mxu1 %vm377_vm3, %v15659_v32  ;;  %13474 = vmatmul.mubr.msk.bf16.vlgmr.msra.gmra.mxu0 %vm377_vm3, %v15659_v32  ;;  %v326_v45 = vadd.f32 1.0, %v15372_v35 }
 0x101   :  { %v15376_v37 = vpop.eup %15375  ;;  %15391 = vrcp.f32 %v322_v30  ;;  %13510 = vmatpush3.bf16.msra.mxu0 %v15633_v16 }
 0x102   :  { %v15378_v38 = vpop.eup %15377  ;;  %v324_v39 = vadd.f32 1.0, %v15376_v37  ;;  %13547 = vmatprep.subr.bf16.mxu0 %v15039_v34 }
 0x103   :  { %v15380_v40 = vpop.eup %15379  ;;  %v15675_v46 = vpack.c.bf16 %v15378_v38, %v15370_v31 }
 0x104   :  { %v15382_v41 = vpop.eup %15381  ;;  %v327_v42 = vadd.f32 1.0, %v15380_v40  ;;  %15393 = vrcp.f32 %v324_v39 }
 0x105   :  { %v15384_v43 = vpop.eup %15383  ;;  %v15673_v44 = vpack.c.bf16 %v15382_v41, %v15374_v36 }
 0x106   :  { %v325_v47 = vadd.f32 1.0, %v15384_v43  ;;  %15395 = vrcp.f32 %v327_v42 }
 0x107   :  { %13439 = vmatprep.mubr.msk.bf16.mxu1 %vm377_vm3, %v15673_v44  ;;  %13477 = vmatprep.mubr.msk.bf16.mxu0 %vm377_vm3, %v15673_v44 }
 0x108   :  { %15397 = vrcp.f32 %v325_v47  ;;  %13440 = vmatmul.mubr.msk.bf16.gmra.mxu1 %vm377_vm3, %v15675_v46  ;;  %13478 = vmatmul.mubr.msk.bf16.gmra.mxu0 %vm377_vm3, %v15675_v46 }
 0x109   :  { %15399 = vrcp.f32 %v326_v45  ;;  %v15386_v16 = vpop.eup %15385 }
 0x10b   :  { %v15388_v48 = vpop.eup %15387 }
 0x10d   :  { %v15390_v49 = vpop.eup %15389 }
 0x10e   :  { %v15392_v50 = vpop.eup %15391  ;;  %v15685_v51 = vpack.c.bf16 %v15390_v49, %v15386_v16 }
 0x10f   :  { %v15687_v52 = vpack.c.bf16 %v15388_v48, %v15392_v50 }
 0x110   :  { %13443 = vmatprep.mubr.msk.bf16.mxu1 %vm377_vm3, %v15685_v51  ;;  %13481 = vmatprep.mubr.msk.bf16.mxu0 %vm377_vm3, %v15685_v51 }
 0x111   :  { %13444 = vmatmul.mubr.msk.bf16.gmra.mxu1 %vm377_vm3, %v15687_v52  ;;  %13482 = vmatmul.mubr.msk.bf16.gmra.mxu0 %vm377_vm3, %v15687_v52  ;;  %v15394_v53 = vpop.eup %15393 }
 0x113   :  { %v15396_v54 = vpop.eup %15395 }
 0x115   :  { %v15398_v55 = vpop.eup %15397 }
 0x116   :  { %v15400_v56 = vpop.eup %15399  ;;  %v15697_v57 = vpack.c.bf16 %v15398_v55, %v15394_v53 }
 0x117   :  { %v15699_v58 = vpack.c.bf16 %v15396_v54, %v15400_v56  ;;  %v15046_v56 = vld [vmem:[%s17920_s3 + $0x8] sm:$0xff]  }
 0x118   :  { %13447 = vmatprep.mubr.msk.bf16.mxu1 %vm377_vm3, %v15697_v57  ;;  %13485 = vmatprep.mubr.msk.bf16.mxu0 %vm377_vm3, %v15697_v57 }
 0x119   :  { %13448 = vmatmul.mubr.msk.bf16.gmra.mxu1 %vm377_vm3, %v15699_v58  ;;  %13486 = vmatmul.mubr.msk.bf16.gmra.mxu0 %vm377_vm3, %v15699_v58 }
 0x11a   :  { %13511 = vmatprep.mubr.msk.bf16.mxu0 %vm377_vm3, %v15657_v17  ;;  %13467 = vmatprep.mubr.bf16.mxu1 %v15045_v62 }
 0x121   :  { %13512 = vmatmul.mubr.msk.bf16.vlgmr.msra.gmra.mxu0 %vm377_vm3, %v15659_v32 }
 0x122   :  { %13515 = vmatprep.mubr.msk.bf16.mxu0 %vm377_vm3, %v15673_v44  ;;  %13548 = vmatpush3.bf16.msra.mxu0 %v15039_v34 }
 0x123   :  { %13585 = vmatprep.subr.bf16.mxu0 %v15040_v59 }
 0x129   :  { %13516 = vmatmul.mubr.msk.bf16.gmra.mxu0 %vm377_vm3, %v15675_v46 }
 0x12a   :  { %13519 = vmatprep.mubr.msk.bf16.mxu0 %vm377_vm3, %v15685_v51 }
 0x131   :  { %13520 = vmatmul.mubr.msk.bf16.gmra.mxu0 %vm377_vm3, %v15687_v52 }
 0x132   :  { %13523 = vmatprep.mubr.msk.bf16.mxu0 %vm377_vm3, %v15697_v57 }
 0x139   :  { %13524 = vmatmul.mubr.msk.bf16.gmra.mxu0 %vm377_vm3, %v15699_v58 }
 0x13a   :  { %13549 = vmatprep.mubr.msk.bf16.mxu0 %vm377_vm3, %v15657_v17 }
 0x141   :  { %13550 = vmatmul.mubr.msk.bf16.vlgmr.msra.gmra.mxu0 %vm377_vm3, %v15659_v32 }
 0x142   :  { %13553 = vmatprep.mubr.msk.bf16.mxu0 %vm377_vm3, %v15673_v44  ;;  %13586 = vmatpush3.bf16.msra.mxu0 %v15040_v59  ;;  %v15047_v59 = vld [vmem:[%s17920_s3 + $0x10] sm:$0xff]  }
 0x143   :  { %13623 = vmatprep.subr.bf16.mxu0 %v15041_v60 }
 0x149   :  { %13554 = vmatmul.mubr.msk.bf16.gmra.mxu0 %vm377_vm3, %v15675_v46 }
 0x14a   :  { %13557 = vmatprep.mubr.msk.bf16.mxu0 %vm377_vm3, %v15685_v51 }
 0x151   :  { %13558 = vmatmul.mubr.msk.bf16.gmra.mxu0 %vm377_vm3, %v15687_v52 }
 0x152   :  { %13561 = vmatprep.mubr.msk.bf16.mxu0 %vm377_vm3, %v15697_v57 }
 0x159   :  { %13562 = vmatmul.mubr.msk.bf16.gmra.mxu0 %vm377_vm3, %v15699_v58 }
 0x15a   :  { %13587 = vmatprep.mubr.msk.bf16.mxu0 %vm377_vm3, %v15657_v17 }
 0x161   :  { %13588 = vmatmul.mubr.msk.bf16.vlgmr.msra.gmra.mxu0 %vm377_vm3, %v15659_v32 }
 0x162   :  { %13591 = vmatprep.mubr.msk.bf16.mxu0 %vm377_vm3, %v15673_v44  ;;  %13624 = vmatpush3.bf16.msra.mxu0 %v15041_v60 }
 0x163   :  { %13661 = vmatprep.subr.bf16.mxu0 %v15042_v61 }
 0x169   :  { %13592 = vmatmul.mubr.msk.bf16.gmra.mxu0 %vm377_vm3, %v15675_v46 }
 0x16a   :  { %13595 = vmatprep.mubr.msk.bf16.mxu0 %vm377_vm3, %v15685_v51 }
 0x171   :  { %13596 = vmatmul.mubr.msk.bf16.gmra.mxu0 %vm377_vm3, %v15687_v52 }
 0x172   :  { %13599 = vmatprep.mubr.msk.bf16.mxu0 %vm377_vm3, %v15697_v57 }
 0x179   :  { %13600 = vmatmul.mubr.msk.bf16.gmra.mxu0 %vm377_vm3, %v15699_v58 }
 0x17a   :  { %13625 = vmatprep.mubr.msk.bf16.mxu0 %vm377_vm3, %v15657_v17 }
 0x181   :  { %13626 = vmatmul.mubr.msk.bf16.vlgmr.msra.gmra.mxu0 %vm377_vm3, %v15659_v32 }
 0x182   :  { %13629 = vmatprep.mubr.msk.bf16.mxu0 %vm377_vm3, %v15673_v44  ;;  %13662 = vmatpush3.bf16.msra.mxu0 %v15042_v61 }
 0x183   :  { %13699 = vmatprep.subr.bf16.mxu0 %v15043_v63 }
 0x189   :  { %13630 = vmatmul.mubr.msk.bf16.gmra.mxu0 %vm377_vm3, %v15675_v46 }
 0x18a   :  { %13633 = vmatprep.mubr.msk.bf16.mxu0 %vm377_vm3, %v15685_v51 }
 0x191   :  { %13634 = vmatmul.mubr.msk.bf16.gmra.mxu0 %vm377_vm3, %v15687_v52 }
 0x192   :  { %13637 = vmatprep.mubr.msk.bf16.mxu0 %vm377_vm3, %v15697_v57 }
 0x199   :  { %13638 = vmatmul.mubr.msk.bf16.gmra.mxu0 %vm377_vm3, %v15699_v58 }
 0x19a   :  { %13663 = vmatprep.mubr.msk.bf16.mxu0 %vm377_vm3, %v15657_v17 }
 0x1a1   :  { %13664 = vmatmul.mubr.msk.bf16.vlgmr.msra.gmra.mxu0 %vm377_vm3, %v15659_v32 }
 0x1a2   :  { %13667 = vmatprep.mubr.msk.bf16.mxu0 %vm377_vm3, %v15673_v44  ;;  %13700 = vmatpush3.bf16.msra.mxu0 %v15043_v63 }
 0x1a3   :  { %13737 = vmatprep.subr.bf16.mxu0 %v15044_v0 }
 0x1a9   :  { %13668 = vmatmul.mubr.msk.bf16.gmra.mxu0 %vm377_vm3, %v15675_v46 }
 0x1aa   :  { %13671 = vmatprep.mubr.msk.bf16.mxu0 %vm377_vm3, %v15685_v51 }
 0x1b1   :  { %13672 = vmatmul.mubr.msk.bf16.gmra.mxu0 %vm377_vm3, %v15687_v52 }
 0x1b2   :  { %13675 = vmatprep.mubr.msk.bf16.mxu0 %vm377_vm3, %v15697_v57 }
 0x1b9   :  { %13676 = vmatmul.mubr.msk.bf16.gmra.mxu0 %vm377_vm3, %v15699_v58 }
 0x1ba   :  { %13701 = vmatprep.mubr.msk.bf16.mxu0 %vm377_vm3, %v15657_v17 }
 0x1c0   :  { %v15809_v1 = vpop.f32.mrf.mxu1  ;;  %v15811_v2 = vpop.f32.mrf.mxu0 }
 0x1c1   :  { %13702 = vmatmul.mubr.msk.bf16.vlgmr.msra.gmra.mxu0 %vm377_vm3, %v15659_v32 }
 0x1c2   :  { %13705 = vmatprep.mubr.msk.bf16.mxu0 %vm377_vm3, %v15673_v44  ;;  %v15817_v3 = vpop.f32.mrf.mxu1  ;;  %v15819_v4 = vpop.f32.mrf.mxu0  ;;  %13738 = vmatpush3.bf16.msra.mxu0 %v15044_v0 }
 0x1c4   :  { %v15821_v5 = vpop.f32.mrf.mxu1  ;;  %v15823_v6 = vpop.f32.mrf.mxu0 }
 0x1c5   :  { %v504_v49 = vpack.c.bf16 %v15821_v5, %v15809_v1 }
 0x1c6   :  { %v15825_v7 = vpop.f32.mrf.mxu1  ;;  %v15827_v8 = vpop.f32.mrf.mxu0 }
 0x1c7   :  { %v503_v53 = vpack.c.bf16 %v15825_v7, %v15817_v3 }
 0x1c8   :  { %v13441_v9 = vpop.f32.mrf.mxu1  ;;  %v15829_v10 = vpop.f32.mrf.mxu0 }
 0x1c9   :  { %13706 = vmatmul.mubr.msk.bf16.gmra.mxu0 %vm377_vm3, %v15675_v46 }
 0x1ca   :  { %13709 = vmatprep.mubr.msk.bf16.mxu0 %vm377_vm3, %v15685_v51  ;;  %v452_v11 = vpop.f32.mrf.mxu1  ;;  %v15835_v12 = vpop.f32.mrf.mxu0 }
 0x1cc   :  { %v13442_v13 = vpop.f32.mrf.mxu1  ;;  %v15837_v14 = vpop.f32.mrf.mxu0 }
 0x1ce   :  { %v455_v15 = vpop.f32.mrf.mxu1  ;;  %v15839_v18 = vpop.f32.mrf.mxu0 }
 0x1cf   :  { %v505_v16 = vpack.c.bf16 %v455_v15, %v452_v11  ;;  %v695_v15 = vpack.c.bf16 %v15839_v18, %v15835_v12 }
 0x1d1   :  { %v13445_v19 = vpop.f32.mrf.mxu1  ;;  %v15841_v20 = vpop.f32.mrf.mxu0  ;;  %13710 = vmatmul.mubr.msk.bf16.gmra.mxu0 %vm377_vm3, %v15687_v52 }
 0x1d2   :  { %13713 = vmatprep.mubr.msk.bf16.mxu0 %vm377_vm3, %v15697_v57 }
 0x1d3   :  { %v468_v21 = vpop.f32.mrf.mxu1  ;;  %v15847_v22 = vpop.f32.mrf.mxu0 }
 0x1d5   :  { %v13446_v23 = vpop.f32.mrf.mxu1  ;;  %v15849_v24 = vpop.f32.mrf.mxu0 }
 0x1d6   :  { %v508_v39 = vpack.c.bf16 %v13446_v23, %v13445_v19  ;;  %v698_v63 = vpack.c.bf16 %v15849_v24, %v15841_v20  ;;  %v15048_v24 = vld [vmem:[%s17920_s3 + $0x18] sm:$0xff]  }
 0x1d7   :  { %v471_v25 = vpop.f32.mrf.mxu1  ;;  %v15851_v26 = vpop.f32.mrf.mxu0 }
 0x1d8   :  { %v507_v42 = vpack.c.bf16 %v471_v25, %v468_v21  ;;  %v697_v3 = vpack.c.bf16 %v15851_v26, %v15847_v22  ;;  %v694_v21 = vpack.c.bf16 %v15823_v6, %v15811_v2  ;;  %v693_v22 = vpack.c.bf16 %v15827_v8, %v15819_v4  ;;  %v15049_v6 = vld [vmem:[%s17920_s3 + $0x20] sm:$0xff]  }
 0x1d9   :  { %v13449_v27 = vpop.f32.mrf.mxu1  ;;  %v13487_v28 = vpop.f32.mrf.mxu0  ;;  %13714 = vmatmul.mubr.msk.bf16.gmra.mxu0 %vm377_vm3, %v15699_v58 }
 0x1da   :  { %13739 = vmatprep.mubr.msk.bf16.mxu0 %vm377_vm3, %v15657_v17 }
 0x1db   :  { %v484_v29 = vpop.f32.mrf.mxu1  ;;  %v673_v30 = vpop.f32.mrf.mxu0 }
 0x1dd   :  { %v13450_v31 = vpop.f32.mrf.mxu1  ;;  %v13488_v33 = vpop.f32.mrf.mxu0 }
 0x1de   :  { %v510_v34 = vpack.c.bf16 %v13450_v31, %v13449_v27  ;;  %v700_v55 = vpack.c.bf16 %v13488_v33, %v13487_v28 }
 0x1df   :  { %v487_v35 = vpop.f32.mrf.mxu1  ;;  %v676_v36 = vpop.f32.mrf.mxu0 }
 0x1e0   :  { %v509_v37 = vpack.c.bf16 %v487_v35, %v484_v29  ;;  %13451 = vmatprep.subr.bf16.mxu1 %v510_v34  ;;  %v699_v61 = vpack.c.bf16 %v676_v36, %v673_v30 }
 0x1e1   :  { %13452 = vmatpush3.bf16.msra.mxu1 %v510_v34  ;;  %v15857_v38 = vpop.f32.mrf.mxu0  ;;  %13740 = vmatmul.mubr.msk.bf16.vlgmr.msra.gmra.mxu0 %vm377_vm3, %v15659_v32 }
 0x1e2   :  { %13453 = vmatprep.subr.bf16.mxu1 %v509_v37  ;;  %13743 = vmatprep.mubr.msk.bf16.mxu0 %vm377_vm3, %v15673_v44  ;;  %v506_v44 = vpack.c.bf16 %v13442_v13, %v13441_v9  ;;  %v696_v9 = vpack.c.bf16 %v15837_v14, %v15829_v10 }
 0x1e3   :  { %v15863_v17 = vpop.f32.mrf.mxu0 }
 0x1e5   :  { %13454 = vmatpush3.bf16.msra.mxu1 %v509_v37  ;;  %v15865_v40 = vpop.f32.mrf.mxu0 }
 0x1e6   :  { %13455 = vmatprep.subr.bf16.mxu1 %v508_v39 }
 0x1e7   :  { %v15867_v41 = vpop.f32.mrf.mxu0 }
 0x1e9   :  { %13456 = vmatpush3.bf16.msra.mxu1 %v508_v39  ;;  %v15869_v43 = vpop.f32.mrf.mxu0  ;;  %13744 = vmatmul.mubr.msk.bf16.gmra.mxu0 %vm377_vm3, %v15675_v46 }
 0x1ea   :  { %13457 = vmatprep.subr.bf16.mxu1 %v507_v42  ;;  %13747 = vmatprep.mubr.msk.bf16.mxu0 %vm377_vm3, %v15685_v51 }
 0x1eb   :  { %v15875_v32 = vpop.f32.mrf.mxu0 }
 0x1ed   :  { %13458 = vmatpush3.bf16.msra.mxu1 %v507_v42  ;;  %v15877_v45 = vpop.f32.mrf.mxu0 }
 0x1ee   :  { %13459 = vmatprep.subr.bf16.mxu1 %v506_v44  ;;  %v880_v34 = vpack.c.bf16 %v15877_v45, %v15869_v43 }
 0x1ef   :  { %v15879_v47 = vpop.f32.mrf.mxu0 }
 0x1f0   :  { %v879_v37 = vpack.c.bf16 %v15879_v47, %v15875_v32 }
 0x1f1   :  { %13460 = vmatpush3.bf16.msra.mxu1 %v506_v44  ;;  %v15881_v48 = vpop.f32.mrf.mxu0  ;;  %13748 = vmatmul.mubr.msk.bf16.gmra.mxu0 %vm377_vm3, %v15687_v52  ;;  %v878_v44 = vpack.c.bf16 %v15865_v40, %v15857_v38  ;;  %v15051_v40 = vld [vmem:[%s17920_s3 + $0x30] sm:$0xff]  }
 0x1f2   :  { %13461 = vmatprep.subr.bf16.mxu1 %v505_v16  ;;  %13751 = vmatprep.mubr.msk.bf16.mxu0 %vm377_vm3, %v15697_v57 }
 0x1f3   :  { %v15887_v46 = vpop.f32.mrf.mxu0 }
 0x1f5   :  { %13462 = vmatpush3.bf16.msra.mxu1 %v505_v16  ;;  %v15891_v50 = vpop.f32.mrf.mxu0  ;;  %v877_v16 = vpack.c.bf16 %v15867_v41, %v15863_v17 }
 0x1f6   :  { %13463 = vmatprep.subr.bf16.mxu1 %v504_v49  ;;  %v882_v27 = vpack.c.bf16 %v15891_v50, %v15881_v48 }
 0x1f7   :  { %v15893_v51 = vpop.f32.mrf.mxu0 }
 0x1f8   :  { %v881_v30 = vpack.c.bf16 %v15893_v51, %v15887_v46  ;;  %v15050_v46 = vld [vmem:[%s17920_s3 + $0x28] sm:$0xff]  }
 0x1f9   :  { %13464 = vmatpush3.bf16.msra.mxu1 %v504_v49  ;;  %v13525_v52 = vpop.f32.mrf.mxu0  ;;  %13752 = vmatmul.mubr.msk.bf16.gmra.mxu0 %vm377_vm3, %v15699_v58 }
 0x1fa   :  { %13465 = vmatprep.subr.bf16.mxu1 %v503_v53 }
 0x1fb   :  { %v857_v54 = vpop.f32.mrf.mxu0 }
 0x1fd   :  { %13466 = vmatpush3.bf16.msra.mxu1 %v503_v53  ;;  %v13526_v57 = vpop.f32.mrf.mxu0 }
 0x1fe   :  { %13489 = vmatprep.subr.bf16.mxu1 %v700_v55  ;;  %v884_v23 = vpack.c.bf16 %v13526_v57, %v13525_v52 }
 0x1ff   :  { %v860_v60 = vpop.f32.mrf.mxu0 }
 0x200   :  { %13468 = vmatmul.mubr.bf16.vlgmr.msra.gmra.mxu1 %v15046_v56  ;;  %v883_v26 = vpack.c.bf16 %v860_v60, %v857_v54 }
 0x201   :  { %13490 = vmatpush3.bf16.msra.mxu1 %v700_v55  ;;  %v15905_v62 = vpop.f32.mrf.mxu0  ;;  %13505 = vmatprep.mubr.bf16.mxu1 %v15047_v59 }
 0x202   :  { %13491 = vmatprep.subr.bf16.mxu1 %v699_v61 }
 0x203   :  { %v15907_v58 = vpop.f32.mrf.mxu0 }
 0x205   :  { %13492 = vmatpush3.bf16.msra.mxu1 %v699_v61  ;;  %v15911_v0 = vpop.f32.mrf.mxu0 }
 0x206   :  { %13493 = vmatprep.subr.bf16.mxu1 %v698_v63 }
 0x207   :  { %v15913_v1 = vpop.f32.mrf.mxu0 }
 0x209   :  { %13494 = vmatpush3.bf16.msra.mxu1 %v698_v63  ;;  %v15917_v5 = vpop.f32.mrf.mxu0 }
 0x20a   :  { %13495 = vmatprep.subr.bf16.mxu1 %v697_v3 }
 0x20b   :  { %v15919_v7 = vpop.f32.mrf.mxu0 }
 0x20d   :  { %13496 = vmatpush3.bf16.msra.mxu1 %v697_v3  ;;  %v15923_v11 = vpop.f32.mrf.mxu0 }
 0x20e   :  { %13497 = vmatprep.subr.bf16.mxu1 %v696_v9  ;;  %v1064_v57 = vpack.c.bf16 %v15923_v11, %v15917_v5 }
 0x20f   :  { %v15925_v13 = vpop.f32.mrf.mxu0 }
 0x210   :  { %v1063_v61 = vpack.c.bf16 %v15925_v13, %v15919_v7 }
 0x211   :  { %13498 = vmatpush3.bf16.msra.mxu1 %v696_v9  ;;  %v15929_v19 = vpop.f32.mrf.mxu0  ;;  %v1062_v9 = vpack.c.bf16 %v15911_v0, %v15905_v62  ;;  %v15053_v0 = vld [vmem:[%s17920_s3 + $0x40] sm:$0xff]  }
 0x212   :  { %13499 = vmatprep.subr.bf16.mxu1 %v695_v15 }
 0x213   :  { %v15931_v20 = vpop.f32.mrf.mxu0 }
 0x215   :  { %13500 = vmatpush3.bf16.msra.mxu1 %v695_v15  ;;  %v15935_v10 = vpop.f32.mrf.mxu0  ;;  %v1061_v15 = vpack.c.bf16 %v15913_v1, %v15907_v58 }
 0x216   :  { %13501 = vmatprep.subr.bf16.mxu1 %v694_v21  ;;  %v1066_v51 = vpack.c.bf16 %v15935_v10, %v15929_v19 }
 0x217   :  { %v15937_v14 = vpop.f32.mrf.mxu0 }
 0x218   :  { %v1065_v54 = vpack.c.bf16 %v15937_v14, %v15931_v20  ;;  %v15052_v20 = vld [vmem:[%s17920_s3 + $0x38] sm:$0xff]  }
 0x219   :  { %13502 = vmatpush3.bf16.msra.mxu1 %v694_v21  ;;  %v13563_v12 = vpop.f32.mrf.mxu0 }
 0x21a   :  { %13503 = vmatprep.subr.bf16.mxu1 %v693_v22 }
 0x21b   :  { %v1041_v18 = vpop.f32.mrf.mxu0 }
 0x21d   :  { %13504 = vmatpush3.bf16.msra.mxu1 %v693_v22  ;;  %v13564_v2 = vpop.f32.mrf.mxu0 }
 0x21e   :  { %13527 = vmatprep.subr.bf16.mxu1 %v884_v23  ;;  %v1068_v48 = vpack.c.bf16 %v13564_v2, %v13563_v12 }
 0x21f   :  { %v1044_v25 = vpop.f32.mrf.mxu0 }
 0x220   :  { %13506 = vmatmul.mubr.bf16.vlgmr.msra.gmra.mxu1 %v15048_v24  ;;  %v1067_v50 = vpack.c.bf16 %v1044_v25, %v1041_v18 }
 0x221   :  { %13528 = vmatpush3.bf16.msra.mxu1 %v884_v23  ;;  %v15947_v4 = vpop.f32.mrf.mxu0  ;;  %13543 = vmatprep.mubr.bf16.mxu1 %v15049_v6 }
 0x222   :  { %13529 = vmatprep.subr.bf16.mxu1 %v883_v26 }
 0x223   :  { %v15949_v8 = vpop.f32.mrf.mxu0 }
 0x225   :  { %13530 = vmatpush3.bf16.msra.mxu1 %v883_v26  ;;  %v15953_v28 = vpop.f32.mrf.mxu0 }
 0x226   :  { %13531 = vmatprep.subr.bf16.mxu1 %v882_v27 }
 0x227   :  { %v15955_v29 = vpop.f32.mrf.mxu0 }
 0x229   :  { %13532 = vmatpush3.bf16.msra.mxu1 %v882_v27  ;;  %v15959_v31 = vpop.f32.mrf.mxu0 }
 0x22a   :  { %13533 = vmatprep.subr.bf16.mxu1 %v881_v30 }
 0x22b   :  { %v15961_v33 = vpop.f32.mrf.mxu0 }
 0x22d   :  { %13534 = vmatpush3.bf16.msra.mxu1 %v881_v30  ;;  %v15965_v35 = vpop.f32.mrf.mxu0 }
 0x22e   :  { %13535 = vmatprep.subr.bf16.mxu1 %v880_v34  ;;  %v1248_v2 = vpack.c.bf16 %v15965_v35, %v15959_v31 }
 0x22f   :  { %v15967_v36 = vpop.f32.mrf.mxu0 }
 0x230   :  { %v1247_v26 = vpack.c.bf16 %v15967_v36, %v15961_v33 }
 0x231   :  { %13536 = vmatpush3.bf16.msra.mxu1 %v880_v34  ;;  %v15971_v39 = vpop.f32.mrf.mxu0  ;;  %v1246_v34 = vpack.c.bf16 %v15953_v28, %v15947_v4  ;;  %v15055_v28 = vld [vmem:[%s17920_s3 + $0x50] sm:$0xff]  }
 0x232   :  { %13537 = vmatprep.subr.bf16.mxu1 %v879_v37 }
 0x233   :  { %v15973_v42 = vpop.f32.mrf.mxu0 }
 0x235   :  { %13538 = vmatpush3.bf16.msra.mxu1 %v879_v37  ;;  %v15977_v43 = vpop.f32.mrf.mxu0  ;;  %v1245_v37 = vpack.c.bf16 %v15955_v29, %v15949_v8 }
 0x236   :  { %13539 = vmatprep.subr.bf16.mxu1 %v878_v44  ;;  %v1250_v14 = vpack.c.bf16 %v15977_v43, %v15971_v39 }
 0x237   :  { %v15979_v45 = vpop.f32.mrf.mxu0 }
 0x238   :  { %v1249_v18 = vpack.c.bf16 %v15979_v45, %v15973_v42  ;;  %v15054_v42 = vld [vmem:[%s17920_s3 + $0x48] sm:$0xff]  }
 0x239   :  { %13540 = vmatpush3.bf16.msra.mxu1 %v878_v44  ;;  %v13601_v32 = vpop.f32.mrf.mxu0 }
 0x23a   :  { %13541 = vmatprep.subr.bf16.mxu1 %v877_v16 }
 0x23b   :  { %v1225_v47 = vpop.f32.mrf.mxu0 }
 0x23d   :  { %13542 = vmatpush3.bf16.msra.mxu1 %v877_v16  ;;  %v13602_v38 = vpop.f32.mrf.mxu0 }
 0x23e   :  { %13565 = vmatprep.subr.bf16.mxu1 %v1068_v48  ;;  %v1252_v19 = vpack.c.bf16 %v13602_v38, %v13601_v32 }
 0x23f   :  { %v1228_v49 = vpop.f32.mrf.mxu0 }
 0x240   :  { %13544 = vmatmul.mubr.bf16.vlgmr.msra.gmra.mxu1 %v15050_v46  ;;  %v1251_v10 = vpack.c.bf16 %v1228_v49, %v1225_v47 }
 0x241   :  { %13566 = vmatpush3.bf16.msra.mxu1 %v1068_v48  ;;  %v15989_v17 = vpop.f32.mrf.mxu0  ;;  %13581 = vmatprep.mubr.bf16.mxu1 %v15051_v40 }
 0x242   :  { %13567 = vmatprep.subr.bf16.mxu1 %v1067_v50 }
 0x243   :  { %v15991_v41 = vpop.f32.mrf.mxu0 }
 0x245   :  { %13568 = vmatpush3.bf16.msra.mxu1 %v1067_v50  ;;  %v15995_v53 = vpop.f32.mrf.mxu0 }
 0x246   :  { %13569 = vmatprep.subr.bf16.mxu1 %v1066_v51 }
 0x247   :  { %v15997_v52 = vpop.f32.mrf.mxu0 }
 0x249   :  { %13570 = vmatpush3.bf16.msra.mxu1 %v1066_v51  ;;  %v16001_v55 = vpop.f32.mrf.mxu0 }
 0x24a   :  { %13571 = vmatprep.subr.bf16.mxu1 %v1065_v54 }
 0x24b   :  { %v16003_v56 = vpop.f32.mrf.mxu0 }
 0x24d   :  { %13572 = vmatpush3.bf16.msra.mxu1 %v1065_v54  ;;  %v16007_v59 = vpop.f32.mrf.mxu0 }
 0x24e   :  { %13573 = vmatprep.subr.bf16.mxu1 %v1064_v57  ;;  %v1432_v38 = vpack.c.bf16 %v16007_v59, %v16001_v55  ;;  %v1429_v59 = vpack.c.bf16 %v15997_v52, %v15991_v41 }
 0x24f   :  { %v16009_v60 = vpop.f32.mrf.mxu0 }
 0x250   :  { %v1431_v50 = vpack.c.bf16 %v16009_v60, %v16003_v56  ;;  %v15056_v60 = vld [vmem:[%s17920_s3 + $0x58] sm:$0xff]  }
 0x251   :  { %13574 = vmatpush3.bf16.msra.mxu1 %v1064_v57  ;;  %v16013_v63 = vpop.f32.mrf.mxu0  ;;  %v1430_v57 = vpack.c.bf16 %v15995_v53, %v15989_v17  ;;  %v15057_v17 = vld [vmem:[%s17920_s3 + $0x60] sm:$0xff]  }
 0x252   :  { %13575 = vmatprep.subr.bf16.mxu1 %v1063_v61 }
 0x253   :  { %v16015_v3 = vpop.f32.mrf.mxu0 }
 0x255   :  { %13576 = vmatpush3.bf16.msra.mxu1 %v1063_v61  ;;  %v16019_v5 = vpop.f32.mrf.mxu0 }
 0x256   :  { %13577 = vmatprep.subr.bf16.mxu1 %v1062_v9  ;;  %v1434_v45 = vpack.c.bf16 %v16019_v5, %v16013_v63 }
 0x257   :  { %v16021_v11 = vpop.f32.mrf.mxu0 }
 0x258   :  { %v1433_v47 = vpack.c.bf16 %v16021_v11, %v16015_v3 }
 0x259   :  { %13578 = vmatpush3.bf16.msra.mxu1 %v1062_v9  ;;  %v13639_v7 = vpop.f32.mrf.mxu0 }
 0x25a   :  { %13579 = vmatprep.subr.bf16.mxu1 %v1061_v15 }
 0x25b   :  { %v1409_v13 = vpop.f32.mrf.mxu0 }
 0x25d   :  { %13580 = vmatpush3.bf16.msra.mxu1 %v1061_v15  ;;  %v13640_v62 = vpop.f32.mrf.mxu0 }
 0x25e   :  { %13603 = vmatprep.subr.bf16.mxu1 %v1252_v19  ;;  %v1436_v39 = vpack.c.bf16 %v13640_v62, %v13639_v7 }
 0x25f   :  { %v1412_v21 = vpop.f32.mrf.mxu0 }
 0x260   :  { %13582 = vmatmul.mubr.bf16.vlgmr.msra.gmra.mxu1 %v15052_v20  ;;  %v1435_v43 = vpack.c.bf16 %v1412_v21, %v1409_v13 }
 0x261   :  { %13604 = vmatpush3.bf16.msra.mxu1 %v1252_v19  ;;  %v16031_v58 = vpop.f32.mrf.mxu0  ;;  %13619 = vmatprep.mubr.bf16.mxu1 %v15053_v0 }
 0x262   :  { %13605 = vmatprep.subr.bf16.mxu1 %v1251_v10 }
 0x263   :  { %v16033_v1 = vpop.f32.mrf.mxu0 }
 0x265   :  { %13606 = vmatpush3.bf16.msra.mxu1 %v1251_v10  ;;  %v16037_v22 = vpop.f32.mrf.mxu0 }
 0x266   :  { %13607 = vmatprep.subr.bf16.mxu1 %v1250_v14  ;;  %v1614_v0 = vpack.c.bf16 %v16037_v22, %v16031_v58  ;;  %v15059_v58 = vld [vmem:[%s17920_s3 + $0x70] sm:$0xff]  }
 0x267   :  { %v16039_v12 = vpop.f32.mrf.mxu0 }
 0x268   :  { %v1613_v10 = vpack.c.bf16 %v16039_v12, %v16033_v1 }
 0x269   :  { %13608 = vmatpush3.bf16.msra.mxu1 %v1250_v14  ;;  %v16043_v23 = vpop.f32.mrf.mxu0 }
 0x26a   :  { %13609 = vmatprep.subr.bf16.mxu1 %v1249_v18 }
 0x26b   :  { %v16045_v24 = vpop.f32.mrf.mxu0 }
 0x26d   :  { %13610 = vmatpush3.bf16.msra.mxu1 %v1249_v18  ;;  %v16049_v6 = vpop.f32.mrf.mxu0 }
 0x26e   :  { %13611 = vmatprep.subr.bf16.mxu1 %v1248_v2  ;;  %v1616_v13 = vpack.c.bf16 %v16049_v6, %v16043_v23  ;;  %v15058_v23 = vld [vmem:[%s17920_s3 + $0x68] sm:$0xff]  }
 0x26f   :  { %v16051_v25 = vpop.f32.mrf.mxu0 }
 0x270   :  { %v1615_v20 = vpack.c.bf16 %v16051_v25, %v16045_v24 }
 0x271   :  { %13612 = vmatpush3.bf16.msra.mxu1 %v1248_v2  ;;  %v16055_v27 = vpop.f32.mrf.mxu0 }
 0x272   :  { %13613 = vmatprep.subr.bf16.mxu1 %v1247_v26 }
 0x273   :  { %v16057_v30 = vpop.f32.mrf.mxu0 }
 0x275   :  { %13614 = vmatpush3.bf16.msra.mxu1 %v1247_v26  ;;  %v16061_v31 = vpop.f32.mrf.mxu0 }
 0x276   :  { %13615 = vmatprep.subr.bf16.mxu1 %v1246_v34  ;;  %v1618_v52 = vpack.c.bf16 %v16061_v31, %v16055_v27 }
 0x277   :  { %v16063_v35 = vpop.f32.mrf.mxu0 }
 0x278   :  { %v1617_v15 = vpack.c.bf16 %v16063_v35, %v16057_v30 }
 0x279   :  { %13616 = vmatpush3.bf16.msra.mxu1 %v1246_v34  ;;  %v13677_v33 = vpop.f32.mrf.mxu0 }
 0x27a   :  { %13617 = vmatprep.subr.bf16.mxu1 %v1245_v37 }
 0x27b   :  { %v1593_v36 = vpop.f32.mrf.mxu0 }
 0x27d   :  { %13618 = vmatpush3.bf16.msra.mxu1 %v1245_v37  ;;  %v13678_v4 = vpop.f32.mrf.mxu0 }
 0x27e   :  { %13641 = vmatprep.subr.bf16.mxu1 %v1436_v39  ;;  %v1620_v56 = vpack.c.bf16 %v13678_v4, %v13677_v33  ;;  %v15061_v4 = vld [vmem:[%s17920_s3 + $0x80] sm:$0xff]  }
 0x27f   :  { %v1596_v44 = vpop.f32.mrf.mxu0 }
 0x280   :  { %13620 = vmatmul.mubr.bf16.vlgmr.msra.gmra.mxu1 %v15054_v42  ;;  %v1619_v5 = vpack.c.bf16 %v1596_v44, %v1593_v36 }
 0x281   :  { %13642 = vmatpush3.bf16.msra.mxu1 %v1436_v39  ;;  %v16073_v8 = vpop.f32.mrf.mxu0  ;;  %13657 = vmatprep.mubr.bf16.mxu1 %v15055_v28  ;;  %v15060_v39 = vld [vmem:[%s17920_s3 + $0x78] sm:$0xff]  }
 0x282   :  { %13643 = vmatprep.subr.bf16.mxu1 %v1435_v43 }
 0x283   :  { %v16075_v29 = vpop.f32.mrf.mxu0 }
 0x285   :  { %13644 = vmatpush3.bf16.msra.mxu1 %v1435_v43  ;;  %v16079_v16 = vpop.f32.mrf.mxu0 }
 0x286   :  { %13645 = vmatprep.subr.bf16.mxu1 %v1434_v45  ;;  %v1798_v31 = vpack.c.bf16 %v16079_v16, %v16073_v8 }
 0x287   :  { %v16081_v32 = vpop.f32.mrf.mxu0 }
 0x288   :  { %v1797_v37 = vpack.c.bf16 %v16081_v32, %v16075_v29  ;;  %v15062_v32 = vld [vmem:[%s17920_s3 + $0x88] sm:$0xff]  }
 0x289   :  { %13646 = vmatpush3.bf16.msra.mxu1 %v1434_v45  ;;  %v16085_v48 = vpop.f32.mrf.mxu0 }
 0x28a   :  { %13647 = vmatprep.subr.bf16.mxu1 %v1433_v47 }
 0x28b   :  { %v16087_v46 = vpop.f32.mrf.mxu0 }
 0x28d   :  { %13648 = vmatpush3.bf16.msra.mxu1 %v1433_v47  ;;  %v16091_v40 = vpop.f32.mrf.mxu0 }
 0x28e   :  { %13649 = vmatprep.subr.bf16.mxu1 %v1432_v38  ;;  %v1800_v26 = vpack.c.bf16 %v16091_v40, %v16085_v48 }
 0x28f   :  { %v16093_v49 = vpop.f32.mrf.mxu0 }
 0x290   :  { %v1799_v30 = vpack.c.bf16 %v16093_v49, %v16087_v46 }
 0x291   :  { %13650 = vmatpush3.bf16.msra.mxu1 %v1432_v38  ;;  %v13711_v51 = vpop.f32.mrf.mxu0 }
 0x292   :  { %13651 = vmatprep.subr.bf16.mxu1 %v1431_v50 }
 0x293   :  { %v16097_v54 = vpop.f32.mrf.mxu0 }
 0x295   :  { %13652 = vmatpush3.bf16.msra.mxu1 %v1431_v50  ;;  %v13712_v61 = vpop.f32.mrf.mxu0  ;;  %v15063_v50 = vld [vmem:[%s17921_s8 + $0x8] sm:$0xff]  }
 0x296   :  { %13653 = vmatprep.subr.bf16.mxu1 %v1430_v57  ;;  %v1802_v1 = vpack.c.bf16 %v13712_v61, %v13711_v51  ;;  %13775 = vmatprep.subr.bf16.mxu0 %v15063_v50  ;;  %v16172_v61 = vld [vmem:[%s17921_s8 + $0x18] sm:$0xff]  }
 0x297   :  { %v1764_v55 = vpop.f32.mrf.mxu0  ;;  %13776 = vmatpush3.bf16.msra.mxu0 %v15063_v50 }
 0x298   :  { %v1801_v6 = vpack.c.bf16 %v1764_v55, %v16097_v54  ;;  %v15064_v54 = vld [vmem:[%s17921_s8] sm:$0xff]  }
 0x299   :  { %13654 = vmatpush3.bf16.msra.mxu1 %v1430_v57  ;;  %v13715_v63 = vpop.f32.mrf.mxu0  ;;  %13777 = vmatprep.subr.bf16.mxu0 %v15064_v54 }
 0x29a   :  { %13655 = vmatprep.subr.bf16.mxu1 %v1429_v59 }
 0x29b   :  { %v1777_v3 = vpop.f32.mrf.mxu0  ;;  %13778 = vmatpush3.bf16.msra.mxu0 %v15064_v54 }
 0x29c   :  { %13791 = vmatprep.subr.bf16.mxu0 %v16172_v61 }
 0x29d   :  { %13656 = vmatpush3.bf16.msra.mxu1 %v1429_v59  ;;  %v13716_v9 = vpop.f32.mrf.mxu0 }
 0x29e   :  { %13679 = vmatprep.subr.bf16.mxu1 %v1620_v56  ;;  %v1804_v18 = vpack.c.bf16 %v13716_v9, %v13715_v63 }
 0x29f   :  { %v1780_v53 = vpop.f32.mrf.mxu0 }
 0x2a0   :  { %13658 = vmatmul.mubr.bf16.vlgmr.msra.gmra.mxu1 %v15056_v60  ;;  %v1803_v22 = vpack.c.bf16 %v1780_v53, %v1777_v3 }
 0x2a1   :  { %13680 = vmatpush3.bf16.msra.mxu1 %v1620_v56  ;;  %v16109_v41 = vpop.f32.mrf.mxu0  ;;  %13695 = vmatprep.mubr.bf16.mxu1 %v15057_v17 }
 0x2a2   :  { %13681 = vmatprep.subr.bf16.mxu1 %v1619_v5 }
 0x2a3   :  { %v16113_v11 = vpop.f32.mrf.mxu0 }
 0x2a5   :  { %13682 = vmatpush3.bf16.msra.mxu1 %v1619_v5  ;;  %v16117_v7 = vpop.f32.mrf.mxu0 }
 0x2a6   :  { %13683 = vmatprep.subr.bf16.mxu1 %v1618_v52  ;;  %v1982_v45 = vpack.c.bf16 %v16117_v7, %v16109_v41 }
 0x2a7   :  { %v16121_v19 = vpop.f32.mrf.mxu0 }
 0x2a8   :  { %v1981_v16 = vpack.c.bf16 %v16121_v19, %v16113_v11 }
 0x2a9   :  { %13684 = vmatpush3.bf16.msra.mxu1 %v1618_v52  ;;  %v16125_v62 = vpop.f32.mrf.mxu0 }
 0x2aa   :  { %13685 = vmatprep.subr.bf16.mxu1 %v1617_v15 }
 0x2ab   :  { %v16129_v21 = vpop.f32.mrf.mxu0 }
 0x2ad   :  { %13686 = vmatpush3.bf16.msra.mxu1 %v1617_v15  ;;  %v13746_v14 = vpop.f32.mrf.mxu0 }
 0x2ae   :  { %13687 = vmatprep.subr.bf16.mxu1 %v1616_v13  ;;  %v1984_v8 = vpack.c.bf16 %v13746_v14, %v16125_v62 }
 0x2af   :  { %v1932_v24 = vpop.f32.mrf.mxu0 }
 0x2b0   :  { %v1983_v29 = vpack.c.bf16 %v1932_v24, %v16129_v21 }
 0x2b1   :  { %13688 = vmatpush3.bf16.msra.mxu1 %v1616_v13  ;;  %v13749_v2 = vpop.f32.mrf.mxu0 }
 0x2b2   :  { %13689 = vmatprep.subr.bf16.mxu1 %v1615_v20 }
 0x2b3   :  { %v1945_v12 = vpop.f32.mrf.mxu0 }
 0x2b5   :  { %13690 = vmatpush3.bf16.msra.mxu1 %v1615_v20  ;;  %v13750_v25 = vpop.f32.mrf.mxu0 }
 0x2b6   :  { %13691 = vmatprep.subr.bf16.mxu1 %v1614_v0  ;;  %v1986_v44 = vpack.c.bf16 %v13750_v25, %v13749_v2 }
 0x2b7   :  { %v1948_v27 = vpop.f32.mrf.mxu0 }
 0x2b8   :  { %v1985_v43 = vpack.c.bf16 %v1948_v27, %v1945_v12 }
 0x2b9   :  { %13692 = vmatpush3.bf16.msra.mxu1 %v1614_v0  ;;  %v13753_v34 = vpop.f32.mrf.mxu0  ;;  %v11405_v0 = vld [vmem:[%s17922_s7] ss:$0 sm:$0xff] }
 0x2ba   :  { %13693 = vmatprep.subr.bf16.mxu1 %v1613_v10 }
 0x2bb   :  { %v1961_v35 = vpop.f32.mrf.mxu0 }
 0x2bd   :  { %13694 = vmatpush3.bf16.msra.mxu1 %v1613_v10  ;;  %v13754_v33 = vpop.f32.mrf.mxu0 }
 0x2be   :  { %13717 = vmatprep.subr.bf16.mxu1 %v1804_v18  ;;  %v1988_v36 = vpack.c.bf16 %v13754_v33, %v13753_v34 }
 0x2bf   :  { %v1964_v42 = vpop.f32.mrf.mxu0 }
 0x2c0   :  { %13696 = vmatmul.mubr.bf16.vlgmr.msra.gmra.mxu1 %v15058_v23  ;;  %v1987_v28 = vpack.c.bf16 %v1964_v42, %v1961_v35  ;;  %v13469_v47 = vpop.f32.mrf.mxu1 }
 0x2c1   :  { %13718 = vmatpush3.bf16.msra.mxu1 %v1804_v18  ;;  %13733 = vmatprep.mubr.bf16.mxu1 %v15059_v58  ;;  %v580_v10 = vadd.f32 %v13469_v47, %v11405_v0 }
 0x2c2   :  { %13719 = vmatprep.subr.bf16.mxu1 %v1803_v22  ;;  %v557_v48 = vpop.f32.mrf.mxu1 }
 0x2c3   :  { %v578_v18 = vadd.f32 %v11405_v0, %v557_v48 }
 0x2c4   :  { %v13470_v46 = vpop.f32.mrf.mxu1 }
 0x2c5   :  { %13720 = vmatpush3.bf16.msra.mxu1 %v1803_v22  ;;  %v581_v24 = vadd.f32 %v13470_v46, %v11405_v0 }
 0x2c6   :  { %13721 = vmatprep.subr.bf16.mxu1 %v1802_v1  ;;  %v560_v38 = vpop.f32.mrf.mxu1 }
 0x2c9   :  { %13722 = vmatpush3.bf16.msra.mxu1 %v1802_v1  ;;  %v579_v1 = vadd.f32 %v11405_v0, %v560_v38 }
 0x2ca   :  { %13723 = vmatprep.subr.bf16.mxu1 %v1801_v6 }
 0x2cd   :  { %13724 = vmatpush3.bf16.msra.mxu1 %v1801_v6 }
 0x2ce   :  { %13725 = vmatprep.subr.bf16.mxu1 %v1800_v26 }
 0x2d1   :  { %13726 = vmatpush3.bf16.msra.mxu1 %v1800_v26 }
 0x2d2   :  { %13727 = vmatprep.subr.bf16.mxu1 %v1799_v30 }
 0x2d5   :  { %13728 = vmatpush3.bf16.msra.mxu1 %v1799_v30 }
 0x2d6   :  { %13729 = vmatprep.subr.bf16.mxu1 %v1798_v31 }
 0x2d9   :  { %13730 = vmatpush3.bf16.msra.mxu1 %v1798_v31 }
 0x2da   :  { %13731 = vmatprep.subr.bf16.mxu1 %v1797_v37 }
 0x2dd   :  { %13732 = vmatpush3.bf16.msra.mxu1 %v1797_v37 }
 0x2de   :  { %13755 = vmatprep.subr.bf16.mxu1 %v1988_v36 }
 0x2e0   :  { %13734 = vmatmul.mubr.bf16.vlgmr.msra.gmra.mxu1 %v15060_v39  ;;  %v13507_v40 = vpop.f32.mrf.mxu1 }
 0x2e1   :  { %13756 = vmatpush3.bf16.msra.mxu1 %v1988_v36  ;;  %13771 = vmatprep.mubr.bf16.mxu1 %v15061_v4  ;;  %v764_v23 = vadd.f32 %v13507_v40, %v580_v10  ;;  %v15067_v10 = vld [vmem:[%s17921_s8 + $0x28] sm:$0xff]  }
 0x2e2   :  { %13757 = vmatprep.subr.bf16.mxu1 %v1987_v28  ;;  %v747_v49 = vpop.f32.mrf.mxu1 }
 0x2e3   :  { %v762_v58 = vadd.f32 %v747_v49, %v578_v18  ;;  %v15070_v18 = vld [vmem:[%s17921_s8 + $0x30] sm:$0xff]  }
 0x2e4   :  { %v13508_v51 = vpop.f32.mrf.mxu1 }
 0x2e5   :  { %13758 = vmatpush3.bf16.msra.mxu1 %v1987_v28  ;;  %v765_v12 = vadd.f32 %v13508_v51, %v581_v24  ;;  %v15072_v24 = vld [vmem:[%s17921_s8 + $0x40] sm:$0xff]  }
 0x2e6   :  { %13759 = vmatprep.subr.bf16.mxu1 %v1986_v44  ;;  %v750_v57 = vpop.f32.mrf.mxu1 }
 0x2e7   :  { %v763_v26 = vadd.f32 %v750_v57, %v579_v1  ;;  %v15076_v1 = vld [vmem:[%s17921_s8 + $0x60] sm:$0xff]  }
 0x2e9   :  { %13760 = vmatpush3.bf16.msra.mxu1 %v1986_v44 }
 0x2ea   :  { %13761 = vmatprep.subr.bf16.mxu1 %v1985_v43 }
 0x2ed   :  { %13762 = vmatpush3.bf16.msra.mxu1 %v1985_v43 }
 0x2ee   :  { %13763 = vmatprep.subr.bf16.mxu1 %v1984_v8 }
 0x2f1   :  { %13764 = vmatpush3.bf16.msra.mxu1 %v1984_v8 }
 0x2f2   :  { %13765 = vmatprep.subr.bf16.mxu1 %v1983_v29 }
 0x2f5   :  { %13766 = vmatpush3.bf16.msra.mxu1 %v1983_v29 }
 0x2f6   :  { %13767 = vmatprep.subr.bf16.mxu1 %v1982_v45 }
 0x2f9   :  { %13768 = vmatpush3.bf16.msra.mxu1 %v1982_v45 }
 0x2fa   :  { %13769 = vmatprep.subr.bf16.mxu1 %v1981_v16 }
 0x2fd   :  { %13770 = vmatpush3.bf16.msra.mxu1 %v1981_v16 }
 0x300   :  { %13772 = vmatmul.mubr.bf16.vlgmr.msra.gmra.mxu1 %v15062_v32  ;;  %v13545_v55 = vpop.f32.mrf.mxu1 }
 0x301   :  { %v948_v22 = vadd.f32 %v13545_v55, %v764_v23  ;;  %v15071_v23 = vld [vmem:[%s17921_s8 + $0x48] sm:$0xff]  }
 0x302   :  { %v931_v59 = vpop.f32.mrf.mxu1 }
 0x303   :  { %v946_v6 = vadd.f32 %v931_v59, %v762_v58  ;;  %v15073_v58 = vld [vmem:[%s17921_s8 + $0x58] sm:$0xff]  }
 0x304   :  { %v13546_v63 = vpop.f32.mrf.mxu1 }
 0x305   :  { %v949_v27 = vadd.f32 %v13546_v63, %v765_v12  ;;  %v15077_v12 = vld [vmem:[%s17921_s8 + $0x78] sm:$0xff]  }
 0x306   :  { %v934_v3 = vpop.f32.mrf.mxu1 }
 0x307   :  { %v947_v35 = vadd.f32 %v934_v3, %v763_v26  ;;  %v15080_v26 = vld [vmem:[%s17921_s8 + $0x80] sm:$0xff]  }
 0x320   :  { %v13583_v56 = vpop.f32.mrf.mxu1 }
 0x321   :  { %v1132_v25 = vadd.f32 %v13583_v56, %v948_v22  ;;  %v15074_v22 = vld [vmem:[%s17921_s8 + $0x50] sm:$0xff]  }
 0x322   :  { %v1115_v60 = vpop.f32.mrf.mxu1 }
 0x323   :  { %v1130_v30 = vadd.f32 %v1115_v60, %v946_v6  ;;  %v15078_v6 = vld [vmem:[%s17921_s8 + $0x70] sm:$0xff]  }
 0x324   :  { %v13584_v9 = vpop.f32.mrf.mxu1 }
 0x325   :  { %v1133_v37 = vadd.f32 %v13584_v9, %v949_v27  ;;  %v15081_v27 = vld [vmem:[%s17923_s4] sm:$0xff]  }
 0x326   :  { %v1118_v17 = vpop.f32.mrf.mxu1  ;;  %13787 = vmatprep.mubr.msk.bf16.mxu1 %vm2097_vm4, %v15081_v27 }
 0x327   :  { %v1131_v39 = vadd.f32 %v1118_v17, %v947_v35 }
 0x340   :  { %v13621_v53 = vpop.f32.mrf.mxu1 }
 0x341   :  { %v1316_v34 = vadd.f32 %v13621_v53, %v1132_v25  ;;  %v15079_v25 = vld [vmem:[%s17921_s8 + $0x88] sm:$0xff]  }
 0x342   :  { %v1299_v5 = vpop.f32.mrf.mxu1 }
 0x343   :  { %v1314_v33 = vadd.f32 %v1299_v5, %v1130_v30 }
 0x344   :  { %v13622_v41 = vpop.f32.mrf.mxu1 }
 0x345   :  { %v1317_v42 = vadd.f32 %v13622_v41, %v1133_v37 }
 0x346   :  { %v1302_v52 = vpop.f32.mrf.mxu1 }
 0x347   :  { %v1315_v43 = vadd.f32 %v1302_v52, %v1131_v39 }
 0x360   :  { %v13659_v11 = vpop.f32.mrf.mxu1 }
 0x361   :  { %v1500_v36 = vadd.f32 %v13659_v11, %v1316_v34 }
 0x362   :  { %v1483_v15 = vpop.f32.mrf.mxu1 }
 0x363   :  { %v1498_v4 = vadd.f32 %v1483_v15, %v1314_v33 }
 0x364   :  { %v13660_v7 = vpop.f32.mrf.mxu1 }
 0x365   :  { %v1501_v8 = vadd.f32 %v13660_v7, %v1317_v42  ;;  %v15082_v42 = vld [vmem:[%s17923_s4 + $0x8] sm:$0xff]  }
 0x366   :  { %v1486_v13 = vpop.f32.mrf.mxu1 }
 0x367   :  { %v1499_v32 = vadd.f32 %v1486_v13, %v1315_v43 }
 0x380   :  { %v13697_v19 = vpop.f32.mrf.mxu1 }
 0x381   :  { %v1684_v28 = vadd.f32 %v13697_v19, %v1500_v36 }
 0x382   :  { %v1667_v20 = vpop.f32.mrf.mxu1 }
 0x383   :  { %v1682_v29 = vadd.f32 %v1667_v20, %v1498_v4 }
 0x384   :  { %v13698_v62 = vpop.f32.mrf.mxu1 }
 0x385   :  { %v1685_v47 = vadd.f32 %v13698_v62, %v1501_v8 }
 0x386   :  { %v1670_v21 = vpop.f32.mrf.mxu1 }
 0x387   :  { %v1683_v40 = vadd.f32 %v1670_v21, %v1499_v32  ;;  %v15066_v21 = vld [vmem:[%s17921_s8 + $0x10] sm:$0xff]  }
 0x3a0   :  { %v13735_v14 = vpop.f32.mrf.mxu1 }
 0x3a1   :  { %v1868_v45 = vadd.f32 %v13735_v14, %v1684_v28  ;;  %v15068_v14 = vld [vmem:[%s17921_s8 + $0x20] sm:$0xff]   ;;  %v15083_v28 = vld [vmem:[%s17923_s4 + $0x10] sm:$0xff]  }
 0x3a2   :  { %v1851_v2 = vpop.f32.mrf.mxu1 }
 0x3a3   :  { %v1866_v48 = vadd.f32 %v1851_v2, %v1682_v29  ;;  %v15075_v2 = vld [vmem:[%s17921_s8 + $0x68] sm:$0xff]  }
 0x3a4   :  { %v13736_v31 = vpop.f32.mrf.mxu1 }
 0x3a5   :  { %v1869_v49 = vadd.f32 %v13736_v31, %v1685_v47  ;;  %v15085_v47 = vld [vmem:[%s17923_s4 + $0x20] sm:$0xff]  }
 0x3a6   :  { %v1854_v44 = vpop.f32.mrf.mxu1 }
 0x3a7   :  { %v1867_v57 = vadd.f32 %v1854_v44, %v1683_v40 }
 0x3c0   :  { %v13773_v16 = vpop.f32.mrf.mxu1 }
 0x3c1   :  { %v2052_v46 = vadd.f32 %v13773_v16, %v1868_v45  ;;  %v15084_v16 = vld [vmem:[%s17923_s4 + $0x18] sm:$0xff]  }
 0x3c2   :  { %v2035_v38 = vpop.f32.mrf.mxu1 }
 0x3c3   :  { %v2050_v50 = vadd.f32 %v2035_v38, %v1866_v48  ;;  %v11544_v51 = vmul.f32 -1.442695, %v2052_v46 }
 0x3c4   :  { %v13774_v54 = vpop.f32.mrf.mxu1 }
 0x3c5   :  { %v11542_v55 = vmul.f32 -1.442695, %v2050_v50  ;;  %v2053_v59 = vadd.f32 %v13774_v54, %v1869_v49  ;;  %v15086_v50 = vld [vmem:[%s17923_s4 + $0x28] sm:$0xff]   ;;  %v15087_v54 = vld [vmem:[%s17923_s4 + $0x30] sm:$0xff]  }
 0x3c6   :  { %v2038_v63 = vpop.f32.mrf.mxu1 }
 0x3c7   :  { %15401 = vpow2.f32 %v11542_v55  ;;  %v11545_v3 = vmul.f32 -1.442695, %v2053_v59  ;;  %v2051_v56 = vadd.f32 %v2038_v63, %v1867_v57 }
 0x3c8   :  { %15403 = vpow2.f32 %v11544_v51 }
 0x3c9   :  { %15405 = vpow2.f32 %v11545_v3  ;;  %v11543_v60 = vmul.f32 -1.442695, %v2051_v56  ;;  %v15088_v56 = vld [vmem:[%s17923_s4 + $0x38] sm:$0xff]  }
 0x3cb   :  { %15407 = vpow2.f32 %v11543_v60 }
 0x3d4   :  { %v15402_v9 = vpop.eup %15401 }
 0x3d5   :  { %v15404_v17 = vpop.eup %15403  ;;  %v2066_v53 = vadd.f32 1.0, %v15402_v9  ;;  %v15089_v9 = vld [vmem:[%s17923_s4 + $0x40] sm:$0xff]  }
 0x3d6   :  { %v15406_v5 = vpop.eup %15405  ;;  %v2068_v11 = vadd.f32 1.0, %v15404_v17 }
 0x3d7   :  { %v2069_v41 = vadd.f32 1.0, %v15406_v5  ;;  %15409 = vrcp.f32 %v2066_v53 }
 0x3d8   :  { %v15408_v52 = vpop.eup %15407 }
 0x3d9   :  { %v2067_v15 = vadd.f32 1.0, %v15408_v52  ;;  %15411 = vrcp.f32 %v2069_v41 }
 0x3db   :  { %15413 = vrcp.f32 %v2067_v15 }
 0x3dc   :  { %15415 = vrcp.f32 %v2068_v11  ;;  %v15090_v11 = vld [vmem:[%s17923_s4 + $0x48] sm:$0xff]  }
 0x3e4   :  { %v15410_v7 = vpop.eup %15409 }
 0x3e6   :  { %v15412_v13 = vpop.eup %15411 }
 0x3e8   :  { %v15414_v19 = vpop.eup %15413 }
 0x3e9   :  { %v15416_v20 = vpop.eup %15415  ;;  %v2079_v62 = vpack.c.bf16 %v15414_v19, %v15410_v7  ;;  %v15091_v7 = vld [vmem:[%s17923_s4 + $0x50] sm:$0xff]  }
 0x3ea   :  { %v16178_v0 = vpack.c.bf16 %v15412_v13, %v15416_v20 }
 0x3eb   :  { %13779 = vmatprep.mubr.msk.bf16.mxu0 %vm2097_vm4, %v2079_v62 }
 0x3ec   :  { %13780 = vmatmul.mubr.msk.bf16.vlgmr.msra.gmra.mxu0 %vm2097_vm4, %v16178_v0 }
 0x3ed   :  { %13792 = vmatpush3.bf16.msra.mxu0 %v16172_v61  ;;  %13795 = vmatprep.mubr.msk.bf16.mxu0 %vm2097_vm4, %v2079_v62  ;;  %v15069_v61 = vld [vmem:[%s17921_s8 + $0x38] sm:$0xff]  }
 0x3ee   :  { %13793 = vmatprep.subr.bf16.mxu0 %v15066_v21 }
 0x3f1   :  { %13794 = vmatpush3.bf16.msra.mxu0 %v15066_v21  ;;  %v15092_v21 = vld [vmem:[%s17923_s4 + $0x58] sm:$0xff]  }
 0x3f2   :  { %13807 = vmatprep.subr.bf16.mxu0 %v15067_v10 }
 0x3f4   :  { %13796 = vmatmul.mubr.msk.bf16.vlgmr.msra.gmra.mxu0 %vm2097_vm4, %v16178_v0 }
 0x3f5   :  { %13808 = vmatpush3.bf16.msra.mxu0 %v15067_v10  ;;  %13811 = vmatprep.mubr.msk.bf16.mxu0 %vm2097_vm4, %v2079_v62 }
 0x3f6   :  { %13809 = vmatprep.subr.bf16.mxu0 %v15068_v14 }
 0x3f9   :  { %13810 = vmatpush3.bf16.msra.mxu0 %v15068_v14  ;;  %v15093_v14 = vld [vmem:[%s17923_s4 + $0x60] sm:$0xff]  }
 0x3fa   :  { %13823 = vmatprep.subr.bf16.mxu0 %v15069_v61 }
 0x3fc   :  { %13812 = vmatmul.mubr.msk.bf16.vlgmr.msra.gmra.mxu0 %vm2097_vm4, %v16178_v0 }
 0x3fd   :  { %13824 = vmatpush3.bf16.msra.mxu0 %v15069_v61  ;;  %13827 = vmatprep.mubr.msk.bf16.mxu0 %vm2097_vm4, %v2079_v62 }
 0x3fe   :  { %13825 = vmatprep.subr.bf16.mxu0 %v15070_v18 }
 0x401   :  { %13826 = vmatpush3.bf16.msra.mxu0 %v15070_v18 }
 0x402   :  { %13839 = vmatprep.subr.bf16.mxu0 %v15071_v23 }
 0x404   :  { %13828 = vmatmul.mubr.msk.bf16.vlgmr.msra.gmra.mxu0 %vm2097_vm4, %v16178_v0 }
 0x405   :  { %13840 = vmatpush3.bf16.msra.mxu0 %v15071_v23  ;;  %13843 = vmatprep.mubr.msk.bf16.mxu0 %vm2097_vm4, %v2079_v62 }
 0x406   :  { %13841 = vmatprep.subr.bf16.mxu0 %v15072_v24 }
 0x409   :  { %13842 = vmatpush3.bf16.msra.mxu0 %v15072_v24 }
 0x40a   :  { %13855 = vmatprep.subr.bf16.mxu0 %v15073_v58 }
 0x40c   :  { %13844 = vmatmul.mubr.msk.bf16.vlgmr.msra.gmra.mxu0 %vm2097_vm4, %v16178_v0 }
 0x40d   :  { %13856 = vmatpush3.bf16.msra.mxu0 %v15073_v58  ;;  %13859 = vmatprep.mubr.msk.bf16.mxu0 %vm2097_vm4, %v2079_v62 }
 0x40e   :  { %13857 = vmatprep.subr.bf16.mxu0 %v15074_v22 }
 0x411   :  { %13858 = vmatpush3.bf16.msra.mxu0 %v15074_v22  ;;  %v15094_v22 = vld [vmem:[%s17923_s4 + $0x68] sm:$0xff]  }
 0x412   :  { %13871 = vmatprep.subr.bf16.mxu0 %v15075_v2 }
 0x414   :  { %13860 = vmatmul.mubr.msk.bf16.vlgmr.msra.gmra.mxu0 %vm2097_vm4, %v16178_v0 }
 0x415   :  { %13872 = vmatpush3.bf16.msra.mxu0 %v15075_v2  ;;  %13875 = vmatprep.mubr.msk.bf16.mxu0 %vm2097_vm4, %v2079_v62 }
 0x416   :  { %13873 = vmatprep.subr.bf16.mxu0 %v15076_v1 }
 0x419   :  { %13874 = vmatpush3.bf16.msra.mxu0 %v15076_v1  ;;  %v15095_v1 = vld [vmem:[%s17923_s4 + $0x70] sm:$0xff]  }
 0x41a   :  { %13887 = vmatprep.subr.bf16.mxu0 %v15077_v12 }
 0x41c   :  { %13876 = vmatmul.mubr.msk.bf16.vlgmr.msra.gmra.mxu0 %vm2097_vm4, %v16178_v0 }
 0x41d   :  { %13888 = vmatpush3.bf16.msra.mxu0 %v15077_v12  ;;  %13891 = vmatprep.mubr.msk.bf16.mxu0 %vm2097_vm4, %v2079_v62 }
 0x41e   :  { %13889 = vmatprep.subr.bf16.mxu0 %v15078_v6 }
 0x421   :  { %13890 = vmatpush3.bf16.msra.mxu0 %v15078_v6 }
 0x422   :  { %13903 = vmatprep.subr.bf16.mxu0 %v15079_v25 }
 0x424   :  { %13892 = vmatmul.mubr.msk.bf16.vlgmr.msra.gmra.mxu0 %vm2097_vm4, %v16178_v0 }
 0x425   :  { %13904 = vmatpush3.bf16.msra.mxu0 %v15079_v25  ;;  %13907 = vmatprep.mubr.msk.bf16.mxu0 %vm2097_vm4, %v2079_v62 }
 0x426   :  { %13905 = vmatprep.subr.bf16.mxu0 %v15080_v26 }
 0x429   :  { %13906 = vmatpush3.bf16.msra.mxu0 %v15080_v26 }
 0x42c   :  { %13908 = vmatmul.mubr.msk.bf16.vlgmr.msra.gmra.mxu0 %vm2097_vm4, %v16178_v0 }
 0x4ac   :  { %v13781_v30 = vpop.f32.mrf.mxu0 }
 0x4ae   :  { %v2138_v34 = vpop.f32.mrf.mxu0 }
 0x4b0   :  { %v13782_v31 = vpop.f32.mrf.mxu0 }
 0x4b1   :  { %v2158_v35 = vpack.c.bf16 %v13782_v31, %v13781_v30  ;;  %v15096_v30 = vld [vmem:[%s17923_s4 + $0x78] sm:$0xff]   ;;  %v15097_v31 = vld [vmem:[%s17923_s4 + $0x80] sm:$0xff]  }
 0x4b2   :  { %v2141_v37 = vpop.f32.mrf.mxu0 }
 0x4b3   :  { %v2157_v33 = vpack.c.bf16 %v2141_v37, %v2138_v34  ;;  %13783 = vmatprep.subr.bf16.mxu1 %v2158_v35 }
 0x4b4   :  { %13784 = vmatpush3.bf16.msra.mxu1 %v2158_v35  ;;  %v13797_v36 = vpop.f32.mrf.mxu0 }
 0x4b5   :  { %13785 = vmatprep.subr.bf16.mxu1 %v2157_v33 }
 0x4b6   :  { %v2285_v39 = vpop.f32.mrf.mxu0 }
 0x4b8   :  { %13786 = vmatpush3.bf16.msra.mxu1 %v2157_v33  ;;  %v13798_v4 = vpop.f32.mrf.mxu0 }
 0x4b9   :  { %v2306_v44 = vpack.c.bf16 %v13798_v4, %v13797_v36  ;;  %v15098_v36 = vld [vmem:[%s17923_s4 + $0x88] sm:$0xff]  }
 0x4ba   :  { %v2288_v43 = vpop.f32.mrf.mxu0  ;;  %v15101_v4 = vld [vmem:[%s17924_s10 + $0x8] sm:$0xff]  }
 0x4bb   :  { %v2305_v8 = vpack.c.bf16 %v2288_v43, %v2285_v39  ;;  %13788 = vmatmul.mubr.msk.bf16.vlgmr.msra.gmra.mxu1 %vm2097_vm4, %v15082_v42  ;;  %13799 = vmatprep.subr.bf16.mxu1 %v2306_v44  ;;  %v15099_v39 = vld [vmem:[%s17924_s10 + $0x18] sm:$0xff]   ;;  %v15100_v42 = vld [vmem:[%s17924_s10 + $0x10] sm:$0xff]  }
 0x4bc   :  { %13800 = vmatpush3.bf16.msra.mxu1 %v2306_v44  ;;  %v13813_v29 = vpop.f32.mrf.mxu0  ;;  %13803 = vmatprep.mubr.msk.bf16.mxu1 %vm2097_vm4, %v15083_v28  ;;  %v15102_v28 = vld [vmem:[%s17924_s10] sm:$0xff]  }
 0x4bd   :  { %13801 = vmatprep.subr.bf16.mxu1 %v2305_v8  ;;  %13919 = vmatprep.subr.bf16.mxu0 %v15099_v39 }
 0x4be   :  { %v2427_v45 = vpop.f32.mrf.mxu0  ;;  %13920 = vmatpush3.bf16.msra.mxu0 %v15099_v39 }
 0x4bf   :  { %13921 = vmatprep.subr.bf16.mxu0 %v15100_v42 }
 0x4c0   :  { %13802 = vmatpush3.bf16.msra.mxu1 %v2305_v8  ;;  %v13814_v32 = vpop.f32.mrf.mxu0 }
 0x4c1   :  { %v2448_v48 = vpack.c.bf16 %v13814_v32, %v13813_v29 }
 0x4c2   :  { %v2430_v46 = vpop.f32.mrf.mxu0  ;;  %13922 = vmatpush3.bf16.msra.mxu0 %v15100_v42 }
 0x4c3   :  { %v2447_v38 = vpack.c.bf16 %v2430_v46, %v2427_v45  ;;  %13804 = vmatmul.mubr.msk.bf16.vlgmr.msra.gmra.mxu1 %vm2097_vm4, %v15084_v16  ;;  %13815 = vmatprep.subr.bf16.mxu1 %v2448_v48 }
 0x4c4   :  { %13816 = vmatpush3.bf16.msra.mxu1 %v2448_v48  ;;  %v13829_v40 = vpop.f32.mrf.mxu0  ;;  %13819 = vmatprep.mubr.msk.bf16.mxu1 %vm2097_vm4, %v15085_v47 }
 0x4c5   :  { %13817 = vmatprep.subr.bf16.mxu1 %v2447_v38  ;;  %13923 = vmatprep.subr.bf16.mxu0 %v15101_v4 }
 0x4c6   :  { %v2569_v49 = vpop.f32.mrf.mxu0  ;;  %13924 = vmatpush3.bf16.msra.mxu0 %v15101_v4 }
 0x4c7   :  { %13925 = vmatprep.subr.bf16.mxu0 %v15102_v28 }
 0x4c8   :  { %13818 = vmatpush3.bf16.msra.mxu1 %v2447_v38  ;;  %v13830_v51 = vpop.f32.mrf.mxu0 }
 0x4c9   :  { %v2590_v57 = vpack.c.bf16 %v13830_v51, %v13829_v40 }
 0x4ca   :  { %v2572_v55 = vpop.f32.mrf.mxu0  ;;  %13926 = vmatpush3.bf16.msra.mxu0 %v15102_v28 }
 0x4cb   :  { %v2589_v59 = vpack.c.bf16 %v2572_v55, %v2569_v49  ;;  %13820 = vmatmul.mubr.msk.bf16.vlgmr.msra.gmra.mxu1 %vm2097_vm4, %v15086_v50  ;;  %13831 = vmatprep.subr.bf16.mxu1 %v2590_v57 }
 0x4cc   :  { %13832 = vmatpush3.bf16.msra.mxu1 %v2590_v57  ;;  %v13845_v63 = vpop.f32.mrf.mxu0  ;;  %13835 = vmatprep.mubr.msk.bf16.mxu1 %vm2097_vm4, %v15087_v54 }
 0x4cd   :  { %13833 = vmatprep.subr.bf16.mxu1 %v2589_v59 }
 0x4ce   :  { %v2711_v3 = vpop.f32.mrf.mxu0 }
 0x4d0   :  { %13834 = vmatpush3.bf16.msra.mxu1 %v2589_v59  ;;  %v13846_v60 = vpop.f32.mrf.mxu0 }
 0x4d1   :  { %v2732_v17 = vpack.c.bf16 %v13846_v60, %v13845_v63 }
 0x4d2   :  { %v2714_v53 = vpop.f32.mrf.mxu0 }
 0x4d3   :  { %v2731_v5 = vpack.c.bf16 %v2714_v53, %v2711_v3  ;;  %13836 = vmatmul.mubr.msk.bf16.vlgmr.msra.gmra.mxu1 %vm2097_vm4, %v15088_v56  ;;  %13847 = vmatprep.subr.bf16.mxu1 %v2732_v17 }
 0x4d4   :  { %13848 = vmatpush3.bf16.msra.mxu1 %v2732_v17  ;;  %v13861_v41 = vpop.f32.mrf.mxu0  ;;  %13851 = vmatprep.mubr.msk.bf16.mxu1 %vm2097_vm4, %v15089_v9  ;;  %v11554_v9 = vld [vmem:[%s17925_s9] ss:$0 sm:$0xff] }
 0x4d5   :  { %13849 = vmatprep.subr.bf16.mxu1 %v2731_v5 }
 0x4d6   :  { %v2853_v52 = vpop.f32.mrf.mxu0 }
 0x4d8   :  { %13850 = vmatpush3.bf16.msra.mxu1 %v2731_v5  ;;  %v13862_v15 = vpop.f32.mrf.mxu0 }
 0x4d9   :  { %v2874_v13 = vpack.c.bf16 %v13862_v15, %v13861_v41 }
 0x4da   :  { %v2856_v19 = vpop.f32.mrf.mxu0 }
 0x4db   :  { %v2873_v20 = vpack.c.bf16 %v2856_v19, %v2853_v52  ;;  %13852 = vmatmul.mubr.msk.bf16.vlgmr.msra.gmra.mxu1 %vm2097_vm4, %v15090_v11  ;;  %13863 = vmatprep.subr.bf16.mxu1 %v2874_v13 }
 0x4dc   :  { %13864 = vmatpush3.bf16.msra.mxu1 %v2874_v13  ;;  %v13877_v62 = vpop.f32.mrf.mxu0  ;;  %13867 = vmatprep.mubr.msk.bf16.mxu1 %vm2097_vm4, %v15091_v7 }
 0x4dd   :  { %13865 = vmatprep.subr.bf16.mxu1 %v2873_v20 }
 0x4de   :  { %v2995_v0 = vpop.f32.mrf.mxu0 }
 0x4e0   :  { %13866 = vmatpush3.bf16.msra.mxu1 %v2873_v20  ;;  %v13878_v10 = vpop.f32.mrf.mxu0 }
 0x4e1   :  { %v3016_v61 = vpack.c.bf16 %v13878_v10, %v13877_v62 }
 0x4e2   :  { %v2998_v18 = vpop.f32.mrf.mxu0 }
 0x4e3   :  { %v3015_v23 = vpack.c.bf16 %v2998_v18, %v2995_v0  ;;  %13868 = vmatmul.mubr.msk.bf16.vlgmr.msra.gmra.mxu1 %vm2097_vm4, %v15092_v21  ;;  %13879 = vmatprep.subr.bf16.mxu1 %v3016_v61 }
 0x4e4   :  { %13880 = vmatpush3.bf16.msra.mxu1 %v3016_v61  ;;  %v13893_v24 = vpop.f32.mrf.mxu0  ;;  %13883 = vmatprep.mubr.msk.bf16.mxu1 %vm2097_vm4, %v15093_v14 }
 0x4e5   :  { %13881 = vmatprep.subr.bf16.mxu1 %v3015_v23 }
 0x4e6   :  { %v3137_v58 = vpop.f32.mrf.mxu0 }
 0x4e8   :  { %13882 = vmatpush3.bf16.msra.mxu1 %v3015_v23  ;;  %v13894_v2 = vpop.f32.mrf.mxu0 }
 0x4e9   :  { %v3158_v12 = vpack.c.bf16 %v13894_v2, %v13893_v24 }
 0x4ea   :  { %v3140_v6 = vpop.f32.mrf.mxu0 }
 0x4eb   :  { %v3157_v25 = vpack.c.bf16 %v3140_v6, %v3137_v58  ;;  %13884 = vmatmul.mubr.msk.bf16.vlgmr.msra.gmra.mxu1 %vm2097_vm4, %v15094_v22  ;;  %13895 = vmatprep.subr.bf16.mxu1 %v3158_v12 }
 0x4ec   :  { %13896 = vmatpush3.bf16.msra.mxu1 %v3158_v12  ;;  %v13909_v26 = vpop.f32.mrf.mxu0  ;;  %13899 = vmatprep.mubr.msk.bf16.mxu1 %vm2097_vm4, %v15095_v1 }
 0x4ed   :  { %13897 = vmatprep.subr.bf16.mxu1 %v3157_v25 }
 0x4ee   :  { %v3279_v27 = vpop.f32.mrf.mxu0 }
 0x4f0   :  { %13898 = vmatpush3.bf16.msra.mxu1 %v3157_v25  ;;  %v13910_v34 = vpop.f32.mrf.mxu0 }
 0x4f1   :  { %v3300_v35 = vpack.c.bf16 %v13910_v34, %v13909_v26 }
 0x4f2   :  { %v3282_v37 = vpop.f32.mrf.mxu0 }
 0x4f3   :  { %v3299_v33 = vpack.c.bf16 %v3282_v37, %v3279_v27  ;;  %13900 = vmatmul.mubr.msk.bf16.vlgmr.msra.gmra.mxu1 %vm2097_vm4, %v15096_v30  ;;  %13911 = vmatprep.subr.bf16.mxu1 %v3300_v35 }
 0x4f4   :  { %13912 = vmatpush3.bf16.msra.mxu1 %v3300_v35  ;;  %13915 = vmatprep.mubr.msk.bf16.mxu1 %vm2097_vm4, %v15097_v31 }
 0x4f5   :  { %13913 = vmatprep.subr.bf16.mxu1 %v3299_v33 }
 0x4f8   :  { %13914 = vmatpush3.bf16.msra.mxu1 %v3299_v33 }
 0x4fb   :  { %13916 = vmatmul.mubr.msk.bf16.vlgmr.msra.gmra.mxu1 %vm2097_vm4, %v15098_v36 }
 0x57b   :  { %v13789_v44 = vpop.f32.mrf.mxu1 }
 0x57c   :  { %v2232_v5 = vadd.f32 %v13789_v44, %v11554_v9 }
 0x57d   :  { %v2209_v43 = vpop.f32.mrf.mxu1 }
 0x57e   :  { %v2230_v52 = vadd.f32 %v11554_v9, %v2209_v43 }
 0x57f   :  { %v13790_v8 = vpop.f32.mrf.mxu1 }
 0x580   :  { %v2233_v7 = vadd.f32 %v13790_v8, %v11554_v9 }
 0x581   :  { %v2212_v29 = vpop.f32.mrf.mxu1 }
 0x582   :  { %v2231_v62 = vadd.f32 %v11554_v9, %v2212_v29 }
 0x583   :  { %v13805_v45 = vpop.f32.mrf.mxu1 }
 0x584   :  { %v2374_v11 = vadd.f32 %v13805_v45, %v2232_v5 }
 0x585   :  { %v2357_v16 = vpop.f32.mrf.mxu1 }
 0x586   :  { %v2372_v13 = vadd.f32 %v2357_v16, %v2230_v52 }
 0x587   :  { %v13806_v32 = vpop.f32.mrf.mxu1 }
 0x588   :  { %v2375_v0 = vadd.f32 %v13806_v32, %v2233_v7 }
 0x589   :  { %v2360_v47 = vpop.f32.mrf.mxu1 }
 0x58a   :  { %v2373_v61 = vadd.f32 %v2360_v47, %v2231_v62  ;;  %v15104_v62 = vld [vmem:[%s17926_s5 + $0x8] sm:$0xff]  }
 0x58b   :  { %v13821_v48 = vpop.f32.mrf.mxu1 }
 0x58c   :  { %v2516_v19 = vadd.f32 %v13821_v48, %v2374_v11 }
 0x58d   :  { %v2499_v46 = vpop.f32.mrf.mxu1 }
 0x58e   :  { %v2514_v21 = vadd.f32 %v2499_v46, %v2372_v13 }
 0x58f   :  { %v13822_v38 = vpop.f32.mrf.mxu1 }
 0x590   :  { %v2517_v18 = vadd.f32 %v13822_v38, %v2375_v0  ;;  %v15106_v0 = vld [vmem:[%s17924_s10 + $0x30] sm:$0xff]  }
 0x591   :  { %v2502_v40 = vpop.f32.mrf.mxu1 }
 0x592   :  { %v2515_v22 = vadd.f32 %v2502_v40, %v2373_v61 }
 0x593   :  { %v13837_v49 = vpop.f32.mrf.mxu1 }
 0x594   :  { %v2658_v10 = vadd.f32 %v13837_v49, %v2516_v19 }
 0x595   :  { %v2641_v50 = vpop.f32.mrf.mxu1 }
 0x596   :  { %v2656_v23 = vadd.f32 %v2641_v50, %v2514_v21  ;;  %v15107_v21 = vld [vmem:[%s17924_s10 + $0x28] sm:$0xff]  }
 0x597   :  { %v13838_v51 = vpop.f32.mrf.mxu1 }
 0x598   :  { %v2659_v2 = vadd.f32 %v13838_v51, %v2517_v18 }
 0x599   :  { %v2644_v54 = vpop.f32.mrf.mxu1 }
 0x59a   :  { %v2657_v25 = vadd.f32 %v2644_v54, %v2515_v22 }
 0x59b   :  { %v13853_v57 = vpop.f32.mrf.mxu1 }
 0x59c   :  { %v2800_v24 = vadd.f32 %v13853_v57, %v2658_v10  ;;  %v15108_v10 = vld [vmem:[%s17924_s10 + $0x20] sm:$0xff]  }
 0x59d   :  { %v2783_v55 = vpop.f32.mrf.mxu1 }
 0x59e   :  { %v2798_v1 = vadd.f32 %v2783_v55, %v2656_v23 }
 0x59f   :  { %v13854_v59 = vpop.f32.mrf.mxu1 }
 0x5a0   :  { %v2801_v26 = vadd.f32 %v13854_v59, %v2659_v2 }
 0x5a1   :  { %v2786_v63 = vpop.f32.mrf.mxu1 }
 0x5a2   :  { %v2799_v31 = vadd.f32 %v2786_v63, %v2657_v25  ;;  %v15111_v25 = vld [vmem:[%s17924_s10 + $0x58] sm:$0xff]  }
 0x5a3   :  { %v13869_v3 = vpop.f32.mrf.mxu1 }
 0x5a4   :  { %v2942_v12 = vadd.f32 %v13869_v3, %v2800_v24 }
 0x5a5   :  { %v2925_v56 = vpop.f32.mrf.mxu1 }
 0x5a6   :  { %v2940_v27 = vadd.f32 %v2925_v56, %v2798_v1 }
 0x5a7   :  { %v13870_v60 = vpop.f32.mrf.mxu1 }
 0x5a8   :  { %v2943_v35 = vadd.f32 %v13870_v60, %v2801_v26  ;;  %v15110_v26 = vld [vmem:[%s17926_s5 + $0x18] sm:$0xff]  }
 0x5a9   :  { %v2928_v17 = vpop.f32.mrf.mxu1 }
 0x5aa   :  { %v2941_v39 = vadd.f32 %v2928_v17, %v2799_v31  ;;  %v15115_v31 = vld [vmem:[%s17926_s5 + $0x20] sm:$0xff]  }
 0x5ab   :  { %v13885_v53 = vpop.f32.mrf.mxu1 }
 0x5ac   :  { %v3084_v30 = vadd.f32 %v13885_v53, %v2942_v12 }
 0x5ad   :  { %v3067_v41 = vpop.f32.mrf.mxu1 }
 0x5ae   :  { %v3082_v37 = vadd.f32 %v3067_v41, %v2940_v27  ;;  %v16363_v41 = vld [vmem:[%s17926_s5] sm:$0xff]   ;;  %v15112_v27 = vld [vmem:[%s17924_s10 + $0x50] sm:$0xff]  }
 0x5af   :  { %v13886_v15 = vpop.f32.mrf.mxu1  ;;  %13935 = vmatprep.mubr.msk.bf16.mxu1 %vm2097_vm4, %v16363_v41 }
 0x5b0   :  { %v3085_v42 = vadd.f32 %v13886_v15, %v2943_v35  ;;  %v16420_v35 = vld [vmem:[%s17927_s11] ss:$0 sm:$0xff] }
 0x5b1   :  { %v3070_v20 = vpop.f32.mrf.mxu1 }
 0x5b2   :  { %v3083_v43 = vadd.f32 %v3070_v20, %v2941_v39  ;;  %v15105_v20 = vld [vmem:[%s17924_s10 + $0x38] sm:$0xff]  }
 0x5b3   :  { %v13901_v14 = vpop.f32.mrf.mxu1 }
 0x5b4   :  { %v3226_v33 = vadd.f32 %v13901_v14, %v3084_v30  ;;  %v15109_v14 = vld [vmem:[%s17926_s5 + $0x10] sm:$0xff]   ;;  %v15113_v30 = vld [vmem:[%s17924_s10 + $0x48] sm:$0xff]  }
 0x5b5   :  { %v3209_v58 = vpop.f32.mrf.mxu1 }
 0x5b6   :  { %v3224_v4 = vadd.f32 %v3209_v58, %v3082_v37 }
 0x5b7   :  { %v13902_v6 = vpop.f32.mrf.mxu1 }
 0x5b8   :  { %v3227_v8 = vadd.f32 %v13902_v6, %v3085_v42 }
 0x5b9   :  { %v3212_v34 = vpop.f32.mrf.mxu1 }
 0x5ba   :  { %v3225_v32 = vadd.f32 %v3212_v34, %v3083_v43  ;;  %v15114_v34 = vld [vmem:[%s17924_s10 + $0x40] sm:$0xff]  }
 0x5bb   :  { %v13917_v36 = vpop.f32.mrf.mxu1 }
 0x5bc   :  { %v3368_v28 = vadd.f32 %v13917_v36, %v3226_v33 }
 0x5bd   :  { %v3351_v44 = vpop.f32.mrf.mxu1 }
 0x5be   :  { %v3366_v29 = vadd.f32 %v3351_v44, %v3224_v4  ;;  %v11685_v45 = vmul.f32 -1.442695, %v3368_v28 }
 0x5bf   :  { %v13918_v16 = vpop.f32.mrf.mxu1 }
 0x5c0   :  { %v11683_v47 = vmul.f32 -1.442695, %v3366_v29  ;;  %v3369_v48 = vadd.f32 %v13918_v16, %v3227_v8 }
 0x5c1   :  { %v3354_v46 = vpop.f32.mrf.mxu1 }
 0x5c2   :  { %15417 = vpow2.f32 %v11683_v47  ;;  %v11686_v38 = vmul.f32 -1.442695, %v3369_v48  ;;  %v3367_v40 = vadd.f32 %v3354_v46, %v3225_v32  ;;  %v15117_v46 = vld [vmem:[%s17924_s10 + $0x78] sm:$0xff]  }
 0x5c3   :  { %15419 = vpow2.f32 %v11685_v45 }
 0x5c4   :  { %15421 = vpow2.f32 %v11686_v38  ;;  %v11684_v49 = vmul.f32 -1.442695, %v3367_v40  ;;  %v15116_v38 = vld [vmem:[%s17926_s5 + $0x28] sm:$0xff]   ;;  %v15118_v40 = vld [vmem:[%s17924_s10 + $0x70] sm:$0xff]  }
 0x5c6   :  { %15423 = vpow2.f32 %v11684_v49  ;;  %v15119_v49 = vld [vmem:[%s17924_s10 + $0x68] sm:$0xff]  }
 0x5cf   :  { %v15418_v50 = vpop.eup %15417 }
 0x5d0   :  { %v15420_v51 = vpop.eup %15419  ;;  %v3382_v54 = vadd.f32 1.0, %v15418_v50  ;;  %v15120_v50 = vld [vmem:[%s17924_s10 + $0x60] sm:$0xff]  }
 0x5d1   :  { %v15422_v57 = vpop.eup %15421  ;;  %v3384_v63 = vadd.f32 1.0, %v15420_v51  ;;  %v16450_v51 = vld [vmem:[%s17926_s5 + $0x30] sm:$0xff]  }
 0x5d2   :  { %v3385_v55 = vadd.f32 1.0, %v15422_v57  ;;  %15425 = vrcp.f32 %v3382_v54 }
 0x5d3   :  { %v15424_v59 = vpop.eup %15423 }
 0x5d4   :  { %v3383_v3 = vadd.f32 1.0, %v15424_v59  ;;  %15427 = vrcp.f32 %v3385_v55 }
 0x5d6   :  { %15429 = vrcp.f32 %v3383_v3 }
 0x5d7   :  { %15431 = vrcp.f32 %v3384_v63 }
 0x5df   :  { %v16340_v56 = vpop.eup %15425 }
 0x5e1   :  { %v16342_v60 = vpop.eup %15427 }
 0x5e3   :  { %v16344_v9 = vpop.eup %15429 }
 0x5e4   :  { %v16346_v17 = vpop.eup %15431  ;;  %v16350_v53 = vpack.c.bf16 %v16344_v9, %v16340_v56 }
 0x5e5   :  { %v16354_v5 = vpack.c.bf16 %v16342_v60, %v16346_v17 }
 0x5e6   :  { %13927 = vmatprep.mubr.msk.bf16.mxu0 %vm3429_vm5, %v16350_v53 }
 0x5e7   :  { %13928 = vmatmul.mubr.msk.bf16.vlgmr.msra.gmra.mxu0 %vm3429_vm5, %v16354_v5 }
 0x5e8   :  { %13955 = vmatprep.mubr.msk.bf16.mxu0 %vm2097_vm4, %v15109_v14  ;;  %v15126_v14 = vld [vmem:[%s17924_s10 + $0x80] sm:$0xff]  }
 0x6a7   :  { %v13929_v52 = vpop.f32.mrf.mxu0 }
 0x6a9   :  { %v3470_v11 = vpop.f32.mrf.mxu0 }
 0x6ab   :  { %v13930_v15 = vpop.f32.mrf.mxu0 }
 0x6ac   :  { %v3490_v7 = vpack.c.bf16 %v13930_v15, %v13929_v52 }
 0x6ad   :  { %v3473_v13 = vpop.f32.mrf.mxu0 }
 0x6ae   :  { %v3489_v19 = vpack.c.bf16 %v3473_v13, %v3470_v11  ;;  %13931 = vmatprep.subr.bf16.mxu1 %v3490_v7 }
 0x6af   :  { %13932 = vmatpush3.bf16.msra.mxu1 %v3490_v7 }
 0x6b0   :  { %13933 = vmatprep.subr.bf16.mxu1 %v3489_v19 }
 0x6b3   :  { %13934 = vmatpush3.bf16.msra.mxu1 %v3489_v19 }
 0x6b4   :  { %13939 = vmatprep.subr.bf16.mxu1 %v15105_v20 }
 0x6b6   :  { %13936 = vmatmul.mubr.msk.bf16.vlgmr.msra.gmra.mxu1 %vm2097_vm4, %v15104_v62  ;;  %v15123_v62 = vld [vmem:[%s17924_s10 + $0x98] sm:$0xff]  }
 0x6b7   :  { %13940 = vmatpush3.bf16.msra.mxu1 %v15105_v20  ;;  %13947 = vmatprep.mubr.msk.bf16.mxu1 %vm3429_vm5, %v16350_v53 }
 0x6b8   :  { %13941 = vmatprep.subr.bf16.mxu1 %v15106_v0 }
 0x6bb   :  { %13942 = vmatpush3.bf16.msra.mxu1 %v15106_v0  ;;  %v15122_v0 = vld [vmem:[%s17926_s5 + $0x38] sm:$0xff]  }
 0x6bc   :  { %13943 = vmatprep.subr.bf16.mxu1 %v15107_v21 }
 0x6bf   :  { %13944 = vmatpush3.bf16.msra.mxu1 %v15107_v21  ;;  %v15124_v21 = vld [vmem:[%s17924_s10 + $0x90] sm:$0xff]  }
 0x6c0   :  { %13945 = vmatprep.subr.bf16.mxu1 %v15108_v10 }
 0x6c3   :  { %13946 = vmatpush3.bf16.msra.mxu1 %v15108_v10  ;;  %v15125_v10 = vld [vmem:[%s17924_s10 + $0x88] sm:$0xff]  }
 0x6c6   :  { %13948 = vmatmul.mubr.msk.bf16.vlgmr.msra.gmra.mxu1 %vm3429_vm5, %v16354_v5 }
 0x6c7   :  { %13975 = vmatprep.mubr.msk.bf16.mxu1 %vm2097_vm4, %v15115_v31  ;;  %v15129_v31 = vld [vmem:[%s17924_s10 + $0xb8] sm:$0xff]  }
 0x776   :  { %v13937_v61 = vpop.f32.mrf.mxu1 }
 0x777   :  { %v3564_v37 = vadd.f32 %v13937_v61, %v16420_v35  ;;  %v16479_v61 = vld [vmem:[%s17926_s5 + $0x40] sm:$0xff]  }
 0x778   :  { %v3541_v18 = vpop.f32.mrf.mxu1 }
 0x779   :  { %v3562_v36 = vadd.f32 %v16420_v35, %v3541_v18 }
 0x77a   :  { %v13938_v23 = vpop.f32.mrf.mxu1 }
 0x77b   :  { %v3565_v4 = vadd.f32 %v13938_v23, %v16420_v35 }
 0x77c   :  { %v16391_v24 = vpop.f32.mrf.mxu1 }
 0x786   :  { %v13949_v58 = vpop.f32.mrf.mxu1 }
 0x788   :  { %v3633_v22 = vpop.f32.mrf.mxu1 }
 0x78a   :  { %v13950_v2 = vpop.f32.mrf.mxu1 }
 0x78b   :  { %v3654_v1 = vpack.c.bf16 %v13950_v2, %v13949_v58 }
 0x78c   :  { %v3636_v12 = vpop.f32.mrf.mxu1 }
 0x78d   :  { %v3653_v6 = vpack.c.bf16 %v3636_v12, %v3633_v22  ;;  %13951 = vmatprep.subr.bf16.mxu0 %v3654_v1 }
 0x78e   :  { %13952 = vmatpush3.bf16.msra.mxu0 %v3654_v1 }
 0x78f   :  { %13953 = vmatprep.subr.bf16.mxu0 %v3653_v6 }
 0x792   :  { %13954 = vmatpush3.bf16.msra.mxu0 %v3653_v6 }
 0x793   :  { %13959 = vmatprep.subr.bf16.mxu0 %v15111_v25 }
 0x795   :  { %13956 = vmatmul.mubr.msk.bf16.vlgmr.msra.gmra.mxu0 %vm2097_vm4, %v15110_v26 }
 0x796   :  { %13960 = vmatpush3.bf16.msra.mxu0 %v15111_v25  ;;  %13967 = vmatprep.mubr.msk.bf16.mxu0 %vm3429_vm5, %v16350_v53 }
 0x797   :  { %13961 = vmatprep.subr.bf16.mxu0 %v15112_v27 }
 0x79a   :  { %13962 = vmatpush3.bf16.msra.mxu0 %v15112_v27 }
 0x79b   :  { %13963 = vmatprep.subr.bf16.mxu0 %v15113_v30 }
 0x79e   :  { %13964 = vmatpush3.bf16.msra.mxu0 %v15113_v30 }
 0x79f   :  { %13965 = vmatprep.subr.bf16.mxu0 %v15114_v34 }
 0x7a2   :  { %13966 = vmatpush3.bf16.msra.mxu0 %v15114_v34 }
 0x7a5   :  { %13968 = vmatmul.mubr.msk.bf16.vlgmr.msra.gmra.mxu0 %vm3429_vm5, %v16354_v5 }
 0x7a6   :  { %13995 = vmatprep.mubr.msk.bf16.mxu0 %vm2097_vm4, %v16450_v51 }
 0x855   :  { %v13957_v33 = vpop.f32.mrf.mxu0 }
 0x856   :  { %v3722_v39 = vadd.f32 %v13957_v33, %v3564_v37  ;;  %v15128_v37 = vld [vmem:[%s17926_s5 + $0x48] sm:$0xff]   ;;  %v15130_v33 = vld [vmem:[%s17924_s10 + $0xb0] sm:$0xff]  }
 0x857   :  { %v3705_v42 = vpop.f32.mrf.mxu0 }
 0x858   :  { %v3720_v28 = vadd.f32 %v3705_v42, %v3562_v36  ;;  %v15131_v36 = vld [vmem:[%s17924_s10 + $0xa8] sm:$0xff]   ;;  %v16508_v42 = vld [vmem:[%s17926_s5 + $0x50] sm:$0xff]  }
 0x859   :  { %v13958_v44 = vpop.f32.mrf.mxu0 }
 0x85a   :  { %v3723_v43 = vadd.f32 %v13958_v44, %v3565_v4 }
 0x85b   :  { %v16425_v8 = vpop.f32.mrf.mxu0 }
 0x865   :  { %v13969_v29 = vpop.f32.mrf.mxu0 }
 0x867   :  { %v3791_v45 = vpop.f32.mrf.mxu0 }
 0x869   :  { %v13970_v16 = vpop.f32.mrf.mxu0 }
 0x86a   :  { %v3812_v32 = vpack.c.bf16 %v13970_v16, %v13969_v29 }
 0x86b   :  { %v3794_v47 = vpop.f32.mrf.mxu0 }
 0x86c   :  { %v3811_v48 = vpack.c.bf16 %v3794_v47, %v3791_v45  ;;  %13971 = vmatprep.subr.bf16.mxu1 %v3812_v32 }
 0x86d   :  { %13972 = vmatpush3.bf16.msra.mxu1 %v3812_v32 }
 0x86e   :  { %13973 = vmatprep.subr.bf16.mxu1 %v3811_v48 }
 0x871   :  { %13974 = vmatpush3.bf16.msra.mxu1 %v3811_v48 }
 0x872   :  { %13979 = vmatprep.subr.bf16.mxu1 %v15117_v46 }
 0x874   :  { %13976 = vmatmul.mubr.msk.bf16.vlgmr.msra.gmra.mxu1 %vm2097_vm4, %v15116_v38 }
 0x875   :  { %13980 = vmatpush3.bf16.msra.mxu1 %v15117_v46  ;;  %13987 = vmatprep.mubr.msk.bf16.mxu1 %vm3429_vm5, %v16350_v53 }
 0x876   :  { %13981 = vmatprep.subr.bf16.mxu1 %v15118_v40 }
 0x879   :  { %13982 = vmatpush3.bf16.msra.mxu1 %v15118_v40 }
 0x87a   :  { %13983 = vmatprep.subr.bf16.mxu1 %v15119_v49 }
 0x87d   :  { %13984 = vmatpush3.bf16.msra.mxu1 %v15119_v49  ;;  %v15135_v49 = vld [vmem:[%s17924_s10 + $0xd8] sm:$0xff]  }
 0x87e   :  { %13985 = vmatprep.subr.bf16.mxu1 %v15120_v50 }
 0x881   :  { %13986 = vmatpush3.bf16.msra.mxu1 %v15120_v50  ;;  %v15134_v50 = vld [vmem:[%s17926_s5 + $0x58] sm:$0xff]  }
 0x884   :  { %13988 = vmatmul.mubr.msk.bf16.vlgmr.msra.gmra.mxu1 %vm3429_vm5, %v16354_v5 }
 0x885   :  { %14015 = vmatprep.mubr.msk.bf16.mxu1 %vm2097_vm4, %v16479_v61 }
 0x934   :  { %v13977_v54 = vpop.f32.mrf.mxu1 }
 0x935   :  { %v3880_v57 = vadd.f32 %v13977_v54, %v3722_v39  ;;  %v15132_v39 = vld [vmem:[%s17924_s10 + $0xa0] sm:$0xff]   ;;  %v15136_v54 = vld [vmem:[%s17924_s10 + $0xd0] sm:$0xff]  }
 0x936   :  { %v3863_v55 = vpop.f32.mrf.mxu1 }
 0x937   :  { %v3878_v59 = vadd.f32 %v3863_v55, %v3720_v28  ;;  %v15138_v55 = vld [vmem:[%s17924_s10 + $0xc0] sm:$0xff]  }
 0x938   :  { %v13978_v63 = vpop.f32.mrf.mxu1 }
 0x939   :  { %v3881_v3 = vadd.f32 %v13978_v63, %v3723_v43 }
 0x93a   :  { %v16454_v52 = vpop.f32.mrf.mxu1 }
 0x944   :  { %v13989_v11 = vpop.f32.mrf.mxu1 }
 0x946   :  { %v3949_v15 = vpop.f32.mrf.mxu1 }
 0x948   :  { %v13990_v7 = vpop.f32.mrf.mxu1 }
 0x949   :  { %v3970_v13 = vpack.c.bf16 %v13990_v7, %v13989_v11 }
 0x94a   :  { %v3952_v19 = vpop.f32.mrf.mxu1 }
 0x94b   :  { %v3969_v20 = vpack.c.bf16 %v3952_v19, %v3949_v15  ;;  %13991 = vmatprep.subr.bf16.mxu0 %v3970_v13 }
 0x94c   :  { %13992 = vmatpush3.bf16.msra.mxu0 %v3970_v13 }
 0x94d   :  { %13993 = vmatprep.subr.bf16.mxu0 %v3969_v20 }
 0x950   :  { %13994 = vmatpush3.bf16.msra.mxu0 %v3969_v20 }
 0x951   :  { %13999 = vmatprep.subr.bf16.mxu0 %v15123_v62 }
 0x953   :  { %13996 = vmatmul.mubr.msk.bf16.vlgmr.msra.gmra.mxu0 %vm2097_vm4, %v15122_v0 }
 0x954   :  { %14000 = vmatpush3.bf16.msra.mxu0 %v15123_v62  ;;  %14007 = vmatprep.mubr.msk.bf16.mxu0 %vm3429_vm5, %v16350_v53 }
 0x955   :  { %14001 = vmatprep.subr.bf16.mxu0 %v15124_v21 }
 0x958   :  { %14002 = vmatpush3.bf16.msra.mxu0 %v15124_v21 }
 0x959   :  { %14003 = vmatprep.subr.bf16.mxu0 %v15125_v10 }
 0x95c   :  { %14004 = vmatpush3.bf16.msra.mxu0 %v15125_v10 }
 0x95d   :  { %14005 = vmatprep.subr.bf16.mxu0 %v15126_v14 }
 0x960   :  { %14006 = vmatpush3.bf16.msra.mxu0 %v15126_v14 }
 0x963   :  { %14008 = vmatmul.mubr.msk.bf16.vlgmr.msra.gmra.mxu0 %vm3429_vm5, %v16354_v5 }
 0x964   :  { %14035 = vmatprep.mubr.msk.bf16.mxu0 %vm2097_vm4, %v16508_v42 }
 0xa13   :  { %v13997_v18 = vpop.f32.mrf.mxu0 }
 0xa14   :  { %v4038_v23 = vadd.f32 %v13997_v18, %v3880_v57  ;;  %v15137_v57 = vld [vmem:[%s17924_s10 + $0xc8] sm:$0xff]   ;;  %v15141_v18 = vld [vmem:[%s17924_s10 + $0xf8] sm:$0xff]  }
 0xa15   :  { %v4021_v58 = vpop.f32.mrf.mxu0 }
 0xa16   :  { %v4036_v22 = vadd.f32 %v4021_v58, %v3878_v59  ;;  %v16537_v59 = vld [vmem:[%s17926_s5 + $0x60] sm:$0xff]   ;;  %v15142_v58 = vld [vmem:[%s17924_s10 + $0xf0] sm:$0xff]  }
 0xa17   :  { %v13998_v2 = vpop.f32.mrf.mxu0 }
 0xa18   :  { %v4039_v1 = vadd.f32 %v13998_v2, %v3881_v3  ;;  %v15144_v2 = vld [vmem:[%s17924_s10 + $0xe0] sm:$0xff]  }
 0xa19   :  { %v16483_v12 = vpop.f32.mrf.mxu0 }
 0xa23   :  { %v14009_v6 = vpop.f32.mrf.mxu0 }
 0xa25   :  { %v4107_v25 = vpop.f32.mrf.mxu0 }
 0xa27   :  { %v14010_v26 = vpop.f32.mrf.mxu0 }
 0xa28   :  { %v4128_v27 = vpack.c.bf16 %v14010_v26, %v14009_v6 }
 0xa29   :  { %v4110_v30 = vpop.f32.mrf.mxu0 }
 0xa2a   :  { %v4127_v34 = vpack.c.bf16 %v4110_v30, %v4107_v25  ;;  %14011 = vmatprep.subr.bf16.mxu1 %v4128_v27 }
 0xa2b   :  { %14012 = vmatpush3.bf16.msra.mxu1 %v4128_v27 }
 0xa2c   :  { %14013 = vmatprep.subr.bf16.mxu1 %v4127_v34 }
 0xa2f   :  { %14014 = vmatpush3.bf16.msra.mxu1 %v4127_v34 }
 0xa30   :  { %14019 = vmatprep.subr.bf16.mxu1 %v15129_v31 }
 0xa32   :  { %14016 = vmatmul.mubr.msk.bf16.vlgmr.msra.gmra.mxu1 %vm2097_vm4, %v15128_v37 }
 0xa33   :  { %14020 = vmatpush3.bf16.msra.mxu1 %v15129_v31  ;;  %14027 = vmatprep.mubr.msk.bf16.mxu1 %vm3429_vm5, %v16350_v53 }
 0xa34   :  { %14021 = vmatprep.subr.bf16.mxu1 %v15130_v33 }
 0xa37   :  { %14022 = vmatpush3.bf16.msra.mxu1 %v15130_v33 }
 0xa38   :  { %14023 = vmatprep.subr.bf16.mxu1 %v15131_v36 }
 0xa3b   :  { %14024 = vmatpush3.bf16.msra.mxu1 %v15131_v36 }
 0xa3c   :  { %14025 = vmatprep.subr.bf16.mxu1 %v15132_v39 }
 0xa3f   :  { %14026 = vmatpush3.bf16.msra.mxu1 %v15132_v39 }
 0xa42   :  { %14028 = vmatmul.mubr.msk.bf16.vlgmr.msra.gmra.mxu1 %vm3429_vm5, %v16354_v5 }
 0xa43   :  { %14055 = vmatprep.mubr.msk.bf16.mxu1 %vm2097_vm4, %v16537_v59 }
 0xaf2   :  { %v14017_v4 = vpop.f32.mrf.mxu1 }
 0xaf3   :  { %v4196_v28 = vadd.f32 %v14017_v4, %v4038_v23  ;;  %v15140_v23 = vld [vmem:[%s17926_s5 + $0x68] sm:$0xff]  }
 0xaf4   :  { %v4179_v44 = vpop.f32.mrf.mxu1 }
 0xaf5   :  { %v4194_v43 = vadd.f32 %v4179_v44, %v4036_v22  ;;  %v15143_v22 = vld [vmem:[%s17924_s10 + $0xe8] sm:$0xff]   ;;  %v15147_v44 = vld [vmem:[%s17924_s10 + $0x118] sm:$0xff]  }
 0xaf6   :  { %v14018_v29 = vpop.f32.mrf.mxu1 }
 0xaf7   :  { %v4197_v45 = vadd.f32 %v14018_v29, %v4039_v1  ;;  %v16566_v1 = vld [vmem:[%s17926_s5 + $0x70] sm:$0xff]  }
 0xaf8   :  { %v16512_v16 = vpop.f32.mrf.mxu1  ;;  %v15148_v29 = vld [vmem:[%s17924_s10 + $0x110] sm:$0xff]  }
 0xb02   :  { %v14029_v32 = vpop.f32.mrf.mxu1 }
 0xb04   :  { %v4265_v47 = vpop.f32.mrf.mxu1 }
 0xb06   :  { %v14030_v48 = vpop.f32.mrf.mxu1 }
 0xb07   :  { %v4286_v46 = vpack.c.bf16 %v14030_v48, %v14029_v32  ;;  %v15150_v32 = vld [vmem:[%s17924_s10 + $0x100] sm:$0xff]  }
 0xb08   :  { %v4268_v38 = vpop.f32.mrf.mxu1 }
 0xb09   :  { %v4285_v40 = vpack.c.bf16 %v4268_v38, %v4265_v47  ;;  %14031 = vmatprep.subr.bf16.mxu0 %v4286_v46 }
 0xb0a   :  { %14032 = vmatpush3.bf16.msra.mxu0 %v4286_v46 }
 0xb0b   :  { %14033 = vmatprep.subr.bf16.mxu0 %v4285_v40 }
 0xb0e   :  { %14034 = vmatpush3.bf16.msra.mxu0 %v4285_v40 }
 0xb0f   :  { %14039 = vmatprep.subr.bf16.mxu0 %v15135_v49 }
 0xb11   :  { %14036 = vmatmul.mubr.msk.bf16.vlgmr.msra.gmra.mxu0 %vm2097_vm4, %v15134_v50 }
 0xb12   :  { %14040 = vmatpush3.bf16.msra.mxu0 %v15135_v49  ;;  %14047 = vmatprep.mubr.msk.bf16.mxu0 %vm3429_vm5, %v16350_v53 }
 0xb13   :  { %14041 = vmatprep.subr.bf16.mxu0 %v15136_v54 }
 0xb16   :  { %14042 = vmatpush3.bf16.msra.mxu0 %v15136_v54 }
 0xb17   :  { %14043 = vmatprep.subr.bf16.mxu0 %v15137_v57 }
 0xb1a   :  { %14044 = vmatpush3.bf16.msra.mxu0 %v15137_v57 }
 0xb1b   :  { %14045 = vmatprep.subr.bf16.mxu0 %v15138_v55 }
 0xb1e   :  { %14046 = vmatpush3.bf16.msra.mxu0 %v15138_v55 }
 0xb21   :  { %14048 = vmatmul.mubr.msk.bf16.vlgmr.msra.gmra.mxu0 %vm3429_vm5, %v16354_v5 }
 0xb22   :  { %14075 = vmatprep.mubr.msk.bf16.mxu0 %vm2097_vm4, %v16566_v1 }
 0xbd1   :  { %v14037_v63 = vpop.f32.mrf.mxu0 }
 0xbd2   :  { %v4354_v3 = vadd.f32 %v14037_v63, %v4196_v28 }
 0xbd3   :  { %v4337_v11 = vpop.f32.mrf.mxu0 }
 0xbd4   :  { %v4352_v15 = vadd.f32 %v4337_v11, %v4194_v43  ;;  %v15146_v43 = vld [vmem:[%s17926_s5 + $0x78] sm:$0xff]   ;;  %v16607_v11 = vld [vmem:[%s17926_s5 + $0x88] sm:$0xff]  }
 0xbd5   :  { %v14038_v7 = vpop.f32.mrf.mxu0 }
 0xbd6   :  { %v4355_v13 = vadd.f32 %v14038_v7, %v4197_v45  ;;  %v15149_v45 = vld [vmem:[%s17924_s10 + $0x108] sm:$0xff]  }
 0xbd7   :  { %v16541_v19 = vpop.f32.mrf.mxu0  ;;  %v15155_v7 = vld [vmem:[%s17928_s12 + $0x8] sm:$0xff]  }
 0xbe1   :  { %v14049_v20 = vpop.f32.mrf.mxu0 }
 0xbe3   :  { %v4423_v62 = vpop.f32.mrf.mxu0 }
 0xbe5   :  { %v14050_v0 = vpop.f32.mrf.mxu0 }
 0xbe6   :  { %v4444_v21 = vpack.c.bf16 %v14050_v0, %v14049_v20  ;;  %v3563_v20 = vadd.f32 %v16420_v35, %v16391_v24 }
 0xbe7   :  { %v4426_v10 = vpop.f32.mrf.mxu0 }
 0xbe8   :  { %v4443_v14 = vpack.c.bf16 %v4426_v10, %v4423_v62  ;;  %14051 = vmatprep.subr.bf16.mxu1 %v4444_v21  ;;  %v3721_v62 = vadd.f32 %v16425_v8, %v3563_v20 }
 0xbe9   :  { %14052 = vmatpush3.bf16.msra.mxu1 %v4444_v21 }
 0xbea   :  { %14053 = vmatprep.subr.bf16.mxu1 %v4443_v14  ;;  %v3879_v0 = vadd.f32 %v16454_v52, %v3721_v62 }
 0xbec   :  { %v4037_v21 = vadd.f32 %v16483_v12, %v3879_v0 }
 0xbed   :  { %14054 = vmatpush3.bf16.msra.mxu1 %v4443_v14 }
 0xbee   :  { %14059 = vmatprep.subr.bf16.mxu1 %v15141_v18  ;;  %v4195_v10 = vadd.f32 %v16512_v16, %v4037_v21 }
 0xbf0   :  { %14056 = vmatmul.mubr.msk.bf16.vlgmr.msra.gmra.mxu1 %vm2097_vm4, %v15140_v23 }
 0xbf1   :  { %14060 = vmatpush3.bf16.msra.mxu1 %v15141_v18  ;;  %14067 = vmatprep.mubr.msk.bf16.mxu1 %vm3429_vm5, %v16350_v53  ;;  %v4353_v18 = vadd.f32 %v16541_v19, %v4195_v10  ;;  %v16639_v19 = vld [vmem:[%s17926_s5 + $0x10] sm:$0xff]  }
 0xbf2   :  { %14061 = vmatprep.subr.bf16.mxu1 %v15142_v58 }
 0xbf5   :  { %14062 = vmatpush3.bf16.msra.mxu1 %v15142_v58 }
 0xbf6   :  { %14063 = vmatprep.subr.bf16.mxu1 %v15143_v22 }
 0xbf9   :  { %14064 = vmatpush3.bf16.msra.mxu1 %v15143_v22 }
 0xbfa   :  { %14065 = vmatprep.subr.bf16.mxu1 %v15144_v2 }
 0xbfd   :  { %14066 = vmatpush3.bf16.msra.mxu1 %v15144_v2 }
 0xc00   :  { %14068 = vmatmul.mubr.msk.bf16.vlgmr.msra.gmra.mxu1 %vm3429_vm5, %v16354_v5 }
 0xcb0   :  { %v14057_v6 = vpop.f32.mrf.mxu1 }
 0xcb1   :  { %v4512_v25 = vadd.f32 %v14057_v6, %v4354_v3  ;;  %v15153_v3 = vld [vmem:[%s17928_s12 + $0x18] sm:$0xff]  }
 0xcb2   :  { %v4495_v26 = vpop.f32.mrf.mxu1 }
 0xcb3   :  { %v4510_v27 = vadd.f32 %v4495_v26, %v4352_v15  ;;  %v15154_v15 = vld [vmem:[%s17928_s12 + $0x10] sm:$0xff]  }
 0xcb4   :  { %v14058_v30 = vpop.f32.mrf.mxu1 }
 0xcb5   :  { %v4513_v34 = vadd.f32 %v14058_v30, %v4355_v13  ;;  %v15156_v13 = vld [vmem:[%s17928_s12] sm:$0xff]  }
 0xcb6   :  { %v16570_v31 = vpop.f32.mrf.mxu1 }
 0xcb7   :  { %v4511_v58 = vadd.f32 %v16570_v31, %v4353_v18 }
 0xcc0   :  { %v14069_v37 = vpop.f32.mrf.mxu1 }
 0xcc2   :  { %v4581_v33 = vpop.f32.mrf.mxu1 }
 0xcc4   :  { %v14070_v36 = vpop.f32.mrf.mxu1 }
 0xcc5   :  { %v4602_v39 = vpack.c.bf16 %v14070_v36, %v14069_v37 }
 0xcc6   :  { %v4584_v4 = vpop.f32.mrf.mxu1 }
 0xcc7   :  { %v4601_v28 = vpack.c.bf16 %v4584_v4, %v4581_v33  ;;  %14071 = vmatprep.subr.bf16.mxu0 %v4602_v39  ;;  %v15157_v4 = vld [vmem:[%s17928_s12 + $0x38] sm:$0xff]  }
 0xcc8   :  { %14072 = vmatpush3.bf16.msra.mxu0 %v4602_v39 }
 0xcc9   :  { %14073 = vmatprep.subr.bf16.mxu0 %v4601_v28 }
 0xccc   :  { %14074 = vmatpush3.bf16.msra.mxu0 %v4601_v28  ;;  %v15158_v28 = vld [vmem:[%s17928_s12 + $0x30] sm:$0xff]  }
 0xccd   :  { %14079 = vmatprep.subr.bf16.mxu0 %v15147_v44 }
 0xccf   :  { %14076 = vmatmul.mubr.msk.bf16.vlgmr.msra.gmra.mxu0 %vm2097_vm4, %v15146_v43  ;;  %v15159_v43 = vld [vmem:[%s17928_s12 + $0x28] sm:$0xff]  }
 0xcd0   :  { %14080 = vmatpush3.bf16.msra.mxu0 %v15147_v44  ;;  %14087 = vmatprep.mubr.msk.bf16.mxu0 %vm3429_vm5, %v16350_v53  ;;  %v16597_v53 = vld [vmem:[%s17926_s5 + $0x80] sm:$0xff]   ;;  %v16652_v44 = vld [vmem:[%s17926_s5 + $0x8] sm:$0xff]  }
 0xcd1   :  { %14081 = vmatprep.subr.bf16.mxu0 %v15148_v29  ;;  %14095 = vmatprep.mubr.msk.bf16.mxu1 %vm2097_vm4, %v16597_v53 }
 0xcd4   :  { %14082 = vmatpush3.bf16.msra.mxu0 %v15148_v29  ;;  %v15160_v29 = vld [vmem:[%s17928_s12 + $0x20] sm:$0xff]  }
 0xcd5   :  { %14083 = vmatprep.subr.bf16.mxu0 %v15149_v45 }
 0xcd8   :  { %14084 = vmatpush3.bf16.msra.mxu0 %v15149_v45  ;;  %v16669_v45 = vld [vmem:[%s17926_s5 + $0x20] sm:$0xff]  }
 0xcd9   :  { %14085 = vmatprep.subr.bf16.mxu0 %v15150_v32 }
 0xcdc   :  { %14086 = vmatpush3.bf16.msra.mxu0 %v15150_v32 }
 0xcdf   :  { %14088 = vmatmul.mubr.msk.bf16.vlgmr.msra.gmra.mxu0 %vm3429_vm5, %v16354_v5 }
 0xce0   :  { %14115 = vmatprep.mubr.msk.bf16.mxu0 %vm2097_vm4, %v16363_v41 }
 0xd8f   :  { %v14077_v47 = vpop.f32.mrf.mxu0 }
 0xd90   :  { %v4670_v48 = vadd.f32 %v14077_v47, %v4512_v25 }
 0xd91   :  { %v4653_v46 = vpop.f32.mrf.mxu0 }
 0xd92   :  { %v4668_v38 = vadd.f32 %v4653_v46, %v4510_v27 }
 0xd93   :  { %v14078_v40 = vpop.f32.mrf.mxu0 }
 0xd94   :  { %v4671_v49 = vadd.f32 %v14078_v40, %v4513_v34 }
 0xd95   :  { %v4656_v50 = vpop.f32.mrf.mxu0 }
 0xd96   :  { %v4669_v6 = vadd.f32 %v4656_v50, %v4511_v58 }
 0xd9f   :  { %v14089_v54 = vpop.f32.mrf.mxu0 }
 0xda1   :  { %v4739_v5 = vpop.f32.mrf.mxu0 }
 0xda3   :  { %v14090_v57 = vpop.f32.mrf.mxu0 }
 0xda4   :  { %v4760_v55 = vpack.c.bf16 %v14090_v57, %v14089_v54  ;;  %v15161_v57 = vld [vmem:[%s17928_s12 + $0x58] sm:$0xff]  }
 0xda5   :  { %v4742_v41 = vpop.f32.mrf.mxu0 }
 0xda6   :  { %v4759_v63 = vpack.c.bf16 %v4742_v41, %v4739_v5  ;;  %14091 = vmatprep.subr.bf16.mxu1 %v4760_v55  ;;  %v16684_v41 = vld [vmem:[%s17926_s5 + $0x18] sm:$0xff]  }
 0xda7   :  { %14092 = vmatpush3.bf16.msra.mxu1 %v4760_v55  ;;  %v15162_v55 = vld [vmem:[%s17928_s12 + $0x50] sm:$0xff]  }
 0xda8   :  { %14093 = vmatprep.subr.bf16.mxu1 %v4759_v63 }
 0xdab   :  { %14094 = vmatpush3.bf16.msra.mxu1 %v4759_v63  ;;  %v15163_v63 = vld [vmem:[%s17928_s12 + $0x48] sm:$0xff]  }
 0xdac   :  { %14099 = vmatprep.subr.bf16.mxu1 %v15153_v3 }
 0xdae   :  { %14096 = vmatmul.mubr.msk.bf16.vlgmr.msra.gmra.mxu1 %vm2097_vm4, %v16607_v11 }
 0xdaf   :  { %14100 = vmatpush3.bf16.msra.mxu1 %v15153_v3  ;;  %v15164_v3 = vld [vmem:[%s17928_s12 + $0x40] sm:$0xff]  }
 0xdb0   :  { %14101 = vmatprep.subr.bf16.mxu1 %v15154_v15 }
 0xdb3   :  { %14102 = vmatpush3.bf16.msra.mxu1 %v15154_v15  ;;  %v16703_v15 = vld [vmem:[%s17929_s13] ss:$0 sm:$0xff] }
 0xdb4   :  { %14103 = vmatprep.subr.bf16.mxu1 %v15155_v7 }
 0xdb7   :  { %14104 = vmatpush3.bf16.msra.mxu1 %v15155_v7 }
 0xdb8   :  { %14105 = vmatprep.subr.bf16.mxu1 %v15156_v13 }
 0xdbb   :  { %14106 = vmatpush3.bf16.msra.mxu1 %v15156_v13 }
 0xe6e   :  { %v14097_v14 = vpop.f32.mrf.mxu1 }
 0xe6f   :  { %v4828_v22 = vadd.f32 %v14097_v14, %v4670_v48 }
 0xe70   :  { %v4811_v23 = vpop.f32.mrf.mxu1 }
 0xe71   :  { %v4826_v25 = vadd.f32 %v4811_v23, %v4668_v38  ;;  %v4832_v35 = vmax.f32 %v4828_v22, 0.0 }
 0xe72   :  { %v14098_v2 = vpop.f32.mrf.mxu1 }
 0xe73   :  { %v4829_v26 = vadd.f32 %v14098_v2, %v4671_v49  ;;  %v4830_v52 = vmax.f32 %v4826_v25, 0.0 }
 0xe74   :  { %v4814_v24 = vpop.f32.mrf.mxu1 }
 0xe75   :  { %v4833_v8 = vmax.f32 %v4829_v26, 0.0  ;;  %v4827_v27 = vadd.f32 %v4814_v24, %v4669_v6  ;;  %v15165_v26 = vld [vmem:[%s17928_s12 + $0x78] sm:$0xff]   ;;  %v15166_v24 = vld [vmem:[%s17928_s12 + $0x70] sm:$0xff]  }
 0xe77   :  { %v16628_v30 = vpack.c.bf16 %v4833_v8, %v4832_v35  ;;  %v4831_v12 = vmax.f32 %v4827_v27, 0.0  ;;  %v16719_v35 = vld [vmem:[%s17926_s5 + $0x28] sm:$0xff]   ;;  %v15168_v27 = vld [vmem:[%s17928_s12 + $0x60] sm:$0xff]  }
 0xe78   :  { %v15167_v8 = vld [vmem:[%s17928_s12 + $0x68] sm:$0xff]  }
 0xe79   :  { %v16630_v16 = vpack.c.bf16 %v4831_v12, %v4830_v52 }
 0xe7b   :  { %14107 = vmatprep.mubr.msk.bf16.mxu1 %vm3429_vm5, %v16630_v16 }
 0xe7c   :  { %14108 = vmatmul.mubr.msk.bf16.vlgmr.msra.gmra.mxu1 %vm3429_vm5, %v16628_v30 }
 0xe7d   :  { %14135 = vmatprep.mubr.msk.bf16.mxu1 %vm2097_vm4, %v16639_v19 }
 0xf3c   :  { %v14109_v34 = vpop.f32.mrf.mxu1 }
 0xf3e   :  { %v4909_v31 = vpop.f32.mrf.mxu1 }
 0xf40   :  { %v14110_v37 = vpop.f32.mrf.mxu1 }
 0xf41   :  { %v4925_v33 = vpack.c.bf16 %v14110_v37, %v14109_v34 }
 0xf42   :  { %v4912_v36 = vpop.f32.mrf.mxu1 }
 0xf43   :  { %v4924_v39 = vpack.c.bf16 %v4912_v36, %v4909_v31  ;;  %14111 = vmatprep.subr.bf16.mxu0 %v4925_v33 }
 0xf44   :  { %14112 = vmatpush3.bf16.msra.mxu0 %v4925_v33 }
 0xf45   :  { %14113 = vmatprep.subr.bf16.mxu0 %v4924_v39 }
 0xf48   :  { %14114 = vmatpush3.bf16.msra.mxu0 %v4924_v39 }
 0xf49   :  { %14119 = vmatprep.subr.bf16.mxu0 %v15157_v4 }
 0xf4b   :  { %14116 = vmatmul.mubr.msk.bf16.vlgmr.msra.gmra.mxu0 %vm2097_vm4, %v16652_v44 }
 0xf4c   :  { %14120 = vmatpush3.bf16.msra.mxu0 %v15157_v4  ;;  %14127 = vmatprep.mubr.msk.bf16.mxu0 %vm3429_vm5, %v16630_v16 }
 0xf4d   :  { %14121 = vmatprep.subr.bf16.mxu0 %v15158_v28 }
 0xf50   :  { %14122 = vmatpush3.bf16.msra.mxu0 %v15158_v28 }
 0xf51   :  { %14123 = vmatprep.subr.bf16.mxu0 %v15159_v43 }
 0xf54   :  { %14124 = vmatpush3.bf16.msra.mxu0 %v15159_v43 }
 0xf55   :  { %14125 = vmatprep.subr.bf16.mxu0 %v15160_v29 }
 0xf58   :  { %14126 = vmatpush3.bf16.msra.mxu0 %v15160_v29 }
 0xf5b   :  { %14128 = vmatmul.mubr.msk.bf16.vlgmr.msra.gmra.mxu0 %vm3429_vm5, %v16628_v30 }
 0xf5c   :  { %14155 = vmatprep.mubr.msk.bf16.mxu0 %vm2097_vm4, %v16669_v45 }
0x100b   :  { %v14117_v32 = vpop.f32.mrf.mxu0 }
0x100c   :  { %v4983_v7 = vadd.f32 %v14117_v32, %v16703_v15 }
0x100d   :  { %v4960_v47 = vpop.f32.mrf.mxu0 }
0x100e   :  { %v4981_v20 = vadd.f32 %v16703_v15, %v4960_v47  ;;  %v15170_v47 = vld [vmem:[%s17928_s12 + $0x90] sm:$0xff]  }
0x100f   :  { %v14118_v48 = vpop.f32.mrf.mxu0 }
0x1010   :  { %v4984_v21 = vadd.f32 %v14118_v48, %v16703_v15  ;;  %v16746_v48 = vld [vmem:[%s17926_s5 + $0x38] sm:$0xff]  }
0x1011   :  { %v16673_v46 = vpop.f32.mrf.mxu0 }
0x101b   :  { %v14129_v38 = vpop.f32.mrf.mxu0 }
0x101d   :  { %v5052_v40 = vpop.f32.mrf.mxu0 }
0x101f   :  { %v14130_v49 = vpop.f32.mrf.mxu0 }
0x1020   :  { %v5068_v50 = vpack.c.bf16 %v14130_v49, %v14129_v38  ;;  %v15171_v38 = vld [vmem:[%s17928_s12 + $0x88] sm:$0xff]  }
0x1021   :  { %v5055_v54 = vpop.f32.mrf.mxu0 }
0x1022   :  { %v5067_v5 = vpack.c.bf16 %v5055_v54, %v5052_v40  ;;  %14131 = vmatprep.subr.bf16.mxu1 %v5068_v50  ;;  %v15172_v40 = vld [vmem:[%s17928_s12 + $0x80] sm:$0xff]  }
0x1023   :  { %14132 = vmatpush3.bf16.msra.mxu1 %v5068_v50 }
0x1024   :  { %14133 = vmatprep.subr.bf16.mxu1 %v5067_v5 }
0x1027   :  { %14134 = vmatpush3.bf16.msra.mxu1 %v5067_v5 }
0x1028   :  { %14139 = vmatprep.subr.bf16.mxu1 %v15161_v57 }
0x102a   :  { %14136 = vmatmul.mubr.msk.bf16.vlgmr.msra.gmra.mxu1 %vm2097_vm4, %v16684_v41 }
0x102b   :  { %14140 = vmatpush3.bf16.msra.mxu1 %v15161_v57  ;;  %14147 = vmatprep.mubr.msk.bf16.mxu1 %vm3429_vm5, %v16630_v16 }
0x102c   :  { %14141 = vmatprep.subr.bf16.mxu1 %v15162_v55 }
0x102f   :  { %14142 = vmatpush3.bf16.msra.mxu1 %v15162_v55 }
0x1030   :  { %14143 = vmatprep.subr.bf16.mxu1 %v15163_v63 }
0x1033   :  { %14144 = vmatpush3.bf16.msra.mxu1 %v15163_v63 }
0x1034   :  { %14145 = vmatprep.subr.bf16.mxu1 %v15164_v3 }
0x1037   :  { %14146 = vmatpush3.bf16.msra.mxu1 %v15164_v3 }
0x103a   :  { %14148 = vmatmul.mubr.msk.bf16.vlgmr.msra.gmra.mxu1 %vm3429_vm5, %v16628_v30 }
0x103b   :  { %14175 = vmatprep.mubr.msk.bf16.mxu1 %vm2097_vm4, %v16450_v51 }
0x10ea   :  { %v14137_v13 = vpop.f32.mrf.mxu1 }
0x10eb   :  { %v5120_v62 = vadd.f32 %v14137_v13, %v4983_v7 }
0x10ec   :  { %v5103_v0 = vpop.f32.mrf.mxu1 }
0x10ed   :  { %v5118_v10 = vadd.f32 %v5103_v0, %v4981_v20 }
0x10ee   :  { %v14138_v14 = vpop.f32.mrf.mxu1 }
0x10ef   :  { %v5121_v18 = vadd.f32 %v14138_v14, %v4984_v21  ;;  %v15174_v21 = vld [vmem:[%s17928_s12 + $0xb0] sm:$0xff]   ;;  %v15175_v14 = vld [vmem:[%s17928_s12 + $0xa8] sm:$0xff]  }
0x10f0   :  { %v16708_v23 = vpop.f32.mrf.mxu1 }
0x10fa   :  { %v14149_v51 = vpop.f32.mrf.mxu1 }
0x10fc   :  { %v5189_v58 = vpop.f32.mrf.mxu1 }
0x10fe   :  { %v14150_v22 = vpop.f32.mrf.mxu1 }
0x10ff   :  { %v5205_v2 = vpack.c.bf16 %v14150_v22, %v14149_v51 }
0x1100   :  { %v5192_v6 = vpop.f32.mrf.mxu1 }
0x1101   :  { %v5204_v25 = vpack.c.bf16 %v5192_v6, %v5189_v58  ;;  %14151 = vmatprep.subr.bf16.mxu0 %v5205_v2 }
0x1102   :  { %14152 = vmatpush3.bf16.msra.mxu0 %v5205_v2 }
0x1103   :  { %14153 = vmatprep.subr.bf16.mxu0 %v5204_v25 }
0x1106   :  { %14154 = vmatpush3.bf16.msra.mxu0 %v5204_v25 }
0x1107   :  { %14159 = vmatprep.subr.bf16.mxu0 %v15165_v26 }
0x1109   :  { %14156 = vmatmul.mubr.msk.bf16.vlgmr.msra.gmra.mxu0 %vm2097_vm4, %v16719_v35 }
0x110a   :  { %14160 = vmatpush3.bf16.msra.mxu0 %v15165_v26  ;;  %14167 = vmatprep.mubr.msk.bf16.mxu0 %vm3429_vm5, %v16630_v16 }
0x110b   :  { %14161 = vmatprep.subr.bf16.mxu0 %v15166_v24 }
0x110e   :  { %14162 = vmatpush3.bf16.msra.mxu0 %v15166_v24 }
0x110f   :  { %14163 = vmatprep.subr.bf16.mxu0 %v15167_v8 }
0x1112   :  { %14164 = vmatpush3.bf16.msra.mxu0 %v15167_v8 }
0x1113   :  { %14165 = vmatprep.subr.bf16.mxu0 %v15168_v27 }
0x1116   :  { %14166 = vmatpush3.bf16.msra.mxu0 %v15168_v27 }
0x1119   :  { %14168 = vmatmul.mubr.msk.bf16.vlgmr.msra.gmra.mxu0 %vm3429_vm5, %v16628_v30 }
0x111a   :  { %14195 = vmatprep.mubr.msk.bf16.mxu0 %vm2097_vm4, %v16479_v61  ;;  %v15169_v61 = vld [vmem:[%s17928_s12 + $0x98] sm:$0xff]  }
0x11c9   :  { %v14157_v52 = vpop.f32.mrf.mxu0 }
0x11ca   :  { %v5257_v12 = vadd.f32 %v14157_v52, %v5120_v62 }
0x11cb   :  { %v5240_v34 = vpop.f32.mrf.mxu0 }
0x11cc   :  { %v5255_v31 = vadd.f32 %v5240_v34, %v5118_v10  ;;  %v16773_v10 = vld [vmem:[%s17926_s5 + $0x48] sm:$0xff]  }
0x11cd   :  { %v14158_v37 = vpop.f32.mrf.mxu0 }
0x11ce   :  { %v5258_v33 = vadd.f32 %v14158_v37, %v5121_v18  ;;  %v15176_v18 = vld [vmem:[%s17928_s12 + $0xa0] sm:$0xff]   ;;  %v16800_v37 = vld [vmem:[%s17926_s5 + $0x58] sm:$0xff]  }
0x11cf   :  { %v16735_v36 = vpop.f32.mrf.mxu0 }
0x11d9   :  { %v14169_v39 = vpop.f32.mrf.mxu0 }
0x11db   :  { %v5326_v4 = vpop.f32.mrf.mxu0 }
0x11dd   :  { %v14170_v28 = vpop.f32.mrf.mxu0 }
0x11de   :  { %v5342_v43 = vpack.c.bf16 %v14170_v28, %v14169_v39  ;;  %v15180_v39 = vld [vmem:[%s17928_s12 + $0xc0] sm:$0xff]  }
0x11df   :  { %v5329_v29 = vpop.f32.mrf.mxu0 }
0x11e0   :  { %v5341_v32 = vpack.c.bf16 %v5329_v29, %v5326_v4  ;;  %14171 = vmatprep.subr.bf16.mxu1 %v5342_v43 }
0x11e1   :  { %14172 = vmatpush3.bf16.msra.mxu1 %v5342_v43 }
0x11e2   :  { %14173 = vmatprep.subr.bf16.mxu1 %v5341_v32 }
0x11e5   :  { %14174 = vmatpush3.bf16.msra.mxu1 %v5341_v32 }
0x11e6   :  { %14179 = vmatprep.subr.bf16.mxu1 %v15169_v61 }
0x11e8   :  { %14176 = vmatmul.mubr.msk.bf16.vlgmr.msra.gmra.mxu1 %vm2097_vm4, %v16746_v48 }
0x11e9   :  { %14180 = vmatpush3.bf16.msra.mxu1 %v15169_v61  ;;  %14187 = vmatprep.mubr.msk.bf16.mxu1 %vm3429_vm5, %v16630_v16 }
0x11ea   :  { %14181 = vmatprep.subr.bf16.mxu1 %v15170_v47 }
0x11ed   :  { %14182 = vmatpush3.bf16.msra.mxu1 %v15170_v47 }
0x11ee   :  { %14183 = vmatprep.subr.bf16.mxu1 %v15171_v38 }
0x11f1   :  { %14184 = vmatpush3.bf16.msra.mxu1 %v15171_v38 }
0x11f2   :  { %14185 = vmatprep.subr.bf16.mxu1 %v15172_v40 }
0x11f5   :  { %14186 = vmatpush3.bf16.msra.mxu1 %v15172_v40 }
0x11f8   :  { %14188 = vmatmul.mubr.msk.bf16.vlgmr.msra.gmra.mxu1 %vm3429_vm5, %v16628_v30 }
0x11f9   :  { %14215 = vmatprep.mubr.msk.bf16.mxu1 %vm2097_vm4, %v16508_v42  ;;  %v15173_v42 = vld [vmem:[%s17928_s12 + $0xb8] sm:$0xff]  }
0x12a8   :  { %v14177_v49 = vpop.f32.mrf.mxu1 }
0x12a9   :  { %v5394_v50 = vadd.f32 %v14177_v49, %v5257_v12 }
0x12aa   :  { %v5377_v54 = vpop.f32.mrf.mxu1 }
0x12ab   :  { %v5392_v5 = vadd.f32 %v5377_v54, %v5255_v31  ;;  %v15178_v31 = vld [vmem:[%s17928_s12 + $0xd0] sm:$0xff]  }
0x12ac   :  { %v14178_v57 = vpop.f32.mrf.mxu1 }
0x12ad   :  { %v5395_v55 = vadd.f32 %v14178_v57, %v5258_v33  ;;  %v15179_v33 = vld [vmem:[%s17928_s12 + $0xc8] sm:$0xff]   ;;  %v15182_v57 = vld [vmem:[%s17928_s12 + $0xf0] sm:$0xff]  }
0x12ae   :  { %v16762_v63 = vpop.f32.mrf.mxu1 }
0x12b8   :  { %v14189_v3 = vpop.f32.mrf.mxu1 }
0x12ba   :  { %v5463_v7 = vpop.f32.mrf.mxu1 }
0x12bc   :  { %v14190_v13 = vpop.f32.mrf.mxu1 }
0x12bd   :  { %v5479_v20 = vpack.c.bf16 %v14190_v13, %v14189_v3  ;;  %v15183_v3 = vld [vmem:[%s17928_s12 + $0xe8] sm:$0xff]  }
0x12be   :  { %v5466_v62 = vpop.f32.mrf.mxu1 }
0x12bf   :  { %v5478_v0 = vpack.c.bf16 %v5466_v62, %v5463_v7  ;;  %14191 = vmatprep.subr.bf16.mxu0 %v5479_v20  ;;  %v15184_v7 = vld [vmem:[%s17928_s12 + $0xe0] sm:$0xff]  }
0x12c0   :  { %14192 = vmatpush3.bf16.msra.mxu0 %v5479_v20 }
0x12c1   :  { %14193 = vmatprep.subr.bf16.mxu0 %v5478_v0 }
0x12c4   :  { %14194 = vmatpush3.bf16.msra.mxu0 %v5478_v0 }
0x12c5   :  { %14199 = vmatprep.subr.bf16.mxu0 %v15173_v42 }
0x12c7   :  { %14196 = vmatmul.mubr.msk.bf16.vlgmr.msra.gmra.mxu0 %vm2097_vm4, %v16773_v10 }
0x12c8   :  { %14200 = vmatpush3.bf16.msra.mxu0 %v15173_v42  ;;  %14207 = vmatprep.mubr.msk.bf16.mxu0 %vm3429_vm5, %v16630_v16 }
0x12c9   :  { %14201 = vmatprep.subr.bf16.mxu0 %v15174_v21 }
0x12cc   :  { %14202 = vmatpush3.bf16.msra.mxu0 %v15174_v21 }
0x12cd   :  { %14203 = vmatprep.subr.bf16.mxu0 %v15175_v14 }
0x12d0   :  { %14204 = vmatpush3.bf16.msra.mxu0 %v15175_v14 }
0x12d1   :  { %14205 = vmatprep.subr.bf16.mxu0 %v15176_v18 }
0x12d4   :  { %14206 = vmatpush3.bf16.msra.mxu0 %v15176_v18 }
0x12d7   :  { %14208 = vmatmul.mubr.msk.bf16.vlgmr.msra.gmra.mxu0 %vm3429_vm5, %v16628_v30 }
0x12d8   :  { %14235 = vmatprep.mubr.msk.bf16.mxu0 %vm2097_vm4, %v16537_v59  ;;  %v15177_v59 = vld [vmem:[%s17928_s12 + $0xd8] sm:$0xff]  }
0x1387   :  { %v14197_v51 = vpop.f32.mrf.mxu0 }
0x1388   :  { %v5531_v58 = vadd.f32 %v14197_v51, %v5394_v50 }
0x1389   :  { %v5514_v22 = vpop.f32.mrf.mxu0 }
0x138a   :  { %v5529_v2 = vadd.f32 %v5514_v22, %v5392_v5 }
0x138b   :  { %v14198_v6 = vpop.f32.mrf.mxu0 }
0x138c   :  { %v5532_v25 = vadd.f32 %v14198_v6, %v5395_v55  ;;  %v16827_v55 = vld [vmem:[%s17926_s5 + $0x68] sm:$0xff]  }
0x138d   :  { %v16789_v26 = vpop.f32.mrf.mxu0 }
0x1397   :  { %v14209_v24 = vpop.f32.mrf.mxu0 }
0x1399   :  { %v5600_v8 = vpop.f32.mrf.mxu0 }
0x139b   :  { %v14210_v27 = vpop.f32.mrf.mxu0 }
0x139c   :  { %v5616_v52 = vpack.c.bf16 %v14210_v27, %v14209_v24  ;;  %v16854_v24 = vld [vmem:[%s17926_s5 + $0x78] sm:$0xff]   ;;  %v15188_v27 = vld [vmem:[%s17928_s12 + $0x100] sm:$0xff]  }
0x139d   :  { %v5603_v12 = vpop.f32.mrf.mxu0 }
0x139e   :  { %v5615_v34 = vpack.c.bf16 %v5603_v12, %v5600_v8  ;;  %14211 = vmatprep.subr.bf16.mxu1 %v5616_v52  ;;  %v15187_v8 = vld [vmem:[%s17928_s12 + $0x108] sm:$0xff]  }
0x139f   :  { %14212 = vmatpush3.bf16.msra.mxu1 %v5616_v52 }
0x13a0   :  { %14213 = vmatprep.subr.bf16.mxu1 %v5615_v34 }
0x13a3   :  { %14214 = vmatpush3.bf16.msra.mxu1 %v5615_v34 }
0x13a4   :  { %14219 = vmatprep.subr.bf16.mxu1 %v15177_v59 }
0x13a6   :  { %14216 = vmatmul.mubr.msk.bf16.vlgmr.msra.gmra.mxu1 %vm2097_vm4, %v16800_v37 }
0x13a7   :  { %14220 = vmatpush3.bf16.msra.mxu1 %v15177_v59  ;;  %14227 = vmatprep.mubr.msk.bf16.mxu1 %vm3429_vm5, %v16630_v16 }
0x13a8   :  { %14221 = vmatprep.subr.bf16.mxu1 %v15178_v31 }
0x13ab   :  { %14222 = vmatpush3.bf16.msra.mxu1 %v15178_v31 }
0x13ac   :  { %14223 = vmatprep.subr.bf16.mxu1 %v15179_v33 }
0x13af   :  { %14224 = vmatpush3.bf16.msra.mxu1 %v15179_v33 }
0x13b0   :  { %14225 = vmatprep.subr.bf16.mxu1 %v15180_v39 }
0x13b3   :  { %14226 = vmatpush3.bf16.msra.mxu1 %v15180_v39 }
0x13b6   :  { %14228 = vmatmul.mubr.msk.bf16.vlgmr.msra.gmra.mxu1 %vm3429_vm5, %v16628_v30 }
0x13b7   :  { %14255 = vmatprep.mubr.msk.bf16.mxu1 %vm2097_vm4, %v16566_v1  ;;  %v15181_v1 = vld [vmem:[%s17928_s12 + $0xf8] sm:$0xff]  }
0x1466   :  { %v14217_v4 = vpop.f32.mrf.mxu1 }
0x1467   :  { %v5668_v28 = vadd.f32 %v14217_v4, %v5531_v58 }
0x1468   :  { %v5651_v43 = vpop.f32.mrf.mxu1 }
0x1469   :  { %v5666_v29 = vadd.f32 %v5651_v43, %v5529_v2 }
0x146a   :  { %v14218_v32 = vpop.f32.mrf.mxu1 }
0x146b   :  { %v5669_v61 = vadd.f32 %v14218_v32, %v5532_v25  ;;  %v15186_v25 = vld [vmem:[%s17928_s12 + $0x110] sm:$0xff]  }
0x146c   :  { %v16816_v47 = vpop.f32.mrf.mxu1 }
0x1476   :  { %v14229_v38 = vpop.f32.mrf.mxu1 }
0x1478   :  { %v5737_v40 = vpop.f32.mrf.mxu1 }
0x147a   :  { %v14230_v49 = vpop.f32.mrf.mxu1 }
0x147b   :  { %v5753_v50 = vpack.c.bf16 %v14230_v49, %v14229_v38  ;;  %v15190_v38 = vld [vmem:[%s17924_s10 + $0x130] sm:$0xff]   ;;  %v4982_v49 = vadd.f32 %v16703_v15, %v16673_v46 }
0x147c   :  { %v5740_v54 = vpop.f32.mrf.mxu1 }
0x147d   :  { %v5752_v5 = vpack.c.bf16 %v5740_v54, %v5737_v40  ;;  %14231 = vmatprep.subr.bf16.mxu0 %v5753_v50  ;;  %v15191_v40 = vld [vmem:[%s17924_s10 + $0x128] sm:$0xff]  }
0x147e   :  { %14232 = vmatpush3.bf16.msra.mxu0 %v5753_v50  ;;  %v5119_v50 = vadd.f32 %v16708_v23, %v4982_v49 }
0x147f   :  { %14233 = vmatprep.subr.bf16.mxu0 %v5752_v5 }
0x1480   :  { %v5256_v54 = vadd.f32 %v16735_v36, %v5119_v50 }
0x1482   :  { %14234 = vmatpush3.bf16.msra.mxu0 %v5752_v5  ;;  %v5393_v5 = vadd.f32 %v16762_v63, %v5256_v54 }
0x1483   :  { %14239 = vmatprep.subr.bf16.mxu0 %v15181_v1 }
0x1485   :  { %14236 = vmatmul.mubr.msk.bf16.vlgmr.msra.gmra.mxu0 %vm2097_vm4, %v16827_v55 }
0x1486   :  { %14240 = vmatpush3.bf16.msra.mxu0 %v15181_v1  ;;  %14247 = vmatprep.mubr.msk.bf16.mxu0 %vm3429_vm5, %v16630_v16  ;;  %v5530_v1 = vadd.f32 %v16789_v26, %v5393_v5 }
0x1487   :  { %14241 = vmatprep.subr.bf16.mxu0 %v15182_v57 }
0x148a   :  { %14242 = vmatpush3.bf16.msra.mxu0 %v15182_v57 }
0x148b   :  { %14243 = vmatprep.subr.bf16.mxu0 %v15183_v3 }
0x148e   :  { %14244 = vmatpush3.bf16.msra.mxu0 %v15183_v3  ;;  %v5667_v3 = vadd.f32 %v16816_v47, %v5530_v1 }
0x148f   :  { %14245 = vmatprep.subr.bf16.mxu0 %v15184_v7 }
0x1492   :  { %14246 = vmatpush3.bf16.msra.mxu0 %v15184_v7 }
0x1495   :  { %14248 = vmatmul.mubr.msk.bf16.vlgmr.msra.gmra.mxu0 %vm3429_vm5, %v16628_v30 }
0x1496   :  { %14275 = vmatprep.mubr.msk.bf16.mxu0 %vm2097_vm4, %v16597_v53  ;;  %v15185_v53 = vld [vmem:[%s17928_s12 + $0x118] sm:$0xff]  }
0x1545   :  { %v14237_v13 = vpop.f32.mrf.mxu0 }
0x1546   :  { %v5805_v20 = vadd.f32 %v14237_v13, %v5668_v28 }
0x1547   :  { %v5788_v62 = vpop.f32.mrf.mxu0 }
0x1548   :  { %v5803_v0 = vadd.f32 %v5788_v62, %v5666_v29 }
0x1549   :  { %v14238_v42 = vpop.f32.mrf.mxu0 }
0x154a   :  { %v5806_v21 = vadd.f32 %v14238_v42, %v5669_v61  ;;  %v15189_v61 = vld [vmem:[%s17924_s10 + $0x138] sm:$0xff]  }
0x154b   :  { %v16843_v14 = vpop.f32.mrf.mxu0 }
0x154c   :  { %v5804_v13 = vadd.f32 %v16843_v14, %v5667_v3 }
0x1555   :  { %v14249_v18 = vpop.f32.mrf.mxu0 }
0x1557   :  { %v5874_v51 = vpop.f32.mrf.mxu0 }
0x1559   :  { %v14250_v58 = vpop.f32.mrf.mxu0 }
0x155a   :  { %v5890_v22 = vpack.c.bf16 %v14250_v58, %v14249_v18 }
0x155b   :  { %v5877_v2 = vpop.f32.mrf.mxu0 }
0x155c   :  { %v5889_v6 = vpack.c.bf16 %v5877_v2, %v5874_v51  ;;  %14251 = vmatprep.subr.bf16.mxu1 %v5890_v22 }
0x155d   :  { %14252 = vmatpush3.bf16.msra.mxu1 %v5890_v22 }
0x155e   :  { %14253 = vmatprep.subr.bf16.mxu1 %v5889_v6 }
0x1561   :  { %14254 = vmatpush3.bf16.msra.mxu1 %v5889_v6 }
0x1562   :  { %14259 = vmatprep.subr.bf16.mxu1 %v15185_v53 }
0x1564   :  { %14256 = vmatmul.mubr.msk.bf16.vlgmr.msra.gmra.mxu1 %vm2097_vm4, %v16854_v24 }
0x1565   :  { %14260 = vmatpush3.bf16.msra.mxu1 %v15185_v53  ;;  %14267 = vmatprep.mubr.msk.bf16.mxu1 %vm3429_vm5, %v16630_v16  ;;  %v16871_v16 = vld [vmem:[%s17926_s5] sm:$0xff]   ;;  %v15193_v53 = vld [vmem:[%s17924_s10 + $0x158] sm:$0xff]  }
0x1566   :  { %14261 = vmatprep.subr.bf16.mxu1 %v15186_v25 }
0x1569   :  { %14262 = vmatpush3.bf16.msra.mxu1 %v15186_v25  ;;  %v15194_v25 = vld [vmem:[%s17924_s10 + $0x150] sm:$0xff]  }
0x156a   :  { %14263 = vmatprep.subr.bf16.mxu1 %v15187_v8 }
0x156d   :  { %14264 = vmatpush3.bf16.msra.mxu1 %v15187_v8  ;;  %v15196_v8 = vld [vmem:[%s17924_s10 + $0x140] sm:$0xff]  }
0x156e   :  { %14265 = vmatprep.subr.bf16.mxu1 %v15188_v27 }
0x1571   :  { %14266 = vmatpush3.bf16.msra.mxu1 %v15188_v27 }
0x1574   :  { %14268 = vmatmul.mubr.msk.bf16.vlgmr.msra.gmra.mxu1 %vm3429_vm5, %v16628_v30 }
0x1575   :  { %14295 = vmatprep.mubr.msk.bf16.mxu1 %vm2097_vm4, %v16871_v16 }
0x1624   :  { %v14257_v52 = vpop.f32.mrf.mxu1 }
0x1625   :  { %v5942_v12 = vadd.f32 %v14257_v52, %v5805_v20 }
0x1626   :  { %v5925_v34 = vpop.f32.mrf.mxu1 }
0x1627   :  { %v5940_v59 = vadd.f32 %v5925_v34, %v5803_v0 }
0x1628   :  { %v14258_v31 = vpop.f32.mrf.mxu1 }
0x1629   :  { %v5943_v33 = vadd.f32 %v14258_v31, %v5806_v21 }
0x162a   :  { %v5928_v39 = vpop.f32.mrf.mxu1 }
0x162b   :  { %v5941_v42 = vadd.f32 %v5928_v39, %v5804_v13 }
0x1634   :  { %v14269_v4 = vpop.f32.mrf.mxu1 }
0x1636   :  { %v6011_v28 = vpop.f32.mrf.mxu1 }
0x1638   :  { %v14270_v43 = vpop.f32.mrf.mxu1 }
0x1639   :  { %v6027_v29 = vpack.c.bf16 %v14270_v43, %v14269_v4  ;;  %v15199_v43 = vld [vmem:[%s17924_s10 + $0x168] sm:$0xff]  }
0x163a   :  { %v6014_v30 = vpop.f32.mrf.mxu1 }
0x163b   :  { %v6026_v32 = vpack.c.bf16 %v6014_v30, %v6011_v28  ;;  %14271 = vmatprep.subr.bf16.mxu0 %v6027_v29  ;;  %v15197_v28 = vld [vmem:[%s17924_s10 + $0x178] sm:$0xff]   ;;  %v16981_v30 = vld [vmem:[%s17927_s11 + $0x1] ss:$0 sm:$0xff] }
0x163c   :  { %14272 = vmatpush3.bf16.msra.mxu0 %v6027_v29  ;;  %v15200_v29 = vld [vmem:[%s17924_s10 + $0x160] sm:$0xff]  }
0x163d   :  { %14273 = vmatprep.subr.bf16.mxu0 %v6026_v32 }
0x1640   :  { %14274 = vmatpush3.bf16.msra.mxu0 %v6026_v32 }
0x1641   :  { %14279 = vmatprep.subr.bf16.mxu0 %v15189_v61 }
0x1643   :  { %14276 = vmatmul.mubr.msk.bf16.vlgmr.msra.gmra.mxu0 %vm2097_vm4, %v16607_v11  ;;  %v15192_v11 = vld [vmem:[%s17924_s10 + $0x120] sm:$0xff]  }
0x1644   :  { %14280 = vmatpush3.bf16.msra.mxu0 %v15189_v61 }
0x1645   :  { %14281 = vmatprep.subr.bf16.mxu0 %v15190_v38 }
0x1648   :  { %14282 = vmatpush3.bf16.msra.mxu0 %v15190_v38 }
0x1649   :  { %14283 = vmatprep.subr.bf16.mxu0 %v15191_v40 }
0x164c   :  { %14284 = vmatpush3.bf16.msra.mxu0 %v15191_v40 }
0x164d   :  { %14285 = vmatprep.subr.bf16.mxu0 %v15192_v11 }
0x1650   :  { %14286 = vmatpush3.bf16.msra.mxu0 %v15192_v11 }
0x1703   :  { %v14277_v57 = vpop.f32.mrf.mxu0 }
0x1704   :  { %v6079_v62 = vadd.f32 %v14277_v57, %v5942_v12 }
0x1705   :  { %v6062_v7 = vpop.f32.mrf.mxu0 }
0x1706   :  { %v6077_v20 = vadd.f32 %v6062_v7, %v5940_v59  ;;  %v16904_v63 = vadd.f32 %v16346_v17, %v6079_v62 }
0x1707   :  { %v14278_v0 = vpop.f32.mrf.mxu0 }
0x1708   :  { %v6080_v21 = vadd.f32 %v14278_v0, %v5943_v33  ;;  %v16898_v15 = vadd.f32 %v16340_v56, %v6077_v20  ;;  %v6087_v51 = vmax.f32 %v16904_v63, 0.0  ;;  %v15201_v0 = vld [vmem:[%s17924_s10 + $0x198] sm:$0xff]  }
0x1709   :  { %v6065_v46 = vpop.f32.mrf.mxu0 }
0x170a   :  { %v16901_v23 = vadd.f32 %v16342_v60, %v6080_v21  ;;  %v6078_v36 = vadd.f32 %v6065_v46, %v5941_v42  ;;  %v6085_v14 = vmax.f32 %v16898_v15, 0.0  ;;  %v15202_v42 = vld [vmem:[%s17924_s10 + $0x190] sm:$0xff]   ;;  %v15203_v21 = vld [vmem:[%s17924_s10 + $0x188] sm:$0xff]   ;;  %v15204_v46 = vld [vmem:[%s17924_s10 + $0x180] sm:$0xff]  }
0x170c   :  { %v16907_v26 = vadd.f32 %v16344_v9, %v6078_v36  ;;  %v6088_v47 = vmax.f32 %v16901_v23, 0.0 }
0x170e   :  { %v6086_v18 = vmax.f32 %v16907_v26, 0.0  ;;  %v16923_v60 = vpack.c.bf16 %v6088_v47, %v6087_v51 }
0x1710   :  { %v16917_v56 = vpack.c.bf16 %v6086_v18, %v6085_v14 }
0x1712   :  { %14287 = vmatprep.mubr.msk.bf16.mxu0 %vm3429_vm5, %v16917_v56 }
0x1713   :  { %14288 = vmatmul.mubr.msk.bf16.vlgmr.msra.gmra.mxu0 %vm3429_vm5, %v16923_v60 }
0x1714   :  { %14315 = vmatprep.mubr.msk.bf16.mxu0 %vm2097_vm4, %v16639_v19  ;;  %v15195_v19 = vld [vmem:[%s17924_s10 + $0x148] sm:$0xff]  }
0x17d3   :  { %v14289_v9 = vpop.f32.mrf.mxu0 }
0x17d5   :  { %v6166_v17 = vpop.f32.mrf.mxu0 }
0x17d7   :  { %v14290_v58 = vpop.f32.mrf.mxu0 }
0x17d8   :  { %v6182_v22 = vpack.c.bf16 %v14290_v58, %v14289_v9 }
0x17d9   :  { %v6169_v2 = vpop.f32.mrf.mxu0 }
0x17da   :  { %v6181_v6 = vpack.c.bf16 %v6169_v2, %v6166_v17  ;;  %14291 = vmatprep.subr.bf16.mxu1 %v6182_v22 }
0x17db   :  { %14292 = vmatpush3.bf16.msra.mxu1 %v6182_v22 }
0x17dc   :  { %14293 = vmatprep.subr.bf16.mxu1 %v6181_v6 }
0x17df   :  { %14294 = vmatpush3.bf16.msra.mxu1 %v6181_v6 }
0x17e0   :  { %14299 = vmatprep.subr.bf16.mxu1 %v15193_v53 }
0x17e2   :  { %14296 = vmatmul.mubr.msk.bf16.vlgmr.msra.gmra.mxu1 %vm2097_vm4, %v16652_v44 }
0x17e3   :  { %14300 = vmatpush3.bf16.msra.mxu1 %v15193_v53  ;;  %14307 = vmatprep.mubr.msk.bf16.mxu1 %vm3429_vm5, %v16917_v56 }
0x17e4   :  { %14301 = vmatprep.subr.bf16.mxu1 %v15194_v25 }
0x17e7   :  { %14302 = vmatpush3.bf16.msra.mxu1 %v15194_v25 }
0x17e8   :  { %14303 = vmatprep.subr.bf16.mxu1 %v15195_v19 }
0x17eb   :  { %14304 = vmatpush3.bf16.msra.mxu1 %v15195_v19 }
0x17ec   :  { %14305 = vmatprep.subr.bf16.mxu1 %v15196_v8 }
0x17ef   :  { %14306 = vmatpush3.bf16.msra.mxu1 %v15196_v8 }
0x17f2   :  { %14308 = vmatmul.mubr.msk.bf16.vlgmr.msra.gmra.mxu1 %vm3429_vm5, %v16923_v60 }
0x17f3   :  { %14335 = vmatprep.mubr.msk.bf16.mxu1 %vm2097_vm4, %v16669_v45  ;;  %v15198_v45 = vld [vmem:[%s17924_s10 + $0x170] sm:$0xff]  }
0x18a2   :  { %v14297_v44 = vpop.f32.mrf.mxu1 }
0x18a3   :  { %v6240_v32 = vadd.f32 %v14297_v44, %v16981_v30 }
0x18a4   :  { %v6217_v27 = vpop.f32.mrf.mxu1 }
0x18a5   :  { %v6238_v38 = vadd.f32 %v16981_v30, %v6217_v27 }
0x18a6   :  { %v14298_v52 = vpop.f32.mrf.mxu1 }
0x18a7   :  { %v6241_v49 = vadd.f32 %v14298_v52, %v16981_v30  ;;  %v15205_v52 = vld [vmem:[%s17924_s10 + $0x1b8] sm:$0xff]  }
0x18a8   :  { %v16951_v12 = vpop.f32.mrf.mxu1 }
0x18b2   :  { %v14309_v34 = vpop.f32.mrf.mxu1 }
0x18b4   :  { %v6309_v59 = vpop.f32.mrf.mxu1 }
0x18b6   :  { %v14310_v31 = vpop.f32.mrf.mxu1 }
0x18b7   :  { %v6325_v33 = vpack.c.bf16 %v14310_v31, %v14309_v34  ;;  %v15206_v34 = vld [vmem:[%s17924_s10 + $0x1b0] sm:$0xff]   ;;  %v15208_v31 = vld [vmem:[%s17924_s10 + $0x1a0] sm:$0xff]  }
0x18b8   :  { %v6312_v39 = vpop.f32.mrf.mxu1 }
0x18b9   :  { %v6324_v4 = vpack.c.bf16 %v6312_v39, %v6309_v59  ;;  %14311 = vmatprep.subr.bf16.mxu0 %v6325_v33  ;;  %v15207_v59 = vld [vmem:[%s17924_s10 + $0x1a8] sm:$0xff]  }
0x18ba   :  { %14312 = vmatpush3.bf16.msra.mxu0 %v6325_v33 }
0x18bb   :  { %14313 = vmatprep.subr.bf16.mxu0 %v6324_v4 }
0x18be   :  { %14314 = vmatpush3.bf16.msra.mxu0 %v6324_v4 }
0x18bf   :  { %14319 = vmatprep.subr.bf16.mxu0 %v15197_v28 }
0x18c1   :  { %14316 = vmatmul.mubr.msk.bf16.vlgmr.msra.gmra.mxu0 %vm2097_vm4, %v16684_v41  ;;  %v16974_v41 = vld [vmem:[%s17926_s5 + $0x30] sm:$0xff]  }
0x18c2   :  { %14320 = vmatpush3.bf16.msra.mxu0 %v15197_v28  ;;  %14327 = vmatprep.mubr.msk.bf16.mxu0 %vm3429_vm5, %v16917_v56 }
0x18c3   :  { %14321 = vmatprep.subr.bf16.mxu0 %v15198_v45 }
0x18c6   :  { %14322 = vmatpush3.bf16.msra.mxu0 %v15198_v45 }
0x18c7   :  { %14323 = vmatprep.subr.bf16.mxu0 %v15199_v43 }
0x18ca   :  { %14324 = vmatpush3.bf16.msra.mxu0 %v15199_v43 }
0x18cb   :  { %14325 = vmatprep.subr.bf16.mxu0 %v15200_v29 }
0x18ce   :  { %14326 = vmatpush3.bf16.msra.mxu0 %v15200_v29 }
0x18d1   :  { %14328 = vmatmul.mubr.msk.bf16.vlgmr.msra.gmra.mxu0 %vm3429_vm5, %v16923_v60 }
0x18d2   :  { %14355 = vmatprep.mubr.msk.bf16.mxu0 %vm2097_vm4, %v16974_v41 }
0x1981   :  { %v14317_v61 = vpop.f32.mrf.mxu0 }
0x1982   :  { %v6377_v40 = vadd.f32 %v14317_v61, %v6240_v32 }
0x1983   :  { %v6360_v11 = vpop.f32.mrf.mxu0 }
0x1984   :  { %v6375_v50 = vadd.f32 %v6360_v11, %v6238_v38 }
0x1985   :  { %v14318_v54 = vpop.f32.mrf.mxu0 }
0x1986   :  { %v6378_v5 = vadd.f32 %v14318_v54, %v6241_v49  ;;  %v15210_v54 = vld [vmem:[%s17924_s10 + $0x1d0] sm:$0xff]  }
0x1987   :  { %v16986_v1 = vpop.f32.mrf.mxu0 }
0x1991   :  { %v14329_v57 = vpop.f32.mrf.mxu0 }
0x1993   :  { %v6446_v3 = vpop.f32.mrf.mxu0 }
0x1995   :  { %v14330_v7 = vpop.f32.mrf.mxu0 }
0x1996   :  { %v6462_v13 = vpack.c.bf16 %v14330_v7, %v14329_v57  ;;  %v15212_v57 = vld [vmem:[%s17924_s10 + $0x1c0] sm:$0xff]  }
0x1997   :  { %v6449_v20 = vpop.f32.mrf.mxu0 }
0x1998   :  { %v6461_v62 = vpack.c.bf16 %v6449_v20, %v6446_v3  ;;  %14331 = vmatprep.subr.bf16.mxu1 %v6462_v13 }
0x1999   :  { %14332 = vmatpush3.bf16.msra.mxu1 %v6462_v13 }
0x199a   :  { %14333 = vmatprep.subr.bf16.mxu1 %v6461_v62 }
0x199d   :  { %14334 = vmatpush3.bf16.msra.mxu1 %v6461_v62 }
0x199e   :  { %14339 = vmatprep.subr.bf16.mxu1 %v15201_v0 }
0x19a0   :  { %14336 = vmatmul.mubr.msk.bf16.vlgmr.msra.gmra.mxu1 %vm2097_vm4, %v16719_v35  ;;  %v17009_v35 = vld [vmem:[%s17926_s5 + $0x40] sm:$0xff]  }
0x19a1   :  { %14340 = vmatpush3.bf16.msra.mxu1 %v15201_v0  ;;  %14347 = vmatprep.mubr.msk.bf16.mxu1 %vm3429_vm5, %v16917_v56 }
0x19a2   :  { %14341 = vmatprep.subr.bf16.mxu1 %v15202_v42 }
0x19a5   :  { %14342 = vmatpush3.bf16.msra.mxu1 %v15202_v42 }
0x19a6   :  { %14343 = vmatprep.subr.bf16.mxu1 %v15203_v21 }
0x19a9   :  { %14344 = vmatpush3.bf16.msra.mxu1 %v15203_v21 }
0x19aa   :  { %14345 = vmatprep.subr.bf16.mxu1 %v15204_v46 }
0x19ad   :  { %14346 = vmatpush3.bf16.msra.mxu1 %v15204_v46 }
0x19b0   :  { %14348 = vmatmul.mubr.msk.bf16.vlgmr.msra.gmra.mxu1 %vm3429_vm5, %v16923_v60 }
0x19b1   :  { %14375 = vmatprep.mubr.msk.bf16.mxu1 %vm2097_vm4, %v17009_v35 }
0x1a60   :  { %v14337_v36 = vpop.f32.mrf.mxu1 }
0x1a61   :  { %v6514_v9 = vadd.f32 %v14337_v36, %v6377_v40 }
0x1a62   :  { %v6497_v17 = vpop.f32.mrf.mxu1 }
0x1a63   :  { %v6512_v58 = vadd.f32 %v6497_v17, %v6375_v50  ;;  %v15209_v50 = vld [vmem:[%s17924_s10 + $0x1d8] sm:$0xff]  }
0x1a64   :  { %v14338_v22 = vpop.f32.mrf.mxu1 }
0x1a65   :  { %v6515_v2 = vadd.f32 %v14338_v22, %v6378_v5  ;;  %v15211_v5 = vld [vmem:[%s17924_s10 + $0x1c8] sm:$0xff]   ;;  %v15213_v22 = vld [vmem:[%s17924_s10 + $0x1f8] sm:$0xff]  }
0x1a66   :  { %v17013_v6 = vpop.f32.mrf.mxu1 }
0x1a70   :  { %v14349_v53 = vpop.f32.mrf.mxu1 }
0x1a72   :  { %v6583_v25 = vpop.f32.mrf.mxu1 }
0x1a74   :  { %v14350_v19 = vpop.f32.mrf.mxu1 }
0x1a75   :  { %v6599_v8 = vpack.c.bf16 %v14350_v19, %v14349_v53  ;;  %v15215_v53 = vld [vmem:[%s17924_s10 + $0x1e8] sm:$0xff]  }
0x1a76   :  { %v6586_v44 = vpop.f32.mrf.mxu1 }
0x1a77   :  { %v6598_v27 = vpack.c.bf16 %v6586_v44, %v6583_v25  ;;  %14351 = vmatprep.subr.bf16.mxu0 %v6599_v8  ;;  %v15216_v25 = vld [vmem:[%s17924_s10 + $0x1e0] sm:$0xff]  }
0x1a78   :  { %14352 = vmatpush3.bf16.msra.mxu0 %v6599_v8 }
0x1a79   :  { %14353 = vmatprep.subr.bf16.mxu0 %v6598_v27 }
0x1a7c   :  { %14354 = vmatpush3.bf16.msra.mxu0 %v6598_v27 }
0x1a7d   :  { %14359 = vmatprep.subr.bf16.mxu0 %v15205_v52 }
0x1a7f   :  { %14356 = vmatmul.mubr.msk.bf16.vlgmr.msra.gmra.mxu0 %vm2097_vm4, %v16746_v48  ;;  %v17036_v48 = vld [vmem:[%s17926_s5 + $0x50] sm:$0xff]  }
0x1a80   :  { %14360 = vmatpush3.bf16.msra.mxu0 %v15205_v52  ;;  %14367 = vmatprep.mubr.msk.bf16.mxu0 %vm3429_vm5, %v16917_v56 }
0x1a81   :  { %14361 = vmatprep.subr.bf16.mxu0 %v15206_v34 }
0x1a84   :  { %14362 = vmatpush3.bf16.msra.mxu0 %v15206_v34 }
0x1a85   :  { %14363 = vmatprep.subr.bf16.mxu0 %v15207_v59 }
0x1a88   :  { %14364 = vmatpush3.bf16.msra.mxu0 %v15207_v59 }
0x1a89   :  { %14365 = vmatprep.subr.bf16.mxu0 %v15208_v31 }
0x1a8c   :  { %14366 = vmatpush3.bf16.msra.mxu0 %v15208_v31 }
0x1a8f   :  { %14368 = vmatmul.mubr.msk.bf16.vlgmr.msra.gmra.mxu0 %vm3429_vm5, %v16923_v60 }
0x1a90   :  { %14395 = vmatprep.mubr.msk.bf16.mxu0 %vm2097_vm4, %v17036_v48 }
0x1b3f   :  { %v14357_v33 = vpop.f32.mrf.mxu0 }
0x1b40   :  { %v6651_v39 = vadd.f32 %v14357_v33, %v6514_v9 }
0x1b41   :  { %v6634_v4 = vpop.f32.mrf.mxu0 }
0x1b42   :  { %v6649_v28 = vadd.f32 %v6634_v4, %v6512_v58 }
0x1b43   :  { %v14358_v45 = vpop.f32.mrf.mxu0 }
0x1b44   :  { %v6652_v43 = vadd.f32 %v14358_v45, %v6515_v2  ;;  %v15214_v2 = vld [vmem:[%s17924_s10 + $0x1f0] sm:$0xff]  }
0x1b45   :  { %v17040_v29 = vpop.f32.mrf.mxu0 }
0x1b4f   :  { %v14369_v32 = vpop.f32.mrf.mxu0 }
0x1b51   :  { %v6720_v61 = vpop.f32.mrf.mxu0 }
0x1b53   :  { %v14370_v38 = vpop.f32.mrf.mxu0 }
0x1b54   :  { %v6736_v40 = vpack.c.bf16 %v14370_v38, %v14369_v32  ;;  %v15218_v32 = vld [vmem:[%s17924_s10 + $0x210] sm:$0xff]   ;;  %v15220_v38 = vld [vmem:[%s17924_s10 + $0x200] sm:$0xff]  }
0x1b55   :  { %v6723_v11 = vpop.f32.mrf.mxu0 }
0x1b56   :  { %v6735_v49 = vpack.c.bf16 %v6723_v11, %v6720_v61  ;;  %14371 = vmatprep.subr.bf16.mxu1 %v6736_v40  ;;  %v15219_v61 = vld [vmem:[%s17924_s10 + $0x208] sm:$0xff]  }
0x1b57   :  { %14372 = vmatpush3.bf16.msra.mxu1 %v6736_v40 }
0x1b58   :  { %14373 = vmatprep.subr.bf16.mxu1 %v6735_v49 }
0x1b5b   :  { %14374 = vmatpush3.bf16.msra.mxu1 %v6735_v49 }
0x1b5c   :  { %14379 = vmatprep.subr.bf16.mxu1 %v15209_v50 }
0x1b5e   :  { %14376 = vmatmul.mubr.msk.bf16.vlgmr.msra.gmra.mxu1 %vm2097_vm4, %v16773_v10  ;;  %v17063_v10 = vld [vmem:[%s17926_s5 + $0x60] sm:$0xff]  }
0x1b5f   :  { %14380 = vmatpush3.bf16.msra.mxu1 %v15209_v50  ;;  %14387 = vmatprep.mubr.msk.bf16.mxu1 %vm3429_vm5, %v16917_v56 }
0x1b60   :  { %14381 = vmatprep.subr.bf16.mxu1 %v15210_v54 }
0x1b63   :  { %14382 = vmatpush3.bf16.msra.mxu1 %v15210_v54 }
0x1b64   :  { %14383 = vmatprep.subr.bf16.mxu1 %v15211_v5 }
0x1b67   :  { %14384 = vmatpush3.bf16.msra.mxu1 %v15211_v5 }
0x1b68   :  { %14385 = vmatprep.subr.bf16.mxu1 %v15212_v57 }
0x1b6b   :  { %14386 = vmatpush3.bf16.msra.mxu1 %v15212_v57 }
0x1b6e   :  { %14388 = vmatmul.mubr.msk.bf16.vlgmr.msra.gmra.mxu1 %vm3429_vm5, %v16923_v60 }
0x1b6f   :  { %14415 = vmatprep.mubr.msk.bf16.mxu1 %vm2097_vm4, %v17063_v10 }
0x1c1e   :  { %v14377_v3 = vpop.f32.mrf.mxu1 }
0x1c1f   :  { %v6788_v7 = vadd.f32 %v14377_v3, %v6651_v39 }
0x1c20   :  { %v6771_v13 = vpop.f32.mrf.mxu1 }
0x1c21   :  { %v6786_v20 = vadd.f32 %v6771_v13, %v6649_v28 }
0x1c22   :  { %v14378_v62 = vpop.f32.mrf.mxu1 }
0x1c23   :  { %v6789_v0 = vadd.f32 %v14378_v62, %v6652_v43  ;;  %v15217_v43 = vld [vmem:[%s17924_s10 + $0x218] sm:$0xff]  }
0x1c24   :  { %v17067_v42 = vpop.f32.mrf.mxu1 }
0x1c2e   :  { %v14389_v21 = vpop.f32.mrf.mxu1 }
0x1c30   :  { %v6857_v46 = vpop.f32.mrf.mxu1 }
0x1c32   :  { %v14390_v36 = vpop.f32.mrf.mxu1 }
0x1c33   :  { %v6873_v9 = vpack.c.bf16 %v14390_v36, %v14389_v21  ;;  %v15221_v21 = vld [vmem:[%s17924_s10 + $0x238] sm:$0xff]   ;;  %v15223_v36 = vld [vmem:[%s17924_s10 + $0x228] sm:$0xff]  }
0x1c34   :  { %v6860_v17 = vpop.f32.mrf.mxu1 }
0x1c35   :  { %v6872_v58 = vpack.c.bf16 %v6860_v17, %v6857_v46  ;;  %14391 = vmatprep.subr.bf16.mxu0 %v6873_v9  ;;  %v15222_v46 = vld [vmem:[%s17924_s10 + $0x230] sm:$0xff]  }
0x1c36   :  { %14392 = vmatpush3.bf16.msra.mxu0 %v6873_v9  ;;  %v15224_v9 = vld [vmem:[%s17924_s10 + $0x220] sm:$0xff]  }
0x1c37   :  { %14393 = vmatprep.subr.bf16.mxu0 %v6872_v58 }
0x1c3a   :  { %14394 = vmatpush3.bf16.msra.mxu0 %v6872_v58 }
0x1c3b   :  { %14399 = vmatprep.subr.bf16.mxu0 %v15213_v22 }
0x1c3d   :  { %14396 = vmatmul.mubr.msk.bf16.vlgmr.msra.gmra.mxu0 %vm2097_vm4, %v16800_v37  ;;  %v17090_v37 = vld [vmem:[%s17926_s5 + $0x70] sm:$0xff]  }
0x1c3e   :  { %14400 = vmatpush3.bf16.msra.mxu0 %v15213_v22  ;;  %14407 = vmatprep.mubr.msk.bf16.mxu0 %vm3429_vm5, %v16917_v56 }
0x1c3f   :  { %14401 = vmatprep.subr.bf16.mxu0 %v15214_v2 }
0x1c42   :  { %14402 = vmatpush3.bf16.msra.mxu0 %v15214_v2 }
0x1c43   :  { %14403 = vmatprep.subr.bf16.mxu0 %v15215_v53 }
0x1c46   :  { %14404 = vmatpush3.bf16.msra.mxu0 %v15215_v53 }
0x1c47   :  { %14405 = vmatprep.subr.bf16.mxu0 %v15216_v25 }
0x1c4a   :  { %14406 = vmatpush3.bf16.msra.mxu0 %v15216_v25 }
0x1c4d   :  { %14408 = vmatmul.mubr.msk.bf16.vlgmr.msra.gmra.mxu0 %vm3429_vm5, %v16923_v60 }
0x1c4e   :  { %14435 = vmatprep.mubr.msk.bf16.mxu0 %vm2097_vm4, %v17090_v37 }
0x1cfd   :  { %v14397_v19 = vpop.f32.mrf.mxu0 }
0x1cfe   :  { %v6925_v8 = vadd.f32 %v14397_v19, %v6788_v7 }
0x1cff   :  { %v6908_v44 = vpop.f32.mrf.mxu0 }
0x1d00   :  { %v6923_v27 = vadd.f32 %v6908_v44, %v6786_v20 }
0x1d01   :  { %v14398_v52 = vpop.f32.mrf.mxu0 }
0x1d02   :  { %v6926_v34 = vadd.f32 %v14398_v52, %v6789_v0 }
0x1d03   :  { %v17094_v59 = vpop.f32.mrf.mxu0 }
0x1d0d   :  { %v14409_v31 = vpop.f32.mrf.mxu0 }
0x1d0f   :  { %v6994_v33 = vpop.f32.mrf.mxu0 }
0x1d11   :  { %v14410_v39 = vpop.f32.mrf.mxu0 }
0x1d12   :  { %v7010_v4 = vpack.c.bf16 %v14410_v39, %v14409_v31  ;;  %v15227_v31 = vld [vmem:[%s17928_s12 + $0x128] sm:$0xff]   ;;  %v6239_v39 = vadd.f32 %v16981_v30, %v16951_v12 }
0x1d13   :  { %v6997_v28 = vpop.f32.mrf.mxu0 }
0x1d14   :  { %v7009_v45 = vpack.c.bf16 %v6997_v28, %v6994_v33  ;;  %14411 = vmatprep.subr.bf16.mxu1 %v7010_v4  ;;  %v15228_v33 = vld [vmem:[%s17928_s12 + $0x120] sm:$0xff]  }
0x1d15   :  { %14412 = vmatpush3.bf16.msra.mxu1 %v7010_v4  ;;  %v6376_v4 = vadd.f32 %v16986_v1, %v6239_v39  ;;  %v15236_v39 = vld [vmem:[%s17928_s12 + $0x160] sm:$0xff]  }
0x1d16   :  { %14413 = vmatprep.subr.bf16.mxu1 %v7009_v45 }
0x1d17   :  { %v6513_v28 = vadd.f32 %v17013_v6, %v6376_v4  ;;  %v12174_v4 = vld [vmem:[%s17929_s13 + $0x1] ss:$0 sm:$0xff] }
0x1d19   :  { %14414 = vmatpush3.bf16.msra.mxu1 %v7009_v45  ;;  %v6650_v45 = vadd.f32 %v17040_v29, %v6513_v28 }
0x1d1a   :  { %14419 = vmatprep.subr.bf16.mxu1 %v15217_v43 }
0x1d1c   :  { %14416 = vmatmul.mubr.msk.bf16.vlgmr.msra.gmra.mxu1 %vm2097_vm4, %v16827_v55  ;;  %v17117_v55 = vld [vmem:[%s17926_s5 + $0x80] sm:$0xff]  }
0x1d1d   :  { %14420 = vmatpush3.bf16.msra.mxu1 %v15217_v43  ;;  %14427 = vmatprep.mubr.msk.bf16.mxu1 %vm3429_vm5, %v16917_v56  ;;  %v6787_v43 = vadd.f32 %v17067_v42, %v6650_v45 }
0x1d1e   :  { %14421 = vmatprep.subr.bf16.mxu1 %v15218_v32 }
0x1d21   :  { %14422 = vmatpush3.bf16.msra.mxu1 %v15218_v32 }
0x1d22   :  { %14423 = vmatprep.subr.bf16.mxu1 %v15219_v61 }
0x1d25   :  { %14424 = vmatpush3.bf16.msra.mxu1 %v15219_v61  ;;  %v6924_v61 = vadd.f32 %v17094_v59, %v6787_v43  ;;  %v17181_v59 = vld [vmem:[%s17926_s5 + $0x10] sm:$0xff]  }
0x1d26   :  { %14425 = vmatprep.subr.bf16.mxu1 %v15220_v38 }
0x1d29   :  { %14426 = vmatpush3.bf16.msra.mxu1 %v15220_v38 }
0x1d2c   :  { %14428 = vmatmul.mubr.msk.bf16.vlgmr.msra.gmra.mxu1 %vm3429_vm5, %v16923_v60 }
0x1d2d   :  { %14455 = vmatprep.mubr.msk.bf16.mxu1 %vm2097_vm4, %v17117_v55 }
0x1ddc   :  { %v14417_v40 = vpop.f32.mrf.mxu1 }
0x1ddd   :  { %v7062_v11 = vadd.f32 %v14417_v40, %v6925_v8 }
0x1dde   :  { %v7045_v49 = vpop.f32.mrf.mxu1 }
0x1ddf   :  { %v7060_v50 = vadd.f32 %v7045_v49, %v6923_v27 }
0x1de0   :  { %v14418_v54 = vpop.f32.mrf.mxu1 }
0x1de1   :  { %v7063_v5 = vadd.f32 %v14418_v54, %v6926_v34  ;;  %v15226_v34 = vld [vmem:[%s17928_s12 + $0x130] sm:$0xff]  }
0x1de2   :  { %v17121_v57 = vpop.f32.mrf.mxu1 }
0x1de3   :  { %v7061_v40 = vadd.f32 %v17121_v57, %v6924_v61 }
0x1dec   :  { %v14429_v3 = vpop.f32.mrf.mxu1 }
0x1dee   :  { %v7131_v7 = vpop.f32.mrf.mxu1 }
0x1df0   :  { %v14430_v13 = vpop.f32.mrf.mxu1 }
0x1df1   :  { %v7147_v20 = vpack.c.bf16 %v14430_v13, %v14429_v3 }
0x1df2   :  { %v7134_v62 = vpop.f32.mrf.mxu1 }
0x1df3   :  { %v7146_v0 = vpack.c.bf16 %v7134_v62, %v7131_v7  ;;  %14431 = vmatprep.subr.bf16.mxu0 %v7147_v20 }
0x1df4   :  { %14432 = vmatpush3.bf16.msra.mxu0 %v7147_v20 }
0x1df5   :  { %14433 = vmatprep.subr.bf16.mxu0 %v7146_v0 }
0x1df8   :  { %14434 = vmatpush3.bf16.msra.mxu0 %v7146_v0 }
0x1df9   :  { %14439 = vmatprep.subr.bf16.mxu0 %v15221_v21 }
0x1dfb   :  { %14436 = vmatmul.mubr.msk.bf16.vlgmr.msra.gmra.mxu0 %vm2097_vm4, %v16854_v24 }
0x1dfc   :  { %14440 = vmatpush3.bf16.msra.mxu0 %v15221_v21  ;;  %14447 = vmatprep.mubr.msk.bf16.mxu0 %vm3429_vm5, %v16917_v56 }
0x1dfd   :  { %14441 = vmatprep.subr.bf16.mxu0 %v15222_v46 }
0x1e00   :  { %14442 = vmatpush3.bf16.msra.mxu0 %v15222_v46  ;;  %v15229_v46 = vld [vmem:[%s17928_s12 + $0x158] sm:$0xff]  }
0x1e01   :  { %14443 = vmatprep.subr.bf16.mxu0 %v15223_v36 }
0x1e04   :  { %14444 = vmatpush3.bf16.msra.mxu0 %v15223_v36  ;;  %v15230_v36 = vld [vmem:[%s17928_s12 + $0x150] sm:$0xff]  }
0x1e05   :  { %14445 = vmatprep.subr.bf16.mxu0 %v15224_v9 }
0x1e08   :  { %14446 = vmatpush3.bf16.msra.mxu0 %v15224_v9  ;;  %v17194_v9 = vld [vmem:[%s17926_s5 + $0x8] sm:$0xff]  }
0x1e0b   :  { %14448 = vmatmul.mubr.msk.bf16.vlgmr.msra.gmra.mxu0 %vm3429_vm5, %v16923_v60  ;;  %v17149_v60 = vld [vmem:[%s17926_s5 + $0x88] sm:$0xff]  }
0x1e0c   :  { %14475 = vmatprep.mubr.msk.bf16.mxu0 %vm2097_vm4, %v16871_v16  ;;  %v15225_v16 = vld [vmem:[%s17928_s12 + $0x138] sm:$0xff]  }
0x1ebb   :  { %v14437_v24 = vpop.f32.mrf.mxu0 }
0x1ebc   :  { %v7199_v56 = vadd.f32 %v14437_v24, %v7062_v11  ;;  %v15231_v24 = vld [vmem:[%s17928_s12 + $0x148] sm:$0xff]  }
0x1ebd   :  { %v7182_v17 = vpop.f32.mrf.mxu0 }
0x1ebe   :  { %v7197_v58 = vadd.f32 %v7182_v17, %v7060_v50  ;;  %v17211_v17 = vld [vmem:[%s17926_s5 + $0x20] sm:$0xff]  }
0x1ebf   :  { %v14438_v22 = vpop.f32.mrf.mxu0 }
0x1ec0   :  { %v7200_v2 = vadd.f32 %v14438_v22, %v7063_v5 }
0x1ec1   :  { %v7185_v53 = vpop.f32.mrf.mxu0 }
0x1ec2   :  { %v7198_v50 = vadd.f32 %v7185_v53, %v7061_v40 }
0x1ecb   :  { %v14449_v25 = vpop.f32.mrf.mxu0 }
0x1ecd   :  { %v7268_v19 = vpop.f32.mrf.mxu0 }
0x1ecf   :  { %v14450_v8 = vpop.f32.mrf.mxu0 }
0x1ed0   :  { %v7284_v44 = vpack.c.bf16 %v14450_v8, %v14449_v25 }
0x1ed1   :  { %v7271_v27 = vpop.f32.mrf.mxu0 }
0x1ed2   :  { %v7283_v52 = vpack.c.bf16 %v7271_v27, %v7268_v19  ;;  %14451 = vmatprep.subr.bf16.mxu1 %v7284_v44 }
0x1ed3   :  { %14452 = vmatpush3.bf16.msra.mxu1 %v7284_v44 }
0x1ed4   :  { %14453 = vmatprep.subr.bf16.mxu1 %v7283_v52 }
0x1ed7   :  { %14454 = vmatpush3.bf16.msra.mxu1 %v7283_v52 }
0x1ed8   :  { %14459 = vmatprep.subr.bf16.mxu1 %v15225_v16 }
0x1eda   :  { %14456 = vmatmul.mubr.msk.bf16.vlgmr.msra.gmra.mxu1 %vm2097_vm4, %v17149_v60 }
0x1edb   :  { %14460 = vmatpush3.bf16.msra.mxu1 %v15225_v16  ;;  %v15233_v16 = vld [vmem:[%s17928_s12 + $0x178] sm:$0xff]  }
0x1edc   :  { %14461 = vmatprep.subr.bf16.mxu1 %v15226_v34 }
0x1edf   :  { %14462 = vmatpush3.bf16.msra.mxu1 %v15226_v34  ;;  %v15234_v34 = vld [vmem:[%s17928_s12 + $0x170] sm:$0xff]  }
0x1ee0   :  { %14463 = vmatprep.subr.bf16.mxu1 %v15227_v31 }
0x1ee3   :  { %14464 = vmatpush3.bf16.msra.mxu1 %v15227_v31  ;;  %v17224_v31 = vld [vmem:[%s17926_s5 + $0x18] sm:$0xff]  }
0x1ee4   :  { %14465 = vmatprep.subr.bf16.mxu1 %v15228_v33 }
0x1ee7   :  { %14466 = vmatpush3.bf16.msra.mxu1 %v15228_v33  ;;  %v15235_v33 = vld [vmem:[%s17928_s12 + $0x168] sm:$0xff]  }
0x1f9a   :  { %v14457_v32 = vpop.f32.mrf.mxu1 }
0x1f9b   :  { %v7336_v11 = vadd.f32 %v14457_v32, %v7199_v56  ;;  %v15232_v56 = vld [vmem:[%s17928_s12 + $0x140] sm:$0xff]  }
0x1f9c   :  { %v7319_v38 = vpop.f32.mrf.mxu1 }
0x1f9d   :  { %v7334_v54 = vadd.f32 %v7319_v38, %v7197_v58  ;;  %v7340_v30 = vmax.f32 %v7336_v11, 0.0 }
0x1f9e   :  { %v14458_v49 = vpop.f32.mrf.mxu1 }
0x1f9f   :  { %v7337_v5 = vadd.f32 %v14458_v49, %v7200_v2  ;;  %v7338_v6 = vmax.f32 %v7334_v54, 0.0 }
0x1fa0   :  { %v7322_v12 = vpop.f32.mrf.mxu1 }
0x1fa1   :  { %v7341_v1 = vmax.f32 %v7337_v5, 0.0  ;;  %v7335_v3 = vadd.f32 %v7322_v12, %v7198_v50 }
0x1fa3   :  { %v17170_v7 = vpack.c.bf16 %v7341_v1, %v7340_v30  ;;  %v7339_v29 = vmax.f32 %v7335_v3, 0.0 }
0x1fa5   :  { %v17172_v42 = vpack.c.bf16 %v7339_v29, %v7338_v6  ;;  %v15237_v29 = vld [vmem:[%s17928_s12 + $0x198] sm:$0xff]  }
0x1fa7   :  { %14467 = vmatprep.mubr.msk.bf16.mxu1 %vm3429_vm5, %v17172_v42 }
0x1fa8   :  { %14468 = vmatmul.mubr.msk.bf16.vlgmr.msra.gmra.mxu1 %vm3429_vm5, %v17170_v7 }
0x1fa9   :  { %14495 = vmatprep.mubr.msk.bf16.mxu1 %vm2097_vm4, %v17181_v59 }
0x2068   :  { %v14469_v57 = vpop.f32.mrf.mxu1 }
0x206a   :  { %v7419_v13 = vpop.f32.mrf.mxu1 }
0x206c   :  { %v14470_v20 = vpop.f32.mrf.mxu1 }
0x206d   :  { %v7435_v62 = vpack.c.bf16 %v14470_v20, %v14469_v57  ;;  %v15238_v57 = vld [vmem:[%s17928_s12 + $0x190] sm:$0xff]   ;;  %v15239_v20 = vld [vmem:[%s17928_s12 + $0x188] sm:$0xff]  }
0x206e   :  { %v7422_v0 = vpop.f32.mrf.mxu1 }
0x206f   :  { %v7434_v21 = vpack.c.bf16 %v7422_v0, %v7419_v13  ;;  %14471 = vmatprep.subr.bf16.mxu0 %v7435_v62  ;;  %v17252_v13 = vld [vmem:[%s17926_s5 + $0x28] sm:$0xff]  }
0x2070   :  { %14472 = vmatpush3.bf16.msra.mxu0 %v7435_v62  ;;  %v15240_v62 = vld [vmem:[%s17928_s12 + $0x180] sm:$0xff]  }
0x2071   :  { %14473 = vmatprep.subr.bf16.mxu0 %v7434_v21 }
0x2074   :  { %14474 = vmatpush3.bf16.msra.mxu0 %v7434_v21 }
0x2075   :  { %14479 = vmatprep.subr.bf16.mxu0 %v15229_v46 }
0x2077   :  { %14476 = vmatmul.mubr.msk.bf16.vlgmr.msra.gmra.mxu0 %vm2097_vm4, %v17194_v9 }
0x2078   :  { %14480 = vmatpush3.bf16.msra.mxu0 %v15229_v46  ;;  %14487 = vmatprep.mubr.msk.bf16.mxu0 %vm3429_vm5, %v17172_v42 }
0x2079   :  { %14481 = vmatprep.subr.bf16.mxu0 %v15230_v36 }
0x207c   :  { %14482 = vmatpush3.bf16.msra.mxu0 %v15230_v36 }
0x207d   :  { %14483 = vmatprep.subr.bf16.mxu0 %v15231_v24 }
0x2080   :  { %14484 = vmatpush3.bf16.msra.mxu0 %v15231_v24 }
0x2081   :  { %14485 = vmatprep.subr.bf16.mxu0 %v15232_v56 }
0x2084   :  { %14486 = vmatpush3.bf16.msra.mxu0 %v15232_v56 }
0x2087   :  { %14488 = vmatmul.mubr.msk.bf16.vlgmr.msra.gmra.mxu0 %vm3429_vm5, %v17170_v7 }
0x2088   :  { %14515 = vmatprep.mubr.msk.bf16.mxu0 %vm2097_vm4, %v17211_v17 }
0x2137   :  { %v14477_v58 = vpop.f32.mrf.mxu0 }
0x2138   :  { %v7493_v28 = vadd.f32 %v14477_v58, %v12174_v4 }
0x2139   :  { %v7470_v22 = vpop.f32.mrf.mxu0 }
0x213a   :  { %v7491_v43 = vadd.f32 %v12174_v4, %v7470_v22 }
0x213b   :  { %v14478_v2 = vpop.f32.mrf.mxu0 }
0x213c   :  { %v7494_v38 = vadd.f32 %v14478_v2, %v12174_v4 }
0x213d   :  { %v7473_v53 = vpop.f32.mrf.mxu0 }
0x213e   :  { %v7492_v49 = vadd.f32 %v12174_v4, %v7473_v53 }
0x2147   :  { %v14489_v25 = vpop.f32.mrf.mxu0 }
0x2149   :  { %v7562_v19 = vpop.f32.mrf.mxu0 }
0x214b   :  { %v14490_v8 = vpop.f32.mrf.mxu0 }
0x214c   :  { %v7578_v44 = vpack.c.bf16 %v14490_v8, %v14489_v25 }
0x214d   :  { %v7565_v27 = vpop.f32.mrf.mxu0 }
0x214e   :  { %v7577_v52 = vpack.c.bf16 %v7565_v27, %v7562_v19  ;;  %14491 = vmatprep.subr.bf16.mxu1 %v7578_v44  ;;  %v15242_v27 = vld [vmem:[%s17928_s12 + $0x1b0] sm:$0xff]  }
0x214f   :  { %14492 = vmatpush3.bf16.msra.mxu1 %v7578_v44 }
0x2150   :  { %14493 = vmatprep.subr.bf16.mxu1 %v7577_v52 }
0x2153   :  { %14494 = vmatpush3.bf16.msra.mxu1 %v7577_v52  ;;  %v17277_v52 = vld [vmem:[%s17926_s5 + $0x38] sm:$0xff]  }
0x2154   :  { %14499 = vmatprep.subr.bf16.mxu1 %v15233_v16 }
0x2156   :  { %14496 = vmatmul.mubr.msk.bf16.vlgmr.msra.gmra.mxu1 %vm2097_vm4, %v17224_v31 }
0x2157   :  { %14500 = vmatpush3.bf16.msra.mxu1 %v15233_v16  ;;  %14507 = vmatprep.mubr.msk.bf16.mxu1 %vm3429_vm5, %v17172_v42  ;;  %v15243_v16 = vld [vmem:[%s17928_s12 + $0x1a8] sm:$0xff]  }
0x2158   :  { %14501 = vmatprep.subr.bf16.mxu1 %v15234_v34 }
0x215b   :  { %14502 = vmatpush3.bf16.msra.mxu1 %v15234_v34  ;;  %v15244_v34 = vld [vmem:[%s17928_s12 + $0x1a0] sm:$0xff]  }
0x215c   :  { %14503 = vmatprep.subr.bf16.mxu1 %v15235_v33 }
0x215f   :  { %14504 = vmatpush3.bf16.msra.mxu1 %v15235_v33 }
0x2160   :  { %14505 = vmatprep.subr.bf16.mxu1 %v15236_v39 }
0x2163   :  { %14506 = vmatpush3.bf16.msra.mxu1 %v15236_v39 }
0x2166   :  { %14508 = vmatmul.mubr.msk.bf16.vlgmr.msra.gmra.mxu1 %vm3429_vm5, %v17170_v7 }
0x2167   :  { %14535 = vmatprep.mubr.msk.bf16.mxu1 %vm2097_vm4, %v16974_v41 }
0x2216   :  { %v14497_v45 = vpop.f32.mrf.mxu1 }
0x2217   :  { %v7630_v32 = vadd.f32 %v14497_v45, %v7493_v28 }
0x2218   :  { %v7613_v61 = vpop.f32.mrf.mxu1 }
0x2219   :  { %v7628_v40 = vadd.f32 %v7613_v61, %v7491_v43 }
0x221a   :  { %v14498_v11 = vpop.f32.mrf.mxu1 }
0x221b   :  { %v7631_v50 = vadd.f32 %v14498_v11, %v7494_v38 }
0x221c   :  { %v7616_v54 = vpop.f32.mrf.mxu1 }
0x221d   :  { %v7629_v5 = vadd.f32 %v7616_v54, %v7492_v49 }
0x2226   :  { %v14509_v12 = vpop.f32.mrf.mxu1 }
0x2228   :  { %v7699_v30 = vpop.f32.mrf.mxu1 }
0x222a   :  { %v14510_v1 = vpop.f32.mrf.mxu1 }
0x222b   :  { %v7715_v41 = vpack.c.bf16 %v14510_v1, %v14509_v12  ;;  %v17302_v12 = vld [vmem:[%s17926_s5 + $0x48] sm:$0xff]   ;;  %v15248_v1 = vld [vmem:[%s17928_s12 + $0x1c0] sm:$0xff]  }
0x222c   :  { %v7702_v3 = vpop.f32.mrf.mxu1 }
0x222d   :  { %v7714_v6 = vpack.c.bf16 %v7702_v3, %v7699_v30  ;;  %14511 = vmatprep.subr.bf16.mxu0 %v7715_v41  ;;  %v15247_v30 = vld [vmem:[%s17928_s12 + $0x1c8] sm:$0xff]  }
0x222e   :  { %14512 = vmatpush3.bf16.msra.mxu0 %v7715_v41 }
0x222f   :  { %14513 = vmatprep.subr.bf16.mxu0 %v7714_v6 }
0x2232   :  { %14514 = vmatpush3.bf16.msra.mxu0 %v7714_v6 }
0x2233   :  { %14519 = vmatprep.subr.bf16.mxu0 %v15237_v29 }
0x2235   :  { %14516 = vmatmul.mubr.msk.bf16.vlgmr.msra.gmra.mxu0 %vm2097_vm4, %v17252_v13 }
0x2236   :  { %14520 = vmatpush3.bf16.msra.mxu0 %v15237_v29  ;;  %14527 = vmatprep.mubr.msk.bf16.mxu0 %vm3429_vm5, %v17172_v42 }
0x2237   :  { %14521 = vmatprep.subr.bf16.mxu0 %v15238_v57 }
0x223a   :  { %14522 = vmatpush3.bf16.msra.mxu0 %v15238_v57 }
0x223b   :  { %14523 = vmatprep.subr.bf16.mxu0 %v15239_v20 }
0x223e   :  { %14524 = vmatpush3.bf16.msra.mxu0 %v15239_v20 }
0x223f   :  { %14525 = vmatprep.subr.bf16.mxu0 %v15240_v62 }
0x2242   :  { %14526 = vmatpush3.bf16.msra.mxu0 %v15240_v62 }
0x2245   :  { %14528 = vmatmul.mubr.msk.bf16.vlgmr.msra.gmra.mxu0 %vm3429_vm5, %v17170_v7 }
0x2246   :  { %14555 = vmatprep.mubr.msk.bf16.mxu0 %vm2097_vm4, %v17009_v35  ;;  %v15241_v35 = vld [vmem:[%s17928_s12 + $0x1b8] sm:$0xff]  }
0x22f5   :  { %v14517_v0 = vpop.f32.mrf.mxu0 }
0x22f6   :  { %v7767_v21 = vadd.f32 %v14517_v0, %v7630_v32 }
0x22f7   :  { %v7750_v46 = vpop.f32.mrf.mxu0 }
0x22f8   :  { %v7765_v36 = vadd.f32 %v7750_v46, %v7628_v40 }
0x22f9   :  { %v14518_v24 = vpop.f32.mrf.mxu0 }
0x22fa   :  { %v7768_v56 = vadd.f32 %v14518_v24, %v7631_v50 }
0x22fb   :  { %v7753_v58 = vpop.f32.mrf.mxu0 }
0x22fc   :  { %v7766_v22 = vadd.f32 %v7753_v58, %v7629_v5  ;;  %v15246_v5 = vld [vmem:[%s17928_s12 + $0x1d0] sm:$0xff]  }
0x2305   :  { %v14529_v2 = vpop.f32.mrf.mxu0 }
0x2307   :  { %v7836_v53 = vpop.f32.mrf.mxu0 }
0x2309   :  { %v14530_v25 = vpop.f32.mrf.mxu0 }
0x230a   :  { %v7852_v19 = vpack.c.bf16 %v14530_v25, %v14529_v2  ;;  %v17327_v2 = vld [vmem:[%s17926_s5 + $0x58] sm:$0xff]   ;;  %v15252_v25 = vld [vmem:[%s17928_s12 + $0x1e0] sm:$0xff]  }
0x230b   :  { %v7839_v8 = vpop.f32.mrf.mxu0 }
0x230c   :  { %v7851_v44 = vpack.c.bf16 %v7839_v8, %v7836_v53  ;;  %14531 = vmatprep.subr.bf16.mxu1 %v7852_v19  ;;  %v15251_v53 = vld [vmem:[%s17928_s12 + $0x1e8] sm:$0xff]  }
0x230d   :  { %14532 = vmatpush3.bf16.msra.mxu1 %v7852_v19 }
0x230e   :  { %14533 = vmatprep.subr.bf16.mxu1 %v7851_v44 }
0x2311   :  { %14534 = vmatpush3.bf16.msra.mxu1 %v7851_v44 }
0x2312   :  { %14539 = vmatprep.subr.bf16.mxu1 %v15241_v35 }
0x2314   :  { %14536 = vmatmul.mubr.msk.bf16.vlgmr.msra.gmra.mxu1 %vm2097_vm4, %v17277_v52 }
0x2315   :  { %14540 = vmatpush3.bf16.msra.mxu1 %v15241_v35  ;;  %14547 = vmatprep.mubr.msk.bf16.mxu1 %vm3429_vm5, %v17172_v42 }
0x2316   :  { %14541 = vmatprep.subr.bf16.mxu1 %v15242_v27 }
0x2319   :  { %14542 = vmatpush3.bf16.msra.mxu1 %v15242_v27 }
0x231a   :  { %14543 = vmatprep.subr.bf16.mxu1 %v15243_v16 }
0x231d   :  { %14544 = vmatpush3.bf16.msra.mxu1 %v15243_v16 }
0x231e   :  { %14545 = vmatprep.subr.bf16.mxu1 %v15244_v34 }
0x2321   :  { %14546 = vmatpush3.bf16.msra.mxu1 %v15244_v34 }
0x2324   :  { %14548 = vmatmul.mubr.msk.bf16.vlgmr.msra.gmra.mxu1 %vm3429_vm5, %v17170_v7 }
0x2325   :  { %14575 = vmatprep.mubr.msk.bf16.mxu1 %vm2097_vm4, %v17036_v48  ;;  %v15245_v48 = vld [vmem:[%s17928_s12 + $0x1d8] sm:$0xff]  }
0x23d4   :  { %v14537_v33 = vpop.f32.mrf.mxu1 }
0x23d5   :  { %v7904_v39 = vadd.f32 %v14537_v33, %v7767_v21 }
0x23d6   :  { %v7887_v4 = vpop.f32.mrf.mxu1 }
0x23d7   :  { %v7902_v28 = vadd.f32 %v7887_v4, %v7765_v36 }
0x23d8   :  { %v14538_v45 = vpop.f32.mrf.mxu1 }
0x23d9   :  { %v7905_v43 = vadd.f32 %v14538_v45, %v7768_v56 }
0x23da   :  { %v7890_v32 = vpop.f32.mrf.mxu1 }
0x23db   :  { %v7903_v61 = vadd.f32 %v7890_v32, %v7766_v22  ;;  %v15250_v22 = vld [vmem:[%s17928_s12 + $0x1f0] sm:$0xff]  }
0x23e4   :  { %v14549_v38 = vpop.f32.mrf.mxu1 }
0x23e6   :  { %v7973_v40 = vpop.f32.mrf.mxu1 }
0x23e8   :  { %v14550_v11 = vpop.f32.mrf.mxu1 }
0x23e9   :  { %v7989_v49 = vpack.c.bf16 %v14550_v11, %v14549_v38  ;;  %v17352_v38 = vld [vmem:[%s17926_s5 + $0x68] sm:$0xff]   ;;  %v15256_v11 = vld [vmem:[%s17928_s12 + $0x200] sm:$0xff]  }
0x23ea   :  { %v7976_v50 = vpop.f32.mrf.mxu1 }
0x23eb   :  { %v7988_v54 = vpack.c.bf16 %v7976_v50, %v7973_v40  ;;  %14551 = vmatprep.subr.bf16.mxu0 %v7989_v49  ;;  %v15255_v40 = vld [vmem:[%s17928_s12 + $0x208] sm:$0xff]  }
0x23ec   :  { %14552 = vmatpush3.bf16.msra.mxu0 %v7989_v49 }
0x23ed   :  { %14553 = vmatprep.subr.bf16.mxu0 %v7988_v54 }
0x23f0   :  { %14554 = vmatpush3.bf16.msra.mxu0 %v7988_v54 }
0x23f1   :  { %14559 = vmatprep.subr.bf16.mxu0 %v15245_v48 }
0x23f3   :  { %14556 = vmatmul.mubr.msk.bf16.vlgmr.msra.gmra.mxu0 %vm2097_vm4, %v17302_v12 }
0x23f4   :  { %14560 = vmatpush3.bf16.msra.mxu0 %v15245_v48  ;;  %14567 = vmatprep.mubr.msk.bf16.mxu0 %vm3429_vm5, %v17172_v42 }
0x23f5   :  { %14561 = vmatprep.subr.bf16.mxu0 %v15246_v5 }
0x23f8   :  { %14562 = vmatpush3.bf16.msra.mxu0 %v15246_v5 }
0x23f9   :  { %14563 = vmatprep.subr.bf16.mxu0 %v15247_v30 }
0x23fc   :  { %14564 = vmatpush3.bf16.msra.mxu0 %v15247_v30 }
0x23fd   :  { %14565 = vmatprep.subr.bf16.mxu0 %v15248_v1 }
0x2400   :  { %14566 = vmatpush3.bf16.msra.mxu0 %v15248_v1 }
0x2403   :  { %14568 = vmatmul.mubr.msk.bf16.vlgmr.msra.gmra.mxu0 %vm3429_vm5, %v17170_v7 }
0x2404   :  { %14595 = vmatprep.mubr.msk.bf16.mxu0 %vm2097_vm4, %v17063_v10  ;;  %v15249_v10 = vld [vmem:[%s17928_s12 + $0x1f8] sm:$0xff]  }
0x24b3   :  { %v14557_v41 = vpop.f32.mrf.mxu0 }
0x24b4   :  { %v8041_v3 = vadd.f32 %v14557_v41, %v7904_v39 }
0x24b5   :  { %v8024_v6 = vpop.f32.mrf.mxu0 }
0x24b6   :  { %v8039_v29 = vadd.f32 %v8024_v6, %v7902_v28 }
0x24b7   :  { %v14558_v57 = vpop.f32.mrf.mxu0 }
0x24b8   :  { %v8042_v20 = vadd.f32 %v14558_v57, %v7905_v43 }
0x24b9   :  { %v8027_v62 = vpop.f32.mrf.mxu0 }
0x24ba   :  { %v8040_v0 = vadd.f32 %v8027_v62, %v7903_v61  ;;  %v15254_v61 = vld [vmem:[%s17928_s12 + $0x210] sm:$0xff]  }
0x24c3   :  { %v14569_v21 = vpop.f32.mrf.mxu0 }
0x24c5   :  { %v8110_v46 = vpop.f32.mrf.mxu0 }
0x24c7   :  { %v14570_v36 = vpop.f32.mrf.mxu0 }
0x24c8   :  { %v8126_v24 = vpack.c.bf16 %v14570_v36, %v14569_v21  ;;  %v17377_v21 = vld [vmem:[%s17926_s5 + $0x78] sm:$0xff]   ;;  %v15260_v36 = vld [vmem:[%s17928_s12 + $0x220] sm:$0xff]  }
0x24c9   :  { %v8113_v56 = vpop.f32.mrf.mxu0 }
0x24ca   :  { %v8125_v58 = vpack.c.bf16 %v8113_v56, %v8110_v46  ;;  %14571 = vmatprep.subr.bf16.mxu1 %v8126_v24  ;;  %v15259_v46 = vld [vmem:[%s17928_s12 + $0x228] sm:$0xff]  }
0x24cb   :  { %14572 = vmatpush3.bf16.msra.mxu1 %v8126_v24 }
0x24cc   :  { %14573 = vmatprep.subr.bf16.mxu1 %v8125_v58 }
0x24cf   :  { %14574 = vmatpush3.bf16.msra.mxu1 %v8125_v58 }
0x24d0   :  { %14579 = vmatprep.subr.bf16.mxu1 %v15249_v10 }
0x24d2   :  { %14576 = vmatmul.mubr.msk.bf16.vlgmr.msra.gmra.mxu1 %vm2097_vm4, %v17327_v2 }
0x24d3   :  { %14580 = vmatpush3.bf16.msra.mxu1 %v15249_v10  ;;  %14587 = vmatprep.mubr.msk.bf16.mxu1 %vm3429_vm5, %v17172_v42 }
0x24d4   :  { %14581 = vmatprep.subr.bf16.mxu1 %v15250_v22 }
0x24d7   :  { %14582 = vmatpush3.bf16.msra.mxu1 %v15250_v22 }
0x24d8   :  { %14583 = vmatprep.subr.bf16.mxu1 %v15251_v53 }
0x24db   :  { %14584 = vmatpush3.bf16.msra.mxu1 %v15251_v53 }
0x24dc   :  { %14585 = vmatprep.subr.bf16.mxu1 %v15252_v25 }
0x24df   :  { %14586 = vmatpush3.bf16.msra.mxu1 %v15252_v25 }
0x24e2   :  { %14588 = vmatmul.mubr.msk.bf16.vlgmr.msra.gmra.mxu1 %vm3429_vm5, %v17170_v7 }
0x24e3   :  { %14615 = vmatprep.mubr.msk.bf16.mxu1 %vm2097_vm4, %v17090_v37  ;;  %v15253_v37 = vld [vmem:[%s17928_s12 + $0x218] sm:$0xff]  }
0x2592   :  { %v14577_v19 = vpop.f32.mrf.mxu1 }
0x2593   :  { %v8178_v8 = vadd.f32 %v14577_v19, %v8041_v3 }
0x2594   :  { %v8161_v44 = vpop.f32.mrf.mxu1 }
0x2595   :  { %v8176_v35 = vadd.f32 %v8161_v44, %v8039_v29 }
0x2596   :  { %v14578_v27 = vpop.f32.mrf.mxu1 }
0x2597   :  { %v8179_v16 = vadd.f32 %v14578_v27, %v8042_v20 }
0x2598   :  { %v8164_v34 = vpop.f32.mrf.mxu1 }
0x2599   :  { %v8177_v33 = vadd.f32 %v8164_v34, %v8040_v0  ;;  %v15258_v0 = vld [vmem:[%s17928_s12 + $0x230] sm:$0xff]   ;;  %v15261_v34 = vld [vmem:[%s17924_s10 + $0x258] sm:$0xff]  }
0x25a2   :  { %v14589_v39 = vpop.f32.mrf.mxu1 }
0x25a4   :  { %v8247_v4 = vpop.f32.mrf.mxu1 }
0x25a6   :  { %v14590_v28 = vpop.f32.mrf.mxu1 }
0x25a7   :  { %v8263_v45 = vpack.c.bf16 %v14590_v28, %v14589_v39  ;;  %v15263_v39 = vld [vmem:[%s17924_s10 + $0x248] sm:$0xff]  }
0x25a8   :  { %v8250_v43 = vpop.f32.mrf.mxu1 }
0x25a9   :  { %v8262_v32 = vpack.c.bf16 %v8250_v43, %v8247_v4  ;;  %14591 = vmatprep.subr.bf16.mxu0 %v8263_v45 }
0x25aa   :  { %14592 = vmatpush3.bf16.msra.mxu0 %v8263_v45 }
0x25ab   :  { %14593 = vmatprep.subr.bf16.mxu0 %v8262_v32 }
0x25ae   :  { %14594 = vmatpush3.bf16.msra.mxu0 %v8262_v32 }
0x25af   :  { %14599 = vmatprep.subr.bf16.mxu0 %v15253_v37 }
0x25b1   :  { %14596 = vmatmul.mubr.msk.bf16.vlgmr.msra.gmra.mxu0 %vm2097_vm4, %v17352_v38 }
0x25b2   :  { %14600 = vmatpush3.bf16.msra.mxu0 %v15253_v37  ;;  %14607 = vmatprep.mubr.msk.bf16.mxu0 %vm3429_vm5, %v17172_v42 }
0x25b3   :  { %14601 = vmatprep.subr.bf16.mxu0 %v15254_v61 }
0x25b6   :  { %14602 = vmatpush3.bf16.msra.mxu0 %v15254_v61 }
0x25b7   :  { %14603 = vmatprep.subr.bf16.mxu0 %v15255_v40 }
0x25ba   :  { %14604 = vmatpush3.bf16.msra.mxu0 %v15255_v40 }
0x25bb   :  { %14605 = vmatprep.subr.bf16.mxu0 %v15256_v11 }
0x25be   :  { %14606 = vmatpush3.bf16.msra.mxu0 %v15256_v11 }
0x25c1   :  { %14608 = vmatmul.mubr.msk.bf16.vlgmr.msra.gmra.mxu0 %vm3429_vm5, %v17170_v7 }
0x25c2   :  { %14635 = vmatprep.mubr.msk.bf16.mxu0 %vm2097_vm4, %v17117_v55  ;;  %v15257_v55 = vld [vmem:[%s17928_s12 + $0x238] sm:$0xff]  }
0x2671   :  { %v14597_v49 = vpop.f32.mrf.mxu0 }
0x2672   :  { %v8315_v50 = vadd.f32 %v14597_v49, %v8178_v8 }
0x2673   :  { %v8298_v54 = vpop.f32.mrf.mxu0 }
0x2674   :  { %v8313_v48 = vadd.f32 %v8298_v54, %v8176_v35 }
0x2675   :  { %v14598_v5 = vpop.f32.mrf.mxu0 }
0x2676   :  { %v8316_v30 = vadd.f32 %v14598_v5, %v8179_v16 }
0x2677   :  { %v8301_v1 = vpop.f32.mrf.mxu0 }
0x2678   :  { %v8314_v41 = vadd.f32 %v8301_v1, %v8177_v33  ;;  %v15262_v33 = vld [vmem:[%s17924_s10 + $0x250] sm:$0xff]  }
0x2681   :  { %v14609_v3 = vpop.f32.mrf.mxu0 }
0x2683   :  { %v8384_v6 = vpop.f32.mrf.mxu0 }
0x2685   :  { %v14610_v29 = vpop.f32.mrf.mxu0 }
0x2686   :  { %v8400_v57 = vpack.c.bf16 %v14610_v29, %v14609_v3  ;;  %v15266_v3 = vld [vmem:[%s17924_s10 + $0x270] sm:$0xff]  }
0x2687   :  { %v8387_v20 = vpop.f32.mrf.mxu0 }
0x2688   :  { %v8399_v62 = vpack.c.bf16 %v8387_v20, %v8384_v6  ;;  %14611 = vmatprep.subr.bf16.mxu1 %v8400_v57  ;;  %v15268_v6 = vld [vmem:[%s17924_s10 + $0x260] sm:$0xff]  }
0x2689   :  { %14612 = vmatpush3.bf16.msra.mxu1 %v8400_v57 }
0x268a   :  { %14613 = vmatprep.subr.bf16.mxu1 %v8399_v62 }
0x268d   :  { %14614 = vmatpush3.bf16.msra.mxu1 %v8399_v62 }
0x268e   :  { %14619 = vmatprep.subr.bf16.mxu1 %v15257_v55 }
0x2690   :  { %14616 = vmatmul.mubr.msk.bf16.vlgmr.msra.gmra.mxu1 %vm2097_vm4, %v17377_v21 }
0x2691   :  { %14620 = vmatpush3.bf16.msra.mxu1 %v15257_v55  ;;  %14627 = vmatprep.mubr.msk.bf16.mxu1 %vm3429_vm5, %v17172_v42  ;;  %v17394_v42 = vld [vmem:[%s17926_s5] sm:$0xff]  }
0x2692   :  { %14621 = vmatprep.subr.bf16.mxu1 %v15258_v0 }
0x2695   :  { %14622 = vmatpush3.bf16.msra.mxu1 %v15258_v0 }
0x2696   :  { %14623 = vmatprep.subr.bf16.mxu1 %v15259_v46 }
0x2699   :  { %14624 = vmatpush3.bf16.msra.mxu1 %v15259_v46 }
0x269a   :  { %14625 = vmatprep.subr.bf16.mxu1 %v15260_v36 }
0x269d   :  { %14626 = vmatpush3.bf16.msra.mxu1 %v15260_v36 }
0x26a0   :  { %14628 = vmatmul.mubr.msk.bf16.vlgmr.msra.gmra.mxu1 %vm3429_vm5, %v17170_v7 }
0x26a1   :  { %14655 = vmatprep.mubr.msk.bf16.mxu1 %vm2097_vm4, %v17394_v42 }
0x2750   :  { %v14617_v24 = vpop.f32.mrf.mxu1 }
0x2751   :  { %v8452_v56 = vadd.f32 %v14617_v24, %v8315_v50 }
0x2752   :  { %v8435_v58 = vpop.f32.mrf.mxu1 }
0x2753   :  { %v8450_v10 = vadd.f32 %v8435_v58, %v8313_v48  ;;  %v15271_v58 = vld [vmem:[%s17924_s10 + $0x288] sm:$0xff]  }
0x2754   :  { %v14618_v22 = vpop.f32.mrf.mxu1 }
0x2755   :  { %v8453_v53 = vadd.f32 %v14618_v22, %v8316_v30  ;;  %v12320_v22 = vld [vmem:[%s17927_s11 + $0x2] ss:$0 sm:$0xff] }
0x2756   :  { %v8438_v25 = vpop.f32.mrf.mxu1 }
0x2757   :  { %v8451_v19 = vadd.f32 %v8438_v25, %v8314_v41  ;;  %v15265_v41 = vld [vmem:[%s17924_s10 + $0x278] sm:$0xff]  }
0x2760   :  { %v14629_v8 = vpop.f32.mrf.mxu1 }
0x2762   :  { %v8521_v44 = vpop.f32.mrf.mxu1 }
0x2764   :  { %v14630_v35 = vpop.f32.mrf.mxu1 }
0x2765   :  { %v8537_v7 = vpack.c.bf16 %v14630_v35, %v14629_v8 }
0x2766   :  { %v8524_v27 = vpop.f32.mrf.mxu1 }
0x2767   :  { %v8536_v16 = vpack.c.bf16 %v8524_v27, %v8521_v44  ;;  %14631 = vmatprep.subr.bf16.mxu0 %v8537_v7 }
0x2768   :  { %14632 = vmatpush3.bf16.msra.mxu0 %v8537_v7 }
0x2769   :  { %14633 = vmatprep.subr.bf16.mxu0 %v8536_v16 }
0x276c   :  { %14634 = vmatpush3.bf16.msra.mxu0 %v8536_v16 }
0x276d   :  { %14639 = vmatprep.subr.bf16.mxu0 %v15261_v34 }
0x276f   :  { %14636 = vmatmul.mubr.msk.bf16.vlgmr.msra.gmra.mxu0 %vm2097_vm4, %v17149_v60  ;;  %v15264_v60 = vld [vmem:[%s17924_s10 + $0x240] sm:$0xff]  }
0x2770   :  { %14640 = vmatpush3.bf16.msra.mxu0 %v15261_v34 }
0x2771   :  { %14641 = vmatprep.subr.bf16.mxu0 %v15262_v33 }
0x2774   :  { %14642 = vmatpush3.bf16.msra.mxu0 %v15262_v33 }
0x2775   :  { %14643 = vmatprep.subr.bf16.mxu0 %v15263_v39 }
0x2778   :  { %14644 = vmatpush3.bf16.msra.mxu0 %v15263_v39 }
0x2779   :  { %14645 = vmatprep.subr.bf16.mxu0 %v15264_v60 }
0x277c   :  { %14646 = vmatpush3.bf16.msra.mxu0 %v15264_v60 }
0x282f   :  { %v14637_v4 = vpop.f32.mrf.mxu0 }
0x2830   :  { %v8589_v43 = vadd.f32 %v14637_v4, %v8452_v56  ;;  %v15269_v56 = vld [vmem:[%s17924_s10 + $0x298] sm:$0xff]  }
0x2831   :  { %v8572_v28 = vpop.f32.mrf.mxu0 }
0x2832   :  { %v8587_v45 = vadd.f32 %v8572_v28, %v8450_v10  ;;  %v17422_v50 = vadd.f32 %v8589_v43, %v6087_v51  ;;  %v15272_v10 = vld [vmem:[%s17924_s10 + $0x280] sm:$0xff]  }
0x2833   :  { %v14638_v32 = vpop.f32.mrf.mxu0 }
0x2834   :  { %v8590_v37 = vadd.f32 %v14638_v32, %v8453_v53  ;;  %v17414_v40 = vadd.f32 %v8587_v45, %v6085_v14  ;;  %v8597_v14 = vmax.f32 %v17422_v50, 0.0 }
0x2835   :  { %v8575_v61 = vpop.f32.mrf.mxu0 }
0x2836   :  { %v17418_v11 = vadd.f32 %v8590_v37, %v6088_v47  ;;  %v8588_v49 = vadd.f32 %v8575_v61, %v8451_v19  ;;  %v8595_v5 = vmax.f32 %v17414_v40, 0.0  ;;  %v15273_v37 = vld [vmem:[%s17924_s10 + $0x2b8] sm:$0xff]   ;;  %v15274_v61 = vld [vmem:[%s17924_s10 + $0x2b0] sm:$0xff]   ;;  %v12595_v40 = vld [vmem:[%s17931_s15] ss:$0 sm:$0xff] }
0x2838   :  { %v17426_v54 = vadd.f32 %v8588_v49, %v6086_v18  ;;  %v8598_v48 = vmax.f32 %v17418_v11, 0.0  ;;  %v15275_v49 = vld [vmem:[%s17924_s10 + $0x2a8] sm:$0xff]  }
0x283a   :  { %v8596_v15 = vmax.f32 %v17426_v54, 0.0  ;;  %v17442_v63 = vpack.c.bf16 %v8598_v48, %v8597_v14 }
0x283c   :  { %v17436_v23 = vpack.c.bf16 %v8596_v15, %v8595_v5 }
0x283e   :  { %14647 = vmatprep.mubr.msk.bf16.mxu0 %vm3429_vm5, %v17436_v23 }
0x283f   :  { %14648 = vmatmul.mubr.msk.bf16.vlgmr.msra.gmra.mxu0 %vm3429_vm5, %v17442_v63 }
0x2840   :  { %14675 = vmatprep.mubr.msk.bf16.mxu0 %vm2097_vm4, %v17181_v59  ;;  %v15267_v59 = vld [vmem:[%s17924_s10 + $0x268] sm:$0xff]  }
0x28ff   :  { %v14649_v26 = vpop.f32.mrf.mxu0 }
0x2901   :  { %v8676_v47 = vpop.f32.mrf.mxu0 }
0x2903   :  { %v14650_v18 = vpop.f32.mrf.mxu0 }
0x2904   :  { %v8692_v51 = vpack.c.bf16 %v14650_v18, %v14649_v26  ;;  %v15276_v26 = vld [vmem:[%s17924_s10 + $0x2a0] sm:$0xff]  }
0x2905   :  { %v8679_v30 = vpop.f32.mrf.mxu0 }
0x2906   :  { %v8691_v1 = vpack.c.bf16 %v8679_v30, %v8676_v47  ;;  %14651 = vmatprep.subr.bf16.mxu1 %v8692_v51 }
0x2907   :  { %14652 = vmatpush3.bf16.msra.mxu1 %v8692_v51 }
0x2908   :  { %14653 = vmatprep.subr.bf16.mxu1 %v8691_v1 }
0x290b   :  { %14654 = vmatpush3.bf16.msra.mxu1 %v8691_v1 }
0x290c   :  { %14659 = vmatprep.subr.bf16.mxu1 %v15265_v41 }
0x290e   :  { %14656 = vmatmul.mubr.msk.bf16.vlgmr.msra.gmra.mxu1 %vm2097_vm4, %v17194_v9 }
0x290f   :  { %14660 = vmatpush3.bf16.msra.mxu1 %v15265_v41  ;;  %14667 = vmatprep.mubr.msk.bf16.mxu1 %vm3429_vm5, %v17436_v23 }
0x2910   :  { %14661 = vmatprep.subr.bf16.mxu1 %v15266_v3 }
0x2913   :  { %14662 = vmatpush3.bf16.msra.mxu1 %v15266_v3 }
0x2914   :  { %14663 = vmatprep.subr.bf16.mxu1 %v15267_v59 }
0x2917   :  { %14664 = vmatpush3.bf16.msra.mxu1 %v15267_v59 }
0x2918   :  { %14665 = vmatprep.subr.bf16.mxu1 %v15268_v6 }
0x291b   :  { %14666 = vmatpush3.bf16.msra.mxu1 %v15268_v6 }
0x291e   :  { %14668 = vmatmul.mubr.msk.bf16.vlgmr.msra.gmra.mxu1 %vm3429_vm5, %v17442_v63 }
0x291f   :  { %14695 = vmatprep.mubr.msk.bf16.mxu1 %vm2097_vm4, %v17211_v17  ;;  %v15270_v17 = vld [vmem:[%s17924_s10 + $0x290] sm:$0xff]  }
0x29ce   :  { %v14657_v9 = vpop.f32.mrf.mxu1 }
0x29cf   :  { %v8750_v53 = vadd.f32 %v14657_v9, %v12320_v22 }
0x29d0   :  { %v8727_v29 = vpop.f32.mrf.mxu1 }
0x29d1   :  { %v8748_v19 = vadd.f32 %v12320_v22, %v8727_v29 }
0x29d2   :  { %v14658_v57 = vpop.f32.mrf.mxu1 }
0x29d3   :  { %v8751_v35 = vadd.f32 %v14658_v57, %v12320_v22 }
0x29d4   :  { %v8730_v20 = vpop.f32.mrf.mxu1 }
0x29d5   :  { %v8749_v16 = vadd.f32 %v12320_v22, %v8730_v20 }
0x29de   :  { %v14669_v62 = vpop.f32.mrf.mxu1 }
0x29e0   :  { %v8819_v55 = vpop.f32.mrf.mxu1 }
0x29e2   :  { %v14670_v0 = vpop.f32.mrf.mxu1 }
0x29e3   :  { %v8835_v46 = vpack.c.bf16 %v14670_v0, %v14669_v62  ;;  %v15278_v0 = vld [vmem:[%s17924_s10 + $0x2d0] sm:$0xff]  }
0x29e4   :  { %v8822_v36 = vpop.f32.mrf.mxu1 }
0x29e5   :  { %v8834_v24 = vpack.c.bf16 %v8822_v36, %v8819_v55  ;;  %14671 = vmatprep.subr.bf16.mxu0 %v8835_v46  ;;  %v15277_v55 = vld [vmem:[%s17924_s10 + $0x2d8] sm:$0xff]   ;;  %v15280_v36 = vld [vmem:[%s17924_s10 + $0x2c0] sm:$0xff]  }
0x29e6   :  { %14672 = vmatpush3.bf16.msra.mxu0 %v8835_v46  ;;  %v15279_v46 = vld [vmem:[%s17924_s10 + $0x2c8] sm:$0xff]  }
0x29e7   :  { %14673 = vmatprep.subr.bf16.mxu0 %v8834_v24 }
0x29ea   :  { %14674 = vmatpush3.bf16.msra.mxu0 %v8834_v24 }
0x29eb   :  { %14679 = vmatprep.subr.bf16.mxu0 %v15269_v56 }
0x29ed   :  { %14676 = vmatmul.mubr.msk.bf16.vlgmr.msra.gmra.mxu0 %vm2097_vm4, %v17224_v31  ;;  %v17491_v31 = vld [vmem:[%s17926_s5 + $0x30] sm:$0xff]  }
0x29ee   :  { %14680 = vmatpush3.bf16.msra.mxu0 %v15269_v56  ;;  %14687 = vmatprep.mubr.msk.bf16.mxu0 %vm3429_vm5, %v17436_v23 }
0x29ef   :  { %14681 = vmatprep.subr.bf16.mxu0 %v15270_v17 }
0x29f2   :  { %14682 = vmatpush3.bf16.msra.mxu0 %v15270_v17 }
0x29f3   :  { %14683 = vmatprep.subr.bf16.mxu0 %v15271_v58 }
0x29f6   :  { %14684 = vmatpush3.bf16.msra.mxu0 %v15271_v58 }
0x29f7   :  { %14685 = vmatprep.subr.bf16.mxu0 %v15272_v10 }
0x29fa   :  { %14686 = vmatpush3.bf16.msra.mxu0 %v15272_v10 }
0x29fd   :  { %14688 = vmatmul.mubr.msk.bf16.vlgmr.msra.gmra.mxu0 %vm3429_vm5, %v17442_v63 }
0x29fe   :  { %14715 = vmatprep.mubr.msk.bf16.mxu0 %vm2097_vm4, %v17491_v31 }
0x2aad   :  { %v14677_v25 = vpop.f32.mrf.mxu0 }
0x2aae   :  { %v8887_v8 = vadd.f32 %v14677_v25, %v8750_v53 }
0x2aaf   :  { %v8870_v44 = vpop.f32.mrf.mxu0 }
0x2ab0   :  { %v8885_v7 = vadd.f32 %v8870_v44, %v8748_v19 }
0x2ab1   :  { %v14678_v27 = vpop.f32.mrf.mxu0 }
0x2ab2   :  { %v8888_v34 = vadd.f32 %v14678_v27, %v8751_v35 }
0x2ab3   :  { %v8873_v33 = vpop.f32.mrf.mxu0 }
0x2ab4   :  { %v8886_v39 = vadd.f32 %v8873_v33, %v8749_v16  ;;  %v15281_v16 = vld [vmem:[%s17924_s10 + $0x2f8] sm:$0xff]   ;;  %v15283_v33 = vld [vmem:[%s17924_s10 + $0x2e8] sm:$0xff]  }
0x2abd   :  { %v14689_v60 = vpop.f32.mrf.mxu0 }
0x2abf   :  { %v8956_v4 = vpop.f32.mrf.mxu0 }
0x2ac1   :  { %v14690_v28 = vpop.f32.mrf.mxu0 }
0x2ac2   :  { %v8972_v45 = vpack.c.bf16 %v14690_v28, %v14689_v60 }
0x2ac3   :  { %v8959_v43 = vpop.f32.mrf.mxu0 }
0x2ac4   :  { %v8971_v32 = vpack.c.bf16 %v8959_v43, %v8956_v4  ;;  %14691 = vmatprep.subr.bf16.mxu1 %v8972_v45 }
0x2ac5   :  { %14692 = vmatpush3.bf16.msra.mxu1 %v8972_v45 }
0x2ac6   :  { %14693 = vmatprep.subr.bf16.mxu1 %v8971_v32 }
0x2ac9   :  { %14694 = vmatpush3.bf16.msra.mxu1 %v8971_v32 }
0x2aca   :  { %14699 = vmatprep.subr.bf16.mxu1 %v15273_v37 }
0x2acc   :  { %14696 = vmatmul.mubr.msk.bf16.vlgmr.msra.gmra.mxu1 %vm2097_vm4, %v17252_v13  ;;  %v17519_v13 = vld [vmem:[%s17926_s5 + $0x40] sm:$0xff]  }
0x2acd   :  { %14700 = vmatpush3.bf16.msra.mxu1 %v15273_v37  ;;  %14707 = vmatprep.mubr.msk.bf16.mxu1 %vm3429_vm5, %v17436_v23 }
0x2ace   :  { %14701 = vmatprep.subr.bf16.mxu1 %v15274_v61 }
0x2ad1   :  { %14702 = vmatpush3.bf16.msra.mxu1 %v15274_v61 }
0x2ad2   :  { %14703 = vmatprep.subr.bf16.mxu1 %v15275_v49 }
0x2ad5   :  { %14704 = vmatpush3.bf16.msra.mxu1 %v15275_v49 }
0x2ad6   :  { %14705 = vmatprep.subr.bf16.mxu1 %v15276_v26 }
0x2ad9   :  { %14706 = vmatpush3.bf16.msra.mxu1 %v15276_v26 }
0x2adc   :  { %14708 = vmatmul.mubr.msk.bf16.vlgmr.msra.gmra.mxu1 %vm3429_vm5, %v17442_v63 }
0x2add   :  { %14735 = vmatprep.mubr.msk.bf16.mxu1 %vm2097_vm4, %v17519_v13 }
0x2b8c   :  { %v14697_v47 = vpop.f32.mrf.mxu1 }
0x2b8d   :  { %v9024_v18 = vadd.f32 %v14697_v47, %v8887_v8 }
0x2b8e   :  { %v9007_v51 = vpop.f32.mrf.mxu1 }
0x2b8f   :  { %v9022_v30 = vadd.f32 %v9007_v51, %v8885_v7 }
0x2b90   :  { %v14698_v1 = vpop.f32.mrf.mxu1 }
0x2b91   :  { %v9025_v41 = vadd.f32 %v14698_v1, %v8888_v34  ;;  %v15282_v34 = vld [vmem:[%s17924_s10 + $0x2f0] sm:$0xff]   ;;  %v15285_v1 = vld [vmem:[%s17924_s10 + $0x318] sm:$0xff]  }
0x2b92   :  { %v9010_v3 = vpop.f32.mrf.mxu1 }
0x2b93   :  { %v9023_v59 = vadd.f32 %v9010_v3, %v8886_v39  ;;  %v15284_v39 = vld [vmem:[%s17924_s10 + $0x2e0] sm:$0xff]   ;;  %v15287_v3 = vld [vmem:[%s17924_s10 + $0x308] sm:$0xff]  }
0x2b9c   :  { %v14709_v6 = vpop.f32.mrf.mxu1 }
0x2b9e   :  { %v9093_v9 = vpop.f32.mrf.mxu1 }
0x2ba0   :  { %v14710_v29 = vpop.f32.mrf.mxu1 }
0x2ba1   :  { %v9109_v57 = vpack.c.bf16 %v14710_v29, %v14709_v6 }
0x2ba2   :  { %v9096_v20 = vpop.f32.mrf.mxu1 }
0x2ba3   :  { %v9108_v62 = vpack.c.bf16 %v9096_v20, %v9093_v9  ;;  %14711 = vmatprep.subr.bf16.mxu0 %v9109_v57 }
0x2ba4   :  { %14712 = vmatpush3.bf16.msra.mxu0 %v9109_v57 }
0x2ba5   :  { %14713 = vmatprep.subr.bf16.mxu0 %v9108_v62 }
0x2ba8   :  { %14714 = vmatpush3.bf16.msra.mxu0 %v9108_v62 }
0x2ba9   :  { %14719 = vmatprep.subr.bf16.mxu0 %v15277_v55 }
0x2bab   :  { %14716 = vmatmul.mubr.msk.bf16.vlgmr.msra.gmra.mxu0 %vm2097_vm4, %v17277_v52  ;;  %v17544_v52 = vld [vmem:[%s17926_s5 + $0x50] sm:$0xff]  }
0x2bac   :  { %14720 = vmatpush3.bf16.msra.mxu0 %v15277_v55  ;;  %14727 = vmatprep.mubr.msk.bf16.mxu0 %vm3429_vm5, %v17436_v23 }
0x2bad   :  { %14721 = vmatprep.subr.bf16.mxu0 %v15278_v0 }
0x2bb0   :  { %14722 = vmatpush3.bf16.msra.mxu0 %v15278_v0 }
0x2bb1   :  { %14723 = vmatprep.subr.bf16.mxu0 %v15279_v46 }
0x2bb4   :  { %14724 = vmatpush3.bf16.msra.mxu0 %v15279_v46 }
0x2bb5   :  { %14725 = vmatprep.subr.bf16.mxu0 %v15280_v36 }
0x2bb8   :  { %14726 = vmatpush3.bf16.msra.mxu0 %v15280_v36 }
0x2bbb   :  { %14728 = vmatmul.mubr.msk.bf16.vlgmr.msra.gmra.mxu0 %vm3429_vm5, %v17442_v63 }
0x2bbc   :  { %14755 = vmatprep.mubr.msk.bf16.mxu0 %vm2097_vm4, %v17544_v52 }
0x2c6b   :  { %v14717_v24 = vpop.f32.mrf.mxu0 }
0x2c6c   :  { %v9161_v56 = vadd.f32 %v14717_v24, %v9024_v18 }
0x2c6d   :  { %v9144_v17 = vpop.f32.mrf.mxu0 }
0x2c6e   :  { %v9159_v58 = vadd.f32 %v9144_v17, %v9022_v30 }
0x2c6f   :  { %v14718_v10 = vpop.f32.mrf.mxu0 }
0x2c70   :  { %v9162_v22 = vadd.f32 %v14718_v10, %v9025_v41  ;;  %v15286_v41 = vld [vmem:[%s17924_s10 + $0x310] sm:$0xff]   ;;  %v15289_v10 = vld [vmem:[%s17924_s10 + $0x338] sm:$0xff]  }
0x2c71   :  { %v9147_v53 = vpop.f32.mrf.mxu0 }
0x2c72   :  { %v9160_v25 = vadd.f32 %v9147_v53, %v9023_v59  ;;  %v15288_v59 = vld [vmem:[%s17924_s10 + $0x300] sm:$0xff]   ;;  %v15291_v53 = vld [vmem:[%s17924_s10 + $0x328] sm:$0xff]  }
0x2c7b   :  { %v14729_v19 = vpop.f32.mrf.mxu0 }
0x2c7d   :  { %v9230_v8 = vpop.f32.mrf.mxu0 }
0x2c7f   :  { %v14730_v44 = vpop.f32.mrf.mxu0 }
0x2c80   :  { %v9246_v35 = vpack.c.bf16 %v14730_v44, %v14729_v19 }
0x2c81   :  { %v9233_v7 = vpop.f32.mrf.mxu0 }
0x2c82   :  { %v9245_v27 = vpack.c.bf16 %v9233_v7, %v9230_v8  ;;  %14731 = vmatprep.subr.bf16.mxu1 %v9246_v35 }
0x2c83   :  { %14732 = vmatpush3.bf16.msra.mxu1 %v9246_v35 }
0x2c84   :  { %14733 = vmatprep.subr.bf16.mxu1 %v9245_v27 }
0x2c87   :  { %14734 = vmatpush3.bf16.msra.mxu1 %v9245_v27 }
0x2c88   :  { %14739 = vmatprep.subr.bf16.mxu1 %v15281_v16 }
0x2c8a   :  { %14736 = vmatmul.mubr.msk.bf16.vlgmr.msra.gmra.mxu1 %vm2097_vm4, %v17302_v12  ;;  %v17569_v12 = vld [vmem:[%s17926_s5 + $0x60] sm:$0xff]  }
0x2c8b   :  { %14740 = vmatpush3.bf16.msra.mxu1 %v15281_v16  ;;  %14747 = vmatprep.mubr.msk.bf16.mxu1 %vm3429_vm5, %v17436_v23 }
0x2c8c   :  { %14741 = vmatprep.subr.bf16.mxu1 %v15282_v34 }
0x2c8f   :  { %14742 = vmatpush3.bf16.msra.mxu1 %v15282_v34 }
0x2c90   :  { %14743 = vmatprep.subr.bf16.mxu1 %v15283_v33 }
0x2c93   :  { %14744 = vmatpush3.bf16.msra.mxu1 %v15283_v33 }
0x2c94   :  { %14745 = vmatprep.subr.bf16.mxu1 %v15284_v39 }
0x2c97   :  { %14746 = vmatpush3.bf16.msra.mxu1 %v15284_v39 }
0x2c9a   :  { %14748 = vmatmul.mubr.msk.bf16.vlgmr.msra.gmra.mxu1 %vm3429_vm5, %v17442_v63 }
0x2c9b   :  { %14775 = vmatprep.mubr.msk.bf16.mxu1 %vm2097_vm4, %v17569_v12 }
0x2d4a   :  { %v14737_v60 = vpop.f32.mrf.mxu1 }
0x2d4b   :  { %v9298_v4 = vadd.f32 %v14737_v60, %v9161_v56 }
0x2d4c   :  { %v9281_v28 = vpop.f32.mrf.mxu1 }
0x2d4d   :  { %v9296_v45 = vadd.f32 %v9281_v28, %v9159_v58 }
0x2d4e   :  { %v14738_v43 = vpop.f32.mrf.mxu1 }
0x2d4f   :  { %v9299_v32 = vadd.f32 %v14738_v43, %v9162_v22  ;;  %v15290_v22 = vld [vmem:[%s17924_s10 + $0x330] sm:$0xff]   ;;  %v15293_v43 = vld [vmem:[%s17924_s10 + $0x358] sm:$0xff]  }
0x2d50   :  { %v9284_v37 = vpop.f32.mrf.mxu1 }
0x2d51   :  { %v9297_v61 = vadd.f32 %v9284_v37, %v9160_v25  ;;  %v15292_v25 = vld [vmem:[%s17924_s10 + $0x320] sm:$0xff]   ;;  %v15295_v37 = vld [vmem:[%s17924_s10 + $0x348] sm:$0xff]  }
0x2d5a   :  { %v14749_v49 = vpop.f32.mrf.mxu1 }
0x2d5c   :  { %v9367_v26 = vpop.f32.mrf.mxu1 }
0x2d5e   :  { %v14750_v47 = vpop.f32.mrf.mxu1 }
0x2d5f   :  { %v9383_v18 = vpack.c.bf16 %v14750_v47, %v14749_v49 }
0x2d60   :  { %v9370_v51 = vpop.f32.mrf.mxu1 }
0x2d61   :  { %v9382_v30 = vpack.c.bf16 %v9370_v51, %v9367_v26  ;;  %14751 = vmatprep.subr.bf16.mxu0 %v9383_v18 }
0x2d62   :  { %14752 = vmatpush3.bf16.msra.mxu0 %v9383_v18 }
0x2d63   :  { %14753 = vmatprep.subr.bf16.mxu0 %v9382_v30 }
0x2d66   :  { %14754 = vmatpush3.bf16.msra.mxu0 %v9382_v30 }
0x2d67   :  { %14759 = vmatprep.subr.bf16.mxu0 %v15285_v1 }
0x2d69   :  { %14756 = vmatmul.mubr.msk.bf16.vlgmr.msra.gmra.mxu0 %vm2097_vm4, %v17327_v2  ;;  %v17594_v2 = vld [vmem:[%s17926_s5 + $0x70] sm:$0xff]  }
0x2d6a   :  { %14760 = vmatpush3.bf16.msra.mxu0 %v15285_v1  ;;  %14767 = vmatprep.mubr.msk.bf16.mxu0 %vm3429_vm5, %v17436_v23 }
0x2d6b   :  { %14761 = vmatprep.subr.bf16.mxu0 %v15286_v41 }
0x2d6e   :  { %14762 = vmatpush3.bf16.msra.mxu0 %v15286_v41 }
0x2d6f   :  { %14763 = vmatprep.subr.bf16.mxu0 %v15287_v3 }
0x2d72   :  { %14764 = vmatpush3.bf16.msra.mxu0 %v15287_v3 }
0x2d73   :  { %14765 = vmatprep.subr.bf16.mxu0 %v15288_v59 }
0x2d76   :  { %14766 = vmatpush3.bf16.msra.mxu0 %v15288_v59 }
0x2d79   :  { %14768 = vmatmul.mubr.msk.bf16.vlgmr.msra.gmra.mxu0 %vm3429_vm5, %v17442_v63 }
0x2d7a   :  { %14795 = vmatprep.mubr.msk.bf16.mxu0 %vm2097_vm4, %v17594_v2 }
0x2e29   :  { %v14757_v6 = vpop.f32.mrf.mxu0 }
0x2e2a   :  { %v9435_v9 = vadd.f32 %v14757_v6, %v9298_v4 }
0x2e2b   :  { %v9418_v29 = vpop.f32.mrf.mxu0 }
0x2e2c   :  { %v9433_v57 = vadd.f32 %v9418_v29, %v9296_v45  ;;  %v15298_v29 = vld [vmem:[%s17928_s12 + $0x250] sm:$0xff]  }
0x2e2d   :  { %v14758_v20 = vpop.f32.mrf.mxu0 }
0x2e2e   :  { %v9436_v62 = vadd.f32 %v14758_v20, %v9299_v32  ;;  %v15294_v32 = vld [vmem:[%s17924_s10 + $0x350] sm:$0xff]   ;;  %v15300_v20 = vld [vmem:[%s17928_s12 + $0x240] sm:$0xff]  }
0x2e2f   :  { %v9421_v55 = vpop.f32.mrf.mxu0 }
0x2e30   :  { %v9434_v0 = vadd.f32 %v9421_v55, %v9297_v61  ;;  %v15296_v61 = vld [vmem:[%s17924_s10 + $0x340] sm:$0xff]  }
0x2e39   :  { %v14769_v46 = vpop.f32.mrf.mxu0 }
0x2e3b   :  { %v9504_v36 = vpop.f32.mrf.mxu0 }
0x2e3d   :  { %v14770_v24 = vpop.f32.mrf.mxu0 }
0x2e3e   :  { %v9520_v56 = vpack.c.bf16 %v14770_v24, %v14769_v46 }
0x2e3f   :  { %v9507_v17 = vpop.f32.mrf.mxu0 }
0x2e40   :  { %v9519_v58 = vpack.c.bf16 %v9507_v17, %v9504_v36  ;;  %14771 = vmatprep.subr.bf16.mxu1 %v9520_v56 }
0x2e41   :  { %14772 = vmatpush3.bf16.msra.mxu1 %v9520_v56 }
0x2e42   :  { %14773 = vmatprep.subr.bf16.mxu1 %v9519_v58 }
0x2e45   :  { %14774 = vmatpush3.bf16.msra.mxu1 %v9519_v58 }
0x2e46   :  { %14779 = vmatprep.subr.bf16.mxu1 %v15289_v10 }
0x2e48   :  { %14776 = vmatmul.mubr.msk.bf16.vlgmr.msra.gmra.mxu1 %vm2097_vm4, %v17352_v38  ;;  %v17619_v38 = vld [vmem:[%s17926_s5 + $0x80] sm:$0xff]  }
0x2e49   :  { %14780 = vmatpush3.bf16.msra.mxu1 %v15289_v10  ;;  %14787 = vmatprep.mubr.msk.bf16.mxu1 %vm3429_vm5, %v17436_v23 }
0x2e4a   :  { %14781 = vmatprep.subr.bf16.mxu1 %v15290_v22 }
0x2e4d   :  { %14782 = vmatpush3.bf16.msra.mxu1 %v15290_v22 }
0x2e4e   :  { %14783 = vmatprep.subr.bf16.mxu1 %v15291_v53 }
0x2e51   :  { %14784 = vmatpush3.bf16.msra.mxu1 %v15291_v53 }
0x2e52   :  { %14785 = vmatprep.subr.bf16.mxu1 %v15292_v25 }
0x2e55   :  { %14786 = vmatpush3.bf16.msra.mxu1 %v15292_v25 }
0x2e58   :  { %14788 = vmatmul.mubr.msk.bf16.vlgmr.msra.gmra.mxu1 %vm3429_vm5, %v17442_v63 }
0x2e59   :  { %14815 = vmatprep.mubr.msk.bf16.mxu1 %vm2097_vm4, %v17619_v38 }
0x2f08   :  { %v14777_v19 = vpop.f32.mrf.mxu1 }
0x2f09   :  { %v9572_v8 = vadd.f32 %v14777_v19, %v9435_v9 }
0x2f0a   :  { %v9555_v44 = vpop.f32.mrf.mxu1 }
0x2f0b   :  { %v9570_v35 = vadd.f32 %v9555_v44, %v9433_v57  ;;  %v15299_v57 = vld [vmem:[%s17928_s12 + $0x248] sm:$0xff]  }
0x2f0c   :  { %v14778_v7 = vpop.f32.mrf.mxu1 }
0x2f0d   :  { %v9573_v27 = vadd.f32 %v14778_v7, %v9436_v62 }
0x2f0e   :  { %v9558_v16 = vpop.f32.mrf.mxu1 }
0x2f0f   :  { %v9571_v34 = vadd.f32 %v9558_v16, %v9434_v0 }
0x2f18   :  { %v14789_v33 = vpop.f32.mrf.mxu1 }
0x2f1a   :  { %v9641_v39 = vpop.f32.mrf.mxu1 }
0x2f1c   :  { %v14790_v60 = vpop.f32.mrf.mxu1 }
0x2f1d   :  { %v9657_v4 = vpack.c.bf16 %v14790_v60, %v14789_v33  ;;  %v15301_v33 = vld [vmem:[%s17928_s12 + $0x278] sm:$0xff]   ;;  %v15486_v60 = vld [vmem:[%s17926_s5 + $0x8] sm:$0xff]  }
0x2f1e   :  { %v9644_v28 = vpop.f32.mrf.mxu1 }
0x2f1f   :  { %v9656_v45 = vpack.c.bf16 %v9644_v28, %v9641_v39  ;;  %14791 = vmatprep.subr.bf16.mxu0 %v9657_v4  ;;  %v15302_v39 = vld [vmem:[%s17928_s12 + $0x270] sm:$0xff]   ;;  %v15304_v28 = vld [vmem:[%s17928_s12 + $0x260] sm:$0xff]  }
0x2f20   :  { %14792 = vmatpush3.bf16.msra.mxu0 %v9657_v4  ;;  %v15303_v4 = vld [vmem:[%s17928_s12 + $0x268] sm:$0xff]  }
0x2f21   :  { %14793 = vmatprep.subr.bf16.mxu0 %v9656_v45 }
0x2f24   :  { %14794 = vmatpush3.bf16.msra.mxu0 %v9656_v45  ;;  %v15487_v45 = vld [vmem:[%s17926_s5 + $0x20] sm:$0xff]  }
0x2f25   :  { %14799 = vmatprep.subr.bf16.mxu0 %v15293_v43 }
0x2f27   :  { %14796 = vmatmul.mubr.msk.bf16.vlgmr.msra.gmra.mxu0 %vm2097_vm4, %v17377_v21 }
0x2f28   :  { %14800 = vmatpush3.bf16.msra.mxu0 %v15293_v43  ;;  %14807 = vmatprep.mubr.msk.bf16.mxu0 %vm3429_vm5, %v17436_v23 }
0x2f29   :  { %14801 = vmatprep.subr.bf16.mxu0 %v15294_v32 }
0x2f2c   :  { %14802 = vmatpush3.bf16.msra.mxu0 %v15294_v32 }
0x2f2d   :  { %14803 = vmatprep.subr.bf16.mxu0 %v15295_v37 }
0x2f30   :  { %14804 = vmatpush3.bf16.msra.mxu0 %v15295_v37 }
0x2f31   :  { %14805 = vmatprep.subr.bf16.mxu0 %v15296_v61 }
0x2f34   :  { %14806 = vmatpush3.bf16.msra.mxu0 %v15296_v61 }
0x2f37   :  { %14808 = vmatmul.mubr.msk.bf16.vlgmr.msra.gmra.mxu0 %vm3429_vm5, %v17442_v63  ;;  %v17649_v63 = vld [vmem:[%s17926_s5 + $0x88] sm:$0xff]  }
0x2f38   :  { %14835 = vmatprep.mubr.msk.bf16.mxu0 %vm2097_vm4, %v17394_v42  ;;  %v15297_v42 = vld [vmem:[%s17928_s12 + $0x258] sm:$0xff]  }
0x2fe7   :  { %v14797_v21 = vpop.f32.mrf.mxu0 }
0x2fe8   :  { %v9709_v23 = vadd.f32 %v14797_v21, %v9572_v8  ;;  %v15485_v8 = vld [vmem:[%s17926_s5 + $0x10] sm:$0xff]  }
0x2fe9   :  { %v9692_v49 = vpop.f32.mrf.mxu0 }
0x2fea   :  { %v9707_v26 = vadd.f32 %v9692_v49, %v9570_v35 }
0x2feb   :  { %v14798_v47 = vpop.f32.mrf.mxu0 }
0x2fec   :  { %v9710_v18 = vadd.f32 %v14798_v47, %v9573_v27 }
0x2fed   :  { %v9695_v51 = vpop.f32.mrf.mxu0 }
0x2fee   :  { %v9708_v30 = vadd.f32 %v9695_v51, %v9571_v34  ;;  %v15305_v51 = vld [vmem:[%s17928_s12 + $0x298] sm:$0xff]  }
0x2ff7   :  { %v14809_v1 = vpop.f32.mrf.mxu0 }
0x2ff9   :  { %v9778_v41 = vpop.f32.mrf.mxu0 }
0x2ffb   :  { %v14810_v3 = vpop.f32.mrf.mxu0 }
0x2ffc   :  { %v9794_v59 = vpack.c.bf16 %v14810_v3, %v14809_v1  ;;  %v15488_v1 = vld [vmem:[%s17926_s5 + $0x18] sm:$0xff]   ;;  %v15308_v3 = vld [vmem:[%s17928_s12 + $0x280] sm:$0xff]  }
0x2ffd   :  { %v9781_v6 = vpop.f32.mrf.mxu0 }
0x2ffe   :  { %v9793_v9 = vpack.c.bf16 %v9781_v6, %v9778_v41  ;;  %14811 = vmatprep.subr.bf16.mxu1 %v9794_v59  ;;  %v15307_v41 = vld [vmem:[%s17928_s12 + $0x288] sm:$0xff]  }
0x2fff   :  { %14812 = vmatpush3.bf16.msra.mxu1 %v9794_v59  ;;  %v12466_v59 = vld [vmem:[%s17929_s13 + $0x2] ss:$0 sm:$0xff] }
0x3000   :  { %14813 = vmatprep.subr.bf16.mxu1 %v9793_v9 }
0x3003   :  { %14814 = vmatpush3.bf16.msra.mxu1 %v9793_v9 }
0x3004   :  { %14819 = vmatprep.subr.bf16.mxu1 %v15297_v42 }
0x3006   :  { %14816 = vmatmul.mubr.msk.bf16.vlgmr.msra.gmra.mxu1 %vm2097_vm4, %v17649_v63 }
0x3007   :  { %14820 = vmatpush3.bf16.msra.mxu1 %v15297_v42 }
0x3008   :  { %14821 = vmatprep.subr.bf16.mxu1 %v15298_v29 }
0x300b   :  { %14822 = vmatpush3.bf16.msra.mxu1 %v15298_v29 }
0x300c   :  { %14823 = vmatprep.subr.bf16.mxu1 %v15299_v57 }
0x300f   :  { %14824 = vmatpush3.bf16.msra.mxu1 %v15299_v57 }
0x3010   :  { %14825 = vmatprep.subr.bf16.mxu1 %v15300_v20 }
0x3013   :  { %14826 = vmatpush3.bf16.msra.mxu1 %v15300_v20 }
0x30c6   :  { %v14817_v62 = vpop.f32.mrf.mxu1 }
0x30c7   :  { %v9846_v0 = vadd.f32 %v14817_v62, %v9709_v23 }
0x30c8   :  { %v9829_v55 = vpop.f32.mrf.mxu1 }
0x30c9   :  { %v9844_v36 = vadd.f32 %v9829_v55, %v9707_v26  ;;  %v9850_v17 = vmax.f32 %v9846_v0, 0.0 }
0x30ca   :  { %v14818_v46 = vpop.f32.mrf.mxu1 }
0x30cb   :  { %v9847_v24 = vadd.f32 %v14818_v46, %v9710_v18  ;;  %v9848_v22 = vmax.f32 %v9844_v36, 0.0 }
0x30cc   :  { %v9832_v56 = vpop.f32.mrf.mxu1 }
0x30cd   :  { %v9851_v58 = vmax.f32 %v9847_v24, 0.0  ;;  %v9845_v10 = vadd.f32 %v9832_v56, %v9708_v30  ;;  %v15306_v30 = vld [vmem:[%s17928_s12 + $0x290] sm:$0xff]  }
0x30cf   :  { %v17662_v53 = vpack.c.bf16 %v9851_v58, %v9850_v17  ;;  %v9849_v25 = vmax.f32 %v9845_v10, 0.0 }
0x30d1   :  { %v17664_v19 = vpack.c.bf16 %v9849_v25, %v9848_v22  ;;  %v15309_v25 = vld [vmem:[%s17928_s12 + $0x2b8] sm:$0xff]  }
0x30d3   :  { %14827 = vmatprep.mubr.msk.bf16.mxu1 %vm3429_vm5, %v17664_v19 }
0x30d4   :  { %14828 = vmatmul.mubr.msk.bf16.vlgmr.msra.gmra.mxu1 %vm3429_vm5, %v17662_v53 }
0x30d5   :  { %14855 = vmatprep.mubr.msk.bf16.mxu1 %vm2097_vm4, %v15485_v8  ;;  %v15310_v8 = vld [vmem:[%s17928_s12 + $0x2b0] sm:$0xff]  }
0x3194   :  { %v14829_v44 = vpop.f32.mrf.mxu1 }
0x3196   :  { %v9929_v35 = vpop.f32.mrf.mxu1 }
0x3198   :  { %v14830_v7 = vpop.f32.mrf.mxu1 }
0x3199   :  { %v9945_v27 = vpack.c.bf16 %v14830_v7, %v14829_v44  ;;  %v15489_v44 = vld [vmem:[%s17926_s5 + $0x28] sm:$0xff]   ;;  %v15312_v7 = vld [vmem:[%s17928_s12 + $0x2a0] sm:$0xff]  }
0x319a   :  { %v9932_v16 = vpop.f32.mrf.mxu1 }
0x319b   :  { %v9944_v34 = vpack.c.bf16 %v9932_v16, %v9929_v35  ;;  %14831 = vmatprep.subr.bf16.mxu0 %v9945_v27  ;;  %v15311_v35 = vld [vmem:[%s17928_s12 + $0x2a8] sm:$0xff]  }
0x319c   :  { %14832 = vmatpush3.bf16.msra.mxu0 %v9945_v27 }
0x319d   :  { %14833 = vmatprep.subr.bf16.mxu0 %v9944_v34 }
0x31a0   :  { %14834 = vmatpush3.bf16.msra.mxu0 %v9944_v34 }
0x31a1   :  { %14839 = vmatprep.subr.bf16.mxu0 %v15301_v33 }
0x31a3   :  { %14836 = vmatmul.mubr.msk.bf16.vlgmr.msra.gmra.mxu0 %vm2097_vm4, %v15486_v60 }
0x31a4   :  { %14840 = vmatpush3.bf16.msra.mxu0 %v15301_v33  ;;  %14847 = vmatprep.mubr.msk.bf16.mxu0 %vm3429_vm5, %v17664_v19 }
0x31a5   :  { %14841 = vmatprep.subr.bf16.mxu0 %v15302_v39 }
0x31a8   :  { %14842 = vmatpush3.bf16.msra.mxu0 %v15302_v39 }
0x31a9   :  { %14843 = vmatprep.subr.bf16.mxu0 %v15303_v4 }
0x31ac   :  { %14844 = vmatpush3.bf16.msra.mxu0 %v15303_v4 }
0x31ad   :  { %14845 = vmatprep.subr.bf16.mxu0 %v15304_v28 }
0x31b0   :  { %14846 = vmatpush3.bf16.msra.mxu0 %v15304_v28 }
0x31b3   :  { %14848 = vmatmul.mubr.msk.bf16.vlgmr.msra.gmra.mxu0 %vm3429_vm5, %v17662_v53 }
0x31b4   :  { %14875 = vmatprep.mubr.msk.bf16.mxu0 %vm2097_vm4, %v15487_v45 }
0x3263   :  { %v14837_v43 = vpop.f32.mrf.mxu0 }
0x3264   :  { %v10003_v6 = vadd.f32 %v14837_v43, %v12466_v59 }
0x3265   :  { %v9980_v32 = vpop.f32.mrf.mxu0 }
0x3266   :  { %v10001_v42 = vadd.f32 %v12466_v59, %v9980_v32 }
0x3267   :  { %v14838_v37 = vpop.f32.mrf.mxu0 }
0x3268   :  { %v10004_v20 = vadd.f32 %v14838_v37, %v12466_v59 }
0x3269   :  { %v9983_v61 = vpop.f32.mrf.mxu0 }
0x326a   :  { %v10002_v0 = vadd.f32 %v12466_v59, %v9983_v61 }
0x3273   :  { %v14849_v21 = vpop.f32.mrf.mxu0 }
0x3275   :  { %v10072_v23 = vpop.f32.mrf.mxu0 }
0x3277   :  { %v14850_v49 = vpop.f32.mrf.mxu0 }
0x3278   :  { %v10088_v26 = vpack.c.bf16 %v14850_v49, %v14849_v21  ;;  %v15490_v49 = vld [vmem:[%s17926_s5 + $0x38] sm:$0xff]  }
0x3279   :  { %v10075_v47 = vpop.f32.mrf.mxu0 }
0x327a   :  { %v10087_v18 = vpack.c.bf16 %v10075_v47, %v10072_v23  ;;  %14851 = vmatprep.subr.bf16.mxu1 %v10088_v26  ;;  %v15314_v23 = vld [vmem:[%s17928_s12 + $0x2d0] sm:$0xff]   ;;  %v15316_v47 = vld [vmem:[%s17928_s12 + $0x2c0] sm:$0xff]  }
0x327b   :  { %14852 = vmatpush3.bf16.msra.mxu1 %v10088_v26  ;;  %v15315_v26 = vld [vmem:[%s17928_s12 + $0x2c8] sm:$0xff]  }
0x327c   :  { %14853 = vmatprep.subr.bf16.mxu1 %v10087_v18 }
0x327f   :  { %14854 = vmatpush3.bf16.msra.mxu1 %v10087_v18 }
0x3280   :  { %14859 = vmatprep.subr.bf16.mxu1 %v15305_v51 }
0x3282   :  { %14856 = vmatmul.mubr.msk.bf16.vlgmr.msra.gmra.mxu1 %vm2097_vm4, %v15488_v1 }
0x3283   :  { %14860 = vmatpush3.bf16.msra.mxu1 %v15305_v51  ;;  %14867 = vmatprep.mubr.msk.bf16.mxu1 %vm3429_vm5, %v17664_v19 }
0x3284   :  { %14861 = vmatprep.subr.bf16.mxu1 %v15306_v30 }
0x3287   :  { %14862 = vmatpush3.bf16.msra.mxu1 %v15306_v30 }
0x3288   :  { %14863 = vmatprep.subr.bf16.mxu1 %v15307_v41 }
0x328b   :  { %14864 = vmatpush3.bf16.msra.mxu1 %v15307_v41 }
0x328c   :  { %14865 = vmatprep.subr.bf16.mxu1 %v15308_v3 }
0x328f   :  { %14866 = vmatpush3.bf16.msra.mxu1 %v15308_v3 }
0x3292   :  { %14868 = vmatmul.mubr.msk.bf16.vlgmr.msra.gmra.mxu1 %vm3429_vm5, %v17662_v53 }
0x3293   :  { %14895 = vmatprep.mubr.msk.bf16.mxu1 %vm2097_vm4, %v17491_v31 }
0x3342   :  { %v14857_v9 = vpop.f32.mrf.mxu1 }
0x3343   :  { %v10140_v29 = vadd.f32 %v14857_v9, %v10003_v6 }
0x3344   :  { %v10123_v57 = vpop.f32.mrf.mxu1 }
0x3345   :  { %v10138_v62 = vadd.f32 %v10123_v57, %v10001_v42 }
0x3346   :  { %v14858_v55 = vpop.f32.mrf.mxu1 }
0x3347   :  { %v10141_v46 = vadd.f32 %v14858_v55, %v10004_v20  ;;  %v15318_v55 = vld [vmem:[%s17928_s12 + $0x2f0] sm:$0xff]  }
0x3348   :  { %v10126_v36 = vpop.f32.mrf.mxu1 }
0x3349   :  { %v10139_v24 = vadd.f32 %v10126_v36, %v10002_v0  ;;  %v15491_v0 = vld [vmem:[%s17926_s5 + $0x48] sm:$0xff]   ;;  %v15320_v36 = vld [vmem:[%s17928_s12 + $0x2e0] sm:$0xff]  }
0x3352   :  { %v14869_v56 = vpop.f32.mrf.mxu1 }
0x3354   :  { %v10209_v17 = vpop.f32.mrf.mxu1 }
0x3356   :  { %v14870_v58 = vpop.f32.mrf.mxu1 }
0x3357   :  { %v10225_v31 = vpack.c.bf16 %v14870_v58, %v14869_v56 }
0x3358   :  { %v10212_v10 = vpop.f32.mrf.mxu1 }
0x3359   :  { %v10224_v22 = vpack.c.bf16 %v10212_v10, %v10209_v17  ;;  %14871 = vmatprep.subr.bf16.mxu0 %v10225_v31 }
0x335a   :  { %14872 = vmatpush3.bf16.msra.mxu0 %v10225_v31 }
0x335b   :  { %14873 = vmatprep.subr.bf16.mxu0 %v10224_v22 }
0x335e   :  { %14874 = vmatpush3.bf16.msra.mxu0 %v10224_v22 }
0x335f   :  { %14879 = vmatprep.subr.bf16.mxu0 %v15309_v25 }
0x3361   :  { %14876 = vmatmul.mubr.msk.bf16.vlgmr.msra.gmra.mxu0 %vm2097_vm4, %v15489_v44 }
0x3362   :  { %14880 = vmatpush3.bf16.msra.mxu0 %v15309_v25  ;;  %14887 = vmatprep.mubr.msk.bf16.mxu0 %vm3429_vm5, %v17664_v19 }
0x3363   :  { %14881 = vmatprep.subr.bf16.mxu0 %v15310_v8 }
0x3366   :  { %14882 = vmatpush3.bf16.msra.mxu0 %v15310_v8 }
0x3367   :  { %14883 = vmatprep.subr.bf16.mxu0 %v15311_v35 }
0x336a   :  { %14884 = vmatpush3.bf16.msra.mxu0 %v15311_v35 }
0x336b   :  { %14885 = vmatprep.subr.bf16.mxu0 %v15312_v7 }
0x336e   :  { %14886 = vmatpush3.bf16.msra.mxu0 %v15312_v7 }
0x3371   :  { %14888 = vmatmul.mubr.msk.bf16.vlgmr.msra.gmra.mxu0 %vm3429_vm5, %v17662_v53 }
0x3372   :  { %14915 = vmatprep.mubr.msk.bf16.mxu0 %vm2097_vm4, %v17519_v13  ;;  %v15313_v13 = vld [vmem:[%s17928_s12 + $0x2d8] sm:$0xff]  }
0x3421   :  { %v14877_v27 = vpop.f32.mrf.mxu0 }
0x3422   :  { %v10277_v16 = vadd.f32 %v14877_v27, %v10140_v29 }
0x3423   :  { %v10260_v34 = vpop.f32.mrf.mxu0 }
0x3424   :  { %v10275_v33 = vadd.f32 %v10260_v34, %v10138_v62  ;;  %v15322_v34 = vld [vmem:[%s17928_s12 + $0x310] sm:$0xff]  }
0x3425   :  { %v14878_v39 = vpop.f32.mrf.mxu0 }
0x3426   :  { %v10278_v60 = vadd.f32 %v14878_v39, %v10141_v46  ;;  %v15319_v46 = vld [vmem:[%s17928_s12 + $0x2e8] sm:$0xff]  }
0x3427   :  { %v10263_v4 = vpop.f32.mrf.mxu0  ;;  %v15323_v39 = vld [vmem:[%s17928_s12 + $0x308] sm:$0xff]  }
0x3428   :  { %v10276_v28 = vadd.f32 %v10263_v4, %v10139_v24 }
0x3431   :  { %v14889_v45 = vpop.f32.mrf.mxu0 }
0x3433   :  { %v10346_v43 = vpop.f32.mrf.mxu0 }
0x3435   :  { %v14890_v32 = vpop.f32.mrf.mxu0 }
0x3436   :  { %v10362_v37 = vpack.c.bf16 %v14890_v32, %v14889_v45 }
0x3437   :  { %v10349_v61 = vpop.f32.mrf.mxu0 }
0x3438   :  { %v10361_v21 = vpack.c.bf16 %v10349_v61, %v10346_v43  ;;  %14891 = vmatprep.subr.bf16.mxu1 %v10362_v37 }
0x3439   :  { %14892 = vmatpush3.bf16.msra.mxu1 %v10362_v37 }
0x343a   :  { %14893 = vmatprep.subr.bf16.mxu1 %v10361_v21 }
0x343d   :  { %14894 = vmatpush3.bf16.msra.mxu1 %v10361_v21 }
0x343e   :  { %14899 = vmatprep.subr.bf16.mxu1 %v15313_v13 }
0x3440   :  { %14896 = vmatmul.mubr.msk.bf16.vlgmr.msra.gmra.mxu1 %vm2097_vm4, %v15490_v49 }
0x3441   :  { %14900 = vmatpush3.bf16.msra.mxu1 %v15313_v13  ;;  %14907 = vmatprep.mubr.msk.bf16.mxu1 %vm3429_vm5, %v17664_v19 }
0x3442   :  { %14901 = vmatprep.subr.bf16.mxu1 %v15314_v23 }
0x3445   :  { %14902 = vmatpush3.bf16.msra.mxu1 %v15314_v23 }
0x3446   :  { %14903 = vmatprep.subr.bf16.mxu1 %v15315_v26 }
0x3449   :  { %14904 = vmatpush3.bf16.msra.mxu1 %v15315_v26 }
0x344a   :  { %14905 = vmatprep.subr.bf16.mxu1 %v15316_v47 }
0x344d   :  { %14906 = vmatpush3.bf16.msra.mxu1 %v15316_v47 }
0x3450   :  { %14908 = vmatmul.mubr.msk.bf16.vlgmr.msra.gmra.mxu1 %vm3429_vm5, %v17662_v53 }
0x3451   :  { %14935 = vmatprep.mubr.msk.bf16.mxu1 %vm2097_vm4, %v17544_v52  ;;  %v15317_v52 = vld [vmem:[%s17928_s12 + $0x2f8] sm:$0xff]  }
0x3500   :  { %v14897_v18 = vpop.f32.mrf.mxu1 }
0x3501   :  { %v10414_v51 = vadd.f32 %v14897_v18, %v10277_v16 }
0x3502   :  { %v10397_v30 = vpop.f32.mrf.mxu1 }
0x3503   :  { %v10412_v1 = vadd.f32 %v10397_v30, %v10275_v33  ;;  %v15492_v33 = vld [vmem:[%s17926_s5 + $0x58] sm:$0xff]   ;;  %v15493_v30 = vld [vmem:[%s17926_s5 + $0x68] sm:$0xff]  }
0x3504   :  { %v14898_v41 = vpop.f32.mrf.mxu1 }
0x3505   :  { %v10415_v3 = vadd.f32 %v14898_v41, %v10278_v60  ;;  %v15324_v60 = vld [vmem:[%s17928_s12 + $0x300] sm:$0xff]  }
0x3506   :  { %v10400_v59 = vpop.f32.mrf.mxu1  ;;  %v15328_v41 = vld [vmem:[%s17928_s12 + $0x320] sm:$0xff]  }
0x3507   :  { %v10413_v6 = vadd.f32 %v10400_v59, %v10276_v28 }
0x3510   :  { %v14909_v9 = vpop.f32.mrf.mxu1 }
0x3512   :  { %v10483_v42 = vpop.f32.mrf.mxu1 }
0x3514   :  { %v14910_v29 = vpop.f32.mrf.mxu1 }
0x3515   :  { %v10499_v57 = vpack.c.bf16 %v14910_v29, %v14909_v9 }
0x3516   :  { %v10486_v20 = vpop.f32.mrf.mxu1 }
0x3517   :  { %v10498_v62 = vpack.c.bf16 %v10486_v20, %v10483_v42  ;;  %14911 = vmatprep.subr.bf16.mxu0 %v10499_v57 }
0x3518   :  { %14912 = vmatpush3.bf16.msra.mxu0 %v10499_v57 }
0x3519   :  { %14913 = vmatprep.subr.bf16.mxu0 %v10498_v62 }
0x351c   :  { %14914 = vmatpush3.bf16.msra.mxu0 %v10498_v62 }
0x351d   :  { %14919 = vmatprep.subr.bf16.mxu0 %v15317_v52 }
0x351f   :  { %14916 = vmatmul.mubr.msk.bf16.vlgmr.msra.gmra.mxu0 %vm2097_vm4, %v15491_v0 }
0x3520   :  { %14920 = vmatpush3.bf16.msra.mxu0 %v15317_v52  ;;  %14927 = vmatprep.mubr.msk.bf16.mxu0 %vm3429_vm5, %v17664_v19 }
0x3521   :  { %14921 = vmatprep.subr.bf16.mxu0 %v15318_v55 }
0x3524   :  { %14922 = vmatpush3.bf16.msra.mxu0 %v15318_v55 }
0x3525   :  { %14923 = vmatprep.subr.bf16.mxu0 %v15319_v46 }
0x3528   :  { %14924 = vmatpush3.bf16.msra.mxu0 %v15319_v46 }
0x3529   :  { %14925 = vmatprep.subr.bf16.mxu0 %v15320_v36 }
0x352c   :  { %14926 = vmatpush3.bf16.msra.mxu0 %v15320_v36 }
0x352f   :  { %14928 = vmatmul.mubr.msk.bf16.vlgmr.msra.gmra.mxu0 %vm3429_vm5, %v17662_v53 }
0x3530   :  { %14955 = vmatprep.mubr.msk.bf16.mxu0 %vm2097_vm4, %v17569_v12  ;;  %v15321_v12 = vld [vmem:[%s17928_s12 + $0x318] sm:$0xff]  }
0x35df   :  { %v14917_v24 = vpop.f32.mrf.mxu0 }
0x35e0   :  { %v10551_v56 = vadd.f32 %v14917_v24, %v10414_v51  ;;  %v15326_v51 = vld [vmem:[%s17928_s12 + $0x330] sm:$0xff]  }
0x35e1   :  { %v10534_v17 = vpop.f32.mrf.mxu0  ;;  %v15330_v24 = vld [vmem:[%s17928_s12 + $0x350] sm:$0xff]  }
0x35e2   :  { %v10549_v58 = vadd.f32 %v10534_v17, %v10412_v1  ;;  %v15327_v1 = vld [vmem:[%s17928_s12 + $0x328] sm:$0xff]  }
0x35e3   :  { %v14918_v31 = vpop.f32.mrf.mxu0  ;;  %v15331_v17 = vld [vmem:[%s17928_s12 + $0x348] sm:$0xff]  }
0x35e4   :  { %v10552_v10 = vadd.f32 %v14918_v31, %v10415_v3 }
0x35e5   :  { %v10537_v22 = vpop.f32.mrf.mxu0 }
0x35e6   :  { %v10550_v25 = vadd.f32 %v10537_v22, %v10413_v6 }
0x35ef   :  { %v14929_v8 = vpop.f32.mrf.mxu0 }
0x35f1   :  { %v10620_v44 = vpop.f32.mrf.mxu0 }
0x35f3   :  { %v14930_v35 = vpop.f32.mrf.mxu0 }
0x35f4   :  { %v10636_v7 = vpack.c.bf16 %v14930_v35, %v14929_v8 }
0x35f5   :  { %v10623_v27 = vpop.f32.mrf.mxu0 }
0x35f6   :  { %v10635_v16 = vpack.c.bf16 %v10623_v27, %v10620_v44  ;;  %14931 = vmatprep.subr.bf16.mxu1 %v10636_v7 }
0x35f7   :  { %14932 = vmatpush3.bf16.msra.mxu1 %v10636_v7 }
0x35f8   :  { %14933 = vmatprep.subr.bf16.mxu1 %v10635_v16 }
0x35fb   :  { %14934 = vmatpush3.bf16.msra.mxu1 %v10635_v16 }
0x35fc   :  { %14939 = vmatprep.subr.bf16.mxu1 %v15321_v12 }
0x35fe   :  { %14936 = vmatmul.mubr.msk.bf16.vlgmr.msra.gmra.mxu1 %vm2097_vm4, %v15492_v33 }
0x35ff   :  { %14940 = vmatpush3.bf16.msra.mxu1 %v15321_v12  ;;  %14947 = vmatprep.mubr.msk.bf16.mxu1 %vm3429_vm5, %v17664_v19 }
0x3600   :  { %14941 = vmatprep.subr.bf16.mxu1 %v15322_v34 }
0x3603   :  { %14942 = vmatpush3.bf16.msra.mxu1 %v15322_v34 }
0x3604   :  { %14943 = vmatprep.subr.bf16.mxu1 %v15323_v39 }
0x3607   :  { %14944 = vmatpush3.bf16.msra.mxu1 %v15323_v39  ;;  %v15334_v39 = vld [vmem:[%s17930_s14 + $0x10] sm:$0xff]  }
0x3608   :  { %14945 = vmatprep.subr.bf16.mxu1 %v15324_v60 }
0x360b   :  { %14946 = vmatpush3.bf16.msra.mxu1 %v15324_v60  ;;  %v15335_v60 = vld [vmem:[%s17930_s14 + $0x8] sm:$0xff]  }
0x360e   :  { %14948 = vmatmul.mubr.msk.bf16.vlgmr.msra.gmra.mxu1 %vm3429_vm5, %v17662_v53 }
0x360f   :  { %14975 = vmatprep.mubr.msk.bf16.mxu1 %vm2097_vm4, %v17594_v2  ;;  %v15325_v2 = vld [vmem:[%s17928_s12 + $0x338] sm:$0xff]  }
0x36be   :  { %v14937_v4 = vpop.f32.mrf.mxu1 }
0x36bf   :  { %v10688_v28 = vadd.f32 %v14937_v4, %v10551_v56  ;;  %v15494_v56 = vld [vmem:[%s17926_s5 + $0x78] sm:$0xff]  }
0x36c0   :  { %v10671_v45 = vpop.f32.mrf.mxu1 }
0x36c1   :  { %v10686_v43 = vadd.f32 %v10671_v45, %v10549_v58  ;;  %v15332_v58 = vld [vmem:[%s17928_s12 + $0x340] sm:$0xff]  }
0x36c2   :  { %v14938_v32 = vpop.f32.mrf.mxu1 }
0x36c3   :  { %v10689_v37 = vadd.f32 %v14938_v32, %v10552_v10 }
0x36c4   :  { %v10674_v61 = vpop.f32.mrf.mxu1 }
0x36c5   :  { %v10687_v21 = vadd.f32 %v10674_v61, %v10550_v25 }
0x36ce   :  { %v14949_v13 = vpop.f32.mrf.mxu1 }
0x36d0   :  { %v10757_v23 = vpop.f32.mrf.mxu1 }
0x36d2   :  { %v14950_v49 = vpop.f32.mrf.mxu1 }
0x36d3   :  { %v10773_v26 = vpack.c.bf16 %v14950_v49, %v14949_v13 }
0x36d4   :  { %v10760_v47 = vpop.f32.mrf.mxu1 }
0x36d5   :  { %v10772_v18 = vpack.c.bf16 %v10760_v47, %v10757_v23  ;;  %14951 = vmatprep.subr.bf16.mxu0 %v10773_v26 }
0x36d6   :  { %14952 = vmatpush3.bf16.msra.mxu0 %v10773_v26 }
0x36d7   :  { %14953 = vmatprep.subr.bf16.mxu0 %v10772_v18 }
0x36da   :  { %14954 = vmatpush3.bf16.msra.mxu0 %v10772_v18 }
0x36db   :  { %14959 = vmatprep.subr.bf16.mxu0 %v15325_v2 }
0x36dd   :  { %14956 = vmatmul.mubr.msk.bf16.vlgmr.msra.gmra.mxu0 %vm2097_vm4, %v15493_v30 }
0x36de   :  { %14960 = vmatpush3.bf16.msra.mxu0 %v15325_v2  ;;  %14967 = vmatprep.mubr.msk.bf16.mxu0 %vm3429_vm5, %v17664_v19 }
0x36df   :  { %14961 = vmatprep.subr.bf16.mxu0 %v15326_v51 }
0x36e2   :  { %14962 = vmatpush3.bf16.msra.mxu0 %v15326_v51 }
0x36e3   :  { %14963 = vmatprep.subr.bf16.mxu0 %v15327_v1 }
0x36e6   :  { %14964 = vmatpush3.bf16.msra.mxu0 %v15327_v1 }
0x36e7   :  { %14965 = vmatprep.subr.bf16.mxu0 %v15328_v41 }
0x36ea   :  { %14966 = vmatpush3.bf16.msra.mxu0 %v15328_v41 }
0x36ed   :  { %14968 = vmatmul.mubr.msk.bf16.vlgmr.msra.gmra.mxu0 %vm3429_vm5, %v17662_v53 }
0x36ee   :  { %14995 = vmatprep.mubr.msk.bf16.mxu0 %vm2097_vm4, %v17619_v38  ;;  %v15329_v38 = vld [vmem:[%s17928_s12 + $0x358] sm:$0xff]  }
0x379d   :  { %v14957_v3 = vpop.f32.mrf.mxu0 }
0x379e   :  { %v10825_v59 = vadd.f32 %v14957_v3, %v10688_v28 }
0x379f   :  { %v10808_v6 = vpop.f32.mrf.mxu0 }
0x37a0   :  { %v10823_v9 = vadd.f32 %v10808_v6, %v10686_v43 }
0x37a1   :  { %v14958_v42 = vpop.f32.mrf.mxu0 }
0x37a2   :  { %v10826_v29 = vadd.f32 %v14958_v42, %v10689_v37  ;;  %v11244_v42 = vld [vmem:[%s17932_s16 + $0x18] sm:$0xff] }
0x37a3   :  { %v10811_v57 = vpop.f32.mrf.mxu0 }
0x37a4   :  { %v10824_v20 = vadd.f32 %v10811_v57, %v10687_v21  ;;  %v11242_v57 = vld [vmem:[%s17932_s16 + $0x8] sm:$0xff] }
0x37ad   :  { %v14969_v62 = vpop.f32.mrf.mxu0 }
0x37af   :  { %v10894_v52 = vpop.f32.mrf.mxu0 }
0x37b1   :  { %v14970_v55 = vpop.f32.mrf.mxu0 }
0x37b2   :  { %v10910_v0 = vpack.c.bf16 %v14970_v55, %v14969_v62 }
0x37b3   :  { %v10897_v46 = vpop.f32.mrf.mxu0 }
0x37b4   :  { %v10909_v36 = vpack.c.bf16 %v10897_v46, %v10894_v52  ;;  %14971 = vmatprep.subr.bf16.mxu1 %v10910_v0 }
0x37b5   :  { %14972 = vmatpush3.bf16.msra.mxu1 %v10910_v0 }
0x37b6   :  { %14973 = vmatprep.subr.bf16.mxu1 %v10909_v36 }
0x37b9   :  { %14974 = vmatpush3.bf16.msra.mxu1 %v10909_v36 }
0x37ba   :  { %14979 = vmatprep.subr.bf16.mxu1 %v15329_v38 }
0x37bc   :  { %14976 = vmatmul.mubr.msk.bf16.vlgmr.msra.gmra.mxu1 %vm2097_vm4, %v15494_v56 }
0x37bd   :  { %14980 = vmatpush3.bf16.msra.mxu1 %v15329_v38  ;;  %14987 = vmatprep.mubr.msk.bf16.mxu1 %vm3429_vm5, %v17664_v19 }
0x37be   :  { %14981 = vmatprep.subr.bf16.mxu1 %v15330_v24 }
0x37c1   :  { %14982 = vmatpush3.bf16.msra.mxu1 %v15330_v24 }
0x37c2   :  { %14983 = vmatprep.subr.bf16.mxu1 %v15331_v17 }
0x37c5   :  { %14984 = vmatpush3.bf16.msra.mxu1 %v15331_v17 }
0x37c6   :  { %14985 = vmatprep.subr.bf16.mxu1 %v15332_v58 }
0x37c9   :  { %14986 = vmatpush3.bf16.msra.mxu1 %v15332_v58 }
0x37ca   :  { %15011 = vmatprep.subr.mxu1 %v11244_v42 }
0x37cc   :  { %14988 = vmatmul.mubr.msk.bf16.vlgmr.msra.gmra.mxu1 %vm3429_vm5, %v17662_v53  ;;  %v15333_v53 = vld [vmem:[%s17930_s14 + $0x18] sm:$0xff]  }
0x37cd   :  { %15012 = vmatpush3.msra.mxu1 %v11244_v42 }
0x387c   :  { %v14977_v31 = vpop.f32.mrf.mxu1 }
0x387d   :  { %v10962_v10 = vadd.f32 %v14977_v31, %v10825_v59 }
0x387e   :  { %v10945_v19 = vpop.f32.mrf.mxu1 }
0x387f   :  { %v10960_v22 = vadd.f32 %v10945_v19, %v10823_v9 }
0x3880   :  { %v14978_v25 = vpop.f32.mrf.mxu1 }
0x3881   :  { %v10963_v8 = vadd.f32 %v14978_v25, %v10826_v29  ;;  %v11243_v29 = vld [vmem:[%s17932_s16 + $0x10] sm:$0xff] }
0x3882   :  { %v10948_v44 = vpop.f32.mrf.mxu1  ;;  %15013 = vmatprep.subr.mxu1 %v11243_v29 }
0x3883   :  { %v10961_v35 = vadd.f32 %v10948_v44, %v10824_v20  ;;  %15014 = vmatpush3.msra.mxu1 %v11243_v29  ;;  %v11241_v20 = vld [vmem:[%s17932_s16] sm:$0xff] }
0x3884   :  { %15015 = vmatprep.subr.mxu1 %v11242_v57 }
0x3885   :  { %15016 = vmatpush3.msra.mxu1 %v11242_v57 }
0x3886   :  { %15017 = vmatprep.subr.mxu1 %v11241_v20 }
0x3887   :  { %15018 = vmatpush3.msra.mxu1 %v11241_v20 }
0x388c   :  { %v14989_v7 = vpop.f32.mrf.mxu1 }
0x388e   :  { %v11031_v27 = vpop.f32.mrf.mxu1 }
0x3890   :  { %v14990_v16 = vpop.f32.mrf.mxu1 }
0x3891   :  { %v11047_v12 = vpack.c.bf16 %v14990_v16, %v14989_v7 }
0x3892   :  { %v11034_v34 = vpop.f32.mrf.mxu1 }
0x3893   :  { %v11046_v33 = vpack.c.bf16 %v11034_v34, %v11031_v27  ;;  %14991 = vmatprep.subr.bf16.mxu0 %v11047_v12 }
0x3894   :  { %14992 = vmatpush3.bf16.msra.mxu0 %v11047_v12 }
0x3895   :  { %14993 = vmatprep.subr.bf16.mxu0 %v11046_v33 }
0x3898   :  { %14994 = vmatpush3.bf16.msra.mxu0 %v11046_v33 }
0x3899   :  { %14999 = vmatprep.subr.bf16.mxu0 %v15333_v53 }
0x389b   :  { %14996 = vmatmul.mubr.msk.bf16.vlgmr.msra.gmra.mxu0 %vm2097_vm4, %v17649_v63  ;;  %v15336_v63 = vld [vmem:[%s17930_s14] sm:$0xff]  }
0x389c   :  { %15000 = vmatpush3.bf16.msra.mxu0 %v15333_v53 }
0x389d   :  { %15001 = vmatprep.subr.bf16.mxu0 %v15334_v39 }
0x38a0   :  { %15002 = vmatpush3.bf16.msra.mxu0 %v15334_v39 }
0x38a1   :  { %15003 = vmatprep.subr.bf16.mxu0 %v15335_v60 }
0x38a4   :  { %15004 = vmatpush3.bf16.msra.mxu0 %v15335_v60 }
0x38a5   :  { %15005 = vmatprep.subr.bf16.mxu0 %v15336_v63 }
0x38a8   :  { %15006 = vmatpush3.bf16.msra.mxu0 %v15336_v63 }
0x395b   :  { %v14997_v4 = vpop.f32.mrf.mxu0 }
0x395c   :  { %v11099_v28 = vadd.f32 %v14997_v4, %v10962_v10 }
0x395d   :  { %v11082_v45 = vpop.f32.mrf.mxu0 }
0x395e   :  { %v11097_v43 = vadd.f32 %v11082_v45, %v10960_v22  ;;  %v11103_v37 = vadd.f32 %v11099_v28, %v8597_v14 }
0x395f   :  { %v14998_v32 = vpop.f32.mrf.mxu0 }
0x3960   :  { %v11100_v61 = vadd.f32 %v14998_v32, %v10963_v8  ;;  %v11101_v13 = vadd.f32 %v11097_v43, %v8595_v5  ;;  %v11107_v26 = vmax.f32 %v11103_v37, 0.0 }
0x3961   :  { %v11085_v21 = vpop.f32.mrf.mxu0 }
0x3962   :  { %v11104_v23 = vadd.f32 %v11100_v61, %v8598_v48  ;;  %v11098_v49 = vadd.f32 %v11085_v21, %v10961_v35  ;;  %v11105_v2 = vmax.f32 %v11101_v13, 0.0 }
0x3964   :  { %v11108_v47 = vmax.f32 %v11104_v23, 0.0  ;;  %v11102_v18 = vadd.f32 %v11098_v49, %v8596_v15 }
0x3966   :  { %v11110_v51 = vpack.c.bf16 %v11108_v47, %v11107_v26  ;;  %v11106_v30 = vmax.f32 %v11102_v18, 0.0 }
0x3968   :  { %v11109_v1 = vpack.c.bf16 %v11106_v30, %v11105_v2 }
0x396a   :  { %15007 = vmatprep.mubr.msk.bf16.mxu0 %vm3429_vm5, %v11109_v1 }
0x396b   :  { %15008 = vmatmul.mubr.msk.bf16.vlgmr.msra.gmra.mxu0 %vm3429_vm5, %v11110_v51 }
0x3a2b   :  { %v15009_v11 = vpop.f32.mrf.mxu0 }
0x3a2c   :  { %v11199_v50 = vadd.f32 %v15009_v11, %v12595_v40 }
0x3a2d   :  { %v11190_v48 = vpop.f32.mrf.mxu0 }
0x3a2e   :  { %v11191_v5 = vadd.f32 %v12595_v40, %v11190_v48  ;;  %v11211_v14 = vsel %vm2097_vm4, %v11199_v50, -inf }
0x3a2f   :  { %11212 = vmax.xlane.f32.xlu1 %v11211_v14  ;;  %v15010_v54 = vpop.f32.mrf.mxu0 }
0x3a30   :  { %v11202_v15 = vadd.f32 %v15010_v54, %v12595_v40  ;;  %v11205_v41 = vsel %vm2097_vm4, %v11191_v5, -inf }
0x3a31   :  { %v11193_v3 = vpop.f32.mrf.mxu0  ;;  %11206 = vmax.xlane.f32.xlu0 %v11205_v41 }
0x3a32   :  { %v11194_v59 = vadd.f32 %v12595_v40, %v11193_v3  ;;  %v11214_v6 = vsel %vm2097_vm4, %v11202_v15, -inf }
0x3a33   :  { %11215 = vmax.xlane.f32.xlu1 %v11214_v6 }
0x3a34   :  { %v11208_v9 = vsel %vm2097_vm4, %v11194_v59, -inf }
0x3a35   :  { %11209 = vmax.xlane.f32.xlu0 %v11208_v9 }
0x3ab8   :  { %v11213_v62 = vpop.xlane.xlu1 %11212 }
0x3ab9   :  { %v11219_v52 = vsub.f32 %v11199_v50, %v11213_v62 }
0x3aba   :  { %v11207_v55 = vpop.xlane.xlu0 %11206 }
0x3abb   :  { %v11217_v0 = vsub.f32 %v11191_v5, %v11207_v55  ;;  %v11225_v36 = vmul.f32 1.442695, %v11219_v52 }
0x3abc   :  { %v11216_v46 = vpop.xlane.xlu1 %11215 }
0x3abd   :  { %v11221_v38 = vmul.f32 1.442695, %v11217_v0  ;;  %v11220_v24 = vsub.f32 %v11202_v15, %v11216_v46 }
0x3abe   :  { %v11210_v56 = vpop.xlane.xlu0 %11209 }
0x3abf   :  { %15433 = vpow2.f32 %v11221_v38  ;;  %v11218_v17 = vsub.f32 %v11194_v59, %v11210_v56  ;;  %v11227_v31 = vmul.f32 1.442695, %v11220_v24 }
0x3ac0   :  { %15435 = vpow2.f32 %v11225_v36 }
0x3ac1   :  { %v11223_v58 = vmul.f32 1.442695, %v11218_v17 }
0x3ac3   :  { %15437 = vpow2.f32 %v11223_v58 }
0x3ac4   :  { %15439 = vpow2.f32 %v11227_v31 }
0x3acc   :  { %v15434_v10 = vpop.eup %15433 }
0x3acd   :  { %15019 = vmatprep.mubr.msk.f32.mxu1 %vm2097_vm4, %v15434_v10  ;;  %v11229_v19 = vsel %vm2097_vm4, %v15434_v10, 0.0  ;;  %v15436_v22 = vpop.eup %15435 }
0x3ace   :  { %11230 = vadd.xlane.f32.xlu0 %v11229_v19  ;;  %v11235_v8 = vsel %vm2097_vm4, %v15436_v22, 0.0 }
0x3ad0   :  { %v15438_v25 = vpop.eup %15437 }
0x3ad1   :  { %15020 = vmatmul.mubr.msk.f32.vlgmr.msra.gmra.mxu1 %vm2097_vm4, %v15438_v25  ;;  %v11232_v44 = vsel %vm2097_vm4, %v15438_v25, 0.0  ;;  %v15440_v35 = vpop.eup %15439 }
0x3ad2   :  { %11236 = vadd.xlane.f32.xlu0 %v11235_v8  ;;  %15022 = vmatprep.mubr.msk.f32.mxu1 %vm2097_vm4, %v15436_v22  ;;  %v11238_v7 = vsel %vm2097_vm4, %v15440_v35, 0.0 }
0x3ad3   :  { %11233 = vadd.xlane.f32.xlu1 %v11232_v44 }
0x3ad5   :  { %15023 = vmatmul.mubr.msk.f32.gmra.mxu1 %vm2097_vm4, %v15440_v35 }
0x3ad7   :  { %11239 = vadd.xlane.f32.xlu1 %v11238_v7 }
0x3b57   :  { %v11231_v16 = vpop.xlane.xlu0 %11230 }
0x3b5b   :  { %v11237_v34 = vpop.xlane.xlu0 %11236 }
0x3b5c   :  { %v11234_v27 = vpop.xlane.xlu1 %11233 }
0x3b5d   :  { %15441 = vrcp.f32 %v11234_v27 }
0x3b5e   :  { %15443 = vrcp.f32 %v11231_v16 }
0x3b60   :  { %v11240_v12 = vpop.xlane.xlu1 %11239 }
0x3b61   :  { %15445 = vrcp.f32 %v11240_v12 }
0x3b62   :  { %15447 = vrcp.f32 %v11237_v34 }
0x3b6a   :  { %v15442_v33 = vpop.eup %15441 }
0x3b6b   :  { %v15444_v60 = vpop.eup %15443 }
0x3b6e   :  { %v15446_v28 = vpop.eup %15445 }
0x3b6f   :  { %v15448_v32 = vpop.eup %15447 }
0x3b91   :  { %v15021_v53 = vpop.f32.mrf.mxu1 }
0x3b92   :  { %v11347_v39 = vmul.f32 %v15442_v33, %v15021_v53 }
0x3b93   :  { %v11323_v63 = vpop.f32.mrf.mxu1 }
0x3b94   :  { %11352 = vst.msk [vmem:[%s17933_s17 + $0x8] sm:$0xff] %vm11350_vm6, %v11347_v39  ;;  %v11346_v4 = vmul.f32 %v15444_v60, %v11323_v63 }
0x3b95   :  { %v15024_v45 = vpop.f32.mrf.mxu1 }
0x3b96   :  { %11351 = vst.msk [vmem:[%s17933_s17] sm:$0xff] %vm11350_vm6, %v11346_v4  ;;  %v11349_v43 = vmul.f32 %v15446_v28, %v15024_v45 }
0x3b97   :  { %v11333_v37 = vpop.f32.mrf.mxu1 }
0x3b98   :  { %11354 = vst.msk [vmem:[%s17933_s17 + $0x18] sm:$0xff] %vm11350_vm6, %v11349_v43  ;;  %v11348_v61 = vmul.f32 %v15448_v32, %v11333_v37 }
0x3b9a   :  { %11353 = vst.msk [vmem:[%s17933_s17 + $0x10] sm:$0xff] %vm11350_vm6, %v11348_v61 }

</bundles_post_ra>
